<compile_context>
chip_gen: v7x
topology: tpu7x:2x2x1
jax: 0.10.0
libtpu: 0.0.40
codegen_flags: <defaults>
</compile_context>

<pallas_src>
import functools

import jax
import jax.numpy as jnp
from jax.experimental import pallas as pl
from jax.experimental.pallas import tpu as pltpu


_COMPILER_PARAMS = pltpu.CompilerParams(
    dimension_semantics=("parallel",),      # batch axis -> both TCs on v7x
    vmem_limit_bytes=48 * 1024 * 1024,      # > v5e/v6e defaults, < v7x physical
)


# ---------------------------------------------------------------------------
# Fused ResnetkBlock kernel (one image per grid step, NHWC).
#   out = relu(x + conv3x3(relu(conv3x3(x) + b1)) + b2)
# ---------------------------------------------------------------------------
def _resnetk_block_kernel(x_ref, w1_ref, b1_ref, w2_ref, b2_ref, o_ref,
                          xpad_ref, hpad_ref, *, h, w, c, row_chunk):
    # Build the zero halo in VMEM (no HBM pad).  Zeroed every step: scratch is
    # per-core under megacore, so a program_id==0 guard would be unsafe.
    xpad_ref[...] = jnp.zeros_like(xpad_ref)
    hpad_ref[...] = jnp.zeros_like(hpad_ref)
    xpad_ref[1:h + 1, 1:w + 1, :] = x_ref[0].astype(xpad_ref.dtype)

    chunks = [(r0, min(row_chunk, h - r0)) for r0 in range(0, h, row_chunk)]

    def conv_chunk(src_pad, w_slab_ref, b_ref, r0, rows):
        # Shifted-tap slab built once per chunk -> single deep MXU matmul
        # (rows*W, 9C) x (9C, C); accumulation stays inside the MXU.
        taps = [src_pad[r0 + dh:r0 + dh + rows, dw:dw + w, :]
                for dh in range(3) for dw in range(3)]
        slab = jnp.concatenate(taps, axis=-1).reshape(rows * w, 9 * c)
        acc = jnp.dot(slab, w_slab_ref[...], preferred_element_type=jnp.float32)
        return acc + b_ref[...]                      # (rows*W, C) + (1, C)

    # conv1 + bias + ReLU -> padded hidden activation (VMEM only)
    for r0, rows in chunks:
        a = jnp.maximum(conv_chunk(xpad_ref, w1_ref, b1_ref, r0, rows), 0.0)
        hpad_ref[1 + r0:1 + r0 + rows, 1:w + 1, :] = (
            a.reshape(rows, w, c).astype(hpad_ref.dtype))

    # conv2 + bias + residual + ReLU -> output
    for r0, rows in chunks:
        a = conv_chunk(hpad_ref, w2_ref, b2_ref, r0, rows)
        a = a + x_ref[0, r0:r0 + rows, :, :].reshape(rows * w, c).astype(jnp.float32)
        a = jnp.maximum(a, 0.0)
        o_ref[0, r0:r0 + rows, :, :] = a.reshape(rows, w, c).astype(o_ref.dtype)


def resnetk_block(x, p, *, row_chunk=8):
    """Fused residual block, NHWC. p: dict(w1,(3,3,C,C) HWIO; b1,(C,); w2; b2)."""
    n, h, w, c = x.shape
    w1 = p["w1"].reshape(9 * c, c).astype(jnp.float32)   # tap-major (dh,dw,Cin)
    b1 = p["b1"].reshape(1, c).astype(jnp.float32)
    w2 = p["w2"].reshape(9 * c, c).astype(jnp.float32)
    b2 = p["b2"].reshape(1, c).astype(jnp.float32)
    rc = min(row_chunk, h)

    flops = 2 * 2 * n * h * w * 9 * c * c                # two 3x3 convs
    bytes_accessed = 4 * (2 * x.size + w1.size + w2.size + b1.size + b2.size)

    return pl.pallas_call(
        functools.partial(_resnetk_block_kernel, h=h, w=w, c=c, row_chunk=rc),
        grid=(n,),
        in_specs=[
            pl.BlockSpec((1, h, w, c), lambda i: (i, 0, 0, 0)),
            pl.BlockSpec((9 * c, c), lambda i: (0, 0)),   # resident weights
            pl.BlockSpec((1, c), lambda i: (0, 0)),
            pl.BlockSpec((9 * c, c), lambda i: (0, 0)),
            pl.BlockSpec((1, c), lambda i: (0, 0)),
        ],
        out_specs=pl.BlockSpec((1, h, w, c), lambda i: (i, 0, 0, 0)),
        out_shape=jax.ShapeDtypeStruct((n, h, w, c), x.dtype),
        scratch_shapes=[
            pltpu.VMEM((h + 2, w + 2, c), jnp.float32),   # padded input
            pltpu.VMEM((h + 2, w + 2, c), jnp.float32),   # padded hidden act
        ],
        compiler_params=_COMPILER_PARAMS,
        cost_estimate=pl.CostEstimate(flops=flops, transcendentals=0,
                                      bytes_accessed=bytes_accessed),
    )(x, w1, b1, w2, b2)


# ---------------------------------------------------------------------------
# 2x2 max-pool (stride 2).  x is viewed (free wrapper reshape) as
# (N, H, W/2, 2C): W-pairs sit on the lane axis -> only lane slices + a
# major-dim reshape inside the kernel; x is read from HBM exactly once.
# ---------------------------------------------------------------------------
def _maxpool2x2_kernel(x_ref, o_ref, *, c):
    xv = x_ref[0]                                       # (H, W/2, 2C)
    hh, w2, _ = xv.shape
    wmax = jnp.maximum(xv[:, :, :c], xv[:, :, c:])      # max over W pairs
    wmax = wmax.reshape(hh // 2, 2, w2, c)              # split H (major dims)
    o_ref[0] = jnp.maximum(wmax[:, 0], wmax[:, 1])      # max over H pairs


def maxpool2x2(x):
    n, h, w, c = x.shape
    assert h % 2 == 0 and w % 2 == 0, "maxpool2x2 requires even H and W"
    h2, w2 = h // 2, w // 2
    xr = x.reshape(n, h, w2, 2 * c)                     # free row-major regroup
    return pl.pallas_call(
        functools.partial(_maxpool2x2_kernel, c=c),
        grid=(n,),
        in_specs=[pl.BlockSpec((1, h, w2, 2 * c), lambda i: (i, 0, 0, 0))],
        out_specs=pl.BlockSpec((1, h2, w2, c), lambda i: (i, 0, 0, 0)),
        out_shape=jax.ShapeDtypeStruct((n, h2, w2, c), x.dtype),
        compiler_params=_COMPILER_PARAMS,
    )(xr)


# ---------------------------------------------------------------------------
# Fused nearest-2x upsample + skip add: out = upper0 + upsample2x(lower2).
# upper0/out are viewed as (N, H, W/2, 2C); the upsampled tensor never hits
# HBM; lane-sliced stores avoid the 2C concat temporary.
# ---------------------------------------------------------------------------
def _upsample_add_kernel(u_ref, l_ref, o_ref, *, c):
    lv = l_ref[0]                                       # (H/2, W/2, C)
    h2, w2, _ = lv.shape
    lh = jnp.broadcast_to(lv[:, None], (h2, 2, w2, c)).reshape(2 * h2, w2, c)
    u = u_ref[0]                                        # (H, W/2, 2C)
    o_ref[0, :, :, :c] = u[:, :, :c] + lh.astype(u.dtype)
    o_ref[0, :, :, c:] = u[:, :, c:] + lh.astype(u.dtype)


def upsample2x_add(upper0, lower2):
    n, h, w, c = upper0.shape
    h2, w2 = h // 2, w // 2
    ur = upper0.reshape(n, h, w2, 2 * c)                # free view
    out = pl.pallas_call(
        functools.partial(_upsample_add_kernel, c=c),
        grid=(n,),
        in_specs=[pl.BlockSpec((1, h, w2, 2 * c), lambda i: (i, 0, 0, 0)),
                  pl.BlockSpec((1, h2, w2, c), lambda i: (i, 0, 0, 0))],
        out_specs=pl.BlockSpec((1, h, w2, 2 * c), lambda i: (i, 0, 0, 0)),
        out_shape=jax.ShapeDtypeStruct((n, h, w2, 2 * c), upper0.dtype),
        compiler_params=_COMPILER_PARAMS,
    )(ur, lower2)
    return out.reshape(n, h, w, c)


# ---------------------------------------------------------------------------
# Hourglass forward — mirrors Hourglass._hour_glass_forward exactly.
# ---------------------------------------------------------------------------
def _hour_glass_forward(x, params, n):
    upper0 = resnetk_block(x, params[n - 1][0])
    lower0 = maxpool2x2(x)
    lower0 = resnetk_block(lower0, params[n - 1][1])
    if n > 1:
        lower1 = _hour_glass_forward(lower0, params, n - 1)
    else:
        lower1 = resnetk_block(lower0, params[n - 1][2])
    lower2 = resnetk_block(lower1, params[n - 1][2])    # same block reused, as in PyTorch
    return upsample2x_add(upper0, lower2)


def hourglass_forward(x_nchw, params, *, n):
    nb, c, h, w = x_nchw.shape
    assert h % (2 ** n) == 0 and w % (2 ** n) == 0, "H, W must be divisible by 2**n"
    x = jnp.transpose(x_nchw, (0, 2, 3, 1))             # NCHW -> NHWC (lanes = C)
    y = _hour_glass_forward(x, params, n)
    return jnp.transpose(y, (0, 3, 1, 2))               # NHWC -> NCHW


# ---------------------------------------------------------------------------
# Parameter init matching Hourglass.make_hg structure: hg[0] has 4 blocks
# (hg[0][3] unused by forward, same as in PyTorch), hg[i>0] has 3.
# ---------------------------------------------------------------------------
def init_hourglass_params(key, ch, n):
    params = []
    for i in range(n):
        nblocks = 4 if i == 0 else 3
        blocks = []
        for _ in range(nblocks):
            key, k1, k2, k3, k4 = jax.random.split(key, 5)
            blocks.append(dict(
                w1=0.1 * jax.random.normal(k1, (3, 3, ch, ch), jnp.float32),
                b1=0.1 * jax.random.normal(k2, (ch,), jnp.float32),
                w2=0.1 * jax.random.normal(k3, (3, 3, ch, ch), jnp.float32),
                b2=0.1 * jax.random.normal(k4, (ch,), jnp.float32),
            ))
        params.append(blocks)
    return params


if __name__ == "__main__":
    key = jax.random.PRNGKey(0)
    kx, kp = jax.random.split(key)

    N, C, H, W = 2, 4, 16, 16   # NCHW input, like the PyTorch module
    n_levels = 2                # H, W divisible by 2**n_levels

    x = jax.random.normal(kx, (N, C, H, W), jnp.float32)
    params = init_hourglass_params(kp, C, n_levels)

    fwd = jax.jit(functools.partial(hourglass_forward, n=n_levels))
    out = jax.block_until_ready(fwd(x, params))

    assert out.shape == (N, C, H, W), out.shape
    assert bool(jnp.all(jnp.isfinite(out)))
    print("KERNEL_OK")
</pallas_src>

<mosaic_0001>
module attributes {stable_mosaic.version = 11 : i64} {
  func.func @_resnetk_block_kernel(%arg0: i32, %arg1: memref<1x16x16x4xf32, #tpu.memory_space<vmem>>, %arg2: memref<36x4xf32, #tpu.memory_space<vmem>>, %arg3: memref<1x4xf32, #tpu.memory_space<vmem>>, %arg4: memref<36x4xf32, #tpu.memory_space<vmem>>, %arg5: memref<1x4xf32, #tpu.memory_space<vmem>>, %arg6: memref<1x16x16x4xf32, #tpu.memory_space<vmem>>, %arg7: memref<18x18x4xf32, #tpu.memory_space<vmem>>, %arg8: memref<18x18x4xf32, #tpu.memory_space<vmem>>) attributes {dimension_semantics = [#tpu.dimension_semantics<parallel>], iteration_bounds = array<i64: 2>, scalar_prefetch = 0 : i64, scratch_operands = 2 : i64, tpu.core_type = #tpu.core_type<tc>, window_params = [{transform_indices = @transform_0, window_bounds = array<i64: 1, 16, 16, 4>}, {pipeline_mode = #tpu.pipeline_mode<synchronous>, transform_indices = @transform_1, window_bounds = array<i64: 36, 4>}, {pipeline_mode = #tpu.pipeline_mode<synchronous>, transform_indices = @transform_2, window_bounds = array<i64: 1, 4>}, {pipeline_mode = #tpu.pipeline_mode<synchronous>, transform_indices = @transform_3, window_bounds = array<i64: 36, 4>}, {pipeline_mode = #tpu.pipeline_mode<synchronous>, transform_indices = @transform_4, window_bounds = array<i64: 1, 4>}, {transform_indices = @transform_5, window_bounds = array<i64: 1, 16, 16, 4>}]} {
    %cst = arith.constant 0.000000e+00 : f32
    %0 = vector.broadcast %cst : f32 to vector<18x18x4xf32>
    %c0 = arith.constant 0 : index
    %c0_0 = arith.constant 0 : index
    %c0_1 = arith.constant 0 : index
    %1 = vector.load %arg7[%c0, %c0_0, %c0_1] : memref<18x18x4xf32, #tpu.memory_space<vmem>>, vector<18x18x4xf32>
    tpu.vector_store %arg7[%c0, %c0_0, %c0_1], %0 {strides = array<i32>} : memref<18x18x4xf32, #tpu.memory_space<vmem>>, vector<18x18x4xf32>,
    %cst_2 = arith.constant 0.000000e+00 : f32
    %2 = vector.broadcast %cst_2 : f32 to vector<18x18x4xf32>
    %c0_3 = arith.constant 0 : index
    %c0_4 = arith.constant 0 : index
    %c0_5 = arith.constant 0 : index
    %3 = vector.load %arg8[%c0_3, %c0_4, %c0_5] : memref<18x18x4xf32, #tpu.memory_space<vmem>>, vector<18x18x4xf32>
    tpu.vector_store %arg8[%c0_3, %c0_4, %c0_5], %2 {strides = array<i32>} : memref<18x18x4xf32, #tpu.memory_space<vmem>>, vector<18x18x4xf32>,
    %c0_6 = arith.constant 0 : index
    %c0_7 = arith.constant 0 : index
    %c0_8 = arith.constant 0 : index
    %c0_9 = arith.constant 0 : index
    %4 = vector.load %arg1[%c0_6, %c0_7, %c0_8, %c0_9] : memref<1x16x16x4xf32, #tpu.memory_space<vmem>>, vector<1x16x16x4xf32>
    %5 = vector.shape_cast %4 : vector<1x16x16x4xf32> to vector<16x16x4xf32>
    %c1 = arith.constant 1 : index
    %c1_10 = arith.constant 1 : index
    %c0_11 = arith.constant 0 : index
    %6 = vector.load %arg7[%c1, %c1_10, %c0_11] : memref<18x18x4xf32, #tpu.memory_space<vmem>>, vector<16x16x4xf32>
    tpu.vector_store %arg7[%c1, %c1_10, %c0_11], %5 {strides = array<i32>} : memref<18x18x4xf32, #tpu.memory_space<vmem>>, vector<16x16x4xf32>,
    %c0_12 = arith.constant 0 : index
    %c0_13 = arith.constant 0 : index
    %c0_14 = arith.constant 0 : index
    %7 = vector.load %arg7[%c0_12, %c0_13, %c0_14] : memref<18x18x4xf32, #tpu.memory_space<vmem>>, vector<8x16x4xf32>
    %c0_15 = arith.constant 0 : index
    %c1_16 = arith.constant 1 : index
    %c0_17 = arith.constant 0 : index
    %8 = vector.load %arg7[%c0_15, %c1_16, %c0_17] : memref<18x18x4xf32, #tpu.memory_space<vmem>>, vector<8x16x4xf32>
    %c0_18 = arith.constant 0 : index
    %c2 = arith.constant 2 : index
    %c0_19 = arith.constant 0 : index
    %9 = vector.load %arg7[%c0_18, %c2, %c0_19] : memref<18x18x4xf32, #tpu.memory_space<vmem>>, vector<8x16x4xf32>
    %c1_20 = arith.constant 1 : index
    %c0_21 = arith.constant 0 : index
    %c0_22 = arith.constant 0 : index
    %10 = vector.load %arg7[%c1_20, %c0_21, %c0_22] : memref<18x18x4xf32, #tpu.memory_space<vmem>>, vector<8x16x4xf32>
    %c1_23 = arith.constant 1 : index
    %c1_24 = arith.constant 1 : index
    %c0_25 = arith.constant 0 : index
    %11 = vector.load %arg7[%c1_23, %c1_24, %c0_25] : memref<18x18x4xf32, #tpu.memory_space<vmem>>, vector<8x16x4xf32>
    %c1_26 = arith.constant 1 : index
    %c2_27 = arith.constant 2 : index
    %c0_28 = arith.constant 0 : index
    %12 = vector.load %arg7[%c1_26, %c2_27, %c0_28] : memref<18x18x4xf32, #tpu.memory_space<vmem>>, vector<8x16x4xf32>
    %c2_29 = arith.constant 2 : index
    %c0_30 = arith.constant 0 : index
    %c0_31 = arith.constant 0 : index
    %13 = vector.load %arg7[%c2_29, %c0_30, %c0_31] : memref<18x18x4xf32, #tpu.memory_space<vmem>>, vector<8x16x4xf32>
    %c2_32 = arith.constant 2 : index
    %c1_33 = arith.constant 1 : index
    %c0_34 = arith.constant 0 : index
    %14 = vector.load %arg7[%c2_32, %c1_33, %c0_34] : memref<18x18x4xf32, #tpu.memory_space<vmem>>, vector<8x16x4xf32>
    %c2_35 = arith.constant 2 : index
    %c2_36 = arith.constant 2 : index
    %c0_37 = arith.constant 0 : index
    %15 = vector.load %arg7[%c2_35, %c2_36, %c0_37] : memref<18x18x4xf32, #tpu.memory_space<vmem>>, vector<8x16x4xf32>
    %16 = tpu.concatenate %7, %8, %9, %10, %11, %12, %13, %14, %15 in 2 : vector<8x16x4xf32>, vector<8x16x4xf32>, vector<8x16x4xf32>, vector<8x16x4xf32>, vector<8x16x4xf32>, vector<8x16x4xf32>, vector<8x16x4xf32>, vector<8x16x4xf32>, vector<8x16x4xf32> -> vector<8x16x36xf32>
    %17 = vector.shape_cast %16 : vector<8x16x36xf32> to vector<128x36xf32>
    %c0_38 = arith.constant 0 : index
    %c0_39 = arith.constant 0 : index
    %18 = vector.load %arg2[%c0_38, %c0_39] : memref<36x4xf32, #tpu.memory_space<vmem>>, vector<36x4xf32>
    %cst_40 = arith.constant dense<0.000000e+00> : vector<128x4xf32>
    %19 = tpu.matmul %17, %18, %cst_40 {dimension_numbers = #tpu.dot_dimension_numbers<[1], [0], [0], [1], [0, 0, 1, 1], [], []>} : vector<128x36xf32>, vector<36x4xf32>, vector<128x4xf32> -> vector<128x4xf32>
    %c0_41 = arith.constant 0 : index
    %c0_42 = arith.constant 0 : index
    %20 = vector.load %arg3[%c0_41, %c0_42] : memref<1x4xf32, #tpu.memory_space<vmem>>, vector<1x4xf32>
    %21 = vector.broadcast %20 : vector<1x4xf32> to vector<128x4xf32>
    %22 = arith.addf %19, %21 : vector<128x4xf32>
    %cst_43 = arith.constant 0.000000e+00 : f32
    %23 = vector.broadcast %cst_43 : f32 to vector<128x4xf32>
    %24 = arith.maximumf %22, %23 : vector<128x4xf32>
    %25 = vector.shape_cast %24 : vector<128x4xf32> to vector<8x16x4xf32>
    %c1_44 = arith.constant 1 : index
    %c1_45 = arith.constant 1 : index
    %c0_46 = arith.constant 0 : index
    %26 = vector.load %arg8[%c1_44, %c1_45, %c0_46] : memref<18x18x4xf32, #tpu.memory_space<vmem>>, vector<8x16x4xf32>
    tpu.vector_store %arg8[%c1_44, %c1_45, %c0_46], %25 {strides = array<i32>} : memref<18x18x4xf32, #tpu.memory_space<vmem>>, vector<8x16x4xf32>,
    %c8 = arith.constant 8 : index
    %c0_47 = arith.constant 0 : index
    %c0_48 = arith.constant 0 : index
    %27 = vector.load %arg7[%c8, %c0_47, %c0_48] : memref<18x18x4xf32, #tpu.memory_space<vmem>>, vector<8x16x4xf32>
    %c8_49 = arith.constant 8 : index
    %c1_50 = arith.constant 1 : index
    %c0_51 = arith.constant 0 : index
    %28 = vector.load %arg7[%c8_49, %c1_50, %c0_51] : memref<18x18x4xf32, #tpu.memory_space<vmem>>, vector<8x16x4xf32>
    %c8_52 = arith.constant 8 : index
    %c2_53 = arith.constant 2 : index
    %c0_54 = arith.constant 0 : index
    %29 = vector.load %arg7[%c8_52, %c2_53, %c0_54] : memref<18x18x4xf32, #tpu.memory_space<vmem>>, vector<8x16x4xf32>
    %c9 = arith.constant 9 : index
    %c0_55 = arith.constant 0 : index
    %c0_56 = arith.constant 0 : index
    %30 = vector.load %arg7[%c9, %c0_55, %c0_56] : memref<18x18x4xf32, #tpu.memory_space<vmem>>, vector<8x16x4xf32>
    %c9_57 = arith.constant 9 : index
    %c1_58 = arith.constant 1 : index
    %c0_59 = arith.constant 0 : index
    %31 = vector.load %arg7[%c9_57, %c1_58, %c0_59] : memref<18x18x4xf32, #tpu.memory_space<vmem>>, vector<8x16x4xf32>
    %c9_60 = arith.constant 9 : index
    %c2_61 = arith.constant 2 : index
    %c0_62 = arith.constant 0 : index
    %32 = vector.load %arg7[%c9_60, %c2_61, %c0_62] : memref<18x18x4xf32, #tpu.memory_space<vmem>>, vector<8x16x4xf32>
    %c10 = arith.constant 10 : index
    %c0_63 = arith.constant 0 : index
    %c0_64 = arith.constant 0 : index
    %33 = vector.load %arg7[%c10, %c0_63, %c0_64] : memref<18x18x4xf32, #tpu.memory_space<vmem>>, vector<8x16x4xf32>
    %c10_65 = arith.constant 10 : index
    %c1_66 = arith.constant 1 : index
    %c0_67 = arith.constant 0 : index
    %34 = vector.load %arg7[%c10_65, %c1_66, %c0_67] : memref<18x18x4xf32, #tpu.memory_space<vmem>>, vector<8x16x4xf32>
    %c10_68 = arith.constant 10 : index
    %c2_69 = arith.constant 2 : index
    %c0_70 = arith.constant 0 : index
    %35 = vector.load %arg7[%c10_68, %c2_69, %c0_70] : memref<18x18x4xf32, #tpu.memory_space<vmem>>, vector<8x16x4xf32>
    %36 = tpu.concatenate %27, %28, %29, %30, %31, %32, %33, %34, %35 in 2 : vector<8x16x4xf32>, vector<8x16x4xf32>, vector<8x16x4xf32>, vector<8x16x4xf32>, vector<8x16x4xf32>, vector<8x16x4xf32>, vector<8x16x4xf32>, vector<8x16x4xf32>, vector<8x16x4xf32> -> vector<8x16x36xf32>
    %37 = vector.shape_cast %36 : vector<8x16x36xf32> to vector<128x36xf32>
    %c0_71 = arith.constant 0 : index
    %c0_72 = arith.constant 0 : index
    %38 = vector.load %arg2[%c0_71, %c0_72] : memref<36x4xf32, #tpu.memory_space<vmem>>, vector<36x4xf32>
    %cst_73 = arith.constant dense<0.000000e+00> : vector<128x4xf32>
    %39 = tpu.matmul %37, %38, %cst_73 {dimension_numbers = #tpu.dot_dimension_numbers<[1], [0], [0], [1], [0, 0, 1, 1], [], []>} : vector<128x36xf32>, vector<36x4xf32>, vector<128x4xf32> -> vector<128x4xf32>
    %c0_74 = arith.constant 0 : index
    %c0_75 = arith.constant 0 : index
    %40 = vector.load %arg3[%c0_74, %c0_75] : memref<1x4xf32, #tpu.memory_space<vmem>>, vector<1x4xf32>
    %41 = vector.broadcast %40 : vector<1x4xf32> to vector<128x4xf32>
    %42 = arith.addf %39, %41 : vector<128x4xf32>
    %cst_76 = arith.constant 0.000000e+00 : f32
    %43 = vector.broadcast %cst_76 : f32 to vector<128x4xf32>
    %44 = arith.maximumf %42, %43 : vector<128x4xf32>
    %45 = vector.shape_cast %44 : vector<128x4xf32> to vector<8x16x4xf32>
    %c9_77 = arith.constant 9 : index
    %c1_78 = arith.constant 1 : index
    %c0_79 = arith.constant 0 : index
    %46 = vector.load %arg8[%c9_77, %c1_78, %c0_79] : memref<18x18x4xf32, #tpu.memory_space<vmem>>, vector<8x16x4xf32>
    tpu.vector_store %arg8[%c9_77, %c1_78, %c0_79], %45 {strides = array<i32>} : memref<18x18x4xf32, #tpu.memory_space<vmem>>, vector<8x16x4xf32>,
    %c0_80 = arith.constant 0 : index
    %c0_81 = arith.constant 0 : index
    %c0_82 = arith.constant 0 : index
    %47 = vector.load %arg8[%c0_80, %c0_81, %c0_82] : memref<18x18x4xf32, #tpu.memory_space<vmem>>, vector<8x16x4xf32>
    %c0_83 = arith.constant 0 : index
    %c1_84 = arith.constant 1 : index
    %c0_85 = arith.constant 0 : index
    %48 = vector.load %arg8[%c0_83, %c1_84, %c0_85] : memref<18x18x4xf32, #tpu.memory_space<vmem>>, vector<8x16x4xf32>
    %c0_86 = arith.constant 0 : index
    %c2_87 = arith.constant 2 : index
    %c0_88 = arith.constant 0 : index
    %49 = vector.load %arg8[%c0_86, %c2_87, %c0_88] : memref<18x18x4xf32, #tpu.memory_space<vmem>>, vector<8x16x4xf32>
    %c1_89 = arith.constant 1 : index
    %c0_90 = arith.constant 0 : index
    %c0_91 = arith.constant 0 : index
    %50 = vector.load %arg8[%c1_89, %c0_90, %c0_91] : memref<18x18x4xf32, #tpu.memory_space<vmem>>, vector<8x16x4xf32>
    %c1_92 = arith.constant 1 : index
    %c1_93 = arith.constant 1 : index
    %c0_94 = arith.constant 0 : index
    %51 = vector.load %arg8[%c1_92, %c1_93, %c0_94] : memref<18x18x4xf32, #tpu.memory_space<vmem>>, vector<8x16x4xf32>
    %c1_95 = arith.constant 1 : index
    %c2_96 = arith.constant 2 : index
    %c0_97 = arith.constant 0 : index
    %52 = vector.load %arg8[%c1_95, %c2_96, %c0_97] : memref<18x18x4xf32, #tpu.memory_space<vmem>>, vector<8x16x4xf32>
    %c2_98 = arith.constant 2 : index
    %c0_99 = arith.constant 0 : index
    %c0_100 = arith.constant 0 : index
    %53 = vector.load %arg8[%c2_98, %c0_99, %c0_100] : memref<18x18x4xf32, #tpu.memory_space<vmem>>, vector<8x16x4xf32>
    %c2_101 = arith.constant 2 : index
    %c1_102 = arith.constant 1 : index
    %c0_103 = arith.constant 0 : index
    %54 = vector.load %arg8[%c2_101, %c1_102, %c0_103] : memref<18x18x4xf32, #tpu.memory_space<vmem>>, vector<8x16x4xf32>
    %c2_104 = arith.constant 2 : index
    %c2_105 = arith.constant 2 : index
    %c0_106 = arith.constant 0 : index
    %55 = vector.load %arg8[%c2_104, %c2_105, %c0_106] : memref<18x18x4xf32, #tpu.memory_space<vmem>>, vector<8x16x4xf32>
    %56 = tpu.concatenate %47, %48, %49, %50, %51, %52, %53, %54, %55 in 2 : vector<8x16x4xf32>, vector<8x16x4xf32>, vector<8x16x4xf32>, vector<8x16x4xf32>, vector<8x16x4xf32>, vector<8x16x4xf32>, vector<8x16x4xf32>, vector<8x16x4xf32>, vector<8x16x4xf32> -> vector<8x16x36xf32>
    %57 = vector.shape_cast %56 : vector<8x16x36xf32> to vector<128x36xf32>
    %c0_107 = arith.constant 0 : index
    %c0_108 = arith.constant 0 : index
    %58 = vector.load %arg4[%c0_107, %c0_108] : memref<36x4xf32, #tpu.memory_space<vmem>>, vector<36x4xf32>
    %cst_109 = arith.constant dense<0.000000e+00> : vector<128x4xf32>
    %59 = tpu.matmul %57, %58, %cst_109 {dimension_numbers = #tpu.dot_dimension_numbers<[1], [0], [0], [1], [0, 0, 1, 1], [], []>} : vector<128x36xf32>, vector<36x4xf32>, vector<128x4xf32> -> vector<128x4xf32>
    %c0_110 = arith.constant 0 : index
    %c0_111 = arith.constant 0 : index
    %60 = vector.load %arg5[%c0_110, %c0_111] : memref<1x4xf32, #tpu.memory_space<vmem>>, vector<1x4xf32>
    %61 = vector.broadcast %60 : vector<1x4xf32> to vector<128x4xf32>
    %62 = arith.addf %59, %61 : vector<128x4xf32>
    %c0_112 = arith.constant 0 : index
    %c0_113 = arith.constant 0 : index
    %c0_114 = arith.constant 0 : index
    %c0_115 = arith.constant 0 : index
    %63 = vector.load %arg1[%c0_112, %c0_113, %c0_114, %c0_115] : memref<1x16x16x4xf32, #tpu.memory_space<vmem>>, vector<1x8x16x4xf32>
    %64 = vector.shape_cast %63 : vector<1x8x16x4xf32> to vector<8x16x4xf32>
    %65 = vector.shape_cast %64 : vector<8x16x4xf32> to vector<128x4xf32>
    %66 = arith.addf %62, %65 : vector<128x4xf32>
    %cst_116 = arith.constant 0.000000e+00 : f32
    %67 = vector.broadcast %cst_116 : f32 to vector<128x4xf32>
    %68 = arith.maximumf %66, %67 : vector<128x4xf32>
    %69 = vector.shape_cast %68 : vector<128x4xf32> to vector<8x16x4xf32>
    %c0_117 = arith.constant 0 : index
    %c0_118 = arith.constant 0 : index
    %c0_119 = arith.constant 0 : index
    %c0_120 = arith.constant 0 : index
    %70 = vector.load %arg6[%c0_117, %c0_118, %c0_119, %c0_120] : memref<1x16x16x4xf32, #tpu.memory_space<vmem>>, vector<1x8x16x4xf32>
    %71 = vector.shape_cast %70 : vector<1x8x16x4xf32> to vector<8x16x4xf32>
    %72 = vector.shape_cast %69 : vector<8x16x4xf32> to vector<1x8x16x4xf32>
    tpu.vector_store %arg6[%c0_117, %c0_118, %c0_119, %c0_120], %72 {strides = array<i32>} : memref<1x16x16x4xf32, #tpu.memory_space<vmem>>, vector<1x8x16x4xf32>,
    %c8_121 = arith.constant 8 : index
    %c0_122 = arith.constant 0 : index
    %c0_123 = arith.constant 0 : index
    %73 = vector.load %arg8[%c8_121, %c0_122, %c0_123] : memref<18x18x4xf32, #tpu.memory_space<vmem>>, vector<8x16x4xf32>
    %c8_124 = arith.constant 8 : index
    %c1_125 = arith.constant 1 : index
    %c0_126 = arith.constant 0 : index
    %74 = vector.load %arg8[%c8_124, %c1_125, %c0_126] : memref<18x18x4xf32, #tpu.memory_space<vmem>>, vector<8x16x4xf32>
    %c8_127 = arith.constant 8 : index
    %c2_128 = arith.constant 2 : index
    %c0_129 = arith.constant 0 : index
    %75 = vector.load %arg8[%c8_127, %c2_128, %c0_129] : memref<18x18x4xf32, #tpu.memory_space<vmem>>, vector<8x16x4xf32>
    %c9_130 = arith.constant 9 : index
    %c0_131 = arith.constant 0 : index
    %c0_132 = arith.constant 0 : index
    %76 = vector.load %arg8[%c9_130, %c0_131, %c0_132] : memref<18x18x4xf32, #tpu.memory_space<vmem>>, vector<8x16x4xf32>
    %c9_133 = arith.constant 9 : index
    %c1_134 = arith.constant 1 : index
    %c0_135 = arith.constant 0 : index
    %77 = vector.load %arg8[%c9_133, %c1_134, %c0_135] : memref<18x18x4xf32, #tpu.memory_space<vmem>>, vector<8x16x4xf32>
    %c9_136 = arith.constant 9 : index
    %c2_137 = arith.constant 2 : index
    %c0_138 = arith.constant 0 : index
    %78 = vector.load %arg8[%c9_136, %c2_137, %c0_138] : memref<18x18x4xf32, #tpu.memory_space<vmem>>, vector<8x16x4xf32>
    %c10_139 = arith.constant 10 : index
    %c0_140 = arith.constant 0 : index
    %c0_141 = arith.constant 0 : index
    %79 = vector.load %arg8[%c10_139, %c0_140, %c0_141] : memref<18x18x4xf32, #tpu.memory_space<vmem>>, vector<8x16x4xf32>
    %c10_142 = arith.constant 10 : index
    %c1_143 = arith.constant 1 : index
    %c0_144 = arith.constant 0 : index
    %80 = vector.load %arg8[%c10_142, %c1_143, %c0_144] : memref<18x18x4xf32, #tpu.memory_space<vmem>>, vector<8x16x4xf32>
    %c10_145 = arith.constant 10 : index
    %c2_146 = arith.constant 2 : index
    %c0_147 = arith.constant 0 : index
    %81 = vector.load %arg8[%c10_145, %c2_146, %c0_147] : memref<18x18x4xf32, #tpu.memory_space<vmem>>, vector<8x16x4xf32>
    %82 = tpu.concatenate %73, %74, %75, %76, %77, %78, %79, %80, %81 in 2 : vector<8x16x4xf32>, vector<8x16x4xf32>, vector<8x16x4xf32>, vector<8x16x4xf32>, vector<8x16x4xf32>, vector<8x16x4xf32>, vector<8x16x4xf32>, vector<8x16x4xf32>, vector<8x16x4xf32> -> vector<8x16x36xf32>
    %83 = vector.shape_cast %82 : vector<8x16x36xf32> to vector<128x36xf32>
    %c0_148 = arith.constant 0 : index
    %c0_149 = arith.constant 0 : index
    %84 = vector.load %arg4[%c0_148, %c0_149] : memref<36x4xf32, #tpu.memory_space<vmem>>, vector<36x4xf32>
    %cst_150 = arith.constant dense<0.000000e+00> : vector<128x4xf32>
    %85 = tpu.matmul %83, %84, %cst_150 {dimension_numbers = #tpu.dot_dimension_numbers<[1], [0], [0], [1], [0, 0, 1, 1], [], []>} : vector<128x36xf32>, vector<36x4xf32>, vector<128x4xf32> -> vector<128x4xf32>
    %c0_151 = arith.constant 0 : index
    %c0_152 = arith.constant 0 : index
    %86 = vector.load %arg5[%c0_151, %c0_152] : memref<1x4xf32, #tpu.memory_space<vmem>>, vector<1x4xf32>
    %87 = vector.broadcast %86 : vector<1x4xf32> to vector<128x4xf32>
    %88 = arith.addf %85, %87 : vector<128x4xf32>
    %c0_153 = arith.constant 0 : index
    %c8_154 = arith.constant 8 : index
    %c0_155 = arith.constant 0 : index
    %c0_156 = arith.constant 0 : index
    %89 = vector.load %arg1[%c0_153, %c8_154, %c0_155, %c0_156] : memref<1x16x16x4xf32, #tpu.memory_space<vmem>>, vector<1x8x16x4xf32>
    %90 = vector.shape_cast %89 : vector<1x8x16x4xf32> to vector<8x16x4xf32>
    %91 = vector.shape_cast %90 : vector<8x16x4xf32> to vector<128x4xf32>
    %92 = arith.addf %88, %91 : vector<128x4xf32>
    %cst_157 = arith.constant 0.000000e+00 : f32
    %93 = vector.broadcast %cst_157 : f32 to vector<128x4xf32>
    %94 = arith.maximumf %92, %93 : vector<128x4xf32>
    %95 = vector.shape_cast %94 : vector<128x4xf32> to vector<8x16x4xf32>
    %c0_158 = arith.constant 0 : index
    %c8_159 = arith.constant 8 : index
    %c0_160 = arith.constant 0 : index
    %c0_161 = arith.constant 0 : index
    %96 = vector.load %arg6[%c0_158, %c8_159, %c0_160, %c0_161] : memref<1x16x16x4xf32, #tpu.memory_space<vmem>>, vector<1x8x16x4xf32>
    %97 = vector.shape_cast %96 : vector<1x8x16x4xf32> to vector<8x16x4xf32>
    %98 = vector.shape_cast %95 : vector<8x16x4xf32> to vector<1x8x16x4xf32>
    tpu.vector_store %arg6[%c0_158, %c8_159, %c0_160, %c0_161], %98 {strides = array<i32>} : memref<1x16x16x4xf32, #tpu.memory_space<vmem>>, vector<1x8x16x4xf32>,
    return
  }
  func.func @transform_0(%arg0: i32) -> (i32, i32, i32, i32) {
    %c0_i32 = arith.constant 0 : i32
    %c0_i32_0 = arith.constant 0 : i32
    %c0_i32_1 = arith.constant 0 : i32
    %c0_i32_2 = arith.constant 0 : i32
    return %arg0, %c0_i32, %c0_i32_0, %c0_i32_1 : i32, i32, i32, i32
  }
  func.func @transform_1(%arg0: i32) -> (i32, i32) {
    %c0_i32 = arith.constant 0 : i32
    %c0_i32_0 = arith.constant 0 : i32
    %c0_i32_1 = arith.constant 0 : i32
    return %c0_i32, %c0_i32_0 : i32, i32
  }
  func.func @transform_2(%arg0: i32) -> (i32, i32) {
    %c0_i32 = arith.constant 0 : i32
    %c0_i32_0 = arith.constant 0 : i32
    %c0_i32_1 = arith.constant 0 : i32
    return %c0_i32, %c0_i32_0 : i32, i32
  }
  func.func @transform_3(%arg0: i32) -> (i32, i32) {
    %c0_i32 = arith.constant 0 : i32
    %c0_i32_0 = arith.constant 0 : i32
    %c0_i32_1 = arith.constant 0 : i32
    return %c0_i32, %c0_i32_0 : i32, i32
  }
  func.func @transform_4(%arg0: i32) -> (i32, i32) {
    %c0_i32 = arith.constant 0 : i32
    %c0_i32_0 = arith.constant 0 : i32
    %c0_i32_1 = arith.constant 0 : i32
    return %c0_i32, %c0_i32_0 : i32, i32
  }
  func.func @transform_5(%arg0: i32) -> (i32, i32, i32, i32) {
    %c0_i32 = arith.constant 0 : i32
    %c0_i32_0 = arith.constant 0 : i32
    %c0_i32_1 = arith.constant 0 : i32
    %c0_i32_2 = arith.constant 0 : i32
    return %arg0, %c0_i32, %c0_i32_0, %c0_i32_1 : i32, i32, i32, i32
  }
}

module attributes {stable_mosaic.version = 11 : i64} {
  func.func @_maxpool2x2_kernel(%arg0: i32, %arg1: memref<1x16x8x8xf32, #tpu.memory_space<vmem>>, %arg2: memref<1x8x8x4xf32, #tpu.memory_space<vmem>>) attributes {dimension_semantics = [#tpu.dimension_semantics<parallel>], iteration_bounds = array<i64: 2>, scalar_prefetch = 0 : i64, scratch_operands = 0 : i64, tpu.core_type = #tpu.core_type<tc>, window_params = [{transform_indices = @transform_0, window_bounds = array<i64: 1, 16, 8, 8>}, {transform_indices = @transform_1, window_bounds = array<i64: 1, 8, 8, 4>}]} {
    %c0 = arith.constant 0 : index
    %c0_0 = arith.constant 0 : index
    %c0_1 = arith.constant 0 : index
    %c0_2 = arith.constant 0 : index
    %0 = vector.load %arg1[%c0, %c0_0, %c0_1, %c0_2] : memref<1x16x8x8xf32, #tpu.memory_space<vmem>>, vector<1x16x8x8xf32>
    %1 = vector.shape_cast %0 : vector<1x16x8x8xf32> to vector<16x8x8xf32>
    %2 = vector.extract_strided_slice %1 {offsets = [0, 0, 0], sizes = [16, 8, 4], strides = [1, 1, 1]} : vector<16x8x8xf32> to vector<16x8x4xf32>
    %3 = vector.extract_strided_slice %1 {offsets = [0, 0, 4], sizes = [16, 8, 4], strides = [1, 1, 1]} : vector<16x8x8xf32> to vector<16x8x4xf32>
    %4 = arith.maximumf %2, %3 : vector<16x8x4xf32>
    %5 = vector.shape_cast %4 : vector<16x8x4xf32> to vector<8x2x8x4xf32>
    %6 = vector.extract_strided_slice %5 {offsets = [0, 0, 0, 0], sizes = [8, 1, 8, 4], strides = [1, 1, 1, 1]} : vector<8x2x8x4xf32> to vector<8x1x8x4xf32>
    %7 = vector.shape_cast %6 : vector<8x1x8x4xf32> to vector<8x8x4xf32>
    %8 = vector.extract_strided_slice %5 {offsets = [0, 1, 0, 0], sizes = [8, 1, 8, 4], strides = [1, 1, 1, 1]} : vector<8x2x8x4xf32> to vector<8x1x8x4xf32>
    %9 = vector.shape_cast %8 : vector<8x1x8x4xf32> to vector<8x8x4xf32>
    %10 = arith.maximumf %7, %9 : vector<8x8x4xf32>
    %c0_3 = arith.constant 0 : index
    %c0_4 = arith.constant 0 : index
    %c0_5 = arith.constant 0 : index
    %c0_6 = arith.constant 0 : index
    %11 = vector.load %arg2[%c0_3, %c0_4, %c0_5, %c0_6] : memref<1x8x8x4xf32, #tpu.memory_space<vmem>>, vector<1x8x8x4xf32>
    %12 = vector.shape_cast %11 : vector<1x8x8x4xf32> to vector<8x8x4xf32>
    %13 = vector.shape_cast %10 : vector<8x8x4xf32> to vector<1x8x8x4xf32>
    tpu.vector_store %arg2[%c0_3, %c0_4, %c0_5, %c0_6], %13 {strides = array<i32>} : memref<1x8x8x4xf32, #tpu.memory_space<vmem>>, vector<1x8x8x4xf32>,
    return
  }
  func.func @transform_0(%arg0: i32) -> (i32, i32, i32, i32) {
    %c0_i32 = arith.constant 0 : i32
    %c0_i32_0 = arith.constant 0 : i32
    %c0_i32_1 = arith.constant 0 : i32
    %c0_i32_2 = arith.constant 0 : i32
    return %arg0, %c0_i32, %c0_i32_0, %c0_i32_1 : i32, i32, i32, i32
  }
  func.func @transform_1(%arg0: i32) -> (i32, i32, i32, i32) {
    %c0_i32 = arith.constant 0 : i32
    %c0_i32_0 = arith.constant 0 : i32
    %c0_i32_1 = arith.constant 0 : i32
    %c0_i32_2 = arith.constant 0 : i32
    return %arg0, %c0_i32, %c0_i32_0, %c0_i32_1 : i32, i32, i32, i32
  }
}

module attributes {stable_mosaic.version = 11 : i64} {
  func.func @_resnetk_block_kernel(%arg0: i32, %arg1: memref<1x8x8x4xf32, #tpu.memory_space<vmem>>, %arg2: memref<36x4xf32, #tpu.memory_space<vmem>>, %arg3: memref<1x4xf32, #tpu.memory_space<vmem>>, %arg4: memref<36x4xf32, #tpu.memory_space<vmem>>, %arg5: memref<1x4xf32, #tpu.memory_space<vmem>>, %arg6: memref<1x8x8x4xf32, #tpu.memory_space<vmem>>, %arg7: memref<10x10x4xf32, #tpu.memory_space<vmem>>, %arg8: memref<10x10x4xf32, #tpu.memory_space<vmem>>) attributes {dimension_semantics = [#tpu.dimension_semantics<parallel>], iteration_bounds = array<i64: 2>, scalar_prefetch = 0 : i64, scratch_operands = 2 : i64, tpu.core_type = #tpu.core_type<tc>, window_params = [{transform_indices = @transform_0, window_bounds = array<i64: 1, 8, 8, 4>}, {pipeline_mode = #tpu.pipeline_mode<synchronous>, transform_indices = @transform_1, window_bounds = array<i64: 36, 4>}, {pipeline_mode = #tpu.pipeline_mode<synchronous>, transform_indices = @transform_2, window_bounds = array<i64: 1, 4>}, {pipeline_mode = #tpu.pipeline_mode<synchronous>, transform_indices = @transform_3, window_bounds = array<i64: 36, 4>}, {pipeline_mode = #tpu.pipeline_mode<synchronous>, transform_indices = @transform_4, window_bounds = array<i64: 1, 4>}, {transform_indices = @transform_5, window_bounds = array<i64: 1, 8, 8, 4>}]} {
    %cst = arith.constant 0.000000e+00 : f32
    %0 = vector.broadcast %cst : f32 to vector<10x10x4xf32>
    %c0 = arith.constant 0 : index
    %c0_0 = arith.constant 0 : index
    %c0_1 = arith.constant 0 : index
    %1 = vector.load %arg7[%c0, %c0_0, %c0_1] : memref<10x10x4xf32, #tpu.memory_space<vmem>>, vector<10x10x4xf32>
    tpu.vector_store %arg7[%c0, %c0_0, %c0_1], %0 {strides = array<i32>} : memref<10x10x4xf32, #tpu.memory_space<vmem>>, vector<10x10x4xf32>,
    %cst_2 = arith.constant 0.000000e+00 : f32
    %2 = vector.broadcast %cst_2 : f32 to vector<10x10x4xf32>
    %c0_3 = arith.constant 0 : index
    %c0_4 = arith.constant 0 : index
    %c0_5 = arith.constant 0 : index
    %3 = vector.load %arg8[%c0_3, %c0_4, %c0_5] : memref<10x10x4xf32, #tpu.memory_space<vmem>>, vector<10x10x4xf32>
    tpu.vector_store %arg8[%c0_3, %c0_4, %c0_5], %2 {strides = array<i32>} : memref<10x10x4xf32, #tpu.memory_space<vmem>>, vector<10x10x4xf32>,
    %c0_6 = arith.constant 0 : index
    %c0_7 = arith.constant 0 : index
    %c0_8 = arith.constant 0 : index
    %c0_9 = arith.constant 0 : index
    %4 = vector.load %arg1[%c0_6, %c0_7, %c0_8, %c0_9] : memref<1x8x8x4xf32, #tpu.memory_space<vmem>>, vector<1x8x8x4xf32>
    %5 = vector.shape_cast %4 : vector<1x8x8x4xf32> to vector<8x8x4xf32>
    %c1 = arith.constant 1 : index
    %c1_10 = arith.constant 1 : index
    %c0_11 = arith.constant 0 : index
    %6 = vector.load %arg7[%c1, %c1_10, %c0_11] : memref<10x10x4xf32, #tpu.memory_space<vmem>>, vector<8x8x4xf32>
    tpu.vector_store %arg7[%c1, %c1_10, %c0_11], %5 {strides = array<i32>} : memref<10x10x4xf32, #tpu.memory_space<vmem>>, vector<8x8x4xf32>,
    %c0_12 = arith.constant 0 : index
    %c0_13 = arith.constant 0 : index
    %c0_14 = arith.constant 0 : index
    %7 = vector.load %arg7[%c0_12, %c0_13, %c0_14] : memref<10x10x4xf32, #tpu.memory_space<vmem>>, vector<8x8x4xf32>
    %c0_15 = arith.constant 0 : index
    %c1_16 = arith.constant 1 : index
    %c0_17 = arith.constant 0 : index
    %8 = vector.load %arg7[%c0_15, %c1_16, %c0_17] : memref<10x10x4xf32, #tpu.memory_space<vmem>>, vector<8x8x4xf32>
    %c0_18 = arith.constant 0 : index
    %c2 = arith.constant 2 : index
    %c0_19 = arith.constant 0 : index
    %9 = vector.load %arg7[%c0_18, %c2, %c0_19] : memref<10x10x4xf32, #tpu.memory_space<vmem>>, vector<8x8x4xf32>
    %c1_20 = arith.constant 1 : index
    %c0_21 = arith.constant 0 : index
    %c0_22 = arith.constant 0 : index
    %10 = vector.load %arg7[%c1_20, %c0_21, %c0_22] : memref<10x10x4xf32, #tpu.memory_space<vmem>>, vector<8x8x4xf32>
    %c1_23 = arith.constant 1 : index
    %c1_24 = arith.constant 1 : index
    %c0_25 = arith.constant 0 : index
    %11 = vector.load %arg7[%c1_23, %c1_24, %c0_25] : memref<10x10x4xf32, #tpu.memory_space<vmem>>, vector<8x8x4xf32>
    %c1_26 = arith.constant 1 : index
    %c2_27 = arith.constant 2 : index
    %c0_28 = arith.constant 0 : index
    %12 = vector.load %arg7[%c1_26, %c2_27, %c0_28] : memref<10x10x4xf32, #tpu.memory_space<vmem>>, vector<8x8x4xf32>
    %c2_29 = arith.constant 2 : index
    %c0_30 = arith.constant 0 : index
    %c0_31 = arith.constant 0 : index
    %13 = vector.load %arg7[%c2_29, %c0_30, %c0_31] : memref<10x10x4xf32, #tpu.memory_space<vmem>>, vector<8x8x4xf32>
    %c2_32 = arith.constant 2 : index
    %c1_33 = arith.constant 1 : index
    %c0_34 = arith.constant 0 : index
    %14 = vector.load %arg7[%c2_32, %c1_33, %c0_34] : memref<10x10x4xf32, #tpu.memory_space<vmem>>, vector<8x8x4xf32>
    %c2_35 = arith.constant 2 : index
    %c2_36 = arith.constant 2 : index
    %c0_37 = arith.constant 0 : index
    %15 = vector.load %arg7[%c2_35, %c2_36, %c0_37] : memref<10x10x4xf32, #tpu.memory_space<vmem>>, vector<8x8x4xf32>
    %16 = tpu.concatenate %7, %8, %9, %10, %11, %12, %13, %14, %15 in 2 : vector<8x8x4xf32>, vector<8x8x4xf32>, vector<8x8x4xf32>, vector<8x8x4xf32>, vector<8x8x4xf32>, vector<8x8x4xf32>, vector<8x8x4xf32>, vector<8x8x4xf32>, vector<8x8x4xf32> -> vector<8x8x36xf32>
    %17 = vector.shape_cast %16 : vector<8x8x36xf32> to vector<64x36xf32>
    %c0_38 = arith.constant 0 : index
    %c0_39 = arith.constant 0 : index
    %18 = vector.load %arg2[%c0_38, %c0_39] : memref<36x4xf32, #tpu.memory_space<vmem>>, vector<36x4xf32>
    %cst_40 = arith.constant dense<0.000000e+00> : vector<64x4xf32>
    %19 = tpu.matmul %17, %18, %cst_40 {dimension_numbers = #tpu.dot_dimension_numbers<[1], [0], [0], [1], [0, 0, 1, 1], [], []>} : vector<64x36xf32>, vector<36x4xf32>, vector<64x4xf32> -> vector<64x4xf32>
    %c0_41 = arith.constant 0 : index
    %c0_42 = arith.constant 0 : index
    %20 = vector.load %arg3[%c0_41, %c0_42] : memref<1x4xf32, #tpu.memory_space<vmem>>, vector<1x4xf32>
    %21 = vector.broadcast %20 : vector<1x4xf32> to vector<64x4xf32>
    %22 = arith.addf %19, %21 : vector<64x4xf32>
    %cst_43 = arith.constant 0.000000e+00 : f32
    %23 = vector.broadcast %cst_43 : f32 to vector<64x4xf32>
    %24 = arith.maximumf %22, %23 : vector<64x4xf32>
    %25 = vector.shape_cast %24 : vector<64x4xf32> to vector<8x8x4xf32>
    %c1_44 = arith.constant 1 : index
    %c1_45 = arith.constant 1 : index
    %c0_46 = arith.constant 0 : index
    %26 = vector.load %arg8[%c1_44, %c1_45, %c0_46] : memref<10x10x4xf32, #tpu.memory_space<vmem>>, vector<8x8x4xf32>
    tpu.vector_store %arg8[%c1_44, %c1_45, %c0_46], %25 {strides = array<i32>} : memref<10x10x4xf32, #tpu.memory_space<vmem>>, vector<8x8x4xf32>,
    %c0_47 = arith.constant 0 : index
    %c0_48 = arith.constant 0 : index
    %c0_49 = arith.constant 0 : index
    %27 = vector.load %arg8[%c0_47, %c0_48, %c0_49] : memref<10x10x4xf32, #tpu.memory_space<vmem>>, vector<8x8x4xf32>
    %c0_50 = arith.constant 0 : index
    %c1_51 = arith.constant 1 : index
    %c0_52 = arith.constant 0 : index
    %28 = vector.load %arg8[%c0_50, %c1_51, %c0_52] : memref<10x10x4xf32, #tpu.memory_space<vmem>>, vector<8x8x4xf32>
    %c0_53 = arith.constant 0 : index
    %c2_54 = arith.constant 2 : index
    %c0_55 = arith.constant 0 : index
    %29 = vector.load %arg8[%c0_53, %c2_54, %c0_55] : memref<10x10x4xf32, #tpu.memory_space<vmem>>, vector<8x8x4xf32>
    %c1_56 = arith.constant 1 : index
    %c0_57 = arith.constant 0 : index
    %c0_58 = arith.constant 0 : index
    %30 = vector.load %arg8[%c1_56, %c0_57, %c0_58] : memref<10x10x4xf32, #tpu.memory_space<vmem>>, vector<8x8x4xf32>
    %c1_59 = arith.constant 1 : index
    %c1_60 = arith.constant 1 : index
    %c0_61 = arith.constant 0 : index
    %31 = vector.load %arg8[%c1_59, %c1_60, %c0_61] : memref<10x10x4xf32, #tpu.memory_space<vmem>>, vector<8x8x4xf32>
    %c1_62 = arith.constant 1 : index
    %c2_63 = arith.constant 2 : index
    %c0_64 = arith.constant 0 : index
    %32 = vector.load %arg8[%c1_62, %c2_63, %c0_64] : memref<10x10x4xf32, #tpu.memory_space<vmem>>, vector<8x8x4xf32>
    %c2_65 = arith.constant 2 : index
    %c0_66 = arith.constant 0 : index
    %c0_67 = arith.constant 0 : index
    %33 = vector.load %arg8[%c2_65, %c0_66, %c0_67] : memref<10x10x4xf32, #tpu.memory_space<vmem>>, vector<8x8x4xf32>
    %c2_68 = arith.constant 2 : index
    %c1_69 = arith.constant 1 : index
    %c0_70 = arith.constant 0 : index
    %34 = vector.load %arg8[%c2_68, %c1_69, %c0_70] : memref<10x10x4xf32, #tpu.memory_space<vmem>>, vector<8x8x4xf32>
    %c2_71 = arith.constant 2 : index
    %c2_72 = arith.constant 2 : index
    %c0_73 = arith.constant 0 : index
    %35 = vector.load %arg8[%c2_71, %c2_72, %c0_73] : memref<10x10x4xf32, #tpu.memory_space<vmem>>, vector<8x8x4xf32>
    %36 = tpu.concatenate %27, %28, %29, %30, %31, %32, %33, %34, %35 in 2 : vector<8x8x4xf32>, vector<8x8x4xf32>, vector<8x8x4xf32>, vector<8x8x4xf32>, vector<8x8x4xf32>, vector<8x8x4xf32>, vector<8x8x4xf32>, vector<8x8x4xf32>, vector<8x8x4xf32> -> vector<8x8x36xf32>
    %37 = vector.shape_cast %36 : vector<8x8x36xf32> to vector<64x36xf32>
    %c0_74 = arith.constant 0 : index
    %c0_75 = arith.constant 0 : index
    %38 = vector.load %arg4[%c0_74, %c0_75] : memref<36x4xf32, #tpu.memory_space<vmem>>, vector<36x4xf32>
    %cst_76 = arith.constant dense<0.000000e+00> : vector<64x4xf32>
    %39 = tpu.matmul %37, %38, %cst_76 {dimension_numbers = #tpu.dot_dimension_numbers<[1], [0], [0], [1], [0, 0, 1, 1], [], []>} : vector<64x36xf32>, vector<36x4xf32>, vector<64x4xf32> -> vector<64x4xf32>
    %c0_77 = arith.constant 0 : index
    %c0_78 = arith.constant 0 : index
    %40 = vector.load %arg5[%c0_77, %c0_78] : memref<1x4xf32, #tpu.memory_space<vmem>>, vector<1x4xf32>
    %41 = vector.broadcast %40 : vector<1x4xf32> to vector<64x4xf32>
    %42 = arith.addf %39, %41 : vector<64x4xf32>
    %c0_79 = arith.constant 0 : index
    %c0_80 = arith.constant 0 : index
    %c0_81 = arith.constant 0 : index
    %c0_82 = arith.constant 0 : index
    %43 = vector.load %arg1[%c0_79, %c0_80, %c0_81, %c0_82] : memref<1x8x8x4xf32, #tpu.memory_space<vmem>>, vector<1x8x8x4xf32>
    %44 = vector.shape_cast %43 : vector<1x8x8x4xf32> to vector<8x8x4xf32>
    %45 = vector.shape_cast %44 : vector<8x8x4xf32> to vector<64x4xf32>
    %46 = arith.addf %42, %45 : vector<64x4xf32>
    %cst_83 = arith.constant 0.000000e+00 : f32
    %47 = vector.broadcast %cst_83 : f32 to vector<64x4xf32>
    %48 = arith.maximumf %46, %47 : vector<64x4xf32>
    %49 = vector.shape_cast %48 : vector<64x4xf32> to vector<8x8x4xf32>
    %c0_84 = arith.constant 0 : index
    %c0_85 = arith.constant 0 : index
    %c0_86 = arith.constant 0 : index
    %c0_87 = arith.constant 0 : index
    %50 = vector.load %arg6[%c0_84, %c0_85, %c0_86, %c0_87] : memref<1x8x8x4xf32, #tpu.memory_space<vmem>>, vector<1x8x8x4xf32>
    %51 = vector.shape_cast %50 : vector<1x8x8x4xf32> to vector<8x8x4xf32>
    %52 = vector.shape_cast %49 : vector<8x8x4xf32> to vector<1x8x8x4xf32>
    tpu.vector_store %arg6[%c0_84, %c0_85, %c0_86, %c0_87], %52 {strides = array<i32>} : memref<1x8x8x4xf32, #tpu.memory_space<vmem>>, vector<1x8x8x4xf32>,
    return
  }
  func.func @transform_0(%arg0: i32) -> (i32, i32, i32, i32) {
    %c0_i32 = arith.constant 0 : i32
    %c0_i32_0 = arith.constant 0 : i32
    %c0_i32_1 = arith.constant 0 : i32
    %c0_i32_2 = arith.constant 0 : i32
    return %arg0, %c0_i32, %c0_i32_0, %c0_i32_1 : i32, i32, i32, i32
  }
  func.func @transform_1(%arg0: i32) -> (i32, i32) {
    %c0_i32 = arith.constant 0 : i32
    %c0_i32_0 = arith.constant 0 : i32
    %c0_i32_1 = arith.constant 0 : i32
    return %c0_i32, %c0_i32_0 : i32, i32
  }
  func.func @transform_2(%arg0: i32) -> (i32, i32) {
    %c0_i32 = arith.constant 0 : i32
    %c0_i32_0 = arith.constant 0 : i32
    %c0_i32_1 = arith.constant 0 : i32
    return %c0_i32, %c0_i32_0 : i32, i32
  }
  func.func @transform_3(%arg0: i32) -> (i32, i32) {
    %c0_i32 = arith.constant 0 : i32
    %c0_i32_0 = arith.constant 0 : i32
    %c0_i32_1 = arith.constant 0 : i32
    return %c0_i32, %c0_i32_0 : i32, i32
  }
  func.func @transform_4(%arg0: i32) -> (i32, i32) {
    %c0_i32 = arith.constant 0 : i32
    %c0_i32_0 = arith.constant 0 : i32
    %c0_i32_1 = arith.constant 0 : i32
    return %c0_i32, %c0_i32_0 : i32, i32
  }
  func.func @transform_5(%arg0: i32) -> (i32, i32, i32, i32) {
    %c0_i32 = arith.constant 0 : i32
    %c0_i32_0 = arith.constant 0 : i32
    %c0_i32_1 = arith.constant 0 : i32
    %c0_i32_2 = arith.constant 0 : i32
    return %arg0, %c0_i32, %c0_i32_0, %c0_i32_1 : i32, i32, i32, i32
  }
}

module attributes {stable_mosaic.version = 11 : i64} {
  func.func @_resnetk_block_kernel(%arg0: i32, %arg1: memref<1x4x4x4xf32, #tpu.memory_space<vmem>>, %arg2: memref<36x4xf32, #tpu.memory_space<vmem>>, %arg3: memref<1x4xf32, #tpu.memory_space<vmem>>, %arg4: memref<36x4xf32, #tpu.memory_space<vmem>>, %arg5: memref<1x4xf32, #tpu.memory_space<vmem>>, %arg6: memref<1x4x4x4xf32, #tpu.memory_space<vmem>>, %arg7: memref<6x6x4xf32, #tpu.memory_space<vmem>>, %arg8: memref<6x6x4xf32, #tpu.memory_space<vmem>>) attributes {dimension_semantics = [#tpu.dimension_semantics<parallel>], iteration_bounds = array<i64: 2>, scalar_prefetch = 0 : i64, scratch_operands = 2 : i64, tpu.core_type = #tpu.core_type<tc>, window_params = [{transform_indices = @transform_0, window_bounds = array<i64: 1, 4, 4, 4>}, {pipeline_mode = #tpu.pipeline_mode<synchronous>, transform_indices = @transform_1, window_bounds = array<i64: 36, 4>}, {pipeline_mode = #tpu.pipeline_mode<synchronous>, transform_indices = @transform_2, window_bounds = array<i64: 1, 4>}, {pipeline_mode = #tpu.pipeline_mode<synchronous>, transform_indices = @transform_3, window_bounds = array<i64: 36, 4>}, {pipeline_mode = #tpu.pipeline_mode<synchronous>, transform_indices = @transform_4, window_bounds = array<i64: 1, 4>}, {transform_indices = @transform_5, window_bounds = array<i64: 1, 4, 4, 4>}]} {
    %cst = arith.constant 0.000000e+00 : f32
    %0 = vector.broadcast %cst : f32 to vector<6x6x4xf32>
    %c0 = arith.constant 0 : index
    %c0_0 = arith.constant 0 : index
    %c0_1 = arith.constant 0 : index
    %1 = vector.load %arg7[%c0, %c0_0, %c0_1] : memref<6x6x4xf32, #tpu.memory_space<vmem>>, vector<6x6x4xf32>
    tpu.vector_store %arg7[%c0, %c0_0, %c0_1], %0 {strides = array<i32>} : memref<6x6x4xf32, #tpu.memory_space<vmem>>, vector<6x6x4xf32>,
    %cst_2 = arith.constant 0.000000e+00 : f32
    %2 = vector.broadcast %cst_2 : f32 to vector<6x6x4xf32>
    %c0_3 = arith.constant 0 : index
    %c0_4 = arith.constant 0 : index
    %c0_5 = arith.constant 0 : index
    %3 = vector.load %arg8[%c0_3, %c0_4, %c0_5] : memref<6x6x4xf32, #tpu.memory_space<vmem>>, vector<6x6x4xf32>
    tpu.vector_store %arg8[%c0_3, %c0_4, %c0_5], %2 {strides = array<i32>} : memref<6x6x4xf32, #tpu.memory_space<vmem>>, vector<6x6x4xf32>,
    %c0_6 = arith.constant 0 : index
    %c0_7 = arith.constant 0 : index
    %c0_8 = arith.constant 0 : index
    %c0_9 = arith.constant 0 : index
    %4 = vector.load %arg1[%c0_6, %c0_7, %c0_8, %c0_9] : memref<1x4x4x4xf32, #tpu.memory_space<vmem>>, vector<1x4x4x4xf32>
    %5 = vector.shape_cast %4 : vector<1x4x4x4xf32> to vector<4x4x4xf32>
    %c1 = arith.constant 1 : index
    %c1_10 = arith.constant 1 : index
    %c0_11 = arith.constant 0 : index
    %6 = vector.load %arg7[%c1, %c1_10, %c0_11] : memref<6x6x4xf32, #tpu.memory_space<vmem>>, vector<4x4x4xf32>
    tpu.vector_store %arg7[%c1, %c1_10, %c0_11], %5 {strides = array<i32>} : memref<6x6x4xf32, #tpu.memory_space<vmem>>, vector<4x4x4xf32>,
    %c0_12 = arith.constant 0 : index
    %c0_13 = arith.constant 0 : index
    %c0_14 = arith.constant 0 : index
    %7 = vector.load %arg7[%c0_12, %c0_13, %c0_14] : memref<6x6x4xf32, #tpu.memory_space<vmem>>, vector<4x4x4xf32>
    %c0_15 = arith.constant 0 : index
    %c1_16 = arith.constant 1 : index
    %c0_17 = arith.constant 0 : index
    %8 = vector.load %arg7[%c0_15, %c1_16, %c0_17] : memref<6x6x4xf32, #tpu.memory_space<vmem>>, vector<4x4x4xf32>
    %c0_18 = arith.constant 0 : index
    %c2 = arith.constant 2 : index
    %c0_19 = arith.constant 0 : index
    %9 = vector.load %arg7[%c0_18, %c2, %c0_19] : memref<6x6x4xf32, #tpu.memory_space<vmem>>, vector<4x4x4xf32>
    %c1_20 = arith.constant 1 : index
    %c0_21 = arith.constant 0 : index
    %c0_22 = arith.constant 0 : index
    %10 = vector.load %arg7[%c1_20, %c0_21, %c0_22] : memref<6x6x4xf32, #tpu.memory_space<vmem>>, vector<4x4x4xf32>
    %c1_23 = arith.constant 1 : index
    %c1_24 = arith.constant 1 : index
    %c0_25 = arith.constant 0 : index
    %11 = vector.load %arg7[%c1_23, %c1_24, %c0_25] : memref<6x6x4xf32, #tpu.memory_space<vmem>>, vector<4x4x4xf32>
    %c1_26 = arith.constant 1 : index
    %c2_27 = arith.constant 2 : index
    %c0_28 = arith.constant 0 : index
    %12 = vector.load %arg7[%c1_26, %c2_27, %c0_28] : memref<6x6x4xf32, #tpu.memory_space<vmem>>, vector<4x4x4xf32>
    %c2_29 = arith.constant 2 : index
    %c0_30 = arith.constant 0 : index
    %c0_31 = arith.constant 0 : index
    %13 = vector.load %arg7[%c2_29, %c0_30, %c0_31] : memref<6x6x4xf32, #tpu.memory_space<vmem>>, vector<4x4x4xf32>
    %c2_32 = arith.constant 2 : index
    %c1_33 = arith.constant 1 : index
    %c0_34 = arith.constant 0 : index
    %14 = vector.load %arg7[%c2_32, %c1_33, %c0_34] : memref<6x6x4xf32, #tpu.memory_space<vmem>>, vector<4x4x4xf32>
    %c2_35 = arith.constant 2 : index
    %c2_36 = arith.constant 2 : index
    %c0_37 = arith.constant 0 : index
    %15 = vector.load %arg7[%c2_35, %c2_36, %c0_37] : memref<6x6x4xf32, #tpu.memory_space<vmem>>, vector<4x4x4xf32>
    %16 = tpu.concatenate %7, %8, %9, %10, %11, %12, %13, %14, %15 in 2 : vector<4x4x4xf32>, vector<4x4x4xf32>, vector<4x4x4xf32>, vector<4x4x4xf32>, vector<4x4x4xf32>, vector<4x4x4xf32>, vector<4x4x4xf32>, vector<4x4x4xf32>, vector<4x4x4xf32> -> vector<4x4x36xf32>
    %17 = vector.shape_cast %16 : vector<4x4x36xf32> to vector<16x36xf32>
    %c0_38 = arith.constant 0 : index
    %c0_39 = arith.constant 0 : index
    %18 = vector.load %arg2[%c0_38, %c0_39] : memref<36x4xf32, #tpu.memory_space<vmem>>, vector<36x4xf32>
    %cst_40 = arith.constant dense<0.000000e+00> : vector<16x4xf32>
    %19 = tpu.matmul %17, %18, %cst_40 {dimension_numbers = #tpu.dot_dimension_numbers<[1], [0], [0], [1], [0, 0, 1, 1], [], []>} : vector<16x36xf32>, vector<36x4xf32>, vector<16x4xf32> -> vector<16x4xf32>
    %c0_41 = arith.constant 0 : index
    %c0_42 = arith.constant 0 : index
    %20 = vector.load %arg3[%c0_41, %c0_42] : memref<1x4xf32, #tpu.memory_space<vmem>>, vector<1x4xf32>
    %21 = vector.broadcast %20 : vector<1x4xf32> to vector<16x4xf32>
    %22 = arith.addf %19, %21 : vector<16x4xf32>
    %cst_43 = arith.constant 0.000000e+00 : f32
    %23 = vector.broadcast %cst_43 : f32 to vector<16x4xf32>
    %24 = arith.maximumf %22, %23 : vector<16x4xf32>
    %25 = vector.shape_cast %24 : vector<16x4xf32> to vector<4x4x4xf32>
    %c1_44 = arith.constant 1 : index
    %c1_45 = arith.constant 1 : index
    %c0_46 = arith.constant 0 : index
    %26 = vector.load %arg8[%c1_44, %c1_45, %c0_46] : memref<6x6x4xf32, #tpu.memory_space<vmem>>, vector<4x4x4xf32>
    tpu.vector_store %arg8[%c1_44, %c1_45, %c0_46], %25 {strides = array<i32>} : memref<6x6x4xf32, #tpu.memory_space<vmem>>, vector<4x4x4xf32>,
    %c0_47 = arith.constant 0 : index
    %c0_48 = arith.constant 0 : index
    %c0_49 = arith.constant 0 : index
    %27 = vector.load %arg8[%c0_47, %c0_48, %c0_49] : memref<6x6x4xf32, #tpu.memory_space<vmem>>, vector<4x4x4xf32>
    %c0_50 = arith.constant 0 : index
    %c1_51 = arith.constant 1 : index
    %c0_52 = arith.constant 0 : index
    %28 = vector.load %arg8[%c0_50, %c1_51, %c0_52] : memref<6x6x4xf32, #tpu.memory_space<vmem>>, vector<4x4x4xf32>
    %c0_53 = arith.constant 0 : index
    %c2_54 = arith.constant 2 : index
    %c0_55 = arith.constant 0 : index
    %29 = vector.load %arg8[%c0_53, %c2_54, %c0_55] : memref<6x6x4xf32, #tpu.memory_space<vmem>>, vector<4x4x4xf32>
    %c1_56 = arith.constant 1 : index
    %c0_57 = arith.constant 0 : index
    %c0_58 = arith.constant 0 : index
    %30 = vector.load %arg8[%c1_56, %c0_57, %c0_58] : memref<6x6x4xf32, #tpu.memory_space<vmem>>, vector<4x4x4xf32>
    %c1_59 = arith.constant 1 : index
    %c1_60 = arith.constant 1 : index
    %c0_61 = arith.constant 0 : index
    %31 = vector.load %arg8[%c1_59, %c1_60, %c0_61] : memref<6x6x4xf32, #tpu.memory_space<vmem>>, vector<4x4x4xf32>
    %c1_62 = arith.constant 1 : index
    %c2_63 = arith.constant 2 : index
    %c0_64 = arith.constant 0 : index
    %32 = vector.load %arg8[%c1_62, %c2_63, %c0_64] : memref<6x6x4xf32, #tpu.memory_space<vmem>>, vector<4x4x4xf32>
    %c2_65 = arith.constant 2 : index
    %c0_66 = arith.constant 0 : index
    %c0_67 = arith.constant 0 : index
    %33 = vector.load %arg8[%c2_65, %c0_66, %c0_67] : memref<6x6x4xf32, #tpu.memory_space<vmem>>, vector<4x4x4xf32>
    %c2_68 = arith.constant 2 : index
    %c1_69 = arith.constant 1 : index
    %c0_70 = arith.constant 0 : index
    %34 = vector.load %arg8[%c2_68, %c1_69, %c0_70] : memref<6x6x4xf32, #tpu.memory_space<vmem>>, vector<4x4x4xf32>
    %c2_71 = arith.constant 2 : index
    %c2_72 = arith.constant 2 : index
    %c0_73 = arith.constant 0 : index
    %35 = vector.load %arg8[%c2_71, %c2_72, %c0_73] : memref<6x6x4xf32, #tpu.memory_space<vmem>>, vector<4x4x4xf32>
    %36 = tpu.concatenate %27, %28, %29, %30, %31, %32, %33, %34, %35 in 2 : vector<4x4x4xf32>, vector<4x4x4xf32>, vector<4x4x4xf32>, vector<4x4x4xf32>, vector<4x4x4xf32>, vector<4x4x4xf32>, vector<4x4x4xf32>, vector<4x4x4xf32>, vector<4x4x4xf32> -> vector<4x4x36xf32>
    %37 = vector.shape_cast %36 : vector<4x4x36xf32> to vector<16x36xf32>
    %c0_74 = arith.constant 0 : index
    %c0_75 = arith.constant 0 : index
    %38 = vector.load %arg4[%c0_74, %c0_75] : memref<36x4xf32, #tpu.memory_space<vmem>>, vector<36x4xf32>
    %cst_76 = arith.constant dense<0.000000e+00> : vector<16x4xf32>
    %39 = tpu.matmul %37, %38, %cst_76 {dimension_numbers = #tpu.dot_dimension_numbers<[1], [0], [0], [1], [0, 0, 1, 1], [], []>} : vector<16x36xf32>, vector<36x4xf32>, vector<16x4xf32> -> vector<16x4xf32>
    %c0_77 = arith.constant 0 : index
    %c0_78 = arith.constant 0 : index
    %40 = vector.load %arg5[%c0_77, %c0_78] : memref<1x4xf32, #tpu.memory_space<vmem>>, vector<1x4xf32>
    %41 = vector.broadcast %40 : vector<1x4xf32> to vector<16x4xf32>
    %42 = arith.addf %39, %41 : vector<16x4xf32>
    %c0_79 = arith.constant 0 : index
    %c0_80 = arith.constant 0 : index
    %c0_81 = arith.constant 0 : index
    %c0_82 = arith.constant 0 : index
    %43 = vector.load %arg1[%c0_79, %c0_80, %c0_81, %c0_82] : memref<1x4x4x4xf32, #tpu.memory_space<vmem>>, vector<1x4x4x4xf32>
    %44 = vector.shape_cast %43 : vector<1x4x4x4xf32> to vector<4x4x4xf32>
    %45 = vector.shape_cast %44 : vector<4x4x4xf32> to vector<16x4xf32>
    %46 = arith.addf %42, %45 : vector<16x4xf32>
    %cst_83 = arith.constant 0.000000e+00 : f32
    %47 = vector.broadcast %cst_83 : f32 to vector<16x4xf32>
    %48 = arith.maximumf %46, %47 : vector<16x4xf32>
    %49 = vector.shape_cast %48 : vector<16x4xf32> to vector<4x4x4xf32>
    %c0_84 = arith.constant 0 : index
    %c0_85 = arith.constant 0 : index
    %c0_86 = arith.constant 0 : index
    %c0_87 = arith.constant 0 : index
    %50 = vector.load %arg6[%c0_84, %c0_85, %c0_86, %c0_87] : memref<1x4x4x4xf32, #tpu.memory_space<vmem>>, vector<1x4x4x4xf32>
    %51 = vector.shape_cast %50 : vector<1x4x4x4xf32> to vector<4x4x4xf32>
    %52 = vector.shape_cast %49 : vector<4x4x4xf32> to vector<1x4x4x4xf32>
    tpu.vector_store %arg6[%c0_84, %c0_85, %c0_86, %c0_87], %52 {strides = array<i32>} : memref<1x4x4x4xf32, #tpu.memory_space<vmem>>, vector<1x4x4x4xf32>,
    return
  }
  func.func @transform_0(%arg0: i32) -> (i32, i32, i32, i32) {
    %c0_i32 = arith.constant 0 : i32
    %c0_i32_0 = arith.constant 0 : i32
    %c0_i32_1 = arith.constant 0 : i32
    %c0_i32_2 = arith.constant 0 : i32
    return %arg0, %c0_i32, %c0_i32_0, %c0_i32_1 : i32, i32, i32, i32
  }
  func.func @transform_1(%arg0: i32) -> (i32, i32) {
    %c0_i32 = arith.constant 0 : i32
    %c0_i32_0 = arith.constant 0 : i32
    %c0_i32_1 = arith.constant 0 : i32
    return %c0_i32, %c0_i32_0 : i32, i32
  }
  func.func @transform_2(%arg0: i32) -> (i32, i32) {
    %c0_i32 = arith.constant 0 : i32
    %c0_i32_0 = arith.constant 0 : i32
    %c0_i32_1 = arith.constant 0 : i32
    return %c0_i32, %c0_i32_0 : i32, i32
  }
  func.func @transform_3(%arg0: i32) -> (i32, i32) {
    %c0_i32 = arith.constant 0 : i32
    %c0_i32_0 = arith.constant 0 : i32
    %c0_i32_1 = arith.constant 0 : i32
    return %c0_i32, %c0_i32_0 : i32, i32
  }
  func.func @transform_4(%arg0: i32) -> (i32, i32) {
    %c0_i32 = arith.constant 0 : i32
    %c0_i32_0 = arith.constant 0 : i32
    %c0_i32_1 = arith.constant 0 : i32
    return %c0_i32, %c0_i32_0 : i32, i32
  }
  func.func @transform_5(%arg0: i32) -> (i32, i32, i32, i32) {
    %c0_i32 = arith.constant 0 : i32
    %c0_i32_0 = arith.constant 0 : i32
    %c0_i32_1 = arith.constant 0 : i32
    %c0_i32_2 = arith.constant 0 : i32
    return %arg0, %c0_i32, %c0_i32_0, %c0_i32_1 : i32, i32, i32, i32
  }
}

module attributes {stable_mosaic.version = 11 : i64} {
  func.func @_maxpool2x2_kernel(%arg0: i32, %arg1: memref<1x8x4x8xf32, #tpu.memory_space<vmem>>, %arg2: memref<1x4x4x4xf32, #tpu.memory_space<vmem>>) attributes {dimension_semantics = [#tpu.dimension_semantics<parallel>], iteration_bounds = array<i64: 2>, scalar_prefetch = 0 : i64, scratch_operands = 0 : i64, tpu.core_type = #tpu.core_type<tc>, window_params = [{transform_indices = @transform_0, window_bounds = array<i64: 1, 8, 4, 8>}, {transform_indices = @transform_1, window_bounds = array<i64: 1, 4, 4, 4>}]} {
    %c0 = arith.constant 0 : index
    %c0_0 = arith.constant 0 : index
    %c0_1 = arith.constant 0 : index
    %c0_2 = arith.constant 0 : index
    %0 = vector.load %arg1[%c0, %c0_0, %c0_1, %c0_2] : memref<1x8x4x8xf32, #tpu.memory_space<vmem>>, vector<1x8x4x8xf32>
    %1 = vector.shape_cast %0 : vector<1x8x4x8xf32> to vector<8x4x8xf32>
    %2 = vector.extract_strided_slice %1 {offsets = [0, 0, 0], sizes = [8, 4, 4], strides = [1, 1, 1]} : vector<8x4x8xf32> to vector<8x4x4xf32>
    %3 = vector.extract_strided_slice %1 {offsets = [0, 0, 4], sizes = [8, 4, 4], strides = [1, 1, 1]} : vector<8x4x8xf32> to vector<8x4x4xf32>
    %4 = arith.maximumf %2, %3 : vector<8x4x4xf32>
    %5 = vector.shape_cast %4 : vector<8x4x4xf32> to vector<4x2x4x4xf32>
    %6 = vector.extract_strided_slice %5 {offsets = [0, 0, 0, 0], sizes = [4, 1, 4, 4], strides = [1, 1, 1, 1]} : vector<4x2x4x4xf32> to vector<4x1x4x4xf32>
    %7 = vector.shape_cast %6 : vector<4x1x4x4xf32> to vector<4x4x4xf32>
    %8 = vector.extract_strided_slice %5 {offsets = [0, 1, 0, 0], sizes = [4, 1, 4, 4], strides = [1, 1, 1, 1]} : vector<4x2x4x4xf32> to vector<4x1x4x4xf32>
    %9 = vector.shape_cast %8 : vector<4x1x4x4xf32> to vector<4x4x4xf32>
    %10 = arith.maximumf %7, %9 : vector<4x4x4xf32>
    %c0_3 = arith.constant 0 : index
    %c0_4 = arith.constant 0 : index
    %c0_5 = arith.constant 0 : index
    %c0_6 = arith.constant 0 : index
    %11 = vector.load %arg2[%c0_3, %c0_4, %c0_5, %c0_6] : memref<1x4x4x4xf32, #tpu.memory_space<vmem>>, vector<1x4x4x4xf32>
    %12 = vector.shape_cast %11 : vector<1x4x4x4xf32> to vector<4x4x4xf32>
    %13 = vector.shape_cast %10 : vector<4x4x4xf32> to vector<1x4x4x4xf32>
    tpu.vector_store %arg2[%c0_3, %c0_4, %c0_5, %c0_6], %13 {strides = array<i32>} : memref<1x4x4x4xf32, #tpu.memory_space<vmem>>, vector<1x4x4x4xf32>,
    return
  }
  func.func @transform_0(%arg0: i32) -> (i32, i32, i32, i32) {
    %c0_i32 = arith.constant 0 : i32
    %c0_i32_0 = arith.constant 0 : i32
    %c0_i32_1 = arith.constant 0 : i32
    %c0_i32_2 = arith.constant 0 : i32
    return %arg0, %c0_i32, %c0_i32_0, %c0_i32_1 : i32, i32, i32, i32
  }
  func.func @transform_1(%arg0: i32) -> (i32, i32, i32, i32) {
    %c0_i32 = arith.constant 0 : i32
    %c0_i32_0 = arith.constant 0 : i32
    %c0_i32_1 = arith.constant 0 : i32
    %c0_i32_2 = arith.constant 0 : i32
    return %arg0, %c0_i32, %c0_i32_0, %c0_i32_1 : i32, i32, i32, i32
  }
}

module attributes {stable_mosaic.version = 11 : i64} {
  func.func @_upsample_add_kernel(%arg0: i32, %arg1: memref<1x8x4x8xf32, #tpu.memory_space<vmem>>, %arg2: memref<1x4x4x4xf32, #tpu.memory_space<vmem>>, %arg3: memref<1x8x4x8xf32, #tpu.memory_space<vmem>>) attributes {dimension_semantics = [#tpu.dimension_semantics<parallel>], iteration_bounds = array<i64: 2>, scalar_prefetch = 0 : i64, scratch_operands = 0 : i64, tpu.core_type = #tpu.core_type<tc>, window_params = [{transform_indices = @transform_0, window_bounds = array<i64: 1, 8, 4, 8>}, {transform_indices = @transform_1, window_bounds = array<i64: 1, 4, 4, 4>}, {transform_indices = @transform_2, window_bounds = array<i64: 1, 8, 4, 8>}]} {
    %c0 = arith.constant 0 : index
    %c0_0 = arith.constant 0 : index
    %c0_1 = arith.constant 0 : index
    %c0_2 = arith.constant 0 : index
    %0 = vector.load %arg2[%c0, %c0_0, %c0_1, %c0_2] : memref<1x4x4x4xf32, #tpu.memory_space<vmem>>, vector<1x4x4x4xf32>
    %1 = vector.shape_cast %0 : vector<1x4x4x4xf32> to vector<4x4x4xf32>
    %2 = vector.shape_cast %1 : vector<4x4x4xf32> to vector<4x1x4x4xf32>
    %3 = vector.shape_cast %2 : vector<4x1x4x4xf32> to vector<4x1x4x4xf32>
    %4 = vector.broadcast %3 : vector<4x1x4x4xf32> to vector<4x2x4x4xf32>
    %5 = vector.shape_cast %4 : vector<4x2x4x4xf32> to vector<8x4x4xf32>
    %c0_3 = arith.constant 0 : index
    %c0_4 = arith.constant 0 : index
    %c0_5 = arith.constant 0 : index
    %c0_6 = arith.constant 0 : index
    %6 = vector.load %arg1[%c0_3, %c0_4, %c0_5, %c0_6] : memref<1x8x4x8xf32, #tpu.memory_space<vmem>>, vector<1x8x4x8xf32>
    %7 = vector.shape_cast %6 : vector<1x8x4x8xf32> to vector<8x4x8xf32>
    %8 = vector.extract_strided_slice %7 {offsets = [0, 0, 0], sizes = [8, 4, 4], strides = [1, 1, 1]} : vector<8x4x8xf32> to vector<8x4x4xf32>
    %9 = arith.addf %8, %5 : vector<8x4x4xf32>
    %c0_7 = arith.constant 0 : index
    %c0_8 = arith.constant 0 : index
    %c0_9 = arith.constant 0 : index
    %c0_10 = arith.constant 0 : index
    %10 = vector.load %arg3[%c0_7, %c0_8, %c0_9, %c0_10] : memref<1x8x4x8xf32, #tpu.memory_space<vmem>>, vector<1x8x4x4xf32>
    %11 = vector.shape_cast %10 : vector<1x8x4x4xf32> to vector<8x4x4xf32>
    %12 = vector.shape_cast %9 : vector<8x4x4xf32> to vector<1x8x4x4xf32>
    tpu.vector_store %arg3[%c0_7, %c0_8, %c0_9, %c0_10], %12 {strides = array<i32>} : memref<1x8x4x8xf32, #tpu.memory_space<vmem>>, vector<1x8x4x4xf32>,
    %13 = vector.extract_strided_slice %7 {offsets = [0, 0, 4], sizes = [8, 4, 4], strides = [1, 1, 1]} : vector<8x4x8xf32> to vector<8x4x4xf32>
    %14 = arith.addf %13, %5 : vector<8x4x4xf32>
    %c0_11 = arith.constant 0 : index
    %c0_12 = arith.constant 0 : index
    %c0_13 = arith.constant 0 : index
    %c4 = arith.constant 4 : index
    %15 = vector.load %arg3[%c0_11, %c0_12, %c0_13, %c4] : memref<1x8x4x8xf32, #tpu.memory_space<vmem>>, vector<1x8x4x4xf32>
    %16 = vector.shape_cast %15 : vector<1x8x4x4xf32> to vector<8x4x4xf32>
    %17 = vector.shape_cast %14 : vector<8x4x4xf32> to vector<1x8x4x4xf32>
    tpu.vector_store %arg3[%c0_11, %c0_12, %c0_13, %c4], %17 {strides = array<i32>} : memref<1x8x4x8xf32, #tpu.memory_space<vmem>>, vector<1x8x4x4xf32>,
    return
  }
  func.func @transform_0(%arg0: i32) -> (i32, i32, i32, i32) {
    %c0_i32 = arith.constant 0 : i32
    %c0_i32_0 = arith.constant 0 : i32
    %c0_i32_1 = arith.constant 0 : i32
    %c0_i32_2 = arith.constant 0 : i32
    return %arg0, %c0_i32, %c0_i32_0, %c0_i32_1 : i32, i32, i32, i32
  }
  func.func @transform_1(%arg0: i32) -> (i32, i32, i32, i32) {
    %c0_i32 = arith.constant 0 : i32
    %c0_i32_0 = arith.constant 0 : i32
    %c0_i32_1 = arith.constant 0 : i32
    %c0_i32_2 = arith.constant 0 : i32
    return %arg0, %c0_i32, %c0_i32_0, %c0_i32_1 : i32, i32, i32, i32
  }
  func.func @transform_2(%arg0: i32) -> (i32, i32, i32, i32) {
    %c0_i32 = arith.constant 0 : i32
    %c0_i32_0 = arith.constant 0 : i32
    %c0_i32_1 = arith.constant 0 : i32
    %c0_i32_2 = arith.constant 0 : i32
    return %arg0, %c0_i32, %c0_i32_0, %c0_i32_1 : i32, i32, i32, i32
  }
}

module attributes {stable_mosaic.version = 11 : i64} {
  func.func @_upsample_add_kernel(%arg0: i32, %arg1: memref<1x16x8x8xf32, #tpu.memory_space<vmem>>, %arg2: memref<1x8x8x4xf32, #tpu.memory_space<vmem>>, %arg3: memref<1x16x8x8xf32, #tpu.memory_space<vmem>>) attributes {dimension_semantics = [#tpu.dimension_semantics<parallel>], iteration_bounds = array<i64: 2>, scalar_prefetch = 0 : i64, scratch_operands = 0 : i64, tpu.core_type = #tpu.core_type<tc>, window_params = [{transform_indices = @transform_0, window_bounds = array<i64: 1, 16, 8, 8>}, {transform_indices = @transform_1, window_bounds = array<i64: 1, 8, 8, 4>}, {transform_indices = @transform_2, window_bounds = array<i64: 1, 16, 8, 8>}]} {
    %c0 = arith.constant 0 : index
    %c0_0 = arith.constant 0 : index
    %c0_1 = arith.constant 0 : index
    %c0_2 = arith.constant 0 : index
    %0 = vector.load %arg2[%c0, %c0_0, %c0_1, %c0_2] : memref<1x8x8x4xf32, #tpu.memory_space<vmem>>, vector<1x8x8x4xf32>
    %1 = vector.shape_cast %0 : vector<1x8x8x4xf32> to vector<8x8x4xf32>
    %2 = vector.shape_cast %1 : vector<8x8x4xf32> to vector<8x1x8x4xf32>
    %3 = vector.shape_cast %2 : vector<8x1x8x4xf32> to vector<8x1x8x4xf32>
    %4 = vector.broadcast %3 : vector<8x1x8x4xf32> to vector<8x2x8x4xf32>
    %5 = vector.shape_cast %4 : vector<8x2x8x4xf32> to vector<16x8x4xf32>
    %c0_3 = arith.constant 0 : index
    %c0_4 = arith.constant 0 : index
    %c0_5 = arith.constant 0 : index
    %c0_6 = arith.constant 0 : index
    %6 = vector.load %arg1[%c0_3, %c0_4, %c0_5, %c0_6] : memref<1x16x8x8xf32, #tpu.memory_space<vmem>>, vector<1x16x8x8xf32>
    %7 = vector.shape_cast %6 : vector<1x16x8x8xf32> to vector<16x8x8xf32>
    %8 = vector.extract_strided_slice %7 {offsets = [0, 0, 0], sizes = [16, 8, 4], strides = [1, 1, 1]} : vector<16x8x8xf32> to vector<16x8x4xf32>
    %9 = arith.addf %8, %5 : vector<16x8x4xf32>
    %c0_7 = arith.constant 0 : index
    %c0_8 = arith.constant 0 : index
    %c0_9 = arith.constant 0 : index
    %c0_10 = arith.constant 0 : index
    %10 = vector.load %arg3[%c0_7, %c0_8, %c0_9, %c0_10] : memref<1x16x8x8xf32, #tpu.memory_space<vmem>>, vector<1x16x8x4xf32>
    %11 = vector.shape_cast %10 : vector<1x16x8x4xf32> to vector<16x8x4xf32>
    %12 = vector.shape_cast %9 : vector<16x8x4xf32> to vector<1x16x8x4xf32>
    tpu.vector_store %arg3[%c0_7, %c0_8, %c0_9, %c0_10], %12 {strides = array<i32>} : memref<1x16x8x8xf32, #tpu.memory_space<vmem>>, vector<1x16x8x4xf32>,
    %13 = vector.extract_strided_slice %7 {offsets = [0, 0, 4], sizes = [16, 8, 4], strides = [1, 1, 1]} : vector<16x8x8xf32> to vector<16x8x4xf32>
    %14 = arith.addf %13, %5 : vector<16x8x4xf32>
    %c0_11 = arith.constant 0 : index
    %c0_12 = arith.constant 0 : index
    %c0_13 = arith.constant 0 : index
    %c4 = arith.constant 4 : index
    %15 = vector.load %arg3[%c0_11, %c0_12, %c0_13, %c4] : memref<1x16x8x8xf32, #tpu.memory_space<vmem>>, vector<1x16x8x4xf32>
    %16 = vector.shape_cast %15 : vector<1x16x8x4xf32> to vector<16x8x4xf32>
    %17 = vector.shape_cast %14 : vector<16x8x4xf32> to vector<1x16x8x4xf32>
    tpu.vector_store %arg3[%c0_11, %c0_12, %c0_13, %c4], %17 {strides = array<i32>} : memref<1x16x8x8xf32, #tpu.memory_space<vmem>>, vector<1x16x8x4xf32>,
    return
  }
  func.func @transform_0(%arg0: i32) -> (i32, i32, i32, i32) {
    %c0_i32 = arith.constant 0 : i32
    %c0_i32_0 = arith.constant 0 : i32
    %c0_i32_1 = arith.constant 0 : i32
    %c0_i32_2 = arith.constant 0 : i32
    return %arg0, %c0_i32, %c0_i32_0, %c0_i32_1 : i32, i32, i32, i32
  }
  func.func @transform_1(%arg0: i32) -> (i32, i32, i32, i32) {
    %c0_i32 = arith.constant 0 : i32
    %c0_i32_0 = arith.constant 0 : i32
    %c0_i32_1 = arith.constant 0 : i32
    %c0_i32_2 = arith.constant 0 : i32
    return %arg0, %c0_i32, %c0_i32_0, %c0_i32_1 : i32, i32, i32, i32
  }
  func.func @transform_2(%arg0: i32) -> (i32, i32, i32, i32) {
    %c0_i32 = arith.constant 0 : i32
    %c0_i32_0 = arith.constant 0 : i32
    %c0_i32_1 = arith.constant 0 : i32
    %c0_i32_2 = arith.constant 0 : i32
    return %arg0, %c0_i32, %c0_i32_0, %c0_i32_1 : i32, i32, i32, i32
  }
}

</mosaic_0001>

<bundles_post_ra>
// kernel: hourglass_forward.12
= control target key start
LH: loop header
LB: loop body
LE: loop exit
PB: predicated region body
PF: predicated region fallthrough
CT: control target
= control target key end

     0   :  { %s326_s6 = smov 0   ;;  %s383_s0 = inlined_call_operand.vmem [shape: f32[2,16,8,8], index: 0, kind: input, shape index: {}]   ;;  %s384_s1 = inlined_call_operand.vmem [shape: f32[2,8,8,4], index: 1, kind: output, shape index: {}]  }
   0x1 LB: > { %s285_s7 = sadd.s32 4294967295, %s313_s6   ;;  %p289_p0 = scmp.ge.s32.totalorder %s313_s6, 1  ;;  %s313_s6 = sphi %s326_s6, %s11_s6  }
   0x2   : > { %p87_p1 = scmp.lt.s32.totalorder %s313_s6, 3 }
   0x4   : > { %p88_p2 = pnand %p289_p0, %p87_p1 }
   0x5   : > { %p107_p3 = scmp.lt.s32.totalorder (!%p88_p2), %s285_s7, 1  ;;  %s315_s12 = smov (!%p88_p2), 124   ;;  %vm221_vm0 = vcmask (!%p88_p2), 31744  }
   0x6   : > { %91 = sbr.rel (%p88_p2) target bundleno = 165 (0xa5), region = 24 }
   0xd   : > { %s386_s7 = smov (!%p107_p3, %s285_s7), 1 }
   0xe   : > { %s296_s8 = sshll.u32 %s386_s7, 7  ;;  %s297_s13 = sshll.u32 %s386_s7, 6 }
   0xf   : > { %s340_s11 = scalar_lea.vmem %s383_s0, %s296_s8  ;;  %s362_s16 = scalar_lea.vmem %s384_s1, %s297_s13 }
  0x10   : > { %v119_v0 = vld [vmem:[%s340_s11 + $0x10] sm:$0xff]  ;;  %v117_v1 = vld [vmem:[%s340_s11] sm:$0xff]  ;;  %v120_v2 = vld [vmem:[%s340_s11 + $0x18] sm:$0xff] }
  0x11   : > { %153 = vrot.lane.b32.xlu1 %v119_v0, %s315_s12  ;;  %149 = vrot.lane.b32.xlu0 %v117_v1, %s315_s12  ;;  %v118_v3 = vld [vmem:[%s340_s11 + $0x8] sm:$0xff]  ;;  %v121_v5 = vld [vmem:[%s340_s11 + $0x20] sm:$0xff] }
  0x12   : > { %v122_v4 = vld [vmem:[%s340_s11 + $0x28] sm:$0xff]  ;;  %v124_v6 = vld [vmem:[%s340_s11 + $0x38] sm:$0xff]  ;;  %v123_v7 = vld [vmem:[%s340_s11 + $0x30] sm:$0xff] }
  0x13   : > { %v126_v8 = vld [vmem:[%s340_s11 + $0x48] sm:$0xff]  ;;  %v125_v9 = vld [vmem:[%s340_s11 + $0x40] sm:$0xff]  ;;  %v128_v10 = vld [vmem:[%s340_s11 + $0x58] sm:$0xff] }
  0x14   : > { %v127_v11 = vld [vmem:[%s340_s11 + $0x50] sm:$0xff]  ;;  %v130_v12 = vld [vmem:[%s340_s11 + $0x68] sm:$0xff]  ;;  %v129_v13 = vld [vmem:[%s340_s11 + $0x60] sm:$0xff] }
  0x15   : > { %155 = vrot.lane.b32.xlu1 %v120_v2, %s315_s12  ;;  %151 = vrot.lane.b32.xlu0 %v118_v3, %s315_s12  ;;  %v132_v14 = vld [vmem:[%s340_s11 + $0x78] sm:$0xff]  ;;  %v131_v15 = vld [vmem:[%s340_s11 + $0x70] sm:$0xff] }
  0x19   : > { %159 = vrot.lane.b32.xlu1 %v122_v4, %s315_s12  ;;  %157 = vrot.lane.b32.xlu0 %v121_v5, %s315_s12 }
  0x1d   : > { %163 = vrot.lane.b32.xlu1 %v124_v6, %s315_s12  ;;  %161 = vrot.lane.b32.xlu0 %v123_v7, %s315_s12 }
  0x21   : > { %167 = vrot.lane.b32.xlu1 %v126_v8, %s315_s12  ;;  %165 = vrot.lane.b32.xlu0 %v125_v9, %s315_s12 }
  0x25   : > { %171 = vrot.lane.b32.xlu1 %v128_v10, %s315_s12  ;;  %169 = vrot.lane.b32.xlu0 %v127_v11, %s315_s12 }
  0x29   : > { %175 = vrot.lane.b32.xlu1 %v130_v12, %s315_s12  ;;  %173 = vrot.lane.b32.xlu0 %v129_v13, %s315_s12 }
  0x2d   : > { %179 = vrot.lane.b32.xlu1 %v132_v14, %s315_s12  ;;  %177 = vrot.lane.b32.xlu0 %v131_v15, %s315_s12 }
  0x83   : > { %v154_v16 = vpop.permute.xlu1 %153  ;;  %v150_v17 = vpop.permute.xlu0 %149 }
  0x84   : > { %v199_v20 = vmax.f32 %v119_v0, %v154_v16  ;;  %v197_v21 = vmax.f32 %v117_v1, %v150_v17 }
  0x87   : > { %v156_v18 = vpop.permute.xlu1 %155  ;;  %v152_v19 = vpop.permute.xlu0 %151 }
  0x88   : > { %v200_v22 = vmax.f32 %v120_v2, %v156_v18  ;;  %v198_v23 = vmax.f32 %v118_v3, %v152_v19 }
  0x8a   : > { %v214_v24 = vmax.f32 %v199_v20, %v200_v22  ;;  %v213_v25 = vmax.f32 %v197_v21, %v198_v23 }
  0x8b   : > { %v160_v26 = vpop.permute.xlu1 %159  ;;  %v158_v27 = vpop.permute.xlu0 %157 }
  0x8c   : > { %223 = vst.msk [vmem:[%s362_s16 + $0x8] sm:$0xff] %vm221_vm0, %v214_v24  ;;  %222 = vst.msk [vmem:[%s362_s16] sm:$0xff] %vm221_vm0, %v213_v25  ;;  %v202_v28 = vmax.f32 %v122_v4, %v160_v26  ;;  %v201_v29 = vmax.f32 %v121_v5, %v158_v27 }
  0x8e   : > { %v215_v30 = vmax.f32 %v201_v29, %v202_v28 }
  0x8f   : > { %v164_v31 = vpop.permute.xlu1 %163  ;;  %v162_v32 = vpop.permute.xlu0 %161 }
  0x90   : > { %224 = vst.msk [vmem:[%s362_s16 + $0x10] sm:$0xff] %vm221_vm0, %v215_v30  ;;  %v204_v33 = vmax.f32 %v124_v6, %v164_v31  ;;  %v203_v34 = vmax.f32 %v123_v7, %v162_v32 }
  0x92   : > { %v216_v35 = vmax.f32 %v203_v34, %v204_v33 }
  0x93   : > { %v168_v36 = vpop.permute.xlu1 %167  ;;  %v166_v37 = vpop.permute.xlu0 %165 }
  0x94   : > { %225 = vst.msk [vmem:[%s362_s16 + $0x18] sm:$0xff] %vm221_vm0, %v216_v35  ;;  %v206_v38 = vmax.f32 %v126_v8, %v168_v36  ;;  %v205_v39 = vmax.f32 %v125_v9, %v166_v37 }
  0x96   : > { %v217_v40 = vmax.f32 %v205_v39, %v206_v38 }
  0x97   : > { %v172_v41 = vpop.permute.xlu1 %171  ;;  %v170_v42 = vpop.permute.xlu0 %169 }
  0x98   : > { %226 = vst.msk [vmem:[%s362_s16 + $0x20] sm:$0xff] %vm221_vm0, %v217_v40  ;;  %v208_v43 = vmax.f32 %v128_v10, %v172_v41  ;;  %v207_v44 = vmax.f32 %v127_v11, %v170_v42 }
  0x9a   : > { %v218_v45 = vmax.f32 %v207_v44, %v208_v43 }
  0x9b   : > { %v176_v46 = vpop.permute.xlu1 %175  ;;  %v174_v47 = vpop.permute.xlu0 %173 }
  0x9c   : > { %227 = vst.msk [vmem:[%s362_s16 + $0x28] sm:$0xff] %vm221_vm0, %v218_v45  ;;  %v210_v48 = vmax.f32 %v130_v12, %v176_v46  ;;  %v209_v49 = vmax.f32 %v129_v13, %v174_v47 }
  0x9e   : > { %v219_v50 = vmax.f32 %v209_v49, %v210_v48 }
  0x9f   : > { %v180_v51 = vpop.permute.xlu1 %179  ;;  %v178_v52 = vpop.permute.xlu0 %177 }
  0xa0   : > { %228 = vst.msk [vmem:[%s362_s16 + $0x30] sm:$0xff] %vm221_vm0, %v219_v50  ;;  %v212_v53 = vmax.f32 %v132_v14, %v180_v51  ;;  %v211_v54 = vmax.f32 %v131_v15, %v178_v52 }
  0xa2   : > { %v220_v55 = vmax.f32 %v211_v54, %v212_v53 }
  0xa4   : > { %229 = vst.msk [vmem:[%s362_s16 + $0x38] sm:$0xff] %vm221_vm0, %v220_v55 }
  0xa5 PF: > { %s11_s6 = sadd.s32 1, %s313_s6  }
  0xa6   : > { %p8_p4 = scmp.ge.s32.totalorder %s11_s6, 4  }
  0xa8   :  { %10 = sbr.rel (!%p8_p4) target bundleno = 1 (0x1), region = 54 }

// kernel: hourglass_forward.13
= control target key start
LH: loop header
LB: loop body
LE: loop exit
PB: predicated region body
PF: predicated region fallthrough
CT: control target
= control target key end

     0   :  { %s1654_s18 = smov 0   ;;  %s2173_s0 = inlined_call_operand.vmem [shape: f32[2,8,8,4], index: 0, kind: input, shape index: {}]   ;;  %s2174_s1 = inlined_call_operand.vmem [shape: f32[36,4], index: 1, kind: input, shape index: {}]   ;;  %s2175_s2 = inlined_call_operand.vmem [shape: f32[1,4], index: 2, kind: input, shape index: {}]   ;;  %s2176_s3 = inlined_call_operand.vmem [shape: f32[36,4], index: 3, kind: input, shape index: {}]   ;;  %s2177_s4 = inlined_call_operand.vmem [shape: f32[1,4], index: 4, kind: input, shape index: {}]   ;;  %s2178_s5 = inlined_call_operand.vmem [shape: f32[2,8,8,4], index: 5, kind: output, shape index: {}]  }
   0x1 LB: > { %s1471_s19 = sadd.s32 4294967295, %s1613_s18   ;;  %p1475_p0 = scmp.ge.s32.totalorder %s1613_s18, 1  ;;  %s1613_s18 = sphi %s1654_s18, %s15_s18  }
   0x2   : > { %p187_p1 = scmp.lt.s32.totalorder %s1613_s18, 3 }
   0x4   : > { %p188_p2 = pnand %p1475_p0, %p187_p1 }
   0x5   : > { %vm225_vm0 = vcmask (!%p188_p2), 31744   ;;  %vm227_vm1 = vcmask (!%p188_p2), 25600   ;;  %v1615_v0 = vmov (!%p188_p2), 0.0   ;;  %p215_p3 = scmp.lt.s32.totalorder (!%p188_p2), %s1471_s19, 1  ;;  %s1616_s24 = smov (!%p188_p2), 4   ;;  %v684_v18 = vld [vmem:[%s2174_s1] sm:$0xff] (!%p188_p2) }
   0x6   : > { %191 = sbr.rel (%p188_p2) target bundleno = 888 (0x378), region = 40  ;;  %226 = vst.msk [vmem:[#allocation2] sm:$0xff] (!%p188_p2), %vm225_vm0, %v1615_v0  ;;  %229 = vst.msk [vmem:[#allocation2 + $0x10] sm:$0xff] (!%p188_p2), %vm225_vm0, %v1615_v0  ;;  %s1617_s25 = smov (!%p188_p2), 8   ;;  %v685_v19 = vld [vmem:[%s2174_s1 + $0x8] sm:$0xff] (!%p188_p2)  ;;  %v686_v23 = vld [vmem:[%s2174_s1 + $0x10] sm:$0xff] (!%p188_p2) }
   0x7   : > { %228 = vst.msk [vmem:[#allocation2 + $0x8] sm:$0x3] (!%p188_p2), %vm227_vm1, %v1615_v0  ;;  %230 = vst.msk [vmem:[#allocation2 + $0x18] sm:$0x3] (!%p188_p2), %vm227_vm1, %v1615_v0  ;;  %s1618_s26 = smov (!%p188_p2), 12   ;;  %s1619_s27 = smov (!%p188_p2), 16   ;;  %v1574_v20 = vpack.c.bf16 (!%p188_p2), %v685_v19, %v684_v18 }
   0x8   : > { %231 = vst.msk [vmem:[#allocation2 + $0x20] sm:$0xff] (!%p188_p2), %vm225_vm0, %v1615_v0  ;;  %233 = vst.msk [vmem:[#allocation2 + $0x30] sm:$0xff] (!%p188_p2), %vm225_vm0, %v1615_v0  ;;  %s1620_s28 = smov (!%p188_p2), 20   ;;  %s1621_s8 = smov (!%p188_p2), 24   ;;  %v687_v24 = vld [vmem:[%s2174_s1 + $0x18] sm:$0xff] (!%p188_p2)  ;;  %vm721_vm2 = vcmask (!%p188_p2), 1043456  }
   0x9   : > { %232 = vst.msk [vmem:[#allocation2 + $0x28] sm:$0x3] (!%p188_p2), %vm227_vm1, %v1615_v0  ;;  %234 = vst.msk [vmem:[#allocation2 + $0x38] sm:$0x3] (!%p188_p2), %vm227_vm1, %v1615_v0  ;;  %1575 = vmatprep.subr.bf16.mxu0 (!%p188_p2), %v1574_v20  ;;  %v1578_v25 = vpack.c.bf16 (!%p188_p2), %v687_v24, %v686_v23  ;;  %v688_v26 = vld [vmem:[%s2174_s1 + $0x20] sm:$0xf] (!%p188_p2) }
   0xa   : > { %235 = vst.msk [vmem:[#allocation2 + $0x40] sm:$0xff] (!%p188_p2), %vm225_vm0, %v1615_v0  ;;  %237 = vst.msk [vmem:[#allocation2 + $0x50] sm:$0xff] (!%p188_p2), %vm225_vm0, %v1615_v0  ;;  %1577 = vmatpush3.bf16.msra.mxu0 (!%p188_p2), %v1574_v20  ;;  %s1622_s15 = smov (!%p188_p2), 28   ;;  %s1623_s16 = smov (!%p188_p2), 32   ;;  %vm621_vm3 = vcmask (!%p188_p2), 64512   ;;  %vm630_vm4 = vcmask (!%p188_p2), 97280  }
   0xb   : > { %236 = vst.msk [vmem:[#allocation2 + $0x48] sm:$0x3] (!%p188_p2), %vm227_vm1, %v1615_v0  ;;  %238 = vst.msk [vmem:[#allocation2 + $0x58] sm:$0x3] (!%p188_p2), %vm227_vm1, %v1615_v0  ;;  %1579 = vmatprep.subr.bf16.mxu0 (!%p188_p2), %v1578_v25  ;;  %vm639_vm5 = vcmask (!%p188_p2), 130048   ;;  %vm648_vm6 = vcmask (!%p188_p2), 162816  }
   0xc   : > { %239 = vst.msk [vmem:[#allocation2 + $0x60] sm:$0xff] (!%p188_p2), %vm225_vm0, %v1615_v0  ;;  %241 = vst.msk [vmem:[#allocation2 + $0x70] sm:$0xff] (!%p188_p2), %vm225_vm0, %v1615_v0  ;;  %vm657_vm7 = vcmask (!%p188_p2), 195584   ;;  %vm666_vm8 = vcmask (!%p188_p2), 228352   ;;  %vm675_vm9 = vcmask (!%p188_p2), 261120   ;;  %vm696_vm10 = vcmask (!%p188_p2), 293888  }
   0xd   : > { %240 = vst.msk [vmem:[#allocation2 + $0x68] sm:$0x3] %vm227_vm1, %v1615_v0  ;;  %242 = vst.msk [vmem:[#allocation2 + $0x78] sm:$0x3] %vm227_vm1, %v1615_v0  ;;  %s2180_s19 = smov (!%p215_p3, %s1471_s19), 1  ;;  %v284_v61 = vld [vmem:[#allocation2] sm:$0xff] }
   0xe   : > { %243 = vst.msk [vmem:[#allocation2 + $0x80] sm:$0xff] %vm225_vm0, %v1615_v0  ;;  %245 = vst.msk [vmem:[#allocation2 + $0x90] sm:$0xff] %vm225_vm0, %v1615_v0  ;;  %s1502_s20 = sshll.u32 %s2180_s19, 6  ;;  %v292_v4 = vld [vmem:[#allocation2 + $0x1] sm:$0xff]  ;;  %1581 = vmatpush3.bf16.msra.mxu0 %v1578_v25 }
   0xf   : > { %244 = vst.msk [vmem:[#allocation2 + $0x88] sm:$0x3] %vm227_vm1, %v1615_v0  ;;  %246 = vst.msk [vmem:[#allocation2 + $0x98] sm:$0x3] %vm227_vm1, %v1615_v0  ;;  %s1714_s23 = scalar_lea.vmem %s2173_s0, %s1502_s20  ;;  %v300_v5 = vld [vmem:[#allocation2 + $0x2] sm:$0xff]  ;;  %365 = vrot.lane.b32.xlu0 %v292_v4, %s1616_s24  ;;  %1538 = vmatprep.subr.msk.mxu0 %vm721_vm2, %v688_v26 }
  0x10   : > { %247 = vst.msk [vmem:[#allocation3] sm:$0xff] %vm225_vm0, %v1615_v0  ;;  %249 = vst.msk [vmem:[#allocation3 + $0x10] sm:$0xff] %vm225_vm0, %v1615_v0  ;;  %v267_v1 = vld [vmem:[%s1714_s23] sm:$0xff]  ;;  %v268_v2 = vld [vmem:[%s1714_s23 + $0x8] sm:$0xff]  ;;  %397 = vrot.lane.b32.xlu1 %v300_v5, %s1617_s25 }
  0x11   : > { %248 = vst.msk [vmem:[#allocation3 + $0x8] sm:$0x3] %vm227_vm1, %v1615_v0  ;;  %250 = vst.msk [vmem:[#allocation3 + $0x18] sm:$0x3] %vm227_vm1, %v1615_v0  ;;  %v269_v3 = vld [vmem:[%s1714_s23 + $0x10] sm:$0xff]  ;;  %v270_v6 = vld [vmem:[%s1714_s23 + $0x18] sm:$0xff] }
  0x12   : > { %251 = vst.msk [vmem:[#allocation3 + $0x20] sm:$0xff] %vm225_vm0, %v1615_v0  ;;  %253 = vst.msk [vmem:[#allocation3 + $0x30] sm:$0xff] %vm225_vm0, %v1615_v0  ;;  %v271_v7 = vld [vmem:[%s1714_s23 + $0x20] sm:$0xff]  ;;  %v272_v8 = vld [vmem:[%s1714_s23 + $0x28] sm:$0xff]  ;;  %1539 = vmatpush3.msk.msra.mxu0 %vm721_vm2, %v688_v26 }
  0x13   : > { %252 = vst.msk [vmem:[#allocation3 + $0x28] sm:$0x3] %vm227_vm1, %v1615_v0  ;;  %254 = vst.msk [vmem:[#allocation3 + $0x38] sm:$0x3] %vm227_vm1, %v1615_v0  ;;  %v273_v9 = vld [vmem:[%s1714_s23 + $0x30] sm:$0xff]  ;;  %v274_v10 = vld [vmem:[%s1714_s23 + $0x38] sm:$0xff] }
  0x14   : > { %255 = vst.msk [vmem:[#allocation3 + $0x40] sm:$0xff] %vm225_vm0, %v1615_v0  ;;  %257 = vst.msk [vmem:[#allocation3 + $0x50] sm:$0xff] %vm225_vm0, %v1615_v0 }
  0x15   : > { %256 = vst.msk [vmem:[#allocation3 + $0x48] sm:$0x3] %vm227_vm1, %v1615_v0  ;;  %258 = vst.msk [vmem:[#allocation3 + $0x58] sm:$0x3] %vm227_vm1, %v1615_v0  ;;  %v340_v44 = vld [vmem:[#allocation2 + $0x90] sm:$0xff] }
  0x16   : > { %259 = vst.msk [vmem:[#allocation3 + $0x60] sm:$0xff] %vm225_vm0, %v1615_v0  ;;  %261 = vst.msk [vmem:[#allocation3 + $0x70] sm:$0xff] %vm225_vm0, %v1615_v0  ;;  %v348_v45 = vld [vmem:[#allocation2 + $0x91] sm:$0xff] }
  0x17   : > { %260 = vst.msk [vmem:[#allocation3 + $0x68] sm:$0x3] %vm227_vm1, %v1615_v0  ;;  %262 = vst.msk [vmem:[#allocation3 + $0x78] sm:$0x3] %vm227_vm1, %v1615_v0  ;;  %v356_v48 = vld [vmem:[#allocation2 + $0x92] sm:$0xff] }
  0x18   : > { %263 = vst.msk [vmem:[#allocation3 + $0x80] sm:$0xff] %vm225_vm0, %v1615_v0  ;;  %265 = vst.msk [vmem:[#allocation3 + $0x90] sm:$0xff] %vm225_vm0, %v1615_v0 }
  0x19   : > { %264 = vst.msk [vmem:[#allocation3 + $0x88] sm:$0x3] %vm227_vm1, %v1615_v0  ;;  %266 = vst.msk [vmem:[#allocation3 + $0x98] sm:$0x3] %vm227_vm1, %v1615_v0 }
  0x1a   : > { %276 = vst.msk [vmem:[#allocation2 + $0x11] sm:$0xff] %vm225_vm0, %v267_v1  ;;  %277 = vst.msk [vmem:[#allocation2 + $0x21] sm:$0xff] %vm225_vm0, %v268_v2 }
  0x1b   : > { %278 = vst.msk [vmem:[#allocation2 + $0x31] sm:$0xff] %vm225_vm0, %v269_v3  ;;  %279 = vst.msk [vmem:[#allocation2 + $0x41] sm:$0xff] %vm225_vm0, %v270_v6 }
  0x1c   : > { %280 = vst.msk [vmem:[#allocation2 + $0x51] sm:$0xff] %vm225_vm0, %v271_v7  ;;  %281 = vst.msk [vmem:[#allocation2 + $0x61] sm:$0xff] %vm225_vm0, %v272_v8 }
  0x1d   : > { %282 = vst.msk [vmem:[#allocation2 + $0x71] sm:$0xff] %vm225_vm0, %v273_v9  ;;  %283 = vst.msk [vmem:[#allocation2 + $0x81] sm:$0xff] %vm225_vm0, %v274_v10 }
  0x21   : > { %v301_v11 = vld [vmem:[#allocation2 + $0x12] sm:$0xff]  ;;  %v1736_v13 = vld [vmem:[#allocation2 + $0x20] sm:$0xff] }
  0x22   : > { %v293_v12 = vld [vmem:[#allocation2 + $0x11] sm:$0xff]  ;;  %399 = vrot.lane.b32.xlu1 %v301_v11, %s1617_s25  ;;  %v294_v15 = vld [vmem:[#allocation2 + $0x21] sm:$0xff] }
  0x23   : > { %367 = vrot.lane.b32.xlu0 %v293_v12, %s1616_s24  ;;  %v1738_v14 = vld [vmem:[#allocation2 + $0x10] sm:$0xff]  ;;  %v302_v16 = vld [vmem:[#allocation2 + $0x22] sm:$0xff] }
  0x24   : > { %v295_v17 = vld [vmem:[#allocation2 + $0x31] sm:$0xff]  ;;  %v1776_v27 = vld [vmem:[#allocation2 + $0x40] sm:$0xff] }
  0x25   : > { %v1759_v21 = vld [vmem:[#allocation2 + $0x30] sm:$0xff]  ;;  %v319_v28 = vld [vmem:[#allocation2 + $0x41] sm:$0xff] }
  0x26   : > { %431 = vrot.lane.b32.xlu1 %v1736_v13, %s1618_s26  ;;  %v303_v22 = vld [vmem:[#allocation2 + $0x32] sm:$0xff]  ;;  %v304_v29 = vld [vmem:[#allocation2 + $0x42] sm:$0xff] }
  0x27   : > { %429 = vrot.lane.b32.xlu0 %v1738_v14, %s1618_s26  ;;  %v297_v30 = vld [vmem:[#allocation2 + $0x51] sm:$0xff]  ;;  %v1802_v33 = vld [vmem:[#allocation2 + $0x60] sm:$0xff] }
  0x28   : > { %v1794_v31 = vld [vmem:[#allocation2 + $0x50] sm:$0xff]  ;;  %v321_v34 = vld [vmem:[#allocation2 + $0x61] sm:$0xff] }
  0x29   : > { %v305_v32 = vld [vmem:[#allocation2 + $0x52] sm:$0xff]  ;;  %v306_v35 = vld [vmem:[#allocation2 + $0x62] sm:$0xff] }
  0x2a   : > { %369 = vrot.lane.b32.xlu1 %v294_v15, %s1616_s24  ;;  %v299_v36 = vld [vmem:[#allocation2 + $0x71] sm:$0xff]  ;;  %v315_v39 = vld [vmem:[#allocation2 + $0x80] sm:$0xff] }
  0x2b   : > { %461 = vrot.lane.b32.xlu0 %v293_v12, %s1619_s27  ;;  %v1818_v37 = vld [vmem:[#allocation2 + $0x70] sm:$0xff]  ;;  %v323_v40 = vld [vmem:[#allocation2 + $0x81] sm:$0xff] }
  0x2c   : > { %v307_v38 = vld [vmem:[#allocation2 + $0x72] sm:$0xff]  ;;  %v331_v41 = vld [vmem:[#allocation2 + $0x82] sm:$0xff] }
  0x2e   : > { %493 = vrot.lane.b32.xlu1 %v301_v11, %s1620_s28 }
  0x2f   : > { %463 = vrot.lane.b32.xlu0 %v294_v15, %s1619_s27 }
  0x32   : > { %401 = vrot.lane.b32.xlu1 %v302_v16, %s1617_s25 }
  0x33   : > { %371 = vrot.lane.b32.xlu0 %v295_v17, %s1616_s24 }
  0x36   : > { %525 = vrot.lane.b32.xlu1 %v1736_v13, %s1621_s8 }
  0x37   : > { %495 = vrot.lane.b32.xlu0 %v302_v16, %s1620_s28 }
  0x3a   : > { %433 = vrot.lane.b32.xlu1 %v1759_v21, %s1618_s26 }
  0x3b   : > { %403 = vrot.lane.b32.xlu0 %v303_v22, %s1617_s25 }
  0x3e   : > { %557 = vrot.lane.b32.xlu1 %v294_v15, %s1622_s15 }
  0x3f   : > { %527 = vrot.lane.b32.xlu0 %v1759_v21, %s1621_s8 }
  0x42   : > { %465 = vrot.lane.b32.xlu1 %v295_v17, %s1619_s27 }
  0x43   : > { %435 = vrot.lane.b32.xlu0 %v1776_v27, %s1618_s26 }
  0x46   : > { %589 = vrot.lane.b32.xlu1 %v302_v16, %s1623_s16 }
  0x47   : > { %559 = vrot.lane.b32.xlu0 %v295_v17, %s1622_s15 }
  0x4a   : > { %467 = vrot.lane.b32.xlu1 %v319_v28, %s1619_s27 }
  0x4b   : > { %373 = vrot.lane.b32.xlu0 %v319_v28, %s1616_s24 }
  0x4e   : > { %591 = vrot.lane.b32.xlu1 %v303_v22, %s1623_s16 }
  0x4f   : > { %497 = vrot.lane.b32.xlu0 %v303_v22, %s1620_s28 }
  0x52   : > { %405 = vrot.lane.b32.xlu1 %v304_v29, %s1617_s25 }
  0x53   : > { %375 = vrot.lane.b32.xlu0 %v297_v30, %s1616_s24 }
  0x56   : > { %529 = vrot.lane.b32.xlu1 %v1776_v27, %s1621_s8 }
  0x57   : > { %499 = vrot.lane.b32.xlu0 %v304_v29, %s1620_s28 }
  0x5a   : > { %437 = vrot.lane.b32.xlu1 %v1794_v31, %s1618_s26 }
  0x5b   : > { %407 = vrot.lane.b32.xlu0 %v305_v32, %s1617_s25 }
  0x5e   : > { %561 = vrot.lane.b32.xlu1 %v319_v28, %s1622_s15 }
  0x5f   : > { %531 = vrot.lane.b32.xlu0 %v1794_v31, %s1621_s8 }
  0x62   : > { %469 = vrot.lane.b32.xlu1 %v297_v30, %s1619_s27 }
  0x63   : > { %439 = vrot.lane.b32.xlu0 %v1802_v33, %s1618_s26 }
  0x66   : > { %593 = vrot.lane.b32.xlu1 %v304_v29, %s1623_s16 }
  0x67   : > { %563 = vrot.lane.b32.xlu0 %v297_v30, %s1622_s15 }
  0x6a   : > { %471 = vrot.lane.b32.xlu1 %v321_v34, %s1619_s27 }
  0x6b   : > { %377 = vrot.lane.b32.xlu0 %v321_v34, %s1616_s24 }
  0x6e   : > { %595 = vrot.lane.b32.xlu1 %v305_v32, %s1623_s16 }
  0x6f   : > { %501 = vrot.lane.b32.xlu0 %v305_v32, %s1620_s28 }
  0x72   : > { %409 = vrot.lane.b32.xlu1 %v306_v35, %s1617_s25 }
  0x73   : > { %379 = vrot.lane.b32.xlu0 %v299_v36, %s1616_s24 }
  0x76   : > { %533 = vrot.lane.b32.xlu1 %v1802_v33, %s1621_s8 }
  0x77   : > { %503 = vrot.lane.b32.xlu0 %v306_v35, %s1620_s28 }
  0x7a   : > { %441 = vrot.lane.b32.xlu1 %v1818_v37, %s1618_s26 }
  0x7b   : > { %411 = vrot.lane.b32.xlu0 %v307_v38, %s1617_s25 }
  0x7e   : > { %565 = vrot.lane.b32.xlu1 %v321_v34, %s1622_s15 }
  0x7f   : > { %535 = vrot.lane.b32.xlu0 %v1818_v37, %s1621_s8 }
  0x81   : > { %v366_v42 = vpop.permute.xlu0 %365 }
  0x82   : > { %473 = vrot.lane.b32.xlu1 %v299_v36, %s1619_s27  ;;  %v398_v43 = vpop.permute.xlu1 %397  ;;  %v613_v62 = vsel %vm225_vm0, %v284_v61, %v366_v42 }
  0x83   : > { %443 = vrot.lane.b32.xlu0 %v315_v39, %s1618_s26  ;;  %v622_v1 = vsel %vm621_vm3, %v613_v62, %v398_v43 }
  0x86   : > { %597 = vrot.lane.b32.xlu1 %v306_v35, %s1623_s16 }
  0x87   : > { %567 = vrot.lane.b32.xlu0 %v299_v36, %s1622_s15 }
  0x8a   : > { %505 = vrot.lane.b32.xlu1 %v307_v38, %s1620_s28 }
  0x8b   : > { %475 = vrot.lane.b32.xlu0 %v323_v40, %s1619_s27 }
  0x8e   : > { %507 = vrot.lane.b32.xlu1 %v331_v41, %s1620_s28 }
  0x8f   : > { %599 = vrot.lane.b32.xlu0 %v307_v38, %s1623_s16 }
  0x92   : > { %539 = vrot.lane.b32.xlu1 %v340_v44, %s1621_s8 }
  0x93   : > { %537 = vrot.lane.b32.xlu0 %v315_v39, %s1621_s8 }
  0x94   : > { %v400_v46 = vpop.permute.xlu1 %399 }
  0x95   : > { %v368_v47 = vpop.permute.xlu0 %367 }
  0x96   : > { %571 = vrot.lane.b32.xlu1 %v348_v45, %s1622_s15  ;;  %v614_v8 = vsel %vm225_vm0, %v1738_v14, %v368_v47 }
  0x97   : > { %569 = vrot.lane.b32.xlu0 %v323_v40, %s1622_s15  ;;  %v623_v15 = vsel %vm621_vm3, %v614_v8, %v400_v46 }
  0x98   : > { %v432_v49 = vpop.permute.xlu1 %431 }
  0x99   : > { %v430_v50 = vpop.permute.xlu0 %429  ;;  %v632_v16 = vsel %vm630_vm4, %v623_v15, %v432_v49 }
  0x9a   : > { %603 = vrot.lane.b32.xlu1 %v356_v48, %s1623_s16  ;;  %v631_v2 = vsel %vm630_vm4, %v622_v1, %v430_v50 }
  0x9b   : > { %601 = vrot.lane.b32.xlu0 %v331_v41, %s1623_s16 }
  0x9c   : > { %v370_v51 = vpop.permute.xlu1 %369 }
  0x9d   : > { %v462_v52 = vpop.permute.xlu0 %461  ;;  %v615_v38 = vsel %vm225_vm0, %v1736_v13, %v370_v51 }
  0x9e   : > { %v640_v5 = vsel %vm639_vm5, %v631_v2, %v462_v52 }
  0xa0   : > { %v494_v53 = vpop.permute.xlu1 %493 }
  0xa1   : > { %v464_v54 = vpop.permute.xlu0 %463  ;;  %v649_v6 = vsel %vm648_vm6, %v640_v5, %v494_v53 }
  0xa2   : > { %v641_v19 = vsel %vm639_vm5, %v632_v16, %v464_v54 }
  0xa4   : > { %v402_v55 = vpop.permute.xlu1 %401 }
  0xa5   : > { %v1840_v56 = vpop.permute.xlu0 %371  ;;  %v624_v39 = vsel %vm621_vm3, %v615_v38, %v402_v55 }
  0xa6   : > { %v616_v13 = vsel %vm225_vm0, %v1759_v21, %v1840_v56 }
  0xa8   : > { %v526_v57 = vpop.permute.xlu1 %525 }
  0xa9   : > { %v496_v58 = vpop.permute.xlu0 %495  ;;  %v658_v7 = vsel %vm657_vm7, %v649_v6, %v526_v57 }
  0xaa   : > { %v650_v20 = vsel %vm648_vm6, %v641_v19, %v496_v58 }
  0xac   : > { %v434_v59 = vpop.permute.xlu1 %433 }
  0xad   : > { %v404_v60 = vpop.permute.xlu0 %403  ;;  %v633_v40 = vsel %vm630_vm4, %v624_v39, %v434_v59 }
  0xae   : > { %v625_v50 = vsel %vm621_vm3, %v616_v13, %v404_v60 }
  0xb0   : > { %v558_v63 = vpop.permute.xlu1 %557 }
  0xb1   : > { %v528_v0 = vpop.permute.xlu0 %527  ;;  %v667_v9 = vsel %vm666_vm8, %v658_v7, %v558_v63 }
  0xb2   : > { %v659_v14 = vsel %vm657_vm7, %v650_v20, %v528_v0 }
  0xb4   : > { %v466_v3 = vpop.permute.xlu1 %465 }
  0xb5   : > { %v436_v4 = vpop.permute.xlu0 %435  ;;  %v642_v43 = vsel %vm639_vm5, %v633_v40, %v466_v3 }
  0xb6   : > { %v634_v51 = vsel %vm630_vm4, %v625_v50, %v436_v4 }
  0xb8   : > { %v590_v10 = vpop.permute.xlu1 %589 }
  0xb9   : > { %v560_v11 = vpop.permute.xlu0 %559  ;;  %v676_v12 = vsel %vm675_vm9, %v667_v9, %v590_v10 }
  0xba   : > { %1540 = vmatprep.mubr.msk.f32.mxu0 %vm696_vm10, %v676_v12  ;;  %v668_v22 = vsel %vm666_vm8, %v659_v14, %v560_v11 }
  0xbc   : > { %v468_v17 = vpop.permute.xlu1 %467 }
  0xbd   : > { %v374_v18 = vpop.permute.xlu0 %373  ;;  %v643_v54 = vsel %vm639_vm5, %v634_v51, %v468_v17  ;;  %v903_v51 = vld [vmem:[#allocation3 + $0x90] sm:$0xff] }
  0xbe   : > { %v617_v4 = vsel %vm225_vm0, %v1776_v27, %v374_v18  ;;  %1102 = vrot.lane.b32.xlu1 %v903_v51, %s1621_s8 }
  0xc0   : > { %v592_v23 = vpop.permute.xlu1 %591 }
  0xc1   : > { %v498_v24 = vpop.permute.xlu0 %497  ;;  %v677_v25 = vsel %vm675_vm9, %v668_v22, %v592_v23 }
  0xc2   : > { %1541 = vmatmul.mubr.msk.f32.vlgmr.msra.gmra.mrb[0].mxu0 %vm696_vm10, %v677_v25  ;;  %v651_v44 = vsel %vm648_vm6, %v642_v43, %v498_v24 }
  0xc4   : > { %v406_v26 = vpop.permute.xlu1 %405 }
  0xc5   : > { %v376_v28 = vpop.permute.xlu0 %375  ;;  %v626_v5 = vsel %vm621_vm3, %v617_v4, %v406_v26 }
  0xc6   : > { %v618_v27 = vsel %vm225_vm0, %v1794_v31, %v376_v28 }
  0xc8   : > { %v530_v29 = vpop.permute.xlu1 %529 }
  0xc9   : > { %v500_v30 = vpop.permute.xlu0 %499  ;;  %v660_v45 = vsel %vm657_vm7, %v651_v44, %v530_v29 }
  0xca   : > { %v652_v55 = vsel %vm648_vm6, %v643_v54, %v500_v30  ;;  %v863_v54 = vld [vmem:[#allocation3 + $0x2] sm:$0xff] }
  0xcc   : > { %v438_v32 = vpop.permute.xlu1 %437 }
  0xcd   : > { %v408_v34 = vpop.permute.xlu0 %407  ;;  %v635_v6 = vsel %vm630_vm4, %v626_v5, %v438_v32 }
  0xce   : > { %v627_v18 = vsel %vm621_vm3, %v618_v27, %v408_v34  ;;  %v1242_v27 = vld [vmem:[%s2176_s3 + $0x10] sm:$0xff] }
  0xd0   : > { %v562_v35 = vpop.permute.xlu1 %561 }
  0xd1   : > { %v532_v36 = vpop.permute.xlu0 %531  ;;  %v669_v46 = vsel %vm666_vm8, %v660_v45, %v562_v35 }
  0xd2   : > { %v661_v57 = vsel %vm657_vm7, %v652_v55, %v532_v36  ;;  %v1929_v55 = vld [vmem:[%s2175_s2] ss:$0 sm:$0xff] }
  0xd4   : > { %v470_v41 = vpop.permute.xlu1 %469 }
  0xd5   : > { %v440_v42 = vpop.permute.xlu0 %439  ;;  %v644_v9 = vsel %vm639_vm5, %v635_v6, %v470_v41 }
  0xd6   : > { %v636_v19 = vsel %vm630_vm4, %v627_v18, %v440_v42  ;;  %v1243_v18 = vld [vmem:[%s2176_s3 + $0x18] sm:$0xff] }
  0xd8   : > { %v594_v47 = vpop.permute.xlu1 %593 }
  0xd9   : > { %v564_v48 = vpop.permute.xlu0 %563  ;;  %v678_v49 = vsel %vm675_vm9, %v669_v46, %v594_v47 }
  0xda   : > { %1543 = vmatprep.mubr.msk.f32.mxu0 %vm696_vm10, %v678_v49  ;;  %v670_v58 = vsel %vm666_vm8, %v661_v57, %v564_v48 }
  0xdc   : > { %v472_v52 = vpop.permute.xlu1 %471 }
  0xdd   : > { %v378_v53 = vpop.permute.xlu0 %377  ;;  %v645_v22 = vsel %vm639_vm5, %v636_v19, %v472_v52  ;;  %v855_v52 = vld [vmem:[#allocation3 + $0x1] sm:$0xff]  ;;  %v1586_v19 = vpack.c.bf16 %v1243_v18, %v1242_v27 }
  0xde   : > { %v619_v32 = vsel %vm225_vm0, %v1802_v33, %v378_v53  ;;  %928 = vrot.lane.b32.xlu0 %v855_v52, %s1616_s24  ;;  %v911_v53 = vld [vmem:[#allocation3 + $0x91] sm:$0xff] }
  0xdf   : > { %1134 = vrot.lane.b32.xlu1 %v911_v53, %s1622_s15 }
  0xe0   : > { %v596_v59 = vpop.permute.xlu1 %595 }
  0xe1   : > { %v502_v61 = vpop.permute.xlu0 %501  ;;  %v679_v21 = vsel %vm675_vm9, %v670_v58, %v596_v59 }
  0xe2   : > { %1544 = vmatmul.mubr.msk.f32.gmra.mrb[2].mxu0 %vm696_vm10, %v679_v21  ;;  %v653_v10 = vsel %vm648_vm6, %v644_v9, %v502_v61  ;;  %960 = vrot.lane.b32.xlu0 %v863_v54, %s1617_s25 }
  0xe4   : > { %v410_v56 = vpop.permute.xlu1 %409 }
  0xe5   : > { %v380_v60 = vpop.permute.xlu0 %379  ;;  %v628_v35 = vsel %vm621_vm3, %v619_v32, %v410_v56 }
  0xe6   : > { %v620_v34 = vsel %vm225_vm0, %v1818_v37, %v380_v60 }
  0xe8   : > { %v534_v62 = vpop.permute.xlu1 %533 }
  0xe9   : > { %v504_v63 = vpop.permute.xlu0 %503  ;;  %v662_v11 = vsel %vm657_vm7, %v653_v10, %v534_v62 }
  0xea   : > { %v654_v23 = vsel %vm648_vm6, %v645_v22, %v504_v63 }
  0xec   : > { %v442_v0 = vpop.permute.xlu1 %441 }
  0xed   : > { %v412_v1 = vpop.permute.xlu0 %411  ;;  %v637_v38 = vsel %vm630_vm4, %v628_v35, %v442_v0 }
  0xee   : > { %v629_v36 = vsel %vm621_vm3, %v620_v34, %v412_v1 }
  0xf0   : > { %v566_v2 = vpop.permute.xlu1 %565 }
  0xf1   : > { %v536_v3 = vpop.permute.xlu0 %535  ;;  %v671_v12 = vsel %vm666_vm8, %v662_v11, %v566_v2 }
  0xf2   : > { %v663_v24 = vsel %vm657_vm7, %v654_v23, %v536_v3 }
  0xf4   : > { %v474_v7 = vpop.permute.xlu1 %473 }
  0xf5   : > { %v444_v8 = vpop.permute.xlu0 %443  ;;  %v646_v42 = vsel %vm639_vm5, %v637_v38, %v474_v7 }
  0xf6   : > { %v638_v39 = vsel %vm630_vm4, %v629_v36, %v444_v8 }
  0xf8   : > { %v598_v15 = vpop.permute.xlu1 %597 }
  0xf9   : > { %v568_v16 = vpop.permute.xlu0 %567  ;;  %v680_v17 = vsel %vm675_vm9, %v671_v12, %v598_v15  ;;  %v1240_v12 = vld [vmem:[%s2176_s3] sm:$0xff]  ;;  %v1241_v15 = vld [vmem:[%s2176_s3 + $0x8] sm:$0xff] }
  0xfa   : > { %1546 = vmatprep.mubr.msk.f32.mxu0 %vm696_vm10, %v680_v17  ;;  %v672_v25 = vsel %vm666_vm8, %v663_v24, %v568_v16  ;;  %v1582_v16 = vpack.c.bf16 %v1241_v15, %v1240_v12 }
  0xfc   : > { %v506_v20 = vpop.permute.xlu1 %505  ;;  %1583 = vmatprep.subr.bf16.mxu1 %v1582_v16 }
  0xfd   : > { %v476_v14 = vpop.permute.xlu0 %475  ;;  %v655_v44 = vsel %vm648_vm6, %v646_v42, %v506_v20  ;;  %1585 = vmatpush3.bf16.msra.mxu1 %v1582_v16 }
  0xfe   : > { %v647_v43 = vsel %vm639_vm5, %v638_v39, %v476_v14  ;;  %1587 = vmatprep.subr.bf16.mxu1 %v1586_v19  ;;  %v1244_v14 = vld [vmem:[%s2176_s3 + $0x20] sm:$0xf] }
 0x100   : > { %v508_v26 = vpop.permute.xlu1 %507 }
 0x101   : > { %v600_v29 = vpop.permute.xlu0 %599  ;;  %v656_v33 = vsel %vm648_vm6, %v647_v43, %v508_v26  ;;  %1589 = vmatpush3.bf16.msra.mxu1 %v1586_v19 }
 0x102   : > { %v681_v31 = vsel %vm675_vm9, %v672_v25, %v600_v29  ;;  %1560 = vmatprep.subr.msk.mxu1 %vm721_vm2, %v1244_v14 }
 0x103   : > { %1547 = vmatmul.mubr.msk.f32.gmra.mrb[4].mxu0 %vm696_vm10, %v681_v31 }
 0x104   : > { %v540_v28 = vpop.permute.xlu1 %539 }
 0x105   : > { %v538_v30 = vpop.permute.xlu0 %537  ;;  %v665_v37 = vsel %vm657_vm7, %v656_v33, %v540_v28  ;;  %1561 = vmatpush3.msk.msra.mxu1 %vm721_vm2, %v1244_v14 }
 0x106   : > { %v664_v45 = vsel %vm657_vm7, %v655_v44, %v538_v30 }
 0x108   : > { %v572_v40 = vpop.permute.xlu1 %571 }
 0x109   : > { %v570_v41 = vpop.permute.xlu0 %569  ;;  %v674_v46 = vsel %vm666_vm8, %v665_v37, %v572_v40 }
 0x10a   : > { %v673_v47 = vsel %vm666_vm8, %v664_v45, %v570_v41 }
 0x10c   : > { %v604_v48 = vpop.permute.xlu1 %603 }
 0x10d   : > { %v602_v49 = vpop.permute.xlu0 %601  ;;  %v683_v13 = vsel %vm675_vm9, %v674_v46, %v604_v48 }
 0x10e   : > { %v682_v50 = vsel %vm675_vm9, %v673_v47, %v602_v49 }
 0x10f   : > { %1549 = vmatprep.mubr.msk.f32.mxu0 %vm696_vm10, %v682_v50  ;;  %v919_v50 = vld [vmem:[#allocation3 + $0x92] sm:$0xff] }
 0x110   : > { %1550 = vmatmul.mubr.msk.f32.gmra.mrb[6].mxu0 %vm696_vm10, %v683_v13 }
 0x130   : > { %v2035_v45 = vpop.permute.xlu1 %1102 }
 0x150   : > { %v929_v13 = vpop.permute.xlu0 %928 }
 0x151   : > { %v2044_v48 = vpop.permute.xlu1 %1134 }
 0x154   : > { %v961_v52 = vpop.permute.xlu0 %960 }
 0x195   : > { %v1542_v57 = vpop.f32.mrb[0].mxu0 }
 0x196   : > { %v797_v58 = vadd.f32 %v1542_v57, %v1929_v55  ;;  %v791_v59 = vpop.f32.mrb[1].mxu0 }
 0x197   : > { %v792_v61 = vadd.f32 %v1929_v55, %v791_v59 }
 0x198   : > { %v831_v21 = vmax.f32 %v797_v58, 0.0 }
 0x199   : > { %v830_v56 = vmax.f32 %v792_v61, 0.0 }
 0x19a   : > { %840 = vst.msk [vmem:[#allocation3 + $0x21] sm:$0xff] %vm225_vm0, %v831_v21  ;;  %v847_v21 = vld [vmem:[#allocation3] sm:$0xff] }
 0x19b   : > { %839 = vst.msk [vmem:[#allocation3 + $0x11] sm:$0xff] %vm225_vm0, %v830_v56 }
 0x1a1   : > { %v880_v60 = vld [vmem:[#allocation3 + $0x21] sm:$0xff] }
 0x1a2   : > { %v1935_v62 = vld [vmem:[#allocation3 + $0x20] sm:$0xff]  ;;  %1026 = vrot.lane.b32.xlu0 %v880_v60, %s1619_s27  ;;  %v1942_v0 = vld [vmem:[#allocation3 + $0x10] sm:$0xff] }
 0x1a3   : > { %994 = vrot.lane.b32.xlu1 %v1935_v62, %s1618_s26  ;;  %v888_v63 = vld [vmem:[#allocation3 + $0x22] sm:$0xff]  ;;  %v879_v1 = vld [vmem:[#allocation3 + $0x11] sm:$0xff] }
 0x1a4   : > { %v864_v8 = vld [vmem:[#allocation3 + $0x12] sm:$0xff] }
 0x1a6   : > { %1058 = vrot.lane.b32.xlu0 %v888_v63, %s1620_s28 }
 0x1a7   : > { %932 = vrot.lane.b32.xlu1 %v880_v60, %s1616_s24 }
 0x1aa   : > { %992 = vrot.lane.b32.xlu0 %v1942_v0, %s1618_s26 }
 0x1ab   : > { %964 = vrot.lane.b32.xlu1 %v888_v63, %s1617_s25 }
 0x1ae   : > { %1024 = vrot.lane.b32.xlu0 %v879_v1, %s1619_s27 }
 0x1af   : > { %1088 = vrot.lane.b32.xlu1 %v1935_v62, %s1621_s8 }
 0x1b3   : > { %1120 = vrot.lane.b32.xlu1 %v880_v60, %s1622_s15 }
 0x1b5   : > { %v1545_v2 = vpop.f32.mrb[2].mxu0 }
 0x1b6   : > { %v807_v3 = vadd.f32 %v1545_v2, %v1929_v55  ;;  %v801_v4 = vpop.f32.mrb[3].mxu0 }
 0x1b7   : > { %1152 = vrot.lane.b32.xlu1 %v888_v63, %s1623_s16  ;;  %v802_v5 = vadd.f32 %v1929_v55, %v801_v4  ;;  %v1176_v63 = vsel %vm225_vm0, %v847_v21, %v929_v13 }
 0x1b8   : > { %v833_v6 = vmax.f32 %v807_v3, 0.0 }
 0x1b9   : > { %v832_v7 = vmax.f32 %v802_v5, 0.0 }
 0x1ba   : > { %842 = vst.msk [vmem:[#allocation3 + $0x41] sm:$0xff] %vm225_vm0, %v833_v6 }
 0x1bb   : > { %930 = vrot.lane.b32.xlu1 %v879_v1, %s1616_s24  ;;  %841 = vst.msk [vmem:[#allocation3 + $0x31] sm:$0xff] %vm225_vm0, %v832_v7  ;;  %v1184_v1 = vsel %vm621_vm3, %v1176_v63, %v961_v52 }
 0x1bf   : > { %962 = vrot.lane.b32.xlu1 %v864_v8, %s1617_s25 }
 0x1c1   : > { %v1958_v9 = vld [vmem:[#allocation3 + $0x40] sm:$0xff] }
 0x1c2   : > { %998 = vrot.lane.b32.xlu0 %v1958_v9, %s1618_s26  ;;  %v859_v10 = vld [vmem:[#allocation3 + $0x41] sm:$0xff]  ;;  %v858_v17 = vld [vmem:[#allocation3 + $0x31] sm:$0xff] }
 0x1c3   : > { %1056 = vrot.lane.b32.xlu1 %v864_v8, %s1620_s28  ;;  %v890_v11 = vld [vmem:[#allocation3 + $0x42] sm:$0xff]  ;;  %v866_v20 = vld [vmem:[#allocation3 + $0x32] sm:$0xff] }
 0x1c4   : > { %v1988_v23 = vld [vmem:[#allocation3 + $0x30] sm:$0xff] }
 0x1c6   : > { %936 = vrot.lane.b32.xlu0 %v859_v10, %s1616_s24 }
 0x1c7   : > { %1030 = vrot.lane.b32.xlu1 %v859_v10, %s1619_s27 }
 0x1ca   : > { %1062 = vrot.lane.b32.xlu0 %v890_v11, %s1620_s28 }
 0x1cb   : > { %968 = vrot.lane.b32.xlu1 %v890_v11, %s1617_s25 }
 0x1ce   : > { %934 = vrot.lane.b32.xlu0 %v858_v17, %s1616_s24 }
 0x1cf   : > { %1092 = vrot.lane.b32.xlu1 %v1958_v9, %s1621_s8 }
 0x1d2   : > { %966 = vrot.lane.b32.xlu0 %v866_v20, %s1617_s25 }
 0x1d3   : > { %1124 = vrot.lane.b32.xlu1 %v859_v10, %s1622_s15 }
 0x1d6   : > { %v1548_v22 = vpop.f32.mrb[4].mxu0  ;;  %1090 = vrot.lane.b32.xlu0 %v1988_v23, %s1621_s8 }
 0x1d7   : > { %v817_v24 = vadd.f32 %v1548_v22, %v1929_v55  ;;  %v811_v25 = vpop.f32.mrb[5].mxu0  ;;  %1156 = vrot.lane.b32.xlu1 %v890_v11, %s1623_s16 }
 0x1d8   : > { %v812_v26 = vadd.f32 %v1929_v55, %v811_v25 }
 0x1d9   : > { %v835_v29 = vmax.f32 %v817_v24, 0.0 }
 0x1da   : > { %v834_v31 = vmax.f32 %v812_v26, 0.0  ;;  %1122 = vrot.lane.b32.xlu0 %v858_v17, %s1622_s15 }
 0x1db   : > { %844 = vst.msk [vmem:[#allocation3 + $0x61] sm:$0xff] %vm225_vm0, %v835_v29  ;;  %996 = vrot.lane.b32.xlu1 %v1988_v23, %s1618_s26 }
 0x1dc   : > { %843 = vst.msk [vmem:[#allocation3 + $0x51] sm:$0xff] %vm225_vm0, %v834_v31 }
 0x1de   : > { %1060 = vrot.lane.b32.xlu0 %v866_v20, %s1620_s28 }
 0x1df   : > { %1028 = vrot.lane.b32.xlu1 %v858_v17, %s1619_s27 }
 0x1e2   : > { %v2003_v28 = vld [vmem:[#allocation3 + $0x60] sm:$0xff] }
 0x1e3   : > { %v1551_v30 = vpop.f32.mrb[6].mxu0  ;;  %1002 = vrot.lane.b32.xlu0 %v2003_v28, %s1618_s26  ;;  %1154 = vrot.lane.b32.xlu1 %v866_v20, %s1623_s16  ;;  %v861_v38 = vld [vmem:[#allocation3 + $0x61] sm:$0xff]  ;;  %v860_v41 = vld [vmem:[#allocation3 + $0x51] sm:$0xff] }
 0x1e4   : > { %v827_v32 = vadd.f32 %v1551_v30, %v1929_v55  ;;  %v821_v34 = vpop.f32.mrb[7].mxu0  ;;  %v892_v40 = vld [vmem:[#allocation3 + $0x62] sm:$0xff]  ;;  %v868_v42 = vld [vmem:[#allocation3 + $0x52] sm:$0xff] }
 0x1e5   : > { %v822_v35 = vadd.f32 %v1929_v55, %v821_v34  ;;  %v2021_v43 = vld [vmem:[#allocation3 + $0x50] sm:$0xff] }
 0x1e6   : > { %v837_v36 = vmax.f32 %v827_v32, 0.0 }
 0x1e7   : > { %v836_v39 = vmax.f32 %v822_v35, 0.0  ;;  %940 = vrot.lane.b32.xlu0 %v861_v38, %s1616_s24  ;;  %1034 = vrot.lane.b32.xlu1 %v861_v38, %s1619_s27 }
 0x1e8   : > { %846 = vst.msk [vmem:[#allocation3 + $0x81] sm:$0xff] %vm225_vm0, %v837_v36 }
 0x1e9   : > { %845 = vst.msk [vmem:[#allocation3 + $0x71] sm:$0xff] %vm225_vm0, %v836_v39 }
 0x1eb   : > { %1066 = vrot.lane.b32.xlu0 %v892_v40, %s1620_s28  ;;  %972 = vrot.lane.b32.xlu1 %v892_v40, %s1617_s25 }
 0x1ef   : > { %938 = vrot.lane.b32.xlu0 %v860_v41, %s1616_s24  ;;  %1096 = vrot.lane.b32.xlu1 %v2003_v28, %s1621_s8  ;;  %v878_v44 = vld [vmem:[#allocation3 + $0x80] sm:$0xff] }
 0x1f0   : > { %v886_v33 = vld [vmem:[#allocation3 + $0x81] sm:$0xff]  ;;  %v2037_v46 = vld [vmem:[#allocation3 + $0x70] sm:$0xff] }
 0x1f1   : > { %v894_v37 = vld [vmem:[#allocation3 + $0x82] sm:$0xff]  ;;  %v885_v47 = vld [vmem:[#allocation3 + $0x71] sm:$0xff] }
 0x1f2   : > { %v893_v49 = vld [vmem:[#allocation3 + $0x72] sm:$0xff] }
 0x1f3   : > { %970 = vrot.lane.b32.xlu0 %v868_v42, %s1617_s25  ;;  %1128 = vrot.lane.b32.xlu1 %v861_v38, %s1622_s15 }
 0x1f7   : > { %1094 = vrot.lane.b32.xlu0 %v2021_v43, %s1621_s8  ;;  %1160 = vrot.lane.b32.xlu1 %v892_v40, %s1623_s16 }
 0x1fb   : > { %1126 = vrot.lane.b32.xlu0 %v860_v41, %s1622_s15  ;;  %1000 = vrot.lane.b32.xlu1 %v2021_v43, %s1618_s26 }
 0x1ff   : > { %1064 = vrot.lane.b32.xlu0 %v868_v42, %s1620_s28  ;;  %1032 = vrot.lane.b32.xlu1 %v860_v41, %s1619_s27 }
 0x203   : > { %1006 = vrot.lane.b32.xlu0 %v878_v44, %s1618_s26  ;;  %1158 = vrot.lane.b32.xlu1 %v868_v42, %s1623_s16 }
 0x207   : > { %1038 = vrot.lane.b32.xlu0 %v886_v33, %s1619_s27  ;;  %1070 = vrot.lane.b32.xlu1 %v894_v37, %s1620_s28 }
 0x20b   : > { %1100 = vrot.lane.b32.xlu0 %v878_v44, %s1621_s8  ;;  %1004 = vrot.lane.b32.xlu1 %v2037_v46, %s1618_s26 }
 0x20f   : > { %1132 = vrot.lane.b32.xlu0 %v886_v33, %s1622_s15  ;;  %1036 = vrot.lane.b32.xlu1 %v885_v47, %s1619_s27 }
 0x213   : > { %942 = vrot.lane.b32.xlu0 %v885_v47, %s1616_s24  ;;  %1068 = vrot.lane.b32.xlu1 %v893_v49, %s1620_s28  ;;  %s2146_s28 = scalar_lea.vmem %s2178_s5, %s1502_s20 }
 0x214   : > { %v1027_v55 = vpop.permute.xlu0 %1026 }
 0x215   : > { %v995_v51 = vpop.permute.xlu1 %994 }
 0x217   : > { %974 = vrot.lane.b32.xlu0 %v893_v49, %s1617_s25  ;;  %1166 = vrot.lane.b32.xlu1 %v919_v50, %s1623_s16 }
 0x218   : > { %v1059_v58 = vpop.permute.xlu0 %1058 }
 0x219   : > { %v933_v53 = vpop.permute.xlu1 %932 }
 0x21a   : > { %v1178_v32 = vsel %vm225_vm0, %v1935_v62, %v933_v53 }
 0x21b   : > { %1098 = vrot.lane.b32.xlu0 %v2037_v46, %s1621_s8 }
 0x21c   : > { %v993_v56 = vpop.permute.xlu0 %992 }
 0x21d   : > { %v965_v54 = vpop.permute.xlu1 %964  ;;  %v1192_v4 = vsel %vm630_vm4, %v1184_v1, %v993_v56 }
 0x21e   : > { %v1186_v34 = vsel %vm621_vm3, %v1178_v32, %v965_v54 }
 0x21f   : > { %1130 = vrot.lane.b32.xlu0 %v885_v47, %s1622_s15 }
 0x220   : > { %v1025_v2 = vpop.permute.xlu0 %1024 }
 0x221   : > { %v1089_v57 = vpop.permute.xlu1 %1088  ;;  %v1200_v5 = vsel %vm639_vm5, %v1192_v4, %v1025_v2 }
 0x223   : > { %1162 = vrot.lane.b32.xlu0 %v893_v49, %s1623_s16 }
 0x225   : > { %v1121_v59 = vpop.permute.xlu1 %1120 }
 0x227   : > { %1164 = vrot.lane.b32.xlu0 %v894_v37, %s1623_s16 }
 0x229   : > { %v1153_v61 = vpop.permute.xlu1 %1152 }
 0x22d   : > { %v931_v60 = vpop.permute.xlu1 %930 }
 0x22e   : > { %v1177_v22 = vsel %vm225_vm0, %v1942_v0, %v931_v60 }
 0x231   : > { %v963_v3 = vpop.permute.xlu1 %962 }
 0x232   : > { %v1185_v26 = vsel %vm621_vm3, %v1177_v22, %v963_v3 }
 0x233   : > { %v1193_v29 = vsel %vm630_vm4, %v1185_v26, %v995_v51 }
 0x234   : > { %v999_v6 = vpop.permute.xlu0 %998  ;;  %v1201_v35 = vsel %vm639_vm5, %v1193_v29, %v1027_v55 }
 0x235   : > { %v1057_v7 = vpop.permute.xlu1 %1056  ;;  %v1209_v40 = vsel %vm648_vm6, %v1201_v35, %v1059_v58 }
 0x236   : > { %v1208_v8 = vsel %vm648_vm6, %v1200_v5, %v1057_v7 }
 0x237   : > { %v1216_v10 = vsel %vm657_vm7, %v1208_v8, %v1089_v57 }
 0x238   : > { %v1224_v11 = vsel %vm666_vm8, %v1216_v10, %v1121_v59  ;;  %v937_v12 = vpop.permute.xlu0 %936 }
 0x239   : > { %v1031_v15 = vpop.permute.xlu1 %1030  ;;  %v1232_v16 = vsel %vm675_vm9, %v1224_v11, %v1153_v61  ;;  %v1180_v2 = vsel %vm225_vm0, %v1958_v9, %v937_v12 }
 0x23a   : > { %1562 = vmatprep.mubr.msk.f32.mxu1 %vm696_vm10, %v1232_v16 }
 0x23c   : > { %v1063_v17 = vpop.permute.xlu0 %1062 }
 0x23d   : > { %v969_v27 = vpop.permute.xlu1 %968 }
 0x23e   : > { %v1188_v3 = vsel %vm621_vm3, %v1180_v2, %v969_v27 }
 0x240   : > { %v935_v18 = vpop.permute.xlu0 %934 }
 0x241   : > { %v1093_v19 = vpop.permute.xlu1 %1092  ;;  %v1179_v59 = vsel %vm225_vm0, %v1988_v23, %v935_v18 }
 0x244   : > { %v967_v20 = vpop.permute.xlu0 %966 }
 0x245   : > { %v1125_v14 = vpop.permute.xlu1 %1124  ;;  %v1187_v56 = vsel %vm621_vm3, %v1179_v59, %v967_v20 }
 0x246   : > { %v1195_v60 = vsel %vm630_vm4, %v1187_v56, %v999_v6  ;;  %v1384_v56 = vld [vmem:[%s1714_s23] sm:$0xff] }
 0x247   : > { %v1203_v4 = vsel %vm639_vm5, %v1195_v60, %v1031_v15 }
 0x248   : > { %v1091_v24 = vpop.permute.xlu0 %1090  ;;  %v1211_v10 = vsel %vm648_vm6, %v1203_v4, %v1063_v17 }
 0x249   : > { %v1157_v25 = vpop.permute.xlu1 %1156  ;;  %v1217_v42 = vsel %vm657_vm7, %v1209_v40, %v1091_v24 }
 0x24c   : > { %v1123_v31 = vpop.permute.xlu0 %1122 }
 0x24d   : > { %v997_v30 = vpop.permute.xlu1 %996  ;;  %v1225_v62 = vsel %vm666_vm8, %v1217_v42, %v1123_v31 }
 0x24e   : > { %v1194_v36 = vsel %vm630_vm4, %v1186_v34, %v997_v30 }
 0x250   : > { %v1061_v38 = vpop.permute.xlu0 %1060 }
 0x251   : > { %v1029_v39 = vpop.permute.xlu1 %1028 }
 0x252   : > { %v1202_v0 = vsel %vm639_vm5, %v1194_v36, %v1029_v39 }
 0x253   : > { %v1210_v41 = vsel %vm648_vm6, %v1202_v0, %v1061_v38 }
 0x254   : > { %v1218_v44 = vsel %vm657_vm7, %v1210_v41, %v1093_v19 }
 0x255   : > { %v1003_v33 = vpop.permute.xlu0 %1002  ;;  %v1155_v37 = vpop.permute.xlu1 %1154  ;;  %v1226_v47 = vsel %vm666_vm8, %v1218_v44, %v1125_v14 }
 0x256   : > { %v1233_v49 = vsel %vm675_vm9, %v1225_v62, %v1155_v37  ;;  %v1234_v13 = vsel %vm675_vm9, %v1226_v47, %v1157_v25 }
 0x257   : > { %1563 = vmatmul.mubr.msk.f32.vlgmr.msra.gmra.mrb[0].mxu1 %vm696_vm10, %v1233_v49 }
 0x258   : > { %1565 = vmatprep.mubr.msk.f32.mxu1 %vm696_vm10, %v1234_v13 }
 0x259   : > { %v941_v50 = vpop.permute.xlu0 %940  ;;  %v1035_v51 = vpop.permute.xlu1 %1034 }
 0x25a   : > { %v1182_v39 = vsel %vm225_vm0, %v2003_v28, %v941_v50 }
 0x25d   : > { %v1067_v52 = vpop.permute.xlu0 %1066  ;;  %v973_v53 = vpop.permute.xlu1 %972 }
 0x261   : > { %v939_v54 = vpop.permute.xlu0 %938  ;;  %v1097_v55 = vpop.permute.xlu1 %1096 }
 0x262   : > { %v1181_v26 = vsel %vm225_vm0, %v2021_v43, %v939_v54  ;;  %v1190_v43 = vsel %vm621_vm3, %v1182_v39, %v973_v53 }
 0x265   : > { %v971_v57 = vpop.permute.xlu0 %970  ;;  %v1129_v58 = vpop.permute.xlu1 %1128 }
 0x266   : > { %v1189_v30 = vsel %vm621_vm3, %v1181_v26, %v971_v57 }
 0x267   : > { %v1197_v36 = vsel %vm630_vm4, %v1189_v30, %v1003_v33  ;;  %v1390_v30 = vld [vmem:[%s1714_s23 + $0x30] sm:$0xff] }
 0x269   : > { %v1095_v61 = vpop.permute.xlu0 %1094  ;;  %v1161_v21 = vpop.permute.xlu1 %1160 }
 0x26a   : > { %v1219_v6 = vsel %vm657_vm7, %v1211_v10, %v1095_v61 }
 0x26d   : > { %v1127_v63 = vpop.permute.xlu0 %1126  ;;  %v1001_v1 = vpop.permute.xlu1 %1000 }
 0x26e   : > { %v1196_v5 = vsel %vm630_vm4, %v1188_v3, %v1001_v1  ;;  %v1227_v9 = vsel %vm666_vm8, %v1219_v6, %v1127_v63 }
 0x271   : > { %v1065_v7 = vpop.permute.xlu0 %1064  ;;  %v1033_v8 = vpop.permute.xlu1 %1032 }
 0x272   : > { %v1204_v23 = vsel %vm639_vm5, %v1196_v5, %v1033_v8  ;;  %v1387_v5 = vld [vmem:[%s1714_s23 + $0x18] sm:$0xff] }
 0x273   : > { %v1212_v11 = vsel %vm648_vm6, %v1204_v23, %v1065_v7  ;;  %v1386_v23 = vld [vmem:[%s1714_s23 + $0x10] sm:$0xff] }
 0x274   : > { %v1220_v16 = vsel %vm657_vm7, %v1212_v11, %v1097_v55 }
 0x275   : > { %v1007_v12 = vpop.permute.xlu0 %1006  ;;  %v1159_v27 = vpop.permute.xlu1 %1158  ;;  %v1228_v15 = vsel %vm666_vm8, %v1220_v16, %v1129_v58  ;;  %v1490_v58 = vld [vmem:[%s2177_s4] ss:$0 sm:$0xff] }
 0x276   : > { %v1235_v18 = vsel %vm675_vm9, %v1227_v9, %v1159_v27  ;;  %v1236_v19 = vsel %vm675_vm9, %v1228_v15, %v1161_v21  ;;  %v1389_v27 = vld [vmem:[%s1714_s23 + $0x28] sm:$0xff] }
 0x277   : > { %1566 = vmatmul.mubr.msk.f32.gmra.mrb[2].mxu1 %vm696_vm10, %v1235_v18 }
 0x278   : > { %1568 = vmatprep.mubr.msk.f32.mxu1 %vm696_vm10, %v1236_v19  ;;  %v1388_v19 = vld [vmem:[%s1714_s23 + $0x20] sm:$0xff] }
 0x279   : > { %v1039_v17 = vpop.permute.xlu0 %1038  ;;  %v1071_v14 = vpop.permute.xlu1 %1070 }
 0x27d   : > { %v1101_v20 = vpop.permute.xlu0 %1100  ;;  %v1005_v24 = vpop.permute.xlu1 %1004 }
 0x27e   : > { %v1198_v41 = vsel %vm630_vm4, %v1190_v43, %v1005_v24 }
 0x281   : > { %v1133_v22 = vpop.permute.xlu0 %1132  ;;  %v1037_v32 = vpop.permute.xlu1 %1036 }
 0x282   : > { %v1206_v44 = vsel %vm639_vm5, %v1198_v41, %v1037_v32 }
 0x285   : > { %v943_v25 = vpop.permute.xlu0 %942  ;;  %v1069_v40 = vpop.permute.xlu1 %1068 }
 0x286   : > { %v1183_v29 = vsel %vm225_vm0, %v2037_v46, %v943_v25  ;;  %v1205_v46 = vsel %vm639_vm5, %v1197_v36, %v1035_v51  ;;  %v1214_v33 = vsel %vm648_vm6, %v1206_v44, %v1069_v40  ;;  %v1391_v25 = vld [vmem:[%s1714_s23 + $0x38] sm:$0xff] }
 0x287   : > { %v1213_v37 = vsel %vm648_vm6, %v1205_v46, %v1067_v52  ;;  %v1222_v50 = vsel %vm657_vm7, %v1214_v33, %v1101_v20 }
 0x288   : > { %v1230_v55 = vsel %vm666_vm8, %v1222_v50, %v1133_v22 }
 0x289   : > { %v975_v31 = vpop.permute.xlu0 %974  ;;  %v1167_v52 = vpop.permute.xlu1 %1166 }
 0x28a   : > { %v1191_v34 = vsel %vm621_vm3, %v1183_v29, %v975_v31 }
 0x28b   : > { %v1199_v35 = vsel %vm630_vm4, %v1191_v34, %v1007_v12 }
 0x28c   : > { %v1207_v0 = vsel %vm639_vm5, %v1199_v35, %v1039_v17 }
 0x28d   : > { %v1099_v38 = vpop.permute.xlu0 %1098  ;;  %v1215_v62 = vsel %vm648_vm6, %v1207_v0, %v1071_v14 }
 0x28e   : > { %v1221_v28 = vsel %vm657_vm7, %v1213_v37, %v1099_v38  ;;  %v1223_v47 = vsel %vm657_vm7, %v1215_v62, %v2035_v45 }
 0x28f   : > { %v1231_v53 = vsel %vm666_vm8, %v1223_v47, %v2044_v48  ;;  %v1385_v48 = vld [vmem:[%s1714_s23 + $0x8] sm:$0xff] }
 0x290   : > { %v1239_v57 = vsel %vm675_vm9, %v1231_v53, %v1167_v52 }
 0x291   : > { %v1131_v42 = vpop.permute.xlu0 %1130 }
 0x292   : > { %v1229_v49 = vsel %vm666_vm8, %v1221_v28, %v1131_v42 }
 0x295   : > { %v1163_v13 = vpop.permute.xlu0 %1162 }
 0x296   : > { %v1237_v51 = vsel %vm675_vm9, %v1229_v49, %v1163_v13 }
 0x297   : > { %1569 = vmatmul.mubr.msk.f32.gmra.mrb[4].mxu1 %vm696_vm10, %v1237_v51 }
 0x299   : > { %v1165_v54 = vpop.permute.xlu0 %1164 }
 0x29a   : > { %v1238_v45 = vsel %vm675_vm9, %v1230_v55, %v1165_v54 }
 0x29b   : > { %1571 = vmatprep.mubr.msk.f32.mxu1 %vm696_vm10, %v1238_v45 }
 0x29c   : > { %1572 = vmatmul.mubr.msk.f32.gmra.mrb[6].mxu1 %vm696_vm10, %v1239_v57 }
 0x32a   : > { %v1564_v59 = vpop.f32.mrb[0].mxu1 }
 0x32b   : > { %v1351_v61 = vadd.f32 %v1564_v59, %v1490_v58  ;;  %v1345_v21 = vpop.f32.mrb[1].mxu1 }
 0x32c   : > { %v1346_v60 = vadd.f32 %v1490_v58, %v1345_v21 }
 0x32d   : > { %v1393_v63 = vadd.f32 %v1385_v48, %v1351_v61 }
 0x32e   : > { %v1392_v1 = vadd.f32 %v1384_v56, %v1346_v60 }
 0x32f   : > { %v1401_v2 = vmax.f32 %v1393_v63, 0.0 }
 0x330   : > { %v1400_v3 = vmax.f32 %v1392_v1, 0.0 }
 0x331   : > { %1409 = vst.msk [vmem:[%s2146_s28 + $0x8] sm:$0xff] %vm225_vm0, %v1401_v2 }
 0x332   : > { %1408 = vst.msk [vmem:[%s2146_s28] sm:$0xff] %vm225_vm0, %v1400_v3 }
 0x34a   : > { %v1567_v4 = vpop.f32.mrb[2].mxu1 }
 0x34b   : > { %v1361_v7 = vadd.f32 %v1567_v4, %v1490_v58  ;;  %v1355_v8 = vpop.f32.mrb[3].mxu1 }
 0x34c   : > { %v1356_v10 = vadd.f32 %v1490_v58, %v1355_v8 }
 0x34d   : > { %v1395_v11 = vadd.f32 %v1387_v5, %v1361_v7 }
 0x34e   : > { %v1394_v6 = vadd.f32 %v1386_v23, %v1356_v10 }
 0x34f   : > { %v1403_v16 = vmax.f32 %v1395_v11, 0.0 }
 0x350   : > { %v1402_v9 = vmax.f32 %v1394_v6, 0.0 }
 0x351   : > { %1411 = vst.msk [vmem:[%s2146_s28 + $0x18] sm:$0xff] %vm225_vm0, %v1403_v16 }
 0x352   : > { %1410 = vst.msk [vmem:[%s2146_s28 + $0x10] sm:$0xff] %vm225_vm0, %v1402_v9 }
 0x36a   : > { %v1570_v12 = vpop.f32.mrb[4].mxu1 }
 0x36b   : > { %v1371_v15 = vadd.f32 %v1570_v12, %v1490_v58  ;;  %v1365_v18 = vpop.f32.mrb[5].mxu1 }
 0x36c   : > { %v1366_v17 = vadd.f32 %v1490_v58, %v1365_v18 }
 0x36d   : > { %v1397_v20 = vadd.f32 %v1389_v27, %v1371_v15 }
 0x36e   : > { %v1396_v14 = vadd.f32 %v1388_v19, %v1366_v17 }
 0x36f   : > { %v1405_v22 = vmax.f32 %v1397_v20, 0.0  ;;  %v1573_v24 = vpop.f32.mrb[6].mxu1 }
 0x370   : > { %v1404_v26 = vmax.f32 %v1396_v14, 0.0  ;;  %v1381_v29 = vadd.f32 %v1573_v24, %v1490_v58  ;;  %v1375_v31 = vpop.f32.mrb[7].mxu1 }
 0x371   : > { %1413 = vst.msk [vmem:[%s2146_s28 + $0x28] sm:$0xff] %vm225_vm0, %v1405_v22  ;;  %v1376_v32 = vadd.f32 %v1490_v58, %v1375_v31 }
 0x372   : > { %1412 = vst.msk [vmem:[%s2146_s28 + $0x20] sm:$0xff] %vm225_vm0, %v1404_v26  ;;  %v1399_v34 = vadd.f32 %v1391_v25, %v1381_v29 }
 0x373   : > { %v1398_v35 = vadd.f32 %v1390_v30, %v1376_v32 }
 0x374   : > { %v1407_v36 = vmax.f32 %v1399_v34, 0.0 }
 0x375   : > { %v1406_v38 = vmax.f32 %v1398_v35, 0.0 }
 0x376   : > { %1415 = vst.msk [vmem:[%s2146_s28 + $0x38] sm:$0xff] %vm225_vm0, %v1407_v36 }
 0x377   : > { %1414 = vst.msk [vmem:[%s2146_s28 + $0x30] sm:$0xff] %vm225_vm0, %v1406_v38 }
 0x378 PF: > { %s15_s18 = sadd.s32 1, %s1613_s18  }
 0x379   : > { %p12_p4 = scmp.ge.s32.totalorder %s15_s18, 4  }
 0x37b   :  { %14 = sbr.rel (!%p12_p4) target bundleno = 1 (0x1), region = 74 }

// kernel: hourglass_forward.15
= control target key start
LH: loop header
LB: loop body
LE: loop exit
PB: predicated region body
PF: predicated region fallthrough
CT: control target
= control target key end

     0   :  { %s270_s6 = smov 0   ;;  %s295_s0 = inlined_call_operand.vmem [shape: f32[2,8,4,8], index: 0, kind: input, shape index: {}]   ;;  %s296_s1 = inlined_call_operand.vmem [shape: f32[2,4,4,4], index: 1, kind: output, shape index: {}]  }
   0x1 LB: > { %s229_s7 = sadd.s32 4294967295, %s257_s6   ;;  %p233_p0 = scmp.ge.s32.totalorder %s257_s6, 1  ;;  %s257_s6 = sphi %s270_s6, %s11_s6  }
   0x2   : > { %p87_p1 = scmp.lt.s32.totalorder %s257_s6, 3 }
   0x4   : > { %p88_p2 = pnand %p233_p0, %p87_p1 }
   0x5   : > { %p107_p3 = scmp.lt.s32.totalorder (!%p88_p2), %s229_s7, 1  ;;  %s259_s12 = smov (!%p88_p2), 124   ;;  %vm169_vm0 = vcmask (!%p88_p2), 27648  }
   0x6   : > { %91 = sbr.rel (%p88_p2) target bundleno = 149 (0x95), region = 24 }
   0xd   : > { %s298_s7 = smov (!%p107_p3, %s229_s7), 1 }
   0xe   : > { %s240_s8 = sshll.u32 %s298_s7, 5  ;;  %s241_s13 = sshll.u32 %s298_s7, 4 }
   0xf   : > { %s111_s11 = scalar_lea.vmem %s295_s0, %s240_s8  ;;  %s116_s16 = scalar_lea.vmem %s296_s1, %s241_s13 }
  0x10   : > { %v119_v0 = vld [vmem:[%s111_s11 + $0x8] sm:$0xf]  ;;  %v117_v1 = vld [vmem:[%s111_s11] sm:$0xf]  ;;  %v120_v2 = vld [vmem:[%s111_s11 + $0xc] sm:$0xf] }
  0x11   : > { %137 = vrot.lane.b32.xlu1 %v119_v0, %s259_s12  ;;  %133 = vrot.lane.b32.xlu0 %v117_v1, %s259_s12  ;;  %v118_v3 = vld [vmem:[%s111_s11 + $0x4] sm:$0xf]  ;;  %v122_v4 = vld [vmem:[%s111_s11 + $0x14] sm:$0xf] }
  0x12   : > { %v121_v5 = vld [vmem:[%s111_s11 + $0x10] sm:$0xf]  ;;  %v124_v6 = vld [vmem:[%s111_s11 + $0x1c] sm:$0xf]  ;;  %v123_v7 = vld [vmem:[%s111_s11 + $0x18] sm:$0xf] }
  0x15   : > { %139 = vrot.lane.b32.xlu1 %v120_v2, %s259_s12  ;;  %135 = vrot.lane.b32.xlu0 %v118_v3, %s259_s12 }
  0x19   : > { %143 = vrot.lane.b32.xlu1 %v122_v4, %s259_s12  ;;  %141 = vrot.lane.b32.xlu0 %v121_v5, %s259_s12 }
  0x1d   : > { %147 = vrot.lane.b32.xlu1 %v124_v6, %s259_s12  ;;  %145 = vrot.lane.b32.xlu0 %v123_v7, %s259_s12 }
  0x83   : > { %v138_v8 = vpop.permute.xlu1 %137  ;;  %v134_v9 = vpop.permute.xlu0 %133 }
  0x84   : > { %v159_v12 = vmax.f32 %v119_v0, %v138_v8  ;;  %v157_v13 = vmax.f32 %v117_v1, %v134_v9 }
  0x87   : > { %v140_v10 = vpop.permute.xlu1 %139  ;;  %v136_v11 = vpop.permute.xlu0 %135 }
  0x88   : > { %v160_v14 = vmax.f32 %v120_v2, %v140_v10  ;;  %v158_v15 = vmax.f32 %v118_v3, %v136_v11 }
  0x8a   : > { %v166_v16 = vmax.f32 %v159_v12, %v160_v14  ;;  %v165_v17 = vmax.f32 %v157_v13, %v158_v15 }
  0x8b   : > { %v144_v18 = vpop.permute.xlu1 %143  ;;  %v142_v19 = vpop.permute.xlu0 %141 }
  0x8c   : > { %171 = vst.msk [vmem:[%s116_s16 + $0x4] sm:$0xf] %vm169_vm0, %v166_v16  ;;  %170 = vst.msk [vmem:[%s116_s16] sm:$0xf] %vm169_vm0, %v165_v17  ;;  %v162_v20 = vmax.f32 %v122_v4, %v144_v18  ;;  %v161_v21 = vmax.f32 %v121_v5, %v142_v19 }
  0x8e   : > { %v167_v22 = vmax.f32 %v161_v21, %v162_v20 }
  0x8f   : > { %v148_v23 = vpop.permute.xlu1 %147  ;;  %v146_v24 = vpop.permute.xlu0 %145 }
  0x90   : > { %172 = vst.msk [vmem:[%s116_s16 + $0x8] sm:$0xf] %vm169_vm0, %v167_v22  ;;  %v164_v25 = vmax.f32 %v124_v6, %v148_v23  ;;  %v163_v26 = vmax.f32 %v123_v7, %v146_v24 }
  0x92   : > { %v168_v27 = vmax.f32 %v163_v26, %v164_v25 }
  0x94   : > { %173 = vst.msk [vmem:[%s116_s16 + $0xc] sm:$0xf] %vm169_vm0, %v168_v27 }
  0x95 PF: > { %s11_s6 = sadd.s32 1, %s257_s6  }
  0x96   : > { %p8_p4 = scmp.ge.s32.totalorder %s11_s6, 4  }
  0x98   :  { %10 = sbr.rel (!%p8_p4) target bundleno = 1 (0x1), region = 54 }

// kernel: hourglass_forward.16
= control target key start
LH: loop header
LB: loop body
LE: loop exit
PB: predicated region body
PF: predicated region fallthrough
CT: control target
= control target key end

     0   :  { %s1089_s18 = smov 0   ;;  %s1305_s0 = inlined_call_operand.vmem [shape: f32[2,4,4,4], index: 0, kind: input, shape index: {}]   ;;  %s1306_s1 = inlined_call_operand.vmem [shape: f32[36,4], index: 1, kind: input, shape index: {}]   ;;  %s1307_s2 = inlined_call_operand.vmem [shape: f32[1,4], index: 2, kind: input, shape index: {}]   ;;  %s1308_s3 = inlined_call_operand.vmem [shape: f32[36,4], index: 3, kind: input, shape index: {}]   ;;  %s1309_s4 = inlined_call_operand.vmem [shape: f32[1,4], index: 4, kind: input, shape index: {}]   ;;  %s1310_s5 = inlined_call_operand.vmem [shape: f32[2,4,4,4], index: 5, kind: output, shape index: {}]  }
   0x1 LB: > { %s946_s19 = sadd.s32 4294967295, %s1048_s18   ;;  %p950_p0 = scmp.ge.s32.totalorder %s1048_s18, 1  ;;  %s1048_s18 = sphi %s1089_s18, %s15_s18  }
   0x2   : > { %p187_p1 = scmp.lt.s32.totalorder %s1048_s18, 3 }
   0x4   : > { %p188_p2 = pnand %p950_p0, %p187_p1 }
   0x5   : > { %vm225_vm0 = vcmask (!%p188_p2), 29696   ;;  %v1050_v0 = vmov (!%p188_p2), 0.0   ;;  %p215_p3 = scmp.lt.s32.totalorder (!%p188_p2), %s946_s19, 1  ;;  %vm243_vm1 = vcmask (!%p188_p2), 27648   ;;  %s1051_s24 = smov (!%p188_p2), 4   ;;  %v453_v28 = vld [vmem:[%s1306_s1] sm:$0xff] (!%p188_p2) }
   0x6   : > { %191 = sbr.rel (%p188_p2) target bundleno = 820 (0x334), region = 40  ;;  %226 = vst.msk [vmem:[#allocation2] sm:$0x3f] (!%p188_p2), %vm225_vm0, %v1050_v0  ;;  %227 = vst.msk [vmem:[#allocation2 + $0x8] sm:$0x3f] (!%p188_p2), %vm225_vm0, %v1050_v0  ;;  %s1052_s25 = smov (!%p188_p2), 8  }
   0x7   : > { %228 = vst.msk [vmem:[#allocation2 + $0x10] sm:$0x3f] (!%p188_p2), %vm225_vm0, %v1050_v0  ;;  %229 = vst.msk [vmem:[#allocation2 + $0x18] sm:$0x3f] (!%p188_p2), %vm225_vm0, %v1050_v0  ;;  %s1053_s26 = smov (!%p188_p2), 12   ;;  %s1054_s27 = smov (!%p188_p2), 16  }
   0x8   : > { %230 = vst.msk [vmem:[#allocation2 + $0x20] sm:$0x3f] (!%p188_p2), %vm225_vm0, %v1050_v0  ;;  %231 = vst.msk [vmem:[#allocation2 + $0x28] sm:$0x3f] (!%p188_p2), %vm225_vm0, %v1050_v0  ;;  %s1055_s28 = smov (!%p188_p2), 20   ;;  %s1056_s29 = smov (!%p188_p2), 24  }
   0x9   : > { %232 = vst.msk [vmem:[#allocation3] sm:$0x3f] (!%p188_p2), %vm225_vm0, %v1050_v0  ;;  %233 = vst.msk [vmem:[#allocation3 + $0x8] sm:$0x3f] (!%p188_p2), %vm225_vm0, %v1050_v0  ;;  %v454_v29 = vld [vmem:[%s1306_s1 + $0x8] sm:$0xff] (!%p188_p2)  ;;  %s1057_s9 = smov (!%p188_p2), 28  }
   0xa   : > { %234 = vst.msk [vmem:[#allocation3 + $0x10] sm:$0x3f] (!%p188_p2), %vm225_vm0, %v1050_v0  ;;  %235 = vst.msk [vmem:[#allocation3 + $0x18] sm:$0x3f] (!%p188_p2), %vm225_vm0, %v1050_v0  ;;  %v1007_v31 = vpack.c.bf16 (!%p188_p2), %v454_v29, %v453_v28  ;;  %v455_v33 = vld [vmem:[%s1306_s1 + $0x10] sm:$0xff] (!%p188_p2)  ;;  %v456_v34 = vld [vmem:[%s1306_s1 + $0x18] sm:$0xff] (!%p188_p2) }
   0xb   : > { %236 = vst.msk [vmem:[#allocation3 + $0x20] sm:$0x3f] (!%p188_p2), %vm225_vm0, %v1050_v0  ;;  %237 = vst.msk [vmem:[#allocation3 + $0x28] sm:$0x3f] (!%p188_p2), %vm225_vm0, %v1050_v0  ;;  %v1011_v36 = vpack.c.bf16 (!%p188_p2), %v456_v34, %v455_v33  ;;  %v457_v39 = vld [vmem:[%s1306_s1 + $0x20] sm:$0xf] (!%p188_p2) }
   0xc   : > { %1008 = vmatprep.subr.bf16.mxu0 (!%p188_p2), %v1007_v31  ;;  %vm476_vm2 = vcmask (!%p188_p2), 1043456   ;;  %s1058_s16 = smov (!%p188_p2), 32   ;;  %vm413_vm3 = vcmask (!%p188_p2), 31744   ;;  %vm418_vm4 = vcmask (!%p188_p2), 64512   ;;  %vm423_vm5 = vcmask (!%p188_p2), 97280  }
   0xd   : > { %s1312_s19 = smov (!%p215_p3, %s946_s19), 1  ;;  %v252_v4 = vld [vmem:[#allocation2 + $0x1] sm:$0xf]  ;;  %1010 = vmatpush3.bf16.msra.mxu0 %v1007_v31  ;;  %vm428_vm6 = vcmask 130048   ;;  %vm433_vm7 = vcmask 162816   ;;  %vm438_vm8 = vcmask 195584  }
   0xe   : > { %s965_s20 = sshll.u32 %s1312_s19, 4  ;;  %289 = vrot.lane.b32.xlu0 %v252_v4, %s1051_s24  ;;  %v256_v6 = vld [vmem:[#allocation2 + $0x2] sm:$0xf]  ;;  %1012 = vmatprep.subr.bf16.mxu0 %v1011_v36  ;;  %vm443_vm9 = vcmask 228352   ;;  %vm448_vm10 = vcmask 261120   ;;  %vm471_vm11 = vcmask 293888  }
   0xf   : > { %s1105_s23 = scalar_lea.vmem %s1305_s0, %s965_s20  ;;  %v276_v32 = vld [vmem:[#allocation2 + $0x28] sm:$0xf] }
  0x10   : > { %v239_v1 = vld [vmem:[%s1105_s23 + $0x4] sm:$0xf]  ;;  %v238_v2 = vld [vmem:[%s1105_s23] sm:$0xf]  ;;  %v240_v3 = vld [vmem:[%s1105_s23 + $0x8] sm:$0xf] }
  0x11   : > { %245 = vst.msk [vmem:[#allocation2 + $0x11] sm:$0xf] %vm243_vm1, %v239_v1  ;;  %244 = vst.msk [vmem:[#allocation2 + $0x9] sm:$0xf] %vm243_vm1, %v238_v2  ;;  %v241_v5 = vld [vmem:[%s1105_s23 + $0xc] sm:$0xf]  ;;  %1014 = vmatpush3.bf16.msra.mxu0 %v1011_v36 }
  0x12   : > { %246 = vst.msk [vmem:[#allocation2 + $0x19] sm:$0xf] %vm243_vm1, %v240_v3  ;;  %247 = vst.msk [vmem:[#allocation2 + $0x21] sm:$0xf] %vm243_vm1, %v241_v5  ;;  %305 = vrot.lane.b32.xlu0 %v256_v6, %s1052_s25  ;;  %989 = vmatprep.subr.msk.mxu0 %vm476_vm2, %v457_v39  ;;  %v280_v40 = vld [vmem:[#allocation2 + $0x29] sm:$0xf] }
  0x13   : > { %v284_v43 = vld [vmem:[#allocation2 + $0x2a] sm:$0xf]  ;;  %v248_v5 = vld [vmem:[#allocation2] sm:$0xf] }
  0x15   : > { %990 = vmatpush3.msk.msra.mxu0 %vm476_vm2, %v457_v39 }
  0x18   : > { %v254_v7 = vld [vmem:[#allocation2 + $0x11] sm:$0xf]  ;;  %v253_v8 = vld [vmem:[#allocation2 + $0x9] sm:$0xf] }
  0x19   : > { %293 = vrot.lane.b32.xlu1 %v254_v7, %s1051_s24  ;;  %291 = vrot.lane.b32.xlu0 %v253_v8, %s1051_s24  ;;  %v255_v9 = vld [vmem:[#allocation2 + $0x19] sm:$0xf]  ;;  %v258_v10 = vld [vmem:[#allocation2 + $0x12] sm:$0xf]  ;;  %v257_v11 = vld [vmem:[#allocation2 + $0xa] sm:$0xf] }
  0x1a   : > { %v260_v12 = vld [vmem:[#allocation2 + $0x8] sm:$0xf]  ;;  %v259_v13 = vld [vmem:[#allocation2 + $0x1a] sm:$0xf]  ;;  %v261_v15 = vld [vmem:[#allocation2 + $0x10] sm:$0xf] }
  0x1b   : > { %v262_v14 = vld [vmem:[#allocation2 + $0x18] sm:$0xf]  ;;  %v264_v16 = vld [vmem:[#allocation2 + $0x9] sm:$0xf]  ;;  %v263_v17 = vld [vmem:[#allocation2 + $0x20] sm:$0xf] }
  0x1c   : > { %v266_v18 = vld [vmem:[#allocation2 + $0x19] sm:$0xf]  ;;  %v265_v19 = vld [vmem:[#allocation2 + $0x11] sm:$0xf]  ;;  %v268_v20 = vld [vmem:[#allocation2 + $0xa] sm:$0xf] }
  0x1d   : > { %295 = vrot.lane.b32.xlu1 %v255_v9, %s1051_s24  ;;  %309 = vrot.lane.b32.xlu0 %v258_v10, %s1052_s25  ;;  %v267_v21 = vld [vmem:[#allocation2 + $0x21] sm:$0xf]  ;;  %v270_v22 = vld [vmem:[#allocation2 + $0x1a] sm:$0xf]  ;;  %v269_v23 = vld [vmem:[#allocation2 + $0x12] sm:$0xf] }
  0x1e   : > { %v273_v24 = vld [vmem:[#allocation2 + $0x10] sm:$0xf]  ;;  %v271_v25 = vld [vmem:[#allocation2 + $0x22] sm:$0xf]  ;;  %v274_v27 = vld [vmem:[#allocation2 + $0x18] sm:$0xf] }
  0x1f   : > { %v275_v26 = vld [vmem:[#allocation2 + $0x20] sm:$0xf]  ;;  %v277_v30 = vld [vmem:[#allocation2 + $0x11] sm:$0xf]  ;;  %v278_v37 = vld [vmem:[#allocation2 + $0x19] sm:$0xf] }
  0x20   : > { %v279_v35 = vld [vmem:[#allocation2 + $0x21] sm:$0xf]  ;;  %v281_v38 = vld [vmem:[#allocation2 + $0x12] sm:$0xf]  ;;  %v282_v42 = vld [vmem:[#allocation2 + $0x1a] sm:$0xf] }
  0x21   : > { %307 = vrot.lane.b32.xlu1 %v257_v11, %s1052_s25  ;;  %321 = vrot.lane.b32.xlu0 %v260_v12, %s1053_s26  ;;  %v283_v41 = vld [vmem:[#allocation2 + $0x22] sm:$0xf]  ;;  %v249_v6 = vld [vmem:[#allocation2 + $0x8] sm:$0xf]  ;;  %v250_v12 = vld [vmem:[#allocation2 + $0x10] sm:$0xf] }
  0x25   : > { %311 = vrot.lane.b32.xlu1 %v259_v13, %s1052_s25  ;;  %325 = vrot.lane.b32.xlu0 %v262_v14, %s1053_s26  ;;  %v251_v13 = vld [vmem:[#allocation2 + $0x18] sm:$0xf] }
  0x29   : > { %323 = vrot.lane.b32.xlu1 %v261_v15, %s1053_s26  ;;  %337 = vrot.lane.b32.xlu0 %v264_v16, %s1054_s27 }
  0x2d   : > { %327 = vrot.lane.b32.xlu1 %v263_v17, %s1053_s26  ;;  %341 = vrot.lane.b32.xlu0 %v266_v18, %s1054_s27 }
  0x31   : > { %339 = vrot.lane.b32.xlu1 %v265_v19, %s1054_s27  ;;  %353 = vrot.lane.b32.xlu0 %v268_v20, %s1055_s28 }
  0x35   : > { %343 = vrot.lane.b32.xlu1 %v267_v21, %s1054_s27  ;;  %357 = vrot.lane.b32.xlu0 %v270_v22, %s1055_s28 }
  0x39   : > { %355 = vrot.lane.b32.xlu1 %v269_v23, %s1055_s28  ;;  %369 = vrot.lane.b32.xlu0 %v273_v24, %s1056_s29 }
  0x3d   : > { %359 = vrot.lane.b32.xlu1 %v271_v25, %s1055_s28  ;;  %373 = vrot.lane.b32.xlu0 %v275_v26, %s1056_s29 }
  0x41   : > { %371 = vrot.lane.b32.xlu1 %v274_v27, %s1056_s29  ;;  %385 = vrot.lane.b32.xlu0 %v277_v30, %s1057_s9 }
  0x45   : > { %375 = vrot.lane.b32.xlu1 %v276_v32, %s1056_s29  ;;  %389 = vrot.lane.b32.xlu0 %v279_v35, %s1057_s9 }
  0x49   : > { %387 = vrot.lane.b32.xlu1 %v278_v37, %s1057_s9  ;;  %401 = vrot.lane.b32.xlu0 %v281_v38, %s1058_s16 }
  0x4d   : > { %391 = vrot.lane.b32.xlu1 %v280_v40, %s1057_s9  ;;  %405 = vrot.lane.b32.xlu0 %v283_v41, %s1058_s16 }
  0x51   : > { %403 = vrot.lane.b32.xlu1 %v282_v42, %s1058_s16 }
  0x55   : > { %407 = vrot.lane.b32.xlu1 %v284_v43, %s1058_s16 }
  0x80   : > { %v290_v44 = vpop.permute.xlu0 %289 }
  0x81   : > { %v414_v8 = vsel %vm413_vm3, %v248_v5, %v290_v44 }
  0x84   : > { %v306_v45 = vpop.permute.xlu0 %305 }
  0x85   : > { %v419_v11 = vsel %vm418_vm4, %v414_v8, %v306_v45 }
  0x8b   : > { %v294_v46 = vpop.permute.xlu1 %293  ;;  %v292_v47 = vpop.permute.xlu0 %291 }
  0x8c   : > { %v415_v9 = vsel %vm413_vm3, %v249_v6, %v292_v47  ;;  %v416_v21 = vsel %vm413_vm3, %v250_v12, %v294_v46 }
  0x8f   : > { %v296_v48 = vpop.permute.xlu1 %295  ;;  %v310_v49 = vpop.permute.xlu0 %309 }
  0x90   : > { %v417_v22 = vsel %vm413_vm3, %v251_v13, %v296_v48  ;;  %v421_v25 = vsel %vm418_vm4, %v416_v21, %v310_v49 }
  0x93   : > { %v308_v50 = vpop.permute.xlu1 %307  ;;  %v322_v51 = vpop.permute.xlu0 %321 }
  0x94   : > { %v420_v14 = vsel %vm418_vm4, %v415_v9, %v308_v50  ;;  %v424_v15 = vsel %vm423_vm5, %v419_v11, %v322_v51  ;;  %v572_v50 = vld [vmem:[#allocation3 + $0x1] sm:$0xf]  ;;  %v596_v51 = vld [vmem:[#allocation3 + $0x28] sm:$0xf] }
  0x95   : > { %609 = vrot.lane.b32.xlu0 %v572_v50, %s1051_s24  ;;  %695 = vrot.lane.b32.xlu1 %v596_v51, %s1056_s29 }
  0x97   : > { %v312_v52 = vpop.permute.xlu1 %311  ;;  %v326_v53 = vpop.permute.xlu0 %325 }
  0x98   : > { %v422_v26 = vsel %vm418_vm4, %v417_v22, %v312_v52  ;;  %v426_v29 = vsel %vm423_vm5, %v421_v25, %v326_v53  ;;  %v576_v52 = vld [vmem:[#allocation3 + $0x2] sm:$0xf]  ;;  %v600_v53 = vld [vmem:[#allocation3 + $0x29] sm:$0xf] }
  0x99   : > { %625 = vrot.lane.b32.xlu0 %v576_v52, %s1052_s25  ;;  %711 = vrot.lane.b32.xlu1 %v600_v53, %s1057_s9  ;;  %v767_v22 = vld [vmem:[%s1308_s3 + $0x10] sm:$0xff] }
  0x9b   : > { %v324_v54 = vpop.permute.xlu1 %323  ;;  %v338_v55 = vpop.permute.xlu0 %337 }
  0x9c   : > { %v425_v16 = vsel %vm423_vm5, %v420_v14, %v324_v54  ;;  %v429_v19 = vsel %vm428_vm6, %v424_v15, %v338_v55  ;;  %v955_v54 = vld [vmem:[%s1307_s2] ss:$0 sm:$0xff] }
  0x9f   : > { %v328_v56 = vpop.permute.xlu1 %327  ;;  %v342_v57 = vpop.permute.xlu0 %341 }
  0xa0   : > { %v427_v30 = vsel %vm423_vm5, %v422_v26, %v328_v56  ;;  %v431_v34 = vsel %vm428_vm6, %v426_v29, %v342_v57 }
  0xa3   : > { %v340_v58 = vpop.permute.xlu1 %339  ;;  %v354_v59 = vpop.permute.xlu0 %353 }
  0xa4   : > { %v430_v20 = vsel %vm428_vm6, %v425_v16, %v340_v58  ;;  %v434_v23 = vsel %vm433_vm7, %v429_v19, %v354_v59 }
  0xa7   : > { %v344_v60 = vpop.permute.xlu1 %343  ;;  %v358_v61 = vpop.permute.xlu0 %357 }
  0xa8   : > { %v432_v35 = vsel %vm428_vm6, %v427_v30, %v344_v60  ;;  %v436_v38 = vsel %vm433_vm7, %v431_v34, %v358_v61 }
  0xab   : > { %v356_v62 = vpop.permute.xlu1 %355  ;;  %v370_v63 = vpop.permute.xlu0 %369 }
  0xac   : > { %v435_v24 = vsel %vm433_vm7, %v430_v20, %v356_v62  ;;  %v439_v27 = vsel %vm438_vm8, %v434_v23, %v370_v63  ;;  %v768_v23 = vld [vmem:[%s1308_s3 + $0x18] sm:$0xff] }
  0xaf   : > { %v360_v0 = vpop.permute.xlu1 %359  ;;  %v374_v1 = vpop.permute.xlu0 %373 }
  0xb0   : > { %v437_v39 = vsel %vm433_vm7, %v432_v35, %v360_v0  ;;  %v441_v42 = vsel %vm438_vm8, %v436_v38, %v374_v1 }
  0xb3   : > { %v372_v2 = vpop.permute.xlu1 %371  ;;  %v386_v3 = vpop.permute.xlu0 %385 }
  0xb4   : > { %v440_v28 = vsel %vm438_vm8, %v435_v24, %v372_v2  ;;  %v444_v31 = vsel %vm443_vm9, %v439_v27, %v386_v3  ;;  %v1019_v24 = vpack.c.bf16 %v768_v23, %v767_v22  ;;  %v769_v27 = vld [vmem:[%s1308_s3 + $0x20] sm:$0xf] }
  0xb7   : > { %v376_v4 = vpop.permute.xlu1 %375  ;;  %v390_v7 = vpop.permute.xlu0 %389 }
  0xb8   : > { %v442_v43 = vsel %vm438_vm8, %v437_v39, %v376_v4  ;;  %v446_v44 = vsel %vm443_vm9, %v441_v42, %v390_v7 }
  0xbb   : > { %v388_v10 = vpop.permute.xlu1 %387  ;;  %v402_v17 = vpop.permute.xlu0 %401 }
  0xbc   : > { %v445_v32 = vsel %vm443_vm9, %v440_v28, %v388_v10  ;;  %v449_v36 = vsel %vm448_vm10, %v444_v31, %v402_v17  ;;  %v765_v17 = vld [vmem:[%s1308_s3] sm:$0xff] }
  0xbf   : > { %v392_v18 = vpop.permute.xlu1 %391  ;;  %v406_v40 = vpop.permute.xlu0 %405 }
  0xc0   : > { %v447_v45 = vsel %vm443_vm9, %v442_v43, %v392_v18  ;;  %v451_v47 = vsel %vm448_vm10, %v446_v44, %v406_v40  ;;  %v766_v18 = vld [vmem:[%s1308_s3 + $0x8] sm:$0xff] }
  0xc1   : > { %v1015_v19 = vpack.c.bf16 %v766_v18, %v765_v17 }
  0xc3   : > { %v404_v33 = vpop.permute.xlu1 %403  ;;  %1016 = vmatprep.subr.bf16.mxu1 %v1015_v19 }
  0xc4   : > { %v450_v37 = vsel %vm448_vm10, %v445_v32, %v404_v33  ;;  %1018 = vmatpush3.bf16.msra.mxu1 %v1015_v19  ;;  %v604_v32 = vld [vmem:[#allocation3 + $0x2a] sm:$0xf] }
  0xc5   : > { %v469_v41 = vcombine.low %v449_v36, %v450_v37  ;;  %1020 = vmatprep.subr.bf16.mxu1 %v1019_v24 }
  0xc7   : > { %v408_v46 = vpop.permute.xlu1 %407  ;;  %991 = vmatprep.mubr.msk.f32.mxu0 %vm471_vm11, %v469_v41 }
  0xc8   : > { %v452_v48 = vsel %vm448_vm10, %v447_v45, %v408_v46  ;;  %1022 = vmatpush3.bf16.msra.mxu1 %v1019_v24 }
  0xc9   : > { %v470_v49 = vcombine.low %v451_v47, %v452_v48  ;;  %1002 = vmatprep.subr.msk.mxu1 %vm476_vm2, %v769_v27 }
  0xcb   : > { %992 = vmatmul.mubr.msk.f32.vlgmr.msra.gmra.mrb[0].mxu0 %vm471_vm11, %v470_v49 }
  0xcc   : > { %1003 = vmatpush3.msk.msra.mxu1 %vm476_vm2, %v769_v27 }
 0x107   : > { %v696_v34 = vpop.permute.xlu1 %695  ;;  %v610_v35 = vpop.permute.xlu0 %609 }
 0x10b   : > { %v712_v36 = vpop.permute.xlu1 %711  ;;  %v626_v37 = vpop.permute.xlu0 %625 }
 0x19e   : > { %v993_v55 = vpop.f32.mrb[0].mxu0 }
 0x19f   : > { %v552_v56 = vadd.f32 %v993_v55, %v955_v54  ;;  %v546_v57 = vpop.f32.mrb[1].mxu0 }
 0x1a0   : > { %v547_v58 = vadd.f32 %v955_v54, %v546_v57 }
 0x1a1   : > { %v556_v59 = vmax.f32 %v552_v56, 0.0 }
 0x1a2   : > { %v555_v60 = vmax.f32 %v547_v58, 0.0 }
 0x1a3   : > { %v560_v61 = vcombine.high %v556_v59, %v556_v59  ;;  %566 = vst.msk [vmem:[#allocation3 + $0x19] sm:$0xf] %vm243_vm1, %v556_v59 }
 0x1a4   : > { %v559_v62 = vcombine.high %v555_v60, %v555_v60  ;;  %564 = vst.msk [vmem:[#allocation3 + $0x9] sm:$0xf] %vm243_vm1, %v555_v60 }
 0x1a5   : > { %567 = vst.msk [vmem:[#allocation3 + $0x21] sm:$0xf] %vm243_vm1, %v560_v61  ;;  %v568_v61 = vld [vmem:[#allocation3] sm:$0xf] }
 0x1a6   : > { %565 = vst.msk [vmem:[#allocation3 + $0x11] sm:$0xf] %vm243_vm1, %v559_v62 }
 0x1aa   : > { %v582_v63 = vld [vmem:[#allocation3 + $0x18] sm:$0xf] }
 0x1ab   : > { %v575_v0 = vld [vmem:[#allocation3 + $0x19] sm:$0xf]  ;;  %645 = vrot.lane.b32.xlu0 %v582_v63, %s1053_s26  ;;  %v580_v6 = vld [vmem:[#allocation3 + $0x8] sm:$0xf] }
 0x1ac   : > { %615 = vrot.lane.b32.xlu1 %v575_v0, %s1051_s24  ;;  %v586_v1 = vld [vmem:[#allocation3 + $0x19] sm:$0xf]  ;;  %v584_v8 = vld [vmem:[#allocation3 + $0x9] sm:$0xf]  ;;  %v595_v11 = vld [vmem:[#allocation3 + $0x20] sm:$0xf] }
 0x1ad   : > { %v579_v2 = vld [vmem:[#allocation3 + $0x1a] sm:$0xf]  ;;  %v588_v9 = vld [vmem:[#allocation3 + $0xa] sm:$0xf]  ;;  %v599_v13 = vld [vmem:[#allocation3 + $0x21] sm:$0xf] }
 0x1ae   : > { %v590_v3 = vld [vmem:[#allocation3 + $0x1a] sm:$0xf]  ;;  %v573_v10 = vld [vmem:[#allocation3 + $0x9] sm:$0xf]  ;;  %v583_v14 = vld [vmem:[#allocation3 + $0x20] sm:$0xf] }
 0x1af   : > { %661 = vrot.lane.b32.xlu0 %v586_v1, %s1054_s27  ;;  %v594_v4 = vld [vmem:[#allocation3 + $0x18] sm:$0xf]  ;;  %v577_v12 = vld [vmem:[#allocation3 + $0xa] sm:$0xf]  ;;  %v587_v15 = vld [vmem:[#allocation3 + $0x21] sm:$0xf] }
 0x1b0   : > { %631 = vrot.lane.b32.xlu1 %v579_v2, %s1052_s25  ;;  %v598_v5 = vld [vmem:[#allocation3 + $0x19] sm:$0xf]  ;;  %v574_v16 = vld [vmem:[#allocation3 + $0x11] sm:$0xf]  ;;  %v591_v20 = vld [vmem:[#allocation3 + $0x22] sm:$0xf] }
 0x1b1   : > { %v602_v7 = vld [vmem:[#allocation3 + $0x1a] sm:$0xf]  ;;  %v578_v21 = vld [vmem:[#allocation3 + $0x12] sm:$0xf]  ;;  %v603_v33 = vld [vmem:[#allocation3 + $0x22] sm:$0xf] }
 0x1b2   : > { %v581_v25 = vld [vmem:[#allocation3 + $0x10] sm:$0xf]  ;;  %v571_v1 = vld [vmem:[#allocation3 + $0x18] sm:$0xf] }
 0x1b3   : > { %677 = vrot.lane.b32.xlu0 %v590_v3, %s1055_s28  ;;  %v593_v26 = vld [vmem:[#allocation3 + $0x10] sm:$0xf]  ;;  %v733_v3 = vsel %vm413_vm3, %v568_v61, %v610_v35 }
 0x1b4   : > { %691 = vrot.lane.b32.xlu1 %v594_v4, %s1056_s29  ;;  %v585_v28 = vld [vmem:[#allocation3 + $0x11] sm:$0xf] }
 0x1b5   : > { %v597_v29 = vld [vmem:[#allocation3 + $0x11] sm:$0xf] }
 0x1b6   : > { %v589_v30 = vld [vmem:[#allocation3 + $0x12] sm:$0xf] }
 0x1b7   : > { %641 = vrot.lane.b32.xlu0 %v580_v6, %s1053_s26  ;;  %v601_v31 = vld [vmem:[#allocation3 + $0x12] sm:$0xf]  ;;  %v569_v6 = vld [vmem:[#allocation3 + $0x8] sm:$0xf] }
 0x1b8   : > { %707 = vrot.lane.b32.xlu1 %v598_v5, %s1057_s9  ;;  %v570_v56 = vld [vmem:[#allocation3 + $0x10] sm:$0xf] }
 0x1bb   : > { %657 = vrot.lane.b32.xlu0 %v584_v8, %s1054_s27 }
 0x1bc   : > { %723 = vrot.lane.b32.xlu1 %v602_v7, %s1058_s16 }
 0x1bf   : > { %673 = vrot.lane.b32.xlu0 %v588_v9, %s1055_s28 }
 0x1c0   : > { %611 = vrot.lane.b32.xlu1 %v573_v10, %s1051_s24 }
 0x1c3   : > { %693 = vrot.lane.b32.xlu0 %v595_v11, %s1056_s29 }
 0x1c4   : > { %627 = vrot.lane.b32.xlu1 %v577_v12, %s1052_s25  ;;  %v737_v12 = vsel %vm418_vm4, %v733_v3, %v626_v37 }
 0x1c7   : > { %709 = vrot.lane.b32.xlu0 %v599_v13, %s1057_s9 }
 0x1c8   : > { %647 = vrot.lane.b32.xlu1 %v583_v14, %s1053_s26 }
 0x1cb   : > { %613 = vrot.lane.b32.xlu0 %v574_v16, %s1051_s24 }
 0x1cc   : > { %663 = vrot.lane.b32.xlu1 %v587_v15, %s1054_s27 }
 0x1cf   : > { %629 = vrot.lane.b32.xlu0 %v578_v21, %s1052_s25 }
 0x1d0   : > { %679 = vrot.lane.b32.xlu1 %v591_v20, %s1055_s28 }
 0x1d3   : > { %689 = vrot.lane.b32.xlu0 %v593_v26, %s1056_s29  ;;  %s224_s29 = scalar_lea.vmem %s1310_s5, %s965_s20 }
 0x1d4   : > { %643 = vrot.lane.b32.xlu1 %v581_v25, %s1053_s26 }
 0x1d7   : > { %705 = vrot.lane.b32.xlu0 %v597_v29, %s1057_s9 }
 0x1d8   : > { %659 = vrot.lane.b32.xlu1 %v585_v28, %s1054_s27 }
 0x1db   : > { %721 = vrot.lane.b32.xlu0 %v601_v31, %s1058_s16 }
 0x1dc   : > { %675 = vrot.lane.b32.xlu1 %v589_v30, %s1055_s28 }
 0x1df   : > { %725 = vrot.lane.b32.xlu0 %v603_v33, %s1058_s16 }
 0x1e0   : > { %727 = vrot.lane.b32.xlu1 %v604_v32, %s1058_s16 }
 0x21d   : > { %v646_v38 = vpop.permute.xlu0 %645 }
 0x21e   : > { %v616_v39 = vpop.permute.xlu1 %615 }
 0x21f   : > { %v736_v2 = vsel %vm413_vm3, %v571_v1, %v616_v39 }
 0x221   : > { %v662_v40 = vpop.permute.xlu0 %661 }
 0x222   : > { %v632_v41 = vpop.permute.xlu1 %631 }
 0x223   : > { %v740_v4 = vsel %vm418_vm4, %v736_v2, %v632_v41  ;;  %v1040_v41 = vld [vmem:[%s1105_s23 + $0x8] sm:$0xff]  }
 0x225   : > { %v678_v42 = vpop.permute.xlu0 %677 }
 0x226   : > { %v692_v43 = vpop.permute.xlu1 %691 }
 0x229   : > { %v642_v45 = vpop.permute.xlu0 %641 }
 0x22a   : > { %v708_v44 = vpop.permute.xlu1 %707  ;;  %v741_v16 = vsel %vm423_vm5, %v737_v12, %v642_v45 }
 0x22d   : > { %v658_v47 = vpop.permute.xlu0 %657 }
 0x22e   : > { %v724_v46 = vpop.permute.xlu1 %723  ;;  %v745_v18 = vsel %vm428_vm6, %v741_v16, %v658_v47 }
 0x231   : > { %v674_v48 = vpop.permute.xlu0 %673 }
 0x232   : > { %v612_v49 = vpop.permute.xlu1 %611  ;;  %v749_v22 = vsel %vm433_vm7, %v745_v18, %v674_v48 }
 0x233   : > { %v734_v10 = vsel %vm413_vm3, %v569_v6, %v612_v49 }
 0x235   : > { %v694_v50 = vpop.permute.xlu0 %693 }
 0x236   : > { %v628_v51 = vpop.permute.xlu1 %627 }
 0x237   : > { %v738_v13 = vsel %vm418_vm4, %v734_v10, %v628_v51 }
 0x239   : > { %v710_v52 = vpop.permute.xlu0 %709 }
 0x23a   : > { %v648_v53 = vpop.permute.xlu1 %647 }
 0x23b   : > { %v744_v7 = vsel %vm423_vm5, %v740_v4, %v648_v53 }
 0x23d   : > { %v614_v55 = vpop.permute.xlu0 %613 }
 0x23e   : > { %v664_v54 = vpop.permute.xlu1 %663  ;;  %v735_v57 = vsel %vm413_vm3, %v570_v56, %v614_v55 }
 0x23f   : > { %v748_v11 = vsel %vm428_vm6, %v744_v7, %v664_v54 }
 0x241   : > { %v630_v59 = vpop.permute.xlu0 %629 }
 0x242   : > { %v680_v58 = vpop.permute.xlu1 %679  ;;  %v739_v60 = vsel %vm418_vm4, %v735_v57, %v630_v59 }
 0x243   : > { %v743_v62 = vsel %vm423_vm5, %v739_v60, %v646_v38  ;;  %v752_v14 = vsel %vm433_vm7, %v748_v11, %v680_v58 }
 0x244   : > { %v747_v5 = vsel %vm428_vm6, %v743_v62, %v662_v40  ;;  %v756_v23 = vsel %vm438_vm8, %v752_v14, %v696_v34 }
 0x245   : > { %v690_v0 = vpop.permute.xlu0 %689  ;;  %v751_v15 = vsel %vm433_vm7, %v747_v5, %v678_v42  ;;  %v760_v31 = vsel %vm443_vm9, %v756_v23, %v712_v36  ;;  %v959_v36 = vld [vmem:[%s1309_s4] ss:$0 sm:$0xff] }
 0x246   : > { %v644_v63 = vpop.permute.xlu1 %643  ;;  %v755_v25 = vsel %vm438_vm8, %v751_v15, %v694_v50  ;;  %v753_v26 = vsel %vm438_vm8, %v749_v22, %v690_v0 }
 0x247   : > { %v742_v17 = vsel %vm423_vm5, %v738_v13, %v644_v63  ;;  %v759_v34 = vsel %vm443_vm9, %v755_v25, %v710_v52 }
 0x249   : > { %v706_v9 = vpop.permute.xlu0 %705 }
 0x24a   : > { %v660_v8 = vpop.permute.xlu1 %659  ;;  %v757_v28 = vsel %vm443_vm9, %v753_v26, %v706_v9 }
 0x24b   : > { %v746_v19 = vsel %vm428_vm6, %v742_v17, %v660_v8 }
 0x24d   : > { %v722_v21 = vpop.permute.xlu0 %721 }
 0x24e   : > { %v676_v20 = vpop.permute.xlu1 %675  ;;  %v761_v30 = vsel %vm448_vm10, %v757_v28, %v722_v21 }
 0x24f   : > { %v750_v24 = vsel %vm433_vm7, %v746_v19, %v676_v20 }
 0x250   : > { %v754_v27 = vsel %vm438_vm8, %v750_v24, %v692_v43  ;;  %v1041_v43 = vld [vmem:[%s1105_s23] sm:$0xff]  }
 0x251   : > { %v758_v29 = vsel %vm443_vm9, %v754_v27, %v708_v44  ;;  %v726_v33 = vpop.permute.xlu0 %725 }
 0x252   : > { %v728_v32 = vpop.permute.xlu1 %727  ;;  %v762_v35 = vsel %vm448_vm10, %v758_v29, %v724_v46  ;;  %v763_v38 = vsel %vm448_vm10, %v759_v34, %v726_v33 }
 0x253   : > { %v764_v37 = vsel %vm448_vm10, %v760_v31, %v728_v32  ;;  %v781_v39 = vcombine.low %v761_v30, %v762_v35 }
 0x254   : > { %v782_v40 = vcombine.low %v763_v38, %v764_v37 }
 0x255   : > { %1004 = vmatprep.mubr.msk.f32.mxu1 %vm471_vm11, %v781_v39 }
 0x256   : > { %1005 = vmatmul.mubr.msk.f32.vlgmr.msra.gmra.mrb[0].mxu1 %vm471_vm11, %v782_v40 }
 0x329   : > { %v1006_v42 = vpop.f32.mrb[0].mxu1 }
 0x32a   : > { %v862_v44 = vadd.f32 %v1006_v42, %v959_v36  ;;  %v856_v45 = vpop.f32.mrb[1].mxu1 }
 0x32b   : > { %v857_v46 = vadd.f32 %v959_v36, %v856_v45 }
 0x32c   : > { %v878_v47 = vadd.f32 %v1040_v41, %v862_v44 }
 0x32d   : > { %v877_v48 = vadd.f32 %v1041_v43, %v857_v46 }
 0x32e   : > { %v880_v49 = vmax.f32 %v878_v47, 0.0 }
 0x32f   : > { %v879_v50 = vmax.f32 %v877_v48, 0.0 }
 0x330   : > { %v884_v51 = vcombine.high %v880_v49, %v880_v49  ;;  %889 = vst.msk [vmem:[%s224_s29 + $0x8] sm:$0xf] %vm243_vm1, %v880_v49 }
 0x331   : > { %v883_v52 = vcombine.high %v879_v50, %v879_v50  ;;  %887 = vst.msk [vmem:[%s224_s29] sm:$0xf] %vm243_vm1, %v879_v50 }
 0x332   : > { %890 = vst.msk [vmem:[%s224_s29 + $0xc] sm:$0xf] %vm243_vm1, %v884_v51 }
 0x333   : > { %888 = vst.msk [vmem:[%s224_s29 + $0x4] sm:$0xf] %vm243_vm1, %v883_v52 }
 0x334 PF: > { %s15_s18 = sadd.s32 1, %s1048_s18  }
 0x335   : > { %p12_p4 = scmp.ge.s32.totalorder %s15_s18, 4  }
 0x337   :  { %14 = sbr.rel (!%p12_p4) target bundleno = 1 (0x1), region = 74 }

// kernel: hourglass_forward.19
= control target key start
LH: loop header
LB: loop body
LE: loop exit
PB: predicated region body
PF: predicated region fallthrough
CT: control target
= control target key end

     0   :  { %s342_s9 = smov 0   ;;  %s396_s0 = inlined_call_operand.vmem [shape: f32[2,8,4,8], index: 0, kind: input, shape index: {}]   ;;  %s397_s1 = inlined_call_operand.vmem [shape: f32[2,4,4,4], index: 1, kind: input, shape index: {}]   ;;  %s398_s2 = inlined_call_operand.vmem [shape: f32[2,8,4,8], index: 2, kind: output, shape index: {}]  }
   0x1 LB: > { %s293_s10 = sadd.s32 4294967295, %s324_s9   ;;  %p297_p0 = scmp.ge.s32.totalorder %s324_s9, 1  ;;  %s324_s9 = sphi %s342_s9, %s12_s9  }
   0x2   : > { %p122_p1 = scmp.lt.s32.totalorder %s324_s9, 3 }
   0x4   : > { %p123_p2 = pnand %p297_p0, %p122_p1 }
   0x5   : > { %p149_p3 = scmp.lt.s32.totalorder (!%p123_p2), %s293_s10, 1  ;;  %s326_s19 = smov (!%p123_p2), 4   ;;  %vm184_vm0 = vcmask (!%p123_p2), 27648   ;;  %vm217_vm1 = vcmask (!%p123_p2), 60448  }
   0x6   : > { %126 = sbr.rel (%p123_p2) target bundleno = 140 (0x8c), region = 28 }
   0xd   : > { %s400_s10 = smov (!%p149_p3, %s293_s10), 1 }
   0xe   : > { %s307_s11 = sshll.u32 %s400_s10, 4  ;;  %s306_s12 = sshll.u32 %s400_s10, 5 }
   0xf   : > { %s158_s15 = scalar_lea.vmem %s397_s1, %s307_s11  ;;  %s153_s18 = scalar_lea.vmem %s396_s0, %s306_s12 }
  0x10   : > { %v166_v0 = vld [vmem:[%s158_s15 + $0x8] sm:$0xf]  ;;  %v164_v1 = vld [vmem:[%s158_s15] sm:$0xf]  ;;  %v167_v2 = vld [vmem:[%s158_s15 + $0xc] sm:$0xf]  ;;  %s359_s22 = scalar_lea.vmem %s398_s2, %s306_s12 }
  0x11   : > { %201 = vrot.lane.b32.xlu1 %v166_v0, %s326_s19  ;;  %197 = vrot.lane.b32.xlu0 %v164_v1, %s326_s19  ;;  %v165_v3 = vld [vmem:[%s158_s15 + $0x4] sm:$0xf]  ;;  %v172_v4 = vld [vmem:[%s153_s18 + $0x10] sm:$0xf] }
  0x12   : > { %v173_v5 = vld [vmem:[%s153_s18 + $0x14] sm:$0xf]  ;;  %v180_v6 = vadd.f32 %v172_v4, %v166_v0  ;;  %v168_v7 = vld [vmem:[%s153_s18] sm:$0xf]  ;;  %v169_v8 = vld [vmem:[%s153_s18 + $0x4] sm:$0xf] }
  0x13   : > { %v181_v9 = vadd.f32 %v173_v5, %v166_v0  ;;  %v176_v10 = vadd.f32 %v168_v7, %v164_v1  ;;  %v177_v11 = vadd.f32 %v169_v8, %v164_v1  ;;  %v174_v12 = vld [vmem:[%s153_s18 + $0x18] sm:$0xf]  ;;  %v175_v13 = vld [vmem:[%s153_s18 + $0x1c] sm:$0xf]  ;;  %v170_v14 = vld [vmem:[%s153_s18 + $0x8] sm:$0xf] }
  0x14   : > { %189 = vst.msk [vmem:[%s359_s22 + $0x10] sm:$0xf] %vm184_vm0, %v180_v6  ;;  %v182_v15 = vadd.f32 %v174_v12, %v167_v2  ;;  %v183_v16 = vadd.f32 %v175_v13, %v167_v2  ;;  %v171_v17 = vld [vmem:[%s153_s18 + $0xc] sm:$0xf]  ;;  %v178_v18 = vadd.f32 %v170_v14, %v165_v3 }
  0x15   : > { %203 = vrot.lane.b32.xlu1 %v167_v2, %s326_s19  ;;  %199 = vrot.lane.b32.xlu0 %v165_v3, %s326_s19  ;;  %190 = vst.msk [vmem:[%s359_s22 + $0x14] sm:$0xf] %vm184_vm0, %v181_v9  ;;  %185 = vst.msk [vmem:[%s359_s22] sm:$0xf] %vm184_vm0, %v176_v10  ;;  %v179_v19 = vadd.f32 %v171_v17, %v165_v3 }
  0x16   : > { %186 = vst.msk [vmem:[%s359_s22 + $0x4] sm:$0xf] %vm184_vm0, %v177_v11  ;;  %191 = vst.msk [vmem:[%s359_s22 + $0x18] sm:$0xf] %vm184_vm0, %v182_v15 }
  0x17   : > { %192 = vst.msk [vmem:[%s359_s22 + $0x1c] sm:$0xf] %vm184_vm0, %v183_v16  ;;  %187 = vst.msk [vmem:[%s359_s22 + $0x8] sm:$0xf] %vm184_vm0, %v178_v18 }
  0x18   : > { %188 = vst.msk [vmem:[%s359_s22 + $0xc] sm:$0xf] %vm184_vm0, %v179_v19 }
  0x83   : > { %v202_v20 = vpop.permute.xlu1 %201  ;;  %v198_v21 = vpop.permute.xlu0 %197 }
  0x84   : > { %v213_v22 = vadd.f32 %v202_v20, %v172_v4  ;;  %v214_v23 = vadd.f32 %v202_v20, %v173_v5  ;;  %v209_v24 = vadd.f32 %v198_v21, %v168_v7  ;;  %v210_v25 = vadd.f32 %v198_v21, %v169_v8 }
  0x86   : > { %222 = vst.msk [vmem:[%s359_s22 + $0x10] sm:$0xf] %vm217_vm1, %v213_v22  ;;  %223 = vst.msk [vmem:[%s359_s22 + $0x14] sm:$0xf] %vm217_vm1, %v214_v23 }
  0x87   : > { %218 = vst.msk [vmem:[%s359_s22] sm:$0xf] %vm217_vm1, %v209_v24  ;;  %219 = vst.msk [vmem:[%s359_s22 + $0x4] sm:$0xf] %vm217_vm1, %v210_v25  ;;  %v204_v26 = vpop.permute.xlu1 %203  ;;  %v200_v27 = vpop.permute.xlu0 %199 }
  0x88   : > { %v215_v28 = vadd.f32 %v204_v26, %v174_v12  ;;  %v216_v29 = vadd.f32 %v204_v26, %v175_v13  ;;  %v211_v30 = vadd.f32 %v200_v27, %v170_v14  ;;  %v212_v31 = vadd.f32 %v200_v27, %v171_v17 }
  0x8a   : > { %224 = vst.msk [vmem:[%s359_s22 + $0x18] sm:$0xf] %vm217_vm1, %v215_v28  ;;  %225 = vst.msk [vmem:[%s359_s22 + $0x1c] sm:$0xf] %vm217_vm1, %v216_v29 }
  0x8b   : > { %220 = vst.msk [vmem:[%s359_s22 + $0x8] sm:$0xf] %vm217_vm1, %v211_v30  ;;  %221 = vst.msk [vmem:[%s359_s22 + $0xc] sm:$0xf] %vm217_vm1, %v212_v31 }
  0x8c PF: > { %s12_s9 = sadd.s32 1, %s324_s9  }
  0x8d   : > { %p9_p4 = scmp.ge.s32.totalorder %s12_s9, 4  }
  0x8f   :  { %11 = sbr.rel (!%p9_p4) target bundleno = 1 (0x1), region = 61 }

// kernel: hourglass_forward.21
= control target key start
LH: loop header
LB: loop body
LE: loop exit
PB: predicated region body
PF: predicated region fallthrough
CT: control target
= control target key end

     0   :  { %s402_s9 = smov 0   ;;  %s524_s0 = inlined_call_operand.vmem [shape: f32[2,16,8,8], index: 0, kind: input, shape index: {}]   ;;  %s525_s1 = inlined_call_operand.vmem [shape: f32[2,8,8,4], index: 1, kind: input, shape index: {}]   ;;  %s526_s2 = inlined_call_operand.vmem [shape: f32[2,16,8,8], index: 2, kind: output, shape index: {}]  }
   0x1 LB: > { %s353_s10 = sadd.s32 4294967295, %s384_s9   ;;  %p357_p0 = scmp.ge.s32.totalorder %s384_s9, 1  ;;  %s384_s9 = sphi %s402_s9, %s12_s9  }
   0x2   : > { %p122_p1 = scmp.lt.s32.totalorder %s384_s9, 3 }
   0x4   : > { %p123_p2 = pnand %p357_p0, %p122_p1 }
   0x5   : > { %p149_p3 = scmp.lt.s32.totalorder (!%p123_p2), %s353_s10, 1  ;;  %s386_s19 = smov (!%p123_p2), 4   ;;  %vm204_vm0 = vcmask (!%p123_p2), 31744   ;;  %vm269_vm1 = vcmask (!%p123_p2), 64544  }
   0x6   : > { %126 = sbr.rel (%p123_p2) target bundleno = 148 (0x94), region = 28 }
   0xd   : > { %s528_s10 = smov (!%p149_p3, %s353_s10), 1 }
   0xe   : > { %s367_s11 = sshll.u32 %s528_s10, 6  ;;  %s366_s12 = sshll.u32 %s528_s10, 7 }
   0xf   : > { %s413_s15 = scalar_lea.vmem %s525_s1, %s367_s11  ;;  %s419_s18 = scalar_lea.vmem %s524_s0, %s366_s12 }
  0x10   : > { %v166_v0 = vld [vmem:[%s413_s15 + $0x10] sm:$0xff]  ;;  %v164_v1 = vld [vmem:[%s413_s15] sm:$0xff]  ;;  %v167_v2 = vld [vmem:[%s413_s15 + $0x18] sm:$0xff]  ;;  %s429_s22 = scalar_lea.vmem %s526_s2, %s366_s12 }
  0x11   : > { %233 = vrot.lane.b32.xlu1 %v166_v0, %s386_s19  ;;  %229 = vrot.lane.b32.xlu0 %v164_v1, %s386_s19  ;;  %v165_v3 = vld [vmem:[%s413_s15 + $0x8] sm:$0xff]  ;;  %v176_v4 = vld [vmem:[%s419_s18 + $0x20] sm:$0xff] }
  0x12   : > { %v177_v5 = vld [vmem:[%s419_s18 + $0x28] sm:$0xff]  ;;  %v172_v6 = vld [vmem:[%s419_s18] sm:$0xff]  ;;  %v192_v9 = vadd.f32 %v176_v4, %v166_v0  ;;  %v178_v13 = vld [vmem:[%s419_s18 + $0x30] sm:$0xff] }
  0x13   : > { %v169_v7 = vld [vmem:[%s413_s15 + $0x28] sm:$0xff]  ;;  %v168_v8 = vld [vmem:[%s413_s15 + $0x20] sm:$0xff]  ;;  %v193_v10 = vadd.f32 %v177_v5, %v166_v0  ;;  %v188_v12 = vadd.f32 %v172_v6, %v164_v1  ;;  %v179_v14 = vld [vmem:[%s419_s18 + $0x38] sm:$0xff]  ;;  %v194_v17 = vadd.f32 %v178_v13, %v167_v2 }
  0x14   : > { %v173_v11 = vld [vmem:[%s419_s18 + $0x8] sm:$0xff]  ;;  %v171_v15 = vld [vmem:[%s413_s15 + $0x38] sm:$0xff]  ;;  %v195_v18 = vadd.f32 %v179_v14, %v167_v2  ;;  %v174_v19 = vld [vmem:[%s419_s18 + $0x10] sm:$0xff]  ;;  %209 = vst.msk [vmem:[%s429_s22 + $0x20] sm:$0xff] %vm204_vm0, %v192_v9 }
  0x15   : > { %235 = vrot.lane.b32.xlu1 %v167_v2, %s386_s19  ;;  %231 = vrot.lane.b32.xlu0 %v165_v3, %s386_s19  ;;  %v189_v16 = vadd.f32 %v173_v11, %v164_v1  ;;  %v175_v20 = vld [vmem:[%s419_s18 + $0x18] sm:$0xff]  ;;  %210 = vst.msk [vmem:[%s429_s22 + $0x28] sm:$0xff] %vm204_vm0, %v193_v10  ;;  %v190_v21 = vadd.f32 %v174_v19, %v165_v3 }
  0x16   : > { %205 = vst.msk [vmem:[%s429_s22] sm:$0xff] %vm204_vm0, %v188_v12  ;;  %v191_v22 = vadd.f32 %v175_v20, %v165_v3  ;;  %v182_v23 = vld [vmem:[%s419_s18 + $0x50] sm:$0xff]  ;;  %v183_v24 = vld [vmem:[%s419_s18 + $0x58] sm:$0xff]  ;;  %v180_v25 = vld [vmem:[%s419_s18 + $0x40] sm:$0xff] }
  0x17   : > { %206 = vst.msk [vmem:[%s429_s22 + $0x8] sm:$0xff] %vm204_vm0, %v189_v16  ;;  %211 = vst.msk [vmem:[%s429_s22 + $0x30] sm:$0xff] %vm204_vm0, %v194_v17  ;;  %v198_v26 = vadd.f32 %v182_v23, %v169_v7  ;;  %v199_v27 = vadd.f32 %v183_v24, %v169_v7  ;;  %v181_v28 = vld [vmem:[%s419_s18 + $0x48] sm:$0xff]  ;;  %v196_v29 = vadd.f32 %v180_v25, %v168_v8  ;;  %v186_v30 = vld [vmem:[%s419_s18 + $0x70] sm:$0xff] }
  0x18   : > { %212 = vst.msk [vmem:[%s429_s22 + $0x38] sm:$0xff] %vm204_vm0, %v195_v18  ;;  %v187_v31 = vld [vmem:[%s419_s18 + $0x78] sm:$0xff]  ;;  %v170_v32 = vld [vmem:[%s413_s15 + $0x30] sm:$0xff]  ;;  %207 = vst.msk [vmem:[%s429_s22 + $0x10] sm:$0xff] %vm204_vm0, %v190_v21  ;;  %v197_v33 = vadd.f32 %v181_v28, %v168_v8  ;;  %v202_v34 = vadd.f32 %v186_v30, %v171_v15 }
  0x19   : > { %208 = vst.msk [vmem:[%s429_s22 + $0x18] sm:$0xff] %vm204_vm0, %v191_v22  ;;  %v203_v35 = vadd.f32 %v187_v31, %v171_v15  ;;  %v184_v36 = vld [vmem:[%s419_s18 + $0x60] sm:$0xff]  ;;  %v185_v37 = vld [vmem:[%s419_s18 + $0x68] sm:$0xff]  ;;  %239 = vrot.lane.b32.xlu1 %v169_v7, %s386_s19 }
  0x1a   : > { %237 = vrot.lane.b32.xlu0 %v168_v8, %s386_s19  ;;  %215 = vst.msk [vmem:[%s429_s22 + $0x50] sm:$0xff] %vm204_vm0, %v198_v26  ;;  %216 = vst.msk [vmem:[%s429_s22 + $0x58] sm:$0xff] %vm204_vm0, %v199_v27  ;;  %v200_v38 = vadd.f32 %v184_v36, %v170_v32  ;;  %v201_v39 = vadd.f32 %v185_v37, %v170_v32 }
  0x1b   : > { %213 = vst.msk [vmem:[%s429_s22 + $0x40] sm:$0xff] %vm204_vm0, %v196_v29  ;;  %214 = vst.msk [vmem:[%s429_s22 + $0x48] sm:$0xff] %vm204_vm0, %v197_v33 }
  0x1c   : > { %219 = vst.msk [vmem:[%s429_s22 + $0x70] sm:$0xff] %vm204_vm0, %v202_v34  ;;  %220 = vst.msk [vmem:[%s429_s22 + $0x78] sm:$0xff] %vm204_vm0, %v203_v35 }
  0x1d   : > { %217 = vst.msk [vmem:[%s429_s22 + $0x60] sm:$0xff] %vm204_vm0, %v200_v38  ;;  %218 = vst.msk [vmem:[%s429_s22 + $0x68] sm:$0xff] %vm204_vm0, %v201_v39  ;;  %243 = vrot.lane.b32.xlu1 %v171_v15, %s386_s19 }
  0x1e   : > { %241 = vrot.lane.b32.xlu0 %v170_v32, %s386_s19 }
  0x83   : > { %v234_v40 = vpop.permute.xlu1 %233  ;;  %v230_v41 = vpop.permute.xlu0 %229 }
  0x84   : > { %v257_v42 = vadd.f32 %v234_v40, %v176_v4  ;;  %v258_v43 = vadd.f32 %v234_v40, %v177_v5  ;;  %v253_v44 = vadd.f32 %v230_v41, %v172_v6  ;;  %v254_v45 = vadd.f32 %v230_v41, %v173_v11 }
  0x86   : > { %274 = vst.msk [vmem:[%s429_s22 + $0x20] sm:$0xff] %vm269_vm1, %v257_v42  ;;  %275 = vst.msk [vmem:[%s429_s22 + $0x28] sm:$0xff] %vm269_vm1, %v258_v43 }
  0x87   : > { %270 = vst.msk [vmem:[%s429_s22] sm:$0xff] %vm269_vm1, %v253_v44  ;;  %271 = vst.msk [vmem:[%s429_s22 + $0x8] sm:$0xff] %vm269_vm1, %v254_v45  ;;  %v236_v46 = vpop.permute.xlu1 %235  ;;  %v232_v47 = vpop.permute.xlu0 %231 }
  0x88   : > { %v259_v48 = vadd.f32 %v236_v46, %v178_v13  ;;  %v260_v49 = vadd.f32 %v236_v46, %v179_v14  ;;  %v255_v50 = vadd.f32 %v232_v47, %v174_v19  ;;  %v256_v51 = vadd.f32 %v232_v47, %v175_v20 }
  0x8a   : > { %276 = vst.msk [vmem:[%s429_s22 + $0x30] sm:$0xff] %vm269_vm1, %v259_v48  ;;  %277 = vst.msk [vmem:[%s429_s22 + $0x38] sm:$0xff] %vm269_vm1, %v260_v49 }
  0x8b   : > { %272 = vst.msk [vmem:[%s429_s22 + $0x10] sm:$0xff] %vm269_vm1, %v255_v50  ;;  %273 = vst.msk [vmem:[%s429_s22 + $0x18] sm:$0xff] %vm269_vm1, %v256_v51  ;;  %v240_v52 = vpop.permute.xlu1 %239 }
  0x8c   : > { %v238_v53 = vpop.permute.xlu0 %237  ;;  %v263_v54 = vadd.f32 %v240_v52, %v182_v23  ;;  %v264_v55 = vadd.f32 %v240_v52, %v183_v24 }
  0x8d   : > { %v261_v56 = vadd.f32 %v238_v53, %v180_v25  ;;  %v262_v57 = vadd.f32 %v238_v53, %v181_v28 }
  0x8e   : > { %280 = vst.msk [vmem:[%s429_s22 + $0x50] sm:$0xff] %vm269_vm1, %v263_v54  ;;  %281 = vst.msk [vmem:[%s429_s22 + $0x58] sm:$0xff] %vm269_vm1, %v264_v55 }
  0x8f   : > { %278 = vst.msk [vmem:[%s429_s22 + $0x40] sm:$0xff] %vm269_vm1, %v261_v56  ;;  %279 = vst.msk [vmem:[%s429_s22 + $0x48] sm:$0xff] %vm269_vm1, %v262_v57  ;;  %v244_v58 = vpop.permute.xlu1 %243 }
  0x90   : > { %v242_v59 = vpop.permute.xlu0 %241  ;;  %v267_v60 = vadd.f32 %v244_v58, %v186_v30  ;;  %v268_v61 = vadd.f32 %v244_v58, %v187_v31 }
  0x91   : > { %v265_v62 = vadd.f32 %v242_v59, %v184_v36  ;;  %v266_v63 = vadd.f32 %v242_v59, %v185_v37 }
  0x92   : > { %284 = vst.msk [vmem:[%s429_s22 + $0x70] sm:$0xff] %vm269_vm1, %v267_v60  ;;  %285 = vst.msk [vmem:[%s429_s22 + $0x78] sm:$0xff] %vm269_vm1, %v268_v61 }
  0x93   : > { %282 = vst.msk [vmem:[%s429_s22 + $0x60] sm:$0xff] %vm269_vm1, %v265_v62  ;;  %283 = vst.msk [vmem:[%s429_s22 + $0x68] sm:$0xff] %vm269_vm1, %v266_v63 }
  0x94 PF: > { %s12_s9 = sadd.s32 1, %s384_s9  }
  0x95   : > { %p9_p4 = scmp.ge.s32.totalorder %s12_s9, 4  }
  0x97   :  { %11 = sbr.rel (!%p9_p4) target bundleno = 1 (0x1), region = 61 }

// kernel: hourglass_forward.11
= control target key start
LH: loop header
LB: loop body
LE: loop exit
PB: predicated region body
PF: predicated region fallthrough
CT: control target
= control target key end

     0   :  { %s5091_s18 = smov 0   ;;  %s8543_s0 = inlined_call_operand.vmem [shape: f32[2,16,16,4], index: 0, kind: input, shape index: {}]   ;;  %s8544_s1 = inlined_call_operand.vmem [shape: f32[36,4], index: 1, kind: input, shape index: {}]   ;;  %s8545_s2 = inlined_call_operand.vmem [shape: f32[1,4], index: 2, kind: input, shape index: {}]   ;;  %s8546_s3 = inlined_call_operand.vmem [shape: f32[36,4], index: 3, kind: input, shape index: {}]   ;;  %s8547_s4 = inlined_call_operand.vmem [shape: f32[1,4], index: 4, kind: input, shape index: {}]   ;;  %s8548_s5 = inlined_call_operand.vmem [shape: f32[2,16,16,4], index: 5, kind: output, shape index: {}]  }
   0x1 LB: > { %s4635_s19 = sadd.s32 4294967295, %s5050_s18   ;;  %p4639_p0 = scmp.ge.s32.totalorder %s5050_s18, 1  ;;  %s5050_s18 = sphi %s5091_s18, %s15_s18  }
   0x2   : > { %p187_p1 = scmp.lt.s32.totalorder %s5050_s18, 3 }
   0x4   : > { %p188_p2 = pnand %p4639_p0, %p187_p1 }
   0x6   : > { %191 = sbr.rel (%p188_p2) target bundleno = 1502 (0x5de), region = 40 }
   0xd   : > { %vm225_vm0 = vcmask 31744   ;;  %vm228_vm1 = vcmask 25600   ;;  %p5101_p3 = scmp.lt.s32.totalorder %s4635_s19, 1  ;;  %v5052_v0 = vmov 0.0   ;;  %s5053_s25 = smov 4   ;;  %vm1253_vm2 = vcmask 1043456  }
   0xe   : > { %226 = vst.msk [vmem:[#allocation2] sm:$0xff] %vm225_vm0, %v5052_v0  ;;  %227 = vst.msk [vmem:[#allocation2 + $0x8] sm:$0xff] %vm225_vm0, %v5052_v0  ;;  %s5054_s26 = smov 8   ;;  %s5055_s27 = smov 12   ;;  %vm1073_vm3 = vcmask 64512   ;;  %vm1090_vm4 = vcmask 97280  }
   0xf   : > { %230 = vst.msk [vmem:[#allocation2 + $0x18] sm:$0xff] %vm225_vm0, %v5052_v0  ;;  %231 = vst.msk [vmem:[#allocation2 + $0x20] sm:$0xff] %vm225_vm0, %v5052_v0  ;;  %s9035_s19 = smov (!%p5101_p3, %s4635_s19), 1  ;;  %s5056_s28 = smov 16   ;;  %vm1107_vm5 = vcmask 130048   ;;  %vm1124_vm6 = vcmask 162816  }
  0x10   : > { %233 = vst.msk [vmem:[#allocation2 + $0x30] sm:$0xff] %vm225_vm0, %v5052_v0  ;;  %234 = vst.msk [vmem:[#allocation2 + $0x38] sm:$0xff] %vm225_vm0, %v5052_v0  ;;  %s4750_s21 = sshll.u32 %s9035_s19, 8  ;;  %s5057_s29 = smov 20   ;;  %vm1141_vm7 = vcmask 195584   ;;  %vm1158_vm8 = vcmask 228352  }
  0x11   : > { %236 = vst.msk [vmem:[#allocation2 + $0x48] sm:$0xff] %vm225_vm0, %v5052_v0  ;;  %237 = vst.msk [vmem:[#allocation2 + $0x50] sm:$0xff] %vm225_vm0, %v5052_v0  ;;  %s5333_s24 = scalar_lea.vmem %s8543_s0, %s4750_s21  ;;  %s5058_s30 = smov 24   ;;  %vm1175_vm9 = vcmask 261120   ;;  %vm1204_vm10 = vcmask 293888  }
  0x12   : > { %239 = vst.msk [vmem:[#allocation2 + $0x60] sm:$0xff] %vm225_vm0, %v5052_v0  ;;  %240 = vst.msk [vmem:[#allocation2 + $0x68] sm:$0xff] %vm225_vm0, %v5052_v0  ;;  %v335_v1 = vld [vmem:[%s5333_s24] sm:$0xff]  ;;  %v337_v2 = vld [vmem:[%s5333_s24 + $0x10] sm:$0xff]  ;;  %s5059_s6 = smov 28   ;;  %s5060_s17 = smov 32  }
  0x13   : > { %242 = vst.msk [vmem:[#allocation2 + $0x78] sm:$0xff] %vm225_vm0, %v5052_v0  ;;  %243 = vst.msk [vmem:[#allocation2 + $0x80] sm:$0xff] %vm225_vm0, %v5052_v0  ;;  %v336_v3 = vld [vmem:[%s5333_s24 + $0x8] sm:$0xff]  ;;  %v339_v4 = vld [vmem:[%s5333_s24 + $0x20] sm:$0xff] }
  0x14   : > { %245 = vst.msk [vmem:[#allocation2 + $0x90] sm:$0xff] %vm225_vm0, %v5052_v0  ;;  %246 = vst.msk [vmem:[#allocation2 + $0x98] sm:$0xff] %vm225_vm0, %v5052_v0  ;;  %v338_v5 = vld [vmem:[%s5333_s24 + $0x18] sm:$0xff]  ;;  %v341_v6 = vld [vmem:[%s5333_s24 + $0x30] sm:$0xff] }
  0x15   : > { %248 = vst.msk [vmem:[#allocation2 + $0xa8] sm:$0xff] %vm225_vm0, %v5052_v0  ;;  %249 = vst.msk [vmem:[#allocation2 + $0xb0] sm:$0xff] %vm225_vm0, %v5052_v0  ;;  %v416_v7 = vld [vmem:[#allocation2 + $0x1] sm:$0xff]  ;;  %v342_v11 = vld [vmem:[%s5333_s24 + $0x38] sm:$0xff] }
  0x16   : > { %251 = vst.msk [vmem:[#allocation2 + $0xc0] sm:$0xff] %vm225_vm0, %v5052_v0  ;;  %252 = vst.msk [vmem:[#allocation2 + $0xc8] sm:$0xff] %vm225_vm0, %v5052_v0  ;;  %v340_v9 = vld [vmem:[%s5333_s24 + $0x28] sm:$0xff]  ;;  %561 = vrot.lane.b32.xlu0 %v416_v7, %s5053_s25  ;;  %v343_v10 = vld [vmem:[%s5333_s24 + $0x40] sm:$0xff] }
  0x17   : > { %254 = vst.msk [vmem:[#allocation2 + $0xd8] sm:$0xff] %vm225_vm0, %v5052_v0  ;;  %255 = vst.msk [vmem:[#allocation2 + $0xe0] sm:$0xff] %vm225_vm0, %v5052_v0  ;;  %v345_v12 = vld [vmem:[%s5333_s24 + $0x50] sm:$0xff]  ;;  %v344_v13 = vld [vmem:[%s5333_s24 + $0x48] sm:$0xff] }
  0x18   : > { %257 = vst.msk [vmem:[#allocation2 + $0xf0] sm:$0xff] %vm225_vm0, %v5052_v0  ;;  %258 = vst.msk [vmem:[#allocation2 + $0xf8] sm:$0xff] %vm225_vm0, %v5052_v0  ;;  %v347_v14 = vld [vmem:[%s5333_s24 + $0x60] sm:$0xff]  ;;  %v346_v15 = vld [vmem:[%s5333_s24 + $0x58] sm:$0xff] }
  0x19   : > { %260 = vst.msk [vmem:[#allocation2 + $0x108] sm:$0xff] %vm225_vm0, %v5052_v0  ;;  %261 = vst.msk [vmem:[#allocation2 + $0x110] sm:$0xff] %vm225_vm0, %v5052_v0  ;;  %v348_v16 = vld [vmem:[%s5333_s24 + $0x68] sm:$0xff]  ;;  %v349_v17 = vld [vmem:[%s5333_s24 + $0x70] sm:$0xff] }
  0x1a   : > { %263 = vst.msk [vmem:[#allocation2 + $0x120] sm:$0xff] %vm225_vm0, %v5052_v0  ;;  %264 = vst.msk [vmem:[#allocation2 + $0x128] sm:$0xff] %vm225_vm0, %v5052_v0  ;;  %v350_v18 = vld [vmem:[%s5333_s24 + $0x78] sm:$0xff]  ;;  %v432_v32 = vld [vmem:[#allocation2 + $0x2] sm:$0xff] }
  0x1b   : > { %266 = vst.msk [vmem:[#allocation2 + $0x138] sm:$0xff] %vm225_vm0, %v5052_v0  ;;  %267 = vst.msk [vmem:[#allocation2 + $0x140] sm:$0xff] %vm225_vm0, %v5052_v0  ;;  %v351_v44 = vld [vmem:[%s5333_s24 + $0x80] sm:$0xff]  ;;  %v352_v48 = vld [vmem:[%s5333_s24 + $0x88] sm:$0xff] }
  0x1c   : > { %269 = vst.msk [vmem:[#allocation2 + $0x150] sm:$0xff] %vm225_vm0, %v5052_v0  ;;  %270 = vst.msk [vmem:[#allocation2 + $0x158] sm:$0xff] %vm225_vm0, %v5052_v0 }
  0x1d   : > { %272 = vst.msk [vmem:[#allocation2 + $0x168] sm:$0xff] %vm225_vm0, %v5052_v0  ;;  %273 = vst.msk [vmem:[#allocation2 + $0x170] sm:$0xff] %vm225_vm0, %v5052_v0 }
  0x1e   : > { %275 = vst.msk [vmem:[#allocation2 + $0x180] sm:$0xff] %vm225_vm0, %v5052_v0  ;;  %276 = vst.msk [vmem:[#allocation2 + $0x188] sm:$0xff] %vm225_vm0, %v5052_v0 }
  0x1f   : > { %278 = vst.msk [vmem:[#allocation2 + $0x198] sm:$0xff] %vm225_vm0, %v5052_v0  ;;  %279 = vst.msk [vmem:[#allocation2 + $0x1a0] sm:$0xff] %vm225_vm0, %v5052_v0 }
  0x20   : > { %281 = vst.msk [vmem:[#allocation3] sm:$0xff] %vm225_vm0, %v5052_v0  ;;  %282 = vst.msk [vmem:[#allocation3 + $0x8] sm:$0xff] %vm225_vm0, %v5052_v0 }
  0x21   : > { %284 = vst.msk [vmem:[#allocation3 + $0x18] sm:$0xff] %vm225_vm0, %v5052_v0  ;;  %285 = vst.msk [vmem:[#allocation3 + $0x20] sm:$0xff] %vm225_vm0, %v5052_v0 }
  0x22   : > { %287 = vst.msk [vmem:[#allocation3 + $0x30] sm:$0xff] %vm225_vm0, %v5052_v0  ;;  %288 = vst.msk [vmem:[#allocation3 + $0x38] sm:$0xff] %vm225_vm0, %v5052_v0 }
  0x23   : > { %290 = vst.msk [vmem:[#allocation3 + $0x48] sm:$0xff] %vm225_vm0, %v5052_v0  ;;  %291 = vst.msk [vmem:[#allocation3 + $0x50] sm:$0xff] %vm225_vm0, %v5052_v0 }
  0x24   : > { %293 = vst.msk [vmem:[#allocation3 + $0x60] sm:$0xff] %vm225_vm0, %v5052_v0  ;;  %294 = vst.msk [vmem:[#allocation3 + $0x68] sm:$0xff] %vm225_vm0, %v5052_v0 }
  0x25   : > { %296 = vst.msk [vmem:[#allocation3 + $0x78] sm:$0xff] %vm225_vm0, %v5052_v0  ;;  %297 = vst.msk [vmem:[#allocation3 + $0x80] sm:$0xff] %vm225_vm0, %v5052_v0 }
  0x26   : > { %299 = vst.msk [vmem:[#allocation3 + $0x90] sm:$0xff] %vm225_vm0, %v5052_v0  ;;  %300 = vst.msk [vmem:[#allocation3 + $0x98] sm:$0xff] %vm225_vm0, %v5052_v0 }
  0x27   : > { %302 = vst.msk [vmem:[#allocation3 + $0xa8] sm:$0xff] %vm225_vm0, %v5052_v0  ;;  %303 = vst.msk [vmem:[#allocation3 + $0xb0] sm:$0xff] %vm225_vm0, %v5052_v0 }
  0x28   : > { %305 = vst.msk [vmem:[#allocation3 + $0xc0] sm:$0xff] %vm225_vm0, %v5052_v0  ;;  %306 = vst.msk [vmem:[#allocation3 + $0xc8] sm:$0xff] %vm225_vm0, %v5052_v0 }
  0x29   : > { %308 = vst.msk [vmem:[#allocation3 + $0xd8] sm:$0xff] %vm225_vm0, %v5052_v0  ;;  %309 = vst.msk [vmem:[#allocation3 + $0xe0] sm:$0xff] %vm225_vm0, %v5052_v0 }
  0x2a   : > { %311 = vst.msk [vmem:[#allocation3 + $0xf0] sm:$0xff] %vm225_vm0, %v5052_v0  ;;  %312 = vst.msk [vmem:[#allocation3 + $0xf8] sm:$0xff] %vm225_vm0, %v5052_v0 }
  0x2b   : > { %314 = vst.msk [vmem:[#allocation3 + $0x108] sm:$0xff] %vm225_vm0, %v5052_v0  ;;  %315 = vst.msk [vmem:[#allocation3 + $0x110] sm:$0xff] %vm225_vm0, %v5052_v0 }
  0x2c   : > { %317 = vst.msk [vmem:[#allocation3 + $0x120] sm:$0xff] %vm225_vm0, %v5052_v0  ;;  %318 = vst.msk [vmem:[#allocation3 + $0x128] sm:$0xff] %vm225_vm0, %v5052_v0 }
  0x2d   : > { %320 = vst.msk [vmem:[#allocation3 + $0x138] sm:$0xff] %vm225_vm0, %v5052_v0  ;;  %321 = vst.msk [vmem:[#allocation3 + $0x140] sm:$0xff] %vm225_vm0, %v5052_v0 }
  0x2e   : > { %323 = vst.msk [vmem:[#allocation3 + $0x150] sm:$0xff] %vm225_vm0, %v5052_v0  ;;  %324 = vst.msk [vmem:[#allocation3 + $0x158] sm:$0xff] %vm225_vm0, %v5052_v0 }
  0x2f   : > { %326 = vst.msk [vmem:[#allocation3 + $0x168] sm:$0xff] %vm225_vm0, %v5052_v0  ;;  %327 = vst.msk [vmem:[#allocation3 + $0x170] sm:$0xff] %vm225_vm0, %v5052_v0 }
  0x30   : > { %329 = vst.msk [vmem:[#allocation3 + $0x180] sm:$0xff] %vm225_vm0, %v5052_v0  ;;  %330 = vst.msk [vmem:[#allocation3 + $0x188] sm:$0xff] %vm225_vm0, %v5052_v0 }
  0x31   : > { %332 = vst.msk [vmem:[#allocation3 + $0x198] sm:$0xff] %vm225_vm0, %v5052_v0  ;;  %333 = vst.msk [vmem:[#allocation3 + $0x1a0] sm:$0xff] %vm225_vm0, %v5052_v0 }
  0x32   : > { %229 = vst.msk [vmem:[#allocation2 + $0x10] sm:$0x3] %vm228_vm1, %v5052_v0  ;;  %232 = vst.msk [vmem:[#allocation2 + $0x28] sm:$0x3] %vm228_vm1, %v5052_v0 }
  0x33   : > { %235 = vst.msk [vmem:[#allocation2 + $0x40] sm:$0x3] %vm228_vm1, %v5052_v0  ;;  %238 = vst.msk [vmem:[#allocation2 + $0x58] sm:$0x3] %vm228_vm1, %v5052_v0 }
  0x34   : > { %241 = vst.msk [vmem:[#allocation2 + $0x70] sm:$0x3] %vm228_vm1, %v5052_v0  ;;  %244 = vst.msk [vmem:[#allocation2 + $0x88] sm:$0x3] %vm228_vm1, %v5052_v0 }
  0x35   : > { %247 = vst.msk [vmem:[#allocation2 + $0xa0] sm:$0x3] %vm228_vm1, %v5052_v0  ;;  %250 = vst.msk [vmem:[#allocation2 + $0xb8] sm:$0x3] %vm228_vm1, %v5052_v0 }
  0x36   : > { %253 = vst.msk [vmem:[#allocation2 + $0xd0] sm:$0x3] %vm228_vm1, %v5052_v0  ;;  %256 = vst.msk [vmem:[#allocation2 + $0xe8] sm:$0x3] %vm228_vm1, %v5052_v0 }
  0x37   : > { %259 = vst.msk [vmem:[#allocation2 + $0x100] sm:$0x3] %vm228_vm1, %v5052_v0  ;;  %262 = vst.msk [vmem:[#allocation2 + $0x118] sm:$0x3] %vm228_vm1, %v5052_v0 }
  0x38   : > { %265 = vst.msk [vmem:[#allocation2 + $0x130] sm:$0x3] %vm228_vm1, %v5052_v0  ;;  %268 = vst.msk [vmem:[#allocation2 + $0x148] sm:$0x3] %vm228_vm1, %v5052_v0 }
  0x39   : > { %271 = vst.msk [vmem:[#allocation2 + $0x160] sm:$0x3] %vm228_vm1, %v5052_v0  ;;  %274 = vst.msk [vmem:[#allocation2 + $0x178] sm:$0x3] %vm228_vm1, %v5052_v0  ;;  %v417_v8 = vld [vmem:[#allocation2 + $0x9] sm:$0xff] }
  0x3a   : > { %277 = vst.msk [vmem:[#allocation2 + $0x190] sm:$0x3] %vm228_vm1, %v5052_v0  ;;  %280 = vst.msk [vmem:[#allocation2 + $0x1a8] sm:$0x3] %vm228_vm1, %v5052_v0  ;;  %563 = vrot.lane.b32.xlu0 %v417_v8, %s5053_s25  ;;  %v433_v35 = vld [vmem:[#allocation2 + $0xa] sm:$0xff] }
  0x3b   : > { %283 = vst.msk [vmem:[#allocation3 + $0x10] sm:$0x3] %vm228_vm1, %v5052_v0  ;;  %286 = vst.msk [vmem:[#allocation3 + $0x28] sm:$0x3] %vm228_vm1, %v5052_v0 }
  0x3c   : > { %289 = vst.msk [vmem:[#allocation3 + $0x40] sm:$0x3] %vm228_vm1, %v5052_v0  ;;  %292 = vst.msk [vmem:[#allocation3 + $0x58] sm:$0x3] %vm228_vm1, %v5052_v0 }
  0x3d   : > { %295 = vst.msk [vmem:[#allocation3 + $0x70] sm:$0x3] %vm228_vm1, %v5052_v0  ;;  %298 = vst.msk [vmem:[#allocation3 + $0x88] sm:$0x3] %vm228_vm1, %v5052_v0 }
  0x3e   : > { %301 = vst.msk [vmem:[#allocation3 + $0xa0] sm:$0x3] %vm228_vm1, %v5052_v0  ;;  %304 = vst.msk [vmem:[#allocation3 + $0xb8] sm:$0x3] %vm228_vm1, %v5052_v0 }
  0x3f   : > { %307 = vst.msk [vmem:[#allocation3 + $0xd0] sm:$0x3] %vm228_vm1, %v5052_v0  ;;  %310 = vst.msk [vmem:[#allocation3 + $0xe8] sm:$0x3] %vm228_vm1, %v5052_v0 }
  0x40   : > { %313 = vst.msk [vmem:[#allocation3 + $0x100] sm:$0x3] %vm228_vm1, %v5052_v0  ;;  %316 = vst.msk [vmem:[#allocation3 + $0x118] sm:$0x3] %vm228_vm1, %v5052_v0 }
  0x41   : > { %319 = vst.msk [vmem:[#allocation3 + $0x130] sm:$0x3] %vm228_vm1, %v5052_v0  ;;  %322 = vst.msk [vmem:[#allocation3 + $0x148] sm:$0x3] %vm228_vm1, %v5052_v0 }
  0x42   : > { %325 = vst.msk [vmem:[#allocation3 + $0x160] sm:$0x3] %vm228_vm1, %v5052_v0  ;;  %328 = vst.msk [vmem:[#allocation3 + $0x178] sm:$0x3] %vm228_vm1, %v5052_v0 }
  0x43   : > { %331 = vst.msk [vmem:[#allocation3 + $0x190] sm:$0x3] %vm228_vm1, %v5052_v0  ;;  %334 = vst.msk [vmem:[#allocation3 + $0x1a8] sm:$0x3] %vm228_vm1, %v5052_v0 }
  0x44   : > { %368 = vst.msk [vmem:[#allocation2 + $0x19] sm:$0xff] %vm225_vm0, %v335_v1  ;;  %370 = vst.msk [vmem:[#allocation2 + $0x31] sm:$0xff] %vm225_vm0, %v337_v2 }
  0x45   : > { %369 = vst.msk [vmem:[#allocation2 + $0x21] sm:$0xff] %vm225_vm0, %v336_v3  ;;  %372 = vst.msk [vmem:[#allocation2 + $0x49] sm:$0xff] %vm225_vm0, %v339_v4 }
  0x46   : > { %371 = vst.msk [vmem:[#allocation2 + $0x39] sm:$0xff] %vm225_vm0, %v338_v5  ;;  %374 = vst.msk [vmem:[#allocation2 + $0x61] sm:$0xff] %vm225_vm0, %v341_v6 }
  0x47   : > { %373 = vst.msk [vmem:[#allocation2 + $0x51] sm:$0xff] %vm225_vm0, %v340_v9  ;;  %376 = vst.msk [vmem:[#allocation2 + $0x79] sm:$0xff] %vm225_vm0, %v343_v10 }
  0x48   : > { %375 = vst.msk [vmem:[#allocation2 + $0x69] sm:$0xff] %vm225_vm0, %v342_v11  ;;  %378 = vst.msk [vmem:[#allocation2 + $0x91] sm:$0xff] %vm225_vm0, %v345_v12  ;;  %v353_v11 = vld [vmem:[%s5333_s24 + $0x90] sm:$0xff] }
  0x49   : > { %377 = vst.msk [vmem:[#allocation2 + $0x81] sm:$0xff] %vm225_vm0, %v344_v13  ;;  %380 = vst.msk [vmem:[#allocation2 + $0xa9] sm:$0xff] %vm225_vm0, %v347_v14  ;;  %v355_v14 = vld [vmem:[%s5333_s24 + $0xa0] sm:$0xff] }
  0x4a   : > { %379 = vst.msk [vmem:[#allocation2 + $0x99] sm:$0xff] %vm225_vm0, %v346_v15  ;;  %381 = vst.msk [vmem:[#allocation2 + $0xb1] sm:$0xff] %vm225_vm0, %v348_v16  ;;  %v354_v16 = vld [vmem:[%s5333_s24 + $0x98] sm:$0xff] }
  0x4b   : > { %382 = vst.msk [vmem:[#allocation2 + $0xc1] sm:$0xff] %vm225_vm0, %v349_v17  ;;  %383 = vst.msk [vmem:[#allocation2 + $0xc9] sm:$0xff] %vm225_vm0, %v350_v18  ;;  %v5369_v19 = vld [vmem:[#allocation2 + $0x19] sm:$0xff]  ;;  %v5371_v20 = vld [vmem:[#allocation2 + $0x31] sm:$0xff] }
  0x4c   : > { %565 = vrot.lane.b32.xlu1 %v5369_v19, %s5053_s25  ;;  %v5375_v21 = vld [vmem:[#allocation2 + $0x21] sm:$0xff]  ;;  %569 = vrot.lane.b32.xlu0 %v5371_v20, %s5053_s25  ;;  %v5379_v22 = vld [vmem:[#allocation2 + $0x49] sm:$0xff]  ;;  %384 = vst.msk [vmem:[#allocation2 + $0xd9] sm:$0xff] %vm225_vm0, %v351_v44  ;;  %385 = vst.msk [vmem:[#allocation2 + $0xe1] sm:$0xff] %vm225_vm0, %v352_v48 }
  0x4d   : > { %v5383_v23 = vld [vmem:[#allocation2 + $0x39] sm:$0xff]  ;;  %v5387_v24 = vld [vmem:[#allocation2 + $0x61] sm:$0xff]  ;;  %v5489_v52 = vld [vmem:[#allocation2 + $0x30] sm:$0xff]  ;;  %386 = vst.msk [vmem:[#allocation2 + $0xf1] sm:$0xff] %vm225_vm0, %v353_v11 }
  0x4e   : > { %v5391_v25 = vld [vmem:[#allocation2 + $0x51] sm:$0xff]  ;;  %v5395_v26 = vld [vmem:[#allocation2 + $0x79] sm:$0xff]  ;;  %v5433_v37 = vld [vmem:[#allocation2 + $0x22] sm:$0xff]  ;;  %388 = vst.msk [vmem:[#allocation2 + $0x109] sm:$0xff] %vm225_vm0, %v355_v14 }
  0x4f   : > { %v5399_v27 = vld [vmem:[#allocation2 + $0x69] sm:$0xff]  ;;  %v5403_v28 = vld [vmem:[#allocation2 + $0x91] sm:$0xff]  ;;  %v5424_v34 = vld [vmem:[#allocation2 + $0x1a] sm:$0xff]  ;;  %387 = vst.msk [vmem:[#allocation2 + $0xf9] sm:$0xff] %vm225_vm0, %v354_v16 }
  0x50   : > { %567 = vrot.lane.b32.xlu1 %v5375_v21, %s5053_s25  ;;  %573 = vrot.lane.b32.xlu0 %v5379_v22, %s5053_s25  ;;  %v5407_v29 = vld [vmem:[#allocation2 + $0x81] sm:$0xff]  ;;  %v5411_v30 = vld [vmem:[#allocation2 + $0xa9] sm:$0xff]  ;;  %v5430_v36 = vld [vmem:[#allocation2 + $0x32] sm:$0xff] }
  0x51   : > { %v5415_v31 = vld [vmem:[#allocation2 + $0x99] sm:$0xff]  ;;  %v5421_v33 = vld [vmem:[#allocation2 + $0xb1] sm:$0xff]  ;;  %v5445_v40 = vld [vmem:[#allocation2 + $0x62] sm:$0xff] }
  0x52   : > { %v5437_v38 = vld [vmem:[#allocation2 + $0x4a] sm:$0xff]  ;;  %v5441_v39 = vld [vmem:[#allocation2 + $0x3a] sm:$0xff]  ;;  %v5449_v41 = vld [vmem:[#allocation2 + $0x52] sm:$0xff] }
  0x53   : > { %v5453_v42 = vld [vmem:[#allocation2 + $0x7a] sm:$0xff]  ;;  %v5457_v43 = vld [vmem:[#allocation2 + $0x6a] sm:$0xff]  ;;  %v5463_v45 = vld [vmem:[#allocation2 + $0x92] sm:$0xff] }
  0x54   : > { %571 = vrot.lane.b32.xlu1 %v5383_v23, %s5053_s25  ;;  %577 = vrot.lane.b32.xlu0 %v5387_v24, %s5053_s25  ;;  %v5467_v46 = vld [vmem:[#allocation2 + $0x82] sm:$0xff]  ;;  %v5471_v47 = vld [vmem:[#allocation2 + $0xaa] sm:$0xff]  ;;  %v5477_v49 = vld [vmem:[#allocation2 + $0x9a] sm:$0xff] }
  0x55   : > { %v5481_v50 = vld [vmem:[#allocation2 + $0x18] sm:$0xff]  ;;  %v5493_v53 = vld [vmem:[#allocation2 + $0x20] sm:$0xff]  ;;  %v5497_v54 = vld [vmem:[#allocation2 + $0x48] sm:$0xff] }
  0x56   : > { %v5485_v51 = vld [vmem:[#allocation2 + $0xb2] sm:$0xff]  ;;  %v5505_v56 = vld [vmem:[#allocation2 + $0x60] sm:$0xff]  ;;  %v5517_v59 = vld [vmem:[#allocation2 + $0x68] sm:$0xff] }
  0x57   : > { %v5501_v55 = vld [vmem:[#allocation2 + $0x38] sm:$0xff]  ;;  %v5509_v57 = vld [vmem:[#allocation2 + $0x50] sm:$0xff]  ;;  %v5525_v61 = vld [vmem:[#allocation2 + $0x80] sm:$0xff] }
  0x58   : > { %575 = vrot.lane.b32.xlu1 %v5391_v25, %s5053_s25  ;;  %581 = vrot.lane.b32.xlu0 %v5395_v26, %s5053_s25  ;;  %v5513_v58 = vld [vmem:[#allocation2 + $0x78] sm:$0xff]  ;;  %v5521_v60 = vld [vmem:[#allocation2 + $0x90] sm:$0xff]  ;;  %8621 = vst [vmem:[#allocation5_spill] sm:$0xff] %v5525_v61  ;;  %v5529_v62 = vld [vmem:[#allocation2 + $0xa8] sm:$0xff] }
  0x59   : > { %8620 = vst [vmem:[#allocation4_spill] sm:$0xff] %v5521_v60  ;;  %8622 = vst [vmem:[#allocation6_spill] sm:$0xff] %v5529_v62  ;;  %v5533_v63 = vld [vmem:[#allocation2 + $0x98] sm:$0xff]  ;;  %v5537_v0 = vld [vmem:[#allocation2 + $0xc0] sm:$0xff] }
  0x5a   : > { %8623 = vst [vmem:[#allocation7_spill] sm:$0xff] %v5533_v63  ;;  %v5541_v1 = vld [vmem:[#allocation2 + $0xb0] sm:$0xff]  ;;  %v5547_v2 = vld [vmem:[#allocation2 + $0xc8] sm:$0xff] }
  0x5b   : > { %8624 = vst [vmem:[#allocation8_spill] sm:$0xff] %v5541_v1  ;;  %v5581_v6 = vld [vmem:[#allocation2 + $0xc1] sm:$0xff]  ;;  %v5595_v10 = vld [vmem:[#allocation2 + $0xc9] sm:$0xff] }
  0x5c   : > { %579 = vrot.lane.b32.xlu1 %v5399_v27, %s5053_s25  ;;  %585 = vrot.lane.b32.xlu0 %v5403_v28, %s5053_s25  ;;  %v357_v18 = vld [vmem:[%s5333_s24 + $0xb0] sm:$0xff]  ;;  %v360_v14 = vld [vmem:[%s5333_s24 + $0xc8] sm:$0xff] }
  0x5d   : > { %390 = vst.msk [vmem:[#allocation2 + $0x121] sm:$0xff] %vm225_vm0, %v357_v18  ;;  %v361_v48 = vld [vmem:[%s5333_s24 + $0xd0] sm:$0xff]  ;;  %393 = vst.msk [vmem:[#allocation2 + $0x141] sm:$0xff] %vm225_vm0, %v360_v14  ;;  %v363_v18 = vld [vmem:[%s5333_s24 + $0xe0] sm:$0xff] }
  0x5e   : > { %394 = vst.msk [vmem:[#allocation2 + $0x151] sm:$0xff] %vm225_vm0, %v361_v48  ;;  %396 = vst.msk [vmem:[#allocation2 + $0x169] sm:$0xff] %vm225_vm0, %v363_v18  ;;  %v5671_v14 = vld [vmem:[#allocation2 + $0xc2] sm:$0xff] }
  0x60   : > { %583 = vrot.lane.b32.xlu1 %v5407_v29, %s5053_s25  ;;  %589 = vrot.lane.b32.xlu0 %v5411_v30, %s5053_s25 }
  0x64   : > { %587 = vrot.lane.b32.xlu1 %v5415_v31, %s5053_s25  ;;  %625 = vrot.lane.b32.xlu0 %v432_v32, %s5054_s26 }
  0x68   : > { %591 = vrot.lane.b32.xlu1 %v5421_v33, %s5053_s25  ;;  %629 = vrot.lane.b32.xlu0 %v5424_v34, %s5054_s26 }
  0x6c   : > { %627 = vrot.lane.b32.xlu1 %v433_v35, %s5054_s26  ;;  %633 = vrot.lane.b32.xlu0 %v5430_v36, %s5054_s26 }
  0x70   : > { %631 = vrot.lane.b32.xlu1 %v5433_v37, %s5054_s26  ;;  %637 = vrot.lane.b32.xlu0 %v5437_v38, %s5054_s26 }
  0x74   : > { %635 = vrot.lane.b32.xlu1 %v5441_v39, %s5054_s26  ;;  %641 = vrot.lane.b32.xlu0 %v5445_v40, %s5054_s26 }
  0x78   : > { %639 = vrot.lane.b32.xlu1 %v5449_v41, %s5054_s26  ;;  %645 = vrot.lane.b32.xlu0 %v5453_v42, %s5054_s26 }
  0x7c   : > { %643 = vrot.lane.b32.xlu1 %v5457_v43, %s5054_s26  ;;  %649 = vrot.lane.b32.xlu0 %v5463_v45, %s5054_s26 }
  0x80   : > { %647 = vrot.lane.b32.xlu1 %v5467_v46, %s5054_s26  ;;  %653 = vrot.lane.b32.xlu0 %v5471_v47, %s5054_s26 }
  0x84   : > { %651 = vrot.lane.b32.xlu1 %v5477_v49, %s5054_s26  ;;  %689 = vrot.lane.b32.xlu0 %v5481_v50, %s5055_s27 }
  0x88   : > { %655 = vrot.lane.b32.xlu1 %v5485_v51, %s5054_s26  ;;  %693 = vrot.lane.b32.xlu0 %v5489_v52, %s5055_s27  ;;  %v5567_v3 = vpop.permute.xlu0 %561 }
  0x8c   : > { %691 = vrot.lane.b32.xlu1 %v5493_v53, %s5055_s27  ;;  %697 = vrot.lane.b32.xlu0 %v5497_v54, %s5055_s27 }
  0x90   : > { %695 = vrot.lane.b32.xlu1 %v5501_v55, %s5055_s27  ;;  %701 = vrot.lane.b32.xlu0 %v5505_v56, %s5055_s27 }
  0x94   : > { %699 = vrot.lane.b32.xlu1 %v5509_v57, %s5055_s27  ;;  %705 = vrot.lane.b32.xlu0 %v5513_v58, %s5055_s27 }
  0x98   : > { %703 = vrot.lane.b32.xlu1 %v5517_v59, %s5055_s27  ;;  %709 = vrot.lane.b32.xlu0 %v5521_v60, %s5055_s27 }
  0x9c   : > { %707 = vrot.lane.b32.xlu1 %v5525_v61, %s5055_s27  ;;  %713 = vrot.lane.b32.xlu0 %v5529_v62, %s5055_s27 }
  0xa0   : > { %711 = vrot.lane.b32.xlu1 %v5533_v63, %s5055_s27  ;;  %717 = vrot.lane.b32.xlu0 %v5537_v0, %s5055_s27 }
  0xa4   : > { %715 = vrot.lane.b32.xlu1 %v5541_v1, %s5055_s27  ;;  %753 = vrot.lane.b32.xlu0 %v5369_v19, %s5056_s28 }
  0xa8   : > { %719 = vrot.lane.b32.xlu1 %v5547_v2, %s5055_s27  ;;  %757 = vrot.lane.b32.xlu0 %v5371_v20, %s5056_s28 }
  0xac   : > { %755 = vrot.lane.b32.xlu1 %v5375_v21, %s5056_s28  ;;  %761 = vrot.lane.b32.xlu0 %v5379_v22, %s5056_s28  ;;  %v5573_v4 = vpop.permute.xlu0 %563  ;;  %v356_v21 = vld [vmem:[%s5333_s24 + $0xa8] sm:$0xff] }
  0xad   : > { %389 = vst.msk [vmem:[#allocation2 + $0x111] sm:$0xff] %vm225_vm0, %v356_v21 }
  0xb0   : > { %759 = vrot.lane.b32.xlu1 %v5383_v23, %s5056_s28  ;;  %765 = vrot.lane.b32.xlu0 %v5387_v24, %s5056_s28 }
  0xb4   : > { %763 = vrot.lane.b32.xlu1 %v5391_v25, %s5056_s28  ;;  %769 = vrot.lane.b32.xlu0 %v5395_v26, %s5056_s28 }
  0xb8   : > { %767 = vrot.lane.b32.xlu1 %v5399_v27, %s5056_s28  ;;  %773 = vrot.lane.b32.xlu0 %v5403_v28, %s5056_s28 }
  0xbc   : > { %771 = vrot.lane.b32.xlu1 %v5407_v29, %s5056_s28  ;;  %777 = vrot.lane.b32.xlu0 %v5411_v30, %s5056_s28 }
  0xbe   : > { %v5579_v5 = vpop.permute.xlu1 %565  ;;  %v5583_v7 = vpop.permute.xlu0 %569 }
  0xc0   : > { %775 = vrot.lane.b32.xlu1 %v5415_v31, %s5056_s28  ;;  %781 = vrot.lane.b32.xlu0 %v5581_v6, %s5056_s28 }
  0xc2   : > { %v5589_v8 = vpop.permute.xlu1 %567  ;;  %v5591_v9 = vpop.permute.xlu0 %573 }
  0xc4   : > { %779 = vrot.lane.b32.xlu1 %v5421_v33, %s5056_s28  ;;  %817 = vrot.lane.b32.xlu0 %v5424_v34, %s5057_s29  ;;  %v359_v34 = vld [vmem:[%s5333_s24 + $0xc0] sm:$0xff] }
  0xc5   : > { %392 = vst.msk [vmem:[#allocation2 + $0x139] sm:$0xff] %vm225_vm0, %v359_v34  ;;  %v362_v34 = vld [vmem:[%s5333_s24 + $0xd8] sm:$0xff] }
  0xc6   : > { %v5600_v12 = vpop.permute.xlu1 %571  ;;  %v5603_v13 = vpop.permute.xlu0 %577  ;;  %395 = vst.msk [vmem:[#allocation2 + $0x159] sm:$0xff] %vm225_vm0, %v362_v34 }
  0xc8   : > { %783 = vrot.lane.b32.xlu1 %v5595_v10, %s5056_s28  ;;  %821 = vrot.lane.b32.xlu0 %v5430_v36, %s5057_s29 }
  0xca   : > { %v5610_v15 = vpop.permute.xlu1 %575  ;;  %v5614_v17 = vpop.permute.xlu0 %581 }
  0xcc   : > { %819 = vrot.lane.b32.xlu1 %v5433_v37, %s5057_s29  ;;  %825 = vrot.lane.b32.xlu0 %v5437_v38, %s5057_s29  ;;  %v358_v37 = vld [vmem:[%s5333_s24 + $0xb8] sm:$0xff] }
  0xcd   : > { %391 = vst.msk [vmem:[#allocation2 + $0x129] sm:$0xff] %vm225_vm0, %v358_v37 }
  0xce   : > { %v5622_v19 = vpop.permute.xlu1 %579  ;;  %v5626_v32 = vpop.permute.xlu0 %585 }
  0xcf   : > { %8625 = vst [vmem:[#allocation9_spill] sm:$0xff] %v5626_v32 }
  0xd0   : > { %823 = vrot.lane.b32.xlu1 %v5441_v39, %s5057_s29  ;;  %829 = vrot.lane.b32.xlu0 %v5445_v40, %s5057_s29 }
  0xd2   : > { %v5634_v35 = vpop.permute.xlu1 %583  ;;  %v5638_v44 = vpop.permute.xlu0 %589 }
  0xd3   : > { %8626 = vst [vmem:[#allocation10_spill] sm:$0xff] %v5634_v35  ;;  %8627 = vst [vmem:[#allocation11_spill] sm:$0xff] %v5638_v44 }
  0xd4   : > { %827 = vrot.lane.b32.xlu1 %v5449_v41, %s5057_s29  ;;  %833 = vrot.lane.b32.xlu0 %v5453_v42, %s5057_s29 }
  0xd6   : > { %v5646_v11 = vpop.permute.xlu1 %587  ;;  %v5650_v16 = vpop.permute.xlu0 %625 }
  0xd7   : > { %8628 = vst [vmem:[#allocation12_spill] sm:$0xff] %v5646_v11  ;;  %v364_v11 = vld [vmem:[%s5333_s24 + $0xe8] sm:$0xff] }
  0xd8   : > { %831 = vrot.lane.b32.xlu1 %v5457_v43, %s5057_s29  ;;  %837 = vrot.lane.b32.xlu0 %v5463_v45, %s5057_s29  ;;  %397 = vst.msk [vmem:[#allocation2 + $0x171] sm:$0xff] %vm225_vm0, %v364_v11 }
  0xda   : > { %v5658_v21 = vpop.permute.xlu1 %591  ;;  %v5662_v37 = vpop.permute.xlu0 %629 }
  0xdb   : > { %8629 = vst [vmem:[#allocation13_spill] sm:$0xff] %v5658_v21  ;;  %v5687_v21 = vld [vmem:[#allocation2 + $0xca] sm:$0xff] }
  0xdc   : > { %835 = vrot.lane.b32.xlu1 %v5467_v46, %s5057_s29  ;;  %841 = vrot.lane.b32.xlu0 %v5471_v47, %s5057_s29 }
  0xde   : > { %v5669_v48 = vpop.permute.xlu1 %627  ;;  %v5674_v44 = vpop.permute.xlu0 %633 }
  0xdf   : > { %8630 = vst [vmem:[#allocation14_spill] sm:$0xff] %v5674_v44 }
  0xe0   : > { %839 = vrot.lane.b32.xlu1 %v5477_v49, %s5057_s29  ;;  %845 = vrot.lane.b32.xlu0 %v5671_v14, %s5057_s29 }
  0xe2   : > { %v5681_v18 = vpop.permute.xlu1 %631  ;;  %v5683_v34 = vpop.permute.xlu0 %637 }
  0xe3   : > { %8631 = vst [vmem:[#allocation15_spill] sm:$0xff] %v5683_v34 }
  0xe4   : > { %843 = vrot.lane.b32.xlu1 %v5485_v51, %s5057_s29  ;;  %881 = vrot.lane.b32.xlu0 %v5489_v52, %s5058_s30 }
  0xe6   : > { %v5691_v35 = vpop.permute.xlu1 %635  ;;  %v5693_v32 = vpop.permute.xlu0 %641 }
  0xe7   : > { %8632 = vst [vmem:[#allocation16_spill] sm:$0xff] %v5691_v35  ;;  %8633 = vst [vmem:[#allocation17_spill] sm:$0xff] %v5693_v32 }
  0xe8   : > { %847 = vrot.lane.b32.xlu1 %v5687_v21, %s5057_s29  ;;  %885 = vrot.lane.b32.xlu0 %v5497_v54, %s5058_s30 }
  0xea   : > { %v5699_v11 = vpop.permute.xlu1 %639  ;;  %v5701_v34 = vpop.permute.xlu0 %645 }
  0xeb   : > { %8634 = vst [vmem:[#allocation18_spill] sm:$0xff] %v5699_v11  ;;  %8635 = vst [vmem:[#allocation19_spill] sm:$0xff] %v5701_v34 }
  0xec   : > { %883 = vrot.lane.b32.xlu1 %v5501_v55, %s5058_s30  ;;  %889 = vrot.lane.b32.xlu0 %v5505_v56, %s5058_s30 }
  0xee   : > { %v5707_v44 = vpop.permute.xlu1 %643  ;;  %v5709_v35 = vpop.permute.xlu0 %649 }
  0xef   : > { %8636 = vst [vmem:[#allocation20_spill] sm:$0xff] %v5707_v44  ;;  %8637 = vst [vmem:[#allocation21_spill] sm:$0xff] %v5709_v35 }
  0xf0   : > { %887 = vrot.lane.b32.xlu1 %v5509_v57, %s5058_s30  ;;  %893 = vrot.lane.b32.xlu0 %v5513_v58, %s5058_s30 }
  0xf2   : > { %v5715_v32 = vpop.permute.xlu1 %647  ;;  %v5717_v11 = vpop.permute.xlu0 %653 }
  0xf3   : > { %8638 = vst [vmem:[#allocation22_spill] sm:$0xff] %v5715_v32  ;;  %8639 = vst [vmem:[#allocation23_spill] sm:$0xff] %v5717_v11 }
  0xf4   : > { %891 = vrot.lane.b32.xlu1 %v5517_v59, %s5058_s30  ;;  %897 = vrot.lane.b32.xlu0 %v5521_v60, %s5058_s30 }
  0xf6   : > { %v5723_v34 = vpop.permute.xlu1 %651  ;;  %v5725_v44 = vpop.permute.xlu0 %689 }
  0xf7   : > { %8640 = vst [vmem:[#allocation24_spill] sm:$0xff] %v5723_v34  ;;  %v5741_v34 = vld [vmem:[#allocation2 + $0xd8] sm:$0xff] }
  0xf8   : > { %895 = vrot.lane.b32.xlu1 %v5525_v61, %s5058_s30  ;;  %901 = vrot.lane.b32.xlu0 %v5529_v62, %s5058_s30 }
  0xfa   : > { %v5731_v35 = vpop.permute.xlu1 %655  ;;  %v5733_v32 = vpop.permute.xlu0 %693 }
  0xfb   : > { %8641 = vst [vmem:[#allocation25_spill] sm:$0xff] %v5731_v35 }
  0xfc   : > { %899 = vrot.lane.b32.xlu1 %v5533_v63, %s5058_s30  ;;  %905 = vrot.lane.b32.xlu0 %v5537_v0, %s5058_s30  ;;  %v5755_v0 = vld [vmem:[#allocation2 + $0xe0] sm:$0xff] }
  0xfe   : > { %v5739_v11 = vpop.permute.xlu1 %691  ;;  %v5743_v60 = vpop.permute.xlu0 %697 }
 0x100   : > { %903 = vrot.lane.b32.xlu1 %v5541_v1, %s5058_s30  ;;  %909 = vrot.lane.b32.xlu0 %v5741_v34, %s5058_s30 }
 0x102   : > { %v5749_v35 = vpop.permute.xlu1 %695  ;;  %v5751_v62 = vpop.permute.xlu0 %701 }
 0x103   : > { %8642 = vst [vmem:[#allocation26_spill] sm:$0xff] %v5751_v62 }
 0x104   : > { %907 = vrot.lane.b32.xlu1 %v5547_v2, %s5058_s30  ;;  %945 = vrot.lane.b32.xlu0 %v5371_v20, %s5059_s6 }
 0x106   : > { %v5759_v63 = vpop.permute.xlu1 %699  ;;  %v5761_v61 = vpop.permute.xlu0 %705 }
 0x107   : > { %8643 = vst [vmem:[#allocation27_spill] sm:$0xff] %v5761_v61  ;;  %v6014_v61 = vld [vmem:[#allocation2 + $0xf2] sm:$0xff] }
 0x108   : > { %911 = vrot.lane.b32.xlu1 %v5755_v0, %s5058_s30  ;;  %949 = vrot.lane.b32.xlu0 %v5379_v22, %s5059_s6  ;;  %8689 = vst [vmem:[#allocation73_spill] sm:$0xff] %v6014_v61 }
 0x10a   : > { %v5767_v1 = vpop.permute.xlu1 %703  ;;  %v5769_v62 = vpop.permute.xlu0 %709 }
 0x10b   : > { %8644 = vst [vmem:[#allocation28_spill] sm:$0xff] %v5767_v1  ;;  %8645 = vst [vmem:[#allocation29_spill] sm:$0xff] %v5769_v62  ;;  %v1192_v62 = vld [vmem:[%s8544_s1] sm:$0xff] }
 0x10c   : > { %947 = vrot.lane.b32.xlu1 %v5383_v23, %s5059_s6  ;;  %953 = vrot.lane.b32.xlu0 %v5387_v24, %s5059_s6  ;;  %v1193_v23 = vld [vmem:[%s8544_s1 + $0x8] sm:$0xff] }
 0x10e   : > { %v5775_v20 = vpop.permute.xlu1 %707  ;;  %v5777_v2 = vpop.permute.xlu0 %713 }
 0x10f   : > { %8646 = vst [vmem:[#allocation30_spill] sm:$0xff] %v5775_v20  ;;  %8647 = vst [vmem:[#allocation31_spill] sm:$0xff] %v5777_v2  ;;  %v1194_v2 = vld [vmem:[%s8544_s1 + $0x10] sm:$0xff] }
 0x110   : > { %951 = vrot.lane.b32.xlu1 %v5391_v25, %s5059_s6  ;;  %957 = vrot.lane.b32.xlu0 %v5395_v26, %s5059_s6  ;;  %v4972_v25 = vpack.c.bf16 %v1193_v23, %v1192_v62 }
 0x112   : > { %v5783_v22 = vpop.permute.xlu1 %711  ;;  %v5791_v24 = vpop.permute.xlu0 %717  ;;  %4973 = vmatprep.subr.bf16.mxu0 %v4972_v25  ;;  %4981 = vmatprep.subr.bf16.mxu1 %v4972_v25 }
 0x113   : > { %8648 = vst [vmem:[#allocation32_spill] sm:$0xff] %v5783_v22  ;;  %8649 = vst [vmem:[#allocation33_spill] sm:$0xff] %v5791_v24  ;;  %4975 = vmatpush3.bf16.msra.mxu0 %v4972_v25  ;;  %v1195_v22 = vld [vmem:[%s8544_s1 + $0x18] sm:$0xff]  ;;  %4983 = vmatpush3.bf16.msra.mxu1 %v4972_v25 }
 0x114   : > { %955 = vrot.lane.b32.xlu1 %v5399_v27, %s5059_s6  ;;  %961 = vrot.lane.b32.xlu0 %v5403_v28, %s5059_s6  ;;  %v4976_v27 = vpack.c.bf16 %v1195_v22, %v1194_v2  ;;  %v365_v28 = vld [vmem:[%s5333_s24 + $0xf0] sm:$0xff]  ;;  %v5827_v2 = vld [vmem:[#allocation2 + $0xd9] sm:$0xff] }
 0x115   : > { %398 = vst.msk [vmem:[#allocation2 + $0x181] sm:$0xff] %vm225_vm0, %v365_v28  ;;  %8652 = vst [vmem:[#allocation36_spill] sm:$0xff] %v5827_v2  ;;  %v366_v22 = vld [vmem:[%s5333_s24 + $0xf8] sm:$0xff]  ;;  %v5844_v28 = vld [vmem:[#allocation2 + $0xe1] sm:$0xff] }
 0x116   : > { %v5797_v26 = vpop.permute.xlu1 %715  ;;  %v5805_v24 = vpop.permute.xlu0 %753  ;;  %4977 = vmatprep.subr.bf16.mxu0 %v4976_v27  ;;  %4985 = vmatprep.subr.bf16.mxu1 %v4976_v27  ;;  %399 = vst.msk [vmem:[#allocation2 + $0x189] sm:$0xff] %vm225_vm0, %v366_v22  ;;  %8653 = vst [vmem:[#allocation37_spill] sm:$0xff] %v5844_v28 }
 0x117   : > { %8650 = vst [vmem:[#allocation34_spill] sm:$0xff] %v5797_v26  ;;  %4979 = vmatpush3.bf16.msra.mxu0 %v4976_v27  ;;  %4987 = vmatpush3.bf16.msra.mxu1 %v4976_v27 }
 0x118   : > { %959 = vrot.lane.b32.xlu1 %v5407_v29, %s5059_s6  ;;  %965 = vrot.lane.b32.xlu0 %v5411_v30, %s5059_s6  ;;  %v1196_v29 = vld [vmem:[%s8544_s1 + $0x20] sm:$0xf] }
 0x119   : > { %4844 = vmatprep.subr.msk.mxu0 %vm1253_vm2, %v1196_v29 }
 0x11a   : > { %v5812_v62 = vpop.permute.xlu1 %719  ;;  %v5815_v23 = vpop.permute.xlu0 %757 }
 0x11b   : > { %8651 = vst [vmem:[#allocation35_spill] sm:$0xff] %v5812_v62  ;;  %4845 = vmatpush3.msk.msra.mxu0 %vm1253_vm2, %v1196_v29 }
 0x11c   : > { %963 = vrot.lane.b32.xlu1 %v5415_v31, %s5059_s6  ;;  %969 = vrot.lane.b32.xlu0 %v5581_v6, %s5059_s6 }
 0x11e   : > { %v5824_v30 = vpop.permute.xlu1 %755  ;;  %v5831_v25 = vpop.permute.xlu0 %761 }
 0x120   : > { %967 = vrot.lane.b32.xlu1 %v5421_v33, %s5059_s6  ;;  %973 = vrot.lane.b32.xlu0 %v5827_v2, %s5059_s6 }
 0x122   : > { %v5838_v31 = vpop.permute.xlu1 %759  ;;  %v5840_v27 = vpop.permute.xlu0 %765 }
 0x124   : > { %971 = vrot.lane.b32.xlu1 %v5595_v10, %s5059_s6  ;;  %1009 = vrot.lane.b32.xlu0 %v5430_v36, %s5060_s17 }
 0x126   : > { %v5848_v29 = vpop.permute.xlu1 %763  ;;  %v5850_v33 = vpop.permute.xlu0 %769 }
 0x127   : > { %8654 = vst [vmem:[#allocation38_spill] sm:$0xff] %v5850_v33 }
 0x128   : > { %975 = vrot.lane.b32.xlu1 %v5844_v28, %s5059_s6  ;;  %1013 = vrot.lane.b32.xlu0 %v5437_v38, %s5060_s17 }
 0x12a   : > { %v5856_v22 = vpop.permute.xlu1 %767  ;;  %v5858_v62 = vpop.permute.xlu0 %773 }
 0x12b   : > { %8655 = vst [vmem:[#allocation39_spill] sm:$0xff] %v5856_v22  ;;  %8656 = vst [vmem:[#allocation40_spill] sm:$0xff] %v5858_v62  ;;  %v5936_v62 = vld [vmem:[#allocation2 + $0x109] sm:$0xff] }
 0x12c   : > { %1011 = vrot.lane.b32.xlu1 %v5441_v39, %s5060_s17  ;;  %1017 = vrot.lane.b32.xlu0 %v5445_v40, %s5060_s17  ;;  %8670 = vst [vmem:[#allocation54_spill] sm:$0xff] %v5936_v62 }
 0x12e   : > { %v5864_v36 = vpop.permute.xlu1 %771  ;;  %v5866_v26 = vpop.permute.xlu0 %777 }
 0x12f   : > { %8657 = vst [vmem:[#allocation41_spill] sm:$0xff] %v5864_v36  ;;  %8658 = vst [vmem:[#allocation42_spill] sm:$0xff] %v5866_v26  ;;  %v5926_v26 = vld [vmem:[#allocation2 + $0xf1] sm:$0xff] }
 0x130   : > { %1015 = vrot.lane.b32.xlu1 %v5449_v41, %s5060_s17  ;;  %1021 = vrot.lane.b32.xlu0 %v5453_v42, %s5060_s17  ;;  %8667 = vst [vmem:[#allocation51_spill] sm:$0xff] %v5926_v26 }
 0x132   : > { %v5872_v38 = vpop.permute.xlu1 %775  ;;  %v5874_v20 = vpop.permute.xlu0 %781 }
 0x133   : > { %8659 = vst [vmem:[#allocation43_spill] sm:$0xff] %v5872_v38  ;;  %8660 = vst [vmem:[#allocation44_spill] sm:$0xff] %v5874_v20 }
 0x134   : > { %1019 = vrot.lane.b32.xlu1 %v5457_v43, %s5060_s17  ;;  %1025 = vrot.lane.b32.xlu0 %v5463_v45, %s5060_s17  ;;  %v5898_v45 = vld [vmem:[#allocation2 + $0xda] sm:$0xff] }
 0x135   : > { %8663 = vst [vmem:[#allocation47_spill] sm:$0xff] %v5898_v45 }
 0x136   : > { %v5880_v39 = vpop.permute.xlu1 %779  ;;  %v5882_v40 = vpop.permute.xlu0 %817 }
 0x137   : > { %8661 = vst [vmem:[#allocation45_spill] sm:$0xff] %v5880_v39 }
 0x138   : > { %1023 = vrot.lane.b32.xlu1 %v5467_v46, %s5060_s17  ;;  %1029 = vrot.lane.b32.xlu0 %v5471_v47, %s5060_s17 }
 0x13a   : > { %v5888_v41 = vpop.permute.xlu1 %783  ;;  %v5890_v42 = vpop.permute.xlu0 %821 }
 0x13b   : > { %8662 = vst [vmem:[#allocation46_spill] sm:$0xff] %v5888_v41 }
 0x13c   : > { %1027 = vrot.lane.b32.xlu1 %v5477_v49, %s5060_s17  ;;  %1033 = vrot.lane.b32.xlu0 %v5671_v14, %s5060_s17  ;;  %v5912_v49 = vld [vmem:[#allocation2 + $0xe2] sm:$0xff] }
 0x13d   : > { %8664 = vst [vmem:[#allocation48_spill] sm:$0xff] %v5912_v49 }
 0x13e   : > { %v5896_v43 = vpop.permute.xlu1 %819  ;;  %v5900_v20 = vpop.permute.xlu0 %825 }
 0x140   : > { %1031 = vrot.lane.b32.xlu1 %v5485_v51, %s5060_s17  ;;  %1037 = vrot.lane.b32.xlu0 %v5898_v45, %s5060_s17 }
 0x142   : > { %v5906_v46 = vpop.permute.xlu1 %823  ;;  %v5908_v47 = vpop.permute.xlu0 %829 }
 0x144   : > { %1035 = vrot.lane.b32.xlu1 %v5687_v21, %s5060_s17  ;;  %1598 = vrot.lane.b32.xlu0 %v5581_v6, %s5053_s25 }
 0x146   : > { %v5916_v41 = vpop.permute.xlu1 %827  ;;  %v5918_v39 = vpop.permute.xlu0 %833 }
 0x147   : > { %8665 = vst [vmem:[#allocation49_spill] sm:$0xff] %v5918_v39  ;;  %v5942_v39 = vld [vmem:[#allocation2 + $0xf9] sm:$0xff] }
 0x148   : > { %1039 = vrot.lane.b32.xlu1 %v5912_v49, %s5060_s17  ;;  %1602 = vrot.lane.b32.xlu0 %v5827_v2, %s5053_s25  ;;  %8672 = vst [vmem:[#allocation56_spill] sm:$0xff] %v5942_v39 }
 0x14a   : > { %v5924_v51 = vpop.permute.xlu1 %831  ;;  %v5928_v38 = vpop.permute.xlu0 %837 }
 0x14b   : > { %8666 = vst [vmem:[#allocation50_spill] sm:$0xff] %v5924_v51  ;;  %8668 = vst [vmem:[#allocation52_spill] sm:$0xff] %v5928_v38 }
 0x14c   : > { %1600 = vrot.lane.b32.xlu1 %v5595_v10, %s5053_s25  ;;  %1606 = vrot.lane.b32.xlu0 %v5926_v26, %s5053_s25  ;;  %v5948_v10 = vld [vmem:[#allocation2 + $0x121] sm:$0xff] }
 0x14d   : > { %8674 = vst [vmem:[#allocation58_spill] sm:$0xff] %v5948_v10 }
 0x14e   : > { %v5934_v6 = vpop.permute.xlu1 %835  ;;  %v5938_v36 = vpop.permute.xlu0 %841 }
 0x14f   : > { %8669 = vst [vmem:[#allocation53_spill] sm:$0xff] %v5934_v6  ;;  %8671 = vst [vmem:[#allocation55_spill] sm:$0xff] %v5938_v36  ;;  %v5954_v6 = vld [vmem:[#allocation2 + $0x111] sm:$0xff] }
 0x150   : > { %1604 = vrot.lane.b32.xlu1 %v5844_v28, %s5053_s25  ;;  %1610 = vrot.lane.b32.xlu0 %v5936_v62, %s5053_s25  ;;  %8676 = vst [vmem:[#allocation60_spill] sm:$0xff] %v5954_v6  ;;  %v5960_v28 = vld [vmem:[#allocation2 + $0x139] sm:$0xff] }
 0x151   : > { %8678 = vst [vmem:[#allocation62_spill] sm:$0xff] %v5960_v28 }
 0x152   : > { %v5946_v38 = vpop.permute.xlu1 %839  ;;  %v5950_v51 = vpop.permute.xlu0 %845 }
 0x153   : > { %8673 = vst [vmem:[#allocation57_spill] sm:$0xff] %v5946_v38  ;;  %8675 = vst [vmem:[#allocation59_spill] sm:$0xff] %v5950_v51  ;;  %v5966_v38 = vld [vmem:[#allocation2 + $0x129] sm:$0xff] }
 0x154   : > { %1608 = vrot.lane.b32.xlu1 %v5942_v39, %s5053_s25  ;;  %1614 = vrot.lane.b32.xlu0 %v5948_v10, %s5053_s25  ;;  %8679 = vst [vmem:[#allocation63_spill] sm:$0xff] %v5966_v38  ;;  %v5972_v39 = vld [vmem:[#allocation2 + $0x151] sm:$0xff]  ;;  %v5984_v10 = vld [vmem:[#allocation2 + $0x169] sm:$0xff] }
 0x155   : > { %8681 = vst [vmem:[#allocation65_spill] sm:$0xff] %v5972_v39  ;;  %8683 = vst [vmem:[#allocation67_spill] sm:$0xff] %v5984_v10 }
 0x156   : > { %v5958_v36 = vpop.permute.xlu1 %843  ;;  %v5962_v26 = vpop.permute.xlu0 %881 }
 0x157   : > { %8677 = vst [vmem:[#allocation61_spill] sm:$0xff] %v5958_v36  ;;  %v5978_v36 = vld [vmem:[#allocation2 + $0x141] sm:$0xff] }
 0x158   : > { %1612 = vrot.lane.b32.xlu1 %v5954_v6, %s5053_s25  ;;  %1618 = vrot.lane.b32.xlu0 %v5960_v28, %s5053_s25  ;;  %8682 = vst [vmem:[#allocation66_spill] sm:$0xff] %v5978_v36 }
 0x15a   : > { %v5970_v51 = vpop.permute.xlu1 %847  ;;  %v5974_v62 = vpop.permute.xlu0 %885 }
 0x15b   : > { %8680 = vst [vmem:[#allocation64_spill] sm:$0xff] %v5970_v51  ;;  %v5990_v51 = vld [vmem:[#allocation2 + $0x159] sm:$0xff] }
 0x15c   : > { %1616 = vrot.lane.b32.xlu1 %v5966_v38, %s5053_s25  ;;  %1622 = vrot.lane.b32.xlu0 %v5972_v39, %s5053_s25  ;;  %8684 = vst [vmem:[#allocation68_spill] sm:$0xff] %v5990_v51  ;;  %v6000_v39 = vld [vmem:[#allocation2 + $0x171] sm:$0xff] }
 0x15d   : > { %8686 = vst [vmem:[#allocation70_spill] sm:$0xff] %v6000_v39 }
 0x15e   : > { %v5982_v6 = vpop.permute.xlu1 %883  ;;  %v5986_v33 = vpop.permute.xlu0 %889 }
 0x160   : > { %1620 = vrot.lane.b32.xlu1 %v5978_v36, %s5053_s25  ;;  %1626 = vrot.lane.b32.xlu0 %v5984_v10, %s5053_s25 }
 0x162   : > { %v5994_v38 = vpop.permute.xlu1 %887  ;;  %v5996_v28 = vpop.permute.xlu0 %893 }
 0x163   : > { %8685 = vst [vmem:[#allocation69_spill] sm:$0xff] %v5996_v28 }
 0x164   : > { %1624 = vrot.lane.b32.xlu1 %v5990_v51, %s5053_s25  ;;  %1662 = vrot.lane.b32.xlu0 %v5671_v14, %s5054_s26 }
 0x166   : > { %v6004_v22 = vpop.permute.xlu1 %891  ;;  %v6006_v36 = vpop.permute.xlu0 %897 }
 0x167   : > { %8687 = vst [vmem:[#allocation71_spill] sm:$0xff] %v6006_v36  ;;  %v6024_v36 = vld [vmem:[#allocation2 + $0x10a] sm:$0xff] }
 0x168   : > { %1628 = vrot.lane.b32.xlu1 %v6000_v39, %s5053_s25  ;;  %1666 = vrot.lane.b32.xlu0 %v5898_v45, %s5054_s26  ;;  %8692 = vst [vmem:[#allocation76_spill] sm:$0xff] %v6024_v36  ;;  %v6030_v45 = vld [vmem:[#allocation2 + $0xfa] sm:$0xff] }
 0x169   : > { %8694 = vst [vmem:[#allocation78_spill] sm:$0xff] %v6030_v45 }
 0x16a   : > { %v6012_v10 = vpop.permute.xlu1 %895  ;;  %v6016_v51 = vpop.permute.xlu0 %901 }
 0x16b   : > { %8688 = vst [vmem:[#allocation72_spill] sm:$0xff] %v6012_v10  ;;  %8690 = vst [vmem:[#allocation74_spill] sm:$0xff] %v6016_v51 }
 0x16c   : > { %1664 = vrot.lane.b32.xlu1 %v5687_v21, %s5054_s26  ;;  %1670 = vrot.lane.b32.xlu0 %v6014_v61, %s5054_s26  ;;  %v6036_v21 = vld [vmem:[#allocation2 + $0x122] sm:$0xff]  ;;  %v6042_v61 = vld [vmem:[#allocation2 + $0x112] sm:$0xff] }
 0x16d   : > { %8696 = vst [vmem:[#allocation80_spill] sm:$0xff] %v6036_v21  ;;  %8698 = vst [vmem:[#allocation82_spill] sm:$0xff] %v6042_v61 }
 0x16e   : > { %v6022_v14 = vpop.permute.xlu1 %899  ;;  %v6026_v39 = vpop.permute.xlu0 %905 }
 0x16f   : > { %8691 = vst [vmem:[#allocation75_spill] sm:$0xff] %v6022_v14  ;;  %8693 = vst [vmem:[#allocation77_spill] sm:$0xff] %v6026_v39  ;;  %v6048_v39 = vld [vmem:[#allocation2 + $0x13a] sm:$0xff] }
 0x170   : > { %1668 = vrot.lane.b32.xlu1 %v5912_v49, %s5054_s26  ;;  %1674 = vrot.lane.b32.xlu0 %v6024_v36, %s5054_s26  ;;  %8700 = vst [vmem:[#allocation84_spill] sm:$0xff] %v6048_v39  ;;  %v6054_v36 = vld [vmem:[#allocation2 + $0x12a] sm:$0xff] }
 0x171   : > { %8701 = vst [vmem:[#allocation85_spill] sm:$0xff] %v6054_v36 }
 0x172   : > { %v6034_v51 = vpop.permute.xlu1 %903  ;;  %v6038_v10 = vpop.permute.xlu0 %909 }
 0x173   : > { %8695 = vst [vmem:[#allocation79_spill] sm:$0xff] %v6034_v51  ;;  %8697 = vst [vmem:[#allocation81_spill] sm:$0xff] %v6038_v10  ;;  %v6060_v10 = vld [vmem:[#allocation2 + $0x152] sm:$0xff] }
 0x174   : > { %1672 = vrot.lane.b32.xlu1 %v6030_v45, %s5054_s26  ;;  %1678 = vrot.lane.b32.xlu0 %v6036_v21, %s5054_s26  ;;  %8703 = vst [vmem:[#allocation87_spill] sm:$0xff] %v6060_v10  ;;  %v6066_v21 = vld [vmem:[#allocation2 + $0x142] sm:$0xff] }
 0x175   : > { %8704 = vst [vmem:[#allocation88_spill] sm:$0xff] %v6066_v21 }
 0x176   : > { %v6046_v49 = vpop.permute.xlu1 %907  ;;  %v6050_v14 = vpop.permute.xlu0 %945 }
 0x177   : > { %8699 = vst [vmem:[#allocation83_spill] sm:$0xff] %v6046_v49  ;;  %v6072_v49 = vld [vmem:[#allocation2 + $0x16a] sm:$0xff] }
 0x178   : > { %1676 = vrot.lane.b32.xlu1 %v6042_v61, %s5054_s26  ;;  %1682 = vrot.lane.b32.xlu0 %v6048_v39, %s5054_s26  ;;  %8705 = vst [vmem:[#allocation89_spill] sm:$0xff] %v6072_v49  ;;  %v6078_v39 = vld [vmem:[#allocation2 + $0x15a] sm:$0xff] }
 0x179   : > { %8706 = vst [vmem:[#allocation90_spill] sm:$0xff] %v6078_v39 }
 0x17a   : > { %v6058_v45 = vpop.permute.xlu1 %911  ;;  %v6062_v51 = vpop.permute.xlu0 %949 }
 0x17b   : > { %8702 = vst [vmem:[#allocation86_spill] sm:$0xff] %v6058_v45 }
 0x17c   : > { %1680 = vrot.lane.b32.xlu1 %v6054_v36, %s5054_s26  ;;  %1686 = vrot.lane.b32.xlu0 %v6060_v10, %s5054_s26  ;;  %v6088_v10 = vld [vmem:[#allocation2 + $0x172] sm:$0xff] }
 0x17d   : > { %8708 = vst [vmem:[#allocation92_spill] sm:$0xff] %v6088_v10 }
 0x17e   : > { %v6070_v61 = vpop.permute.xlu1 %947  ;;  %v6074_v2 = vpop.permute.xlu0 %953 }
 0x180   : > { %1684 = vrot.lane.b32.xlu1 %v6066_v21, %s5054_s26  ;;  %1690 = vrot.lane.b32.xlu0 %v6072_v49, %s5054_s26  ;;  %v6094_v21 = vld [vmem:[#allocation2 + $0xf0] sm:$0xff] }
 0x181   : > { %8710 = vst [vmem:[#allocation94_spill] sm:$0xff] %v6094_v21 }
 0x182   : > { %v6082_v36 = vpop.permute.xlu1 %951  ;;  %v6084_v45 = vpop.permute.xlu0 %957 }
 0x183   : > { %8707 = vst [vmem:[#allocation91_spill] sm:$0xff] %v6084_v45 }
 0x184   : > { %1688 = vrot.lane.b32.xlu1 %v6078_v39, %s5054_s26  ;;  %1726 = vrot.lane.b32.xlu0 %v5741_v34, %s5055_s27  ;;  %v6104_v39 = vld [vmem:[#allocation2 + $0x108] sm:$0xff]  ;;  %v6110_v34 = vld [vmem:[#allocation2 + $0xf8] sm:$0xff] }
 0x185   : > { %8713 = vst [vmem:[#allocation97_spill] sm:$0xff] %v6104_v39  ;;  %8715 = vst [vmem:[#allocation99_spill] sm:$0xff] %v6110_v34 }
 0x186   : > { %v6092_v28 = vpop.permute.xlu1 %955  ;;  %v6096_v1 = vpop.permute.xlu0 %961 }
 0x187   : > { %8709 = vst [vmem:[#allocation93_spill] sm:$0xff] %v6092_v28  ;;  %8711 = vst [vmem:[#allocation95_spill] sm:$0xff] %v6096_v1  ;;  %v6116_v28 = vld [vmem:[#allocation2 + $0x120] sm:$0xff] }
 0x188   : > { %1692 = vrot.lane.b32.xlu1 %v6088_v10, %s5054_s26  ;;  %1730 = vrot.lane.b32.xlu0 %v6094_v21, %s5055_s27  ;;  %v400_v10 = vld [vmem:[#allocation2] sm:$0xff]  ;;  %8717 = vst [vmem:[#allocation101_spill] sm:$0xff] %v6116_v28 }
 0x18a   : > { %v6102_v49 = vpop.permute.xlu1 %959  ;;  %v6106_v45 = vpop.permute.xlu0 %965 }
 0x18b   : > { %8712 = vst [vmem:[#allocation96_spill] sm:$0xff] %v6102_v49  ;;  %8714 = vst [vmem:[#allocation98_spill] sm:$0xff] %v6106_v45  ;;  %v6122_v45 = vld [vmem:[#allocation2 + $0x110] sm:$0xff] }
 0x18c   : > { %1728 = vrot.lane.b32.xlu1 %v5755_v0, %s5055_s27  ;;  %1734 = vrot.lane.b32.xlu0 %v6104_v39, %s5055_s27  ;;  %v1057_v0 = vsel %vm225_vm0, %v400_v10, %v5567_v3  ;;  %v401_v3 = vld [vmem:[#allocation2 + $0x8] sm:$0xff] }
 0x18e   : > { %v6114_v1 = vpop.permute.xlu1 %963  ;;  %v6118_v21 = vpop.permute.xlu0 %969 }
 0x18f   : > { %8716 = vst [vmem:[#allocation100_spill] sm:$0xff] %v6114_v1  ;;  %8718 = vst [vmem:[#allocation102_spill] sm:$0xff] %v6118_v21  ;;  %v1074_v1 = vsel %vm1073_vm3, %v1057_v0, %v5650_v16  ;;  %v6132_v21 = vld [vmem:[#allocation2 + $0x138] sm:$0xff]  ;;  %v6152_v0 = vld [vmem:[#allocation2 + $0x150] sm:$0xff] }
 0x190   : > { %1732 = vrot.lane.b32.xlu1 %v6110_v34, %s5055_s27  ;;  %1738 = vrot.lane.b32.xlu0 %v6116_v28, %s5055_s27  ;;  %v1091_v34 = vsel %vm1090_vm4, %v1074_v1, %v5725_v44  ;;  %v6142_v28 = vld [vmem:[#allocation2 + $0x128] sm:$0xff] }
 0x191   : > { %v1108_v10 = vsel %vm1107_vm5, %v1091_v34, %v5805_v24  ;;  %v1058_v24 = vsel %vm225_vm0, %v401_v3, %v5573_v4  ;;  %v1059_v34 = vsel %vm225_vm0, %v5481_v50, %v5579_v5  ;;  %v6172_v5 = vld [vmem:[#allocation2 + $0x140] sm:$0xff] }
 0x192   : > { %v6128_v39 = vpop.permute.xlu1 %967  ;;  %v6136_v49 = vpop.permute.xlu0 %973  ;;  %v1125_v16 = vsel %vm1124_vm6, %v1108_v10, %v5882_v40  ;;  %v1075_v4 = vsel %vm1073_vm3, %v1058_v24, %v5669_v48  ;;  %v1076_v3 = vsel %vm1073_vm3, %v1059_v34, %v5662_v37  ;;  %v6196_v37 = vld [vmem:[#allocation2 + $0x168] sm:$0xff]  ;;  %v1064_v48 = vsel %vm225_vm0, %v5509_v57, %v5610_v15 }
 0x193   : > { %v1142_v44 = vsel %vm1141_vm7, %v1125_v16, %v5962_v26  ;;  %v1061_v26 = vsel %vm225_vm0, %v5489_v52, %v5583_v7  ;;  %v1060_v16 = vsel %vm225_vm0, %v5493_v53, %v5589_v8  ;;  %v1092_v52 = vsel %vm1090_vm4, %v1075_v4, %v5739_v11  ;;  %v8719_v11 = vld [vmem:[#allocation14_spill] sm:$0xff] }
 0x194   : > { %1736 = vrot.lane.b32.xlu1 %v6122_v45, %s5055_s27  ;;  %1742 = vrot.lane.b32.xlu0 %v6132_v21, %s5055_s27  ;;  %v1159_v40 = vsel %vm1158_vm8, %v1142_v44, %v6050_v14  ;;  %v1063_v14 = vsel %vm225_vm0, %v5497_v54, %v5591_v9  ;;  %v1062_v7 = vsel %vm225_vm0, %v5501_v55, %v5600_v12  ;;  %v6242_v44 = vld [vmem:[#allocation2 + $0x180] sm:$0xff] }
 0x195   : > { %v1065_v54 = vsel %vm225_vm0, %v5505_v56, %v5603_v13  ;;  %v1093_v8 = vsel %vm1090_vm4, %v1076_v3, %v5733_v32  ;;  %v1109_v9 = vsel %vm1107_vm5, %v1092_v52, %v5824_v30  ;;  %v6204_v55 = vsel %vm225_vm0, %v5513_v58, %v5614_v17  ;;  %v6223_v17 = vld [vmem:[#allocation2 + $0x158] sm:$0xff] }
 0x196   : > { %v6148_v1 = vpop.permute.xlu1 %971  ;;  %v1010_v10 = vpop.permute.xlu0 %1009  ;;  %v1110_v56 = vsel %vm1107_vm5, %v1093_v8, %v5815_v23  ;;  %v1126_v12 = vsel %vm1124_vm6, %v1109_v9, %v5896_v43  ;;  %v6215_v32 = vsel %vm225_vm0, %v5517_v59, %v5622_v19  ;;  %v1077_v57 = vsel %vm1073_vm3, %v1060_v16, %v5681_v18  ;;  %v8723_v16 = vld [vmem:[#allocation15_spill] sm:$0xff] }
 0x197   : > { %v1176_v50 = vsel %vm1175_vm9, %v1159_v40, %v1010_v10  ;;  %v1127_v58 = vsel %vm1124_vm6, %v1110_v56, %v5890_v42  ;;  %v1143_v15 = vsel %vm1141_vm7, %v1126_v12, %v5982_v6  ;;  %v1078_v23 = vsel %vm1073_vm3, %v1061_v26, %v8719_v11  ;;  %v8722_v40 = vld [vmem:[#allocation16_spill] sm:$0xff]  ;;  %v6264_v26 = vld [vmem:[#allocation2 + $0x170] sm:$0xff]  ;;  %v8726_v12 = vld [vmem:[#allocation5_spill] sm:$0xff] }
 0x198   : > { %1740 = vrot.lane.b32.xlu1 %v6142_v28, %s5055_s27  ;;  %1746 = vrot.lane.b32.xlu0 %v6152_v0, %s5055_s27  ;;  %v1094_v30 = vsel %vm1090_vm4, %v1077_v57, %v5749_v35  ;;  %v1144_v59 = vsel %vm1141_vm7, %v1127_v58, %v5974_v62  ;;  %v1160_v19 = vsel %vm1158_vm8, %v1143_v15, %v6070_v61  ;;  %v6301_v58 = vld [vmem:[#allocation2 + $0x188] sm:$0xff] }
 0x199   : > { %4846 = vmatprep.mubr.msk.f32.mxu0 %vm1204_vm10, %v1176_v50  ;;  %v1095_v42 = vsel %vm1090_vm4, %v1078_v23, %v5743_v60  ;;  %v1111_v43 = vsel %vm1107_vm5, %v1094_v30, %v5838_v31  ;;  %v1161_v6 = vsel %vm1158_vm8, %v1144_v59, %v6062_v51  ;;  %v8720_v60 = vld [vmem:[#allocation9_spill] sm:$0xff]  ;;  %v8721_v31 = vld [vmem:[#allocation4_spill] sm:$0xff]  ;;  %v1079_v10 = vsel %vm1073_vm3, %v1062_v7, %v8722_v40 }
 0x19a   : > { %v6184_v53 = vpop.permute.xlu1 %975  ;;  %v1014_v13 = vpop.permute.xlu0 %1013  ;;  %v1112_v61 = vsel %vm1107_vm5, %v1095_v42, %v5831_v25  ;;  %v1128_v62 = vsel %vm1124_vm6, %v1111_v43, %v5906_v46  ;;  %v6255_v51 = vsel %vm225_vm0, %v8721_v31, %v8720_v60  ;;  %v1080_v4 = vsel %vm1073_vm3, %v1063_v14, %v8723_v16  ;;  %v8728_v15 = vld [vmem:[#allocation17_spill] sm:$0xff]  ;;  %v8729_v23 = vld [vmem:[#allocation28_spill] sm:$0xff]  ;;  %v8733_v42 = vld [vmem:[#allocation27_spill] sm:$0xff] }
 0x19b   : > { %v1178_v24 = vsel %vm1175_vm9, %v1161_v6, %v1014_v13  ;;  %v1129_v25 = vsel %vm1124_vm6, %v1112_v61, %v5900_v20  ;;  %v1145_v46 = vsel %vm1141_vm7, %v1128_v62, %v5994_v38  ;;  %v1096_v50 = vsel %vm1090_vm4, %v1079_v10, %v5759_v63  ;;  %v8724_v38 = vld [vmem:[#allocation26_spill] sm:$0xff]  ;;  %v8730_v59 = vld [vmem:[#allocation69_spill] sm:$0xff]  ;;  %v8734_v6 = vld [vmem:[#allocation39_spill] sm:$0xff] }
 0x19c   : > { %1744 = vrot.lane.b32.xlu1 %v6172_v5, %s5055_s27  ;;  %1750 = vrot.lane.b32.xlu0 %v6196_v37, %s5055_s27  ;;  %v1146_v3 = vsel %vm1141_vm7, %v1129_v25, %v5986_v33  ;;  %v1162_v52 = vsel %vm1158_vm8, %v1145_v46, %v6082_v36  ;;  %v1097_v7 = vsel %vm1090_vm4, %v1080_v4, %v8724_v38  ;;  %v8727_v13 = vld [vmem:[#allocation18_spill] sm:$0xff]  ;;  %v8738_v25 = vld [vmem:[#allocation11_spill] sm:$0xff]  ;;  %v8740_v4 = vld [vmem:[#allocation20_spill] sm:$0xff] }
 0x19d   : > { %v1113_v8 = vsel %vm1107_vm5, %v1096_v50, %v5848_v29  ;;  %v1163_v14 = vsel %vm1158_vm8, %v1146_v3, %v6074_v2  ;;  %v1114_v33 = vsel %vm1107_vm5, %v1097_v7, %v5840_v27  ;;  %v8725_v29 = vld [vmem:[#allocation10_spill] sm:$0xff]  ;;  %v1081_v57 = vsel %vm1073_vm3, %v1064_v48, %v8727_v13  ;;  %v8731_v48 = vld [vmem:[#allocation93_spill] sm:$0xff]  ;;  %v8743_v7 = vld [vmem:[#allocation19_spill] sm:$0xff] }
 0x19e   : > { %v1012_v18 = vpop.permute.xlu1 %1011  ;;  %v1018_v34 = vpop.permute.xlu0 %1017  ;;  %v1130_v36 = vsel %vm1124_vm6, %v1113_v8, %v5916_v41  ;;  %v1068_v2 = vsel %vm225_vm0, %v8726_v12, %v8725_v29  ;;  %v1131_v27 = vsel %vm1124_vm6, %v1114_v33, %v5908_v47  ;;  %v1082_v11 = vsel %vm1073_vm3, %v1065_v54, %v8728_v15  ;;  %v8732_v47 = vld [vmem:[#allocation36_spill] sm:$0xff]  ;;  %v8735_v54 = vld [vmem:[#allocation91_spill] sm:$0xff]  ;;  %v8737_v60 = vld [vmem:[#allocation50_spill] sm:$0xff] }
 0x19f   : > { %v1177_v35 = vsel %vm1175_vm9, %v1160_v19, %v1012_v18  ;;  %v1180_v9 = vsel %vm1175_vm9, %v1163_v14, %v1018_v34  ;;  %v1147_v41 = vsel %vm1141_vm7, %v1130_v36, %v6004_v22  ;;  %v1098_v30 = vsel %vm1090_vm4, %v1081_v57, %v8729_v23  ;;  %v8739_v46 = vld [vmem:[#allocation6_spill] sm:$0xff]  ;;  %v8741_v3 = vld [vmem:[#allocation49_spill] sm:$0xff]  ;;  %v8745_v33 = vld [vmem:[#allocation71_spill] sm:$0xff] }
 0x1a0   : > { %1748 = vrot.lane.b32.xlu1 %v6223_v17, %s5055_s27  ;;  %4847 = vmatmul.mubr.msk.f32.vlgmr.msra.gmra.mrb[0].mxu0 %vm1204_vm10, %v1177_v35  ;;  %v1148_v19 = vsel %vm1141_vm7, %v1131_v27, %v8730_v59  ;;  %v1164_v18 = vsel %vm1158_vm8, %v1147_v41, %v8731_v48  ;;  %v1099_v43 = vsel %vm1090_vm4, %v1082_v11, %v8733_v42  ;;  %v8744_v14 = vld [vmem:[#allocation30_spill] sm:$0xff]  ;;  %v8748_v12 = vld [vmem:[#allocation29_spill] sm:$0xff]  ;;  %v8751_v11 = vld [vmem:[#allocation40_spill] sm:$0xff] }
 0x1a1   : > { %4849 = vmatprep.mubr.msk.f32.mxu0 %vm1204_vm10, %v1178_v24  ;;  %1754 = vrot.lane.b32.xlu0 %v6242_v44, %s5055_s27  ;;  %v1115_v35 = vsel %vm1107_vm5, %v1098_v30, %v8734_v6  ;;  %v1165_v61 = vsel %vm1158_vm8, %v1148_v19, %v8735_v54  ;;  %v8736_v24 = vld [vmem:[#allocation38_spill] sm:$0xff]  ;;  %v1071_v16 = vsel %vm225_vm0, %v8739_v46, %v8738_v25  ;;  %v8749_v57 = vld [vmem:[#allocation41_spill] sm:$0xff]  ;;  %v8762_v25 = vld [vmem:[#allocation100_spill] sm:$0xff] }
 0x1a2   : > { %v1016_v20 = vpop.permute.xlu1 %1015  ;;  %v1022_v56 = vpop.permute.xlu0 %1021  ;;  %v1116_v34 = vsel %vm1107_vm5, %v1099_v43, %v8736_v24  ;;  %v1132_v31 = vsel %vm1124_vm6, %v1115_v35, %v8737_v60  ;;  %v1083_v50 = vsel %vm1073_vm3, %v6215_v32, %v8740_v4  ;;  %v1084_v8 = vsel %vm1073_vm3, %v6204_v55, %v8743_v7  ;;  %v8750_v55 = vld [vmem:[#allocation95_spill] sm:$0xff]  ;;  %v8752_v30 = vld [vmem:[#allocation53_spill] sm:$0xff]  ;;  %v8756_v43 = vld [vmem:[#allocation22_spill] sm:$0xff] }
 0x1a3   : > { %v1179_v63 = vsel %vm1175_vm9, %v1162_v52, %v1016_v20  ;;  %v1182_v40 = vsel %vm1175_vm9, %v1165_v61, %v1022_v56  ;;  %v1133_v52 = vsel %vm1124_vm6, %v1116_v34, %v8741_v3  ;;  %v8742_v20 = vld [vmem:[#allocation72_spill] sm:$0xff]  ;;  %v8747_v56 = vld [vmem:[#allocation51_spill] sm:$0xff]  ;;  %v1101_v13 = vsel %vm1090_vm4, %v1084_v8, %v8748_v12  ;;  %v8759_v24 = vld [vmem:[#allocation21_spill] sm:$0xff] }
 0x1a4   : > { %1752 = vrot.lane.b32.xlu1 %v6264_v26, %s5055_s27  ;;  %4850 = vmatmul.mubr.msk.f32.gmra.mrb[2].mxu0 %vm1204_vm10, %v1179_v63  ;;  %v1149_v38 = vsel %vm1141_vm7, %v1132_v31, %v8742_v20  ;;  %v1100_v63 = vsel %vm1090_vm4, %v1083_v50, %v8744_v14  ;;  %v1150_v36 = vsel %vm1141_vm7, %v1133_v52, %v8745_v33  ;;  %v8757_v35 = vld [vmem:[#allocation52_spill] sm:$0xff]  ;;  %v8758_v61 = vld [vmem:[#allocation75_spill] sm:$0xff]  ;;  %v8763_v46 = vld [vmem:[#allocation54_spill] sm:$0xff] }
 0x1a5   : > { %4852 = vmatprep.mubr.msk.f32.mxu0 %vm1204_vm10, %v1180_v9  ;;  %1790 = vrot.lane.b32.xlu0 %v8732_v47, %s5056_s28  ;;  %v8746_v9 = vld [vmem:[#allocation96_spill] sm:$0xff]  ;;  %v1117_v27 = vsel %vm1107_vm5, %v1100_v63, %v8749_v57  ;;  %v1167_v41 = vsel %vm1158_vm8, %v1150_v36, %v8750_v55  ;;  %v1118_v23 = vsel %vm1107_vm5, %v1101_v13, %v8751_v11  ;;  %v8764_v50 = vld [vmem:[#allocation31_spill] sm:$0xff]  ;;  %v8767_v8 = vld [vmem:[#allocation42_spill] sm:$0xff] }
 0x1a6   : > { %v1020_v22 = vpop.permute.xlu1 %1019  ;;  %v1026_v10 = vpop.permute.xlu0 %1025  ;;  %v1166_v32 = vsel %vm1158_vm8, %v1149_v38, %v8746_v9  ;;  %v1134_v59 = vsel %vm1124_vm6, %v1117_v27, %v8752_v30  ;;  %v8754_v47 = vld [vmem:[#allocation12_spill] sm:$0xff]  ;;  %v1085_v6 = vsel %vm1073_vm3, %v1068_v2, %v8756_v43  ;;  %v1135_v54 = vsel %vm1124_vm6, %v1118_v23, %v8757_v35  ;;  %v8765_v52 = vld [vmem:[#allocation43_spill] sm:$0xff]  ;;  %v8768_v63 = vld [vmem:[#allocation57_spill] sm:$0xff] }
 0x1a7   : > { %v1181_v62 = vsel %vm1175_vm9, %v1164_v18, %v1020_v22  ;;  %v1184_v19 = vsel %vm1175_vm9, %v1167_v41, %v1026_v10  ;;  %v8753_v18 = vld [vmem:[#allocation37_spill] sm:$0xff]  ;;  %v8755_v22 = vld [vmem:[#allocation7_spill] sm:$0xff]  ;;  %v1086_v34 = vsel %vm1073_vm3, %v6255_v51, %v8759_v24  ;;  %v8760_v60 = vld [vmem:[#allocation32_spill] sm:$0xff] }
 0x1a8   : > { %1756 = vrot.lane.b32.xlu1 %v6301_v58, %s5055_s27  ;;  %4853 = vmatmul.mubr.msk.f32.gmra.mrb[4].mxu0 %vm1204_vm10, %v1181_v62  ;;  %v1070_v42 = vsel %vm225_vm0, %v8755_v22, %v8754_v47  ;;  %v1151_v62 = vsel %vm1141_vm7, %v1134_v59, %v8758_v61  ;;  %v1102_v31 = vsel %vm1090_vm4, %v1085_v6, %v8760_v60  ;;  %v8766_v51 = vld [vmem:[#allocation98_spill] sm:$0xff]  ;;  %v8771_v12 = vld [vmem:[#allocation8_spill] sm:$0xff]  ;;  %v8773_v55 = vld [vmem:[#allocation55_spill] sm:$0xff] }
 0x1a9   : > { %4855 = vmatprep.mubr.msk.f32.mxu0 %vm1204_vm10, %v1182_v40  ;;  %1794 = vrot.lane.b32.xlu0 %v8747_v56, %s5056_s28  ;;  %v8761_v40 = vld [vmem:[#allocation74_spill] sm:$0xff]  ;;  %v1168_v2 = vsel %vm1158_vm8, %v1151_v62, %v8762_v25  ;;  %v1103_v3 = vsel %vm1090_vm4, %v1086_v34, %v8764_v50  ;;  %v1119_v20 = vsel %vm1107_vm5, %v1102_v31, %v8765_v52  ;;  %v8772_v57 = vld [vmem:[#allocation24_spill] sm:$0xff]  ;;  %v8775_v23 = vld [vmem:[#allocation23_spill] sm:$0xff] }
 0x1aa   : > { %v1024_v29 = vpop.permute.xlu1 %1023  ;;  %v1030_v48 = vpop.permute.xlu0 %1029  ;;  %v1152_v10 = vsel %vm1141_vm7, %v1135_v54, %v8761_v40  ;;  %v1120_v14 = vsel %vm1107_vm5, %v1103_v3, %v8767_v8  ;;  %v1136_v33 = vsel %vm1124_vm6, %v1119_v20, %v8768_v63  ;;  %v1087_v27 = vsel %vm1073_vm3, %v1070_v42, %v8772_v57  ;;  %v8776_v59 = vld [vmem:[#allocation34_spill] sm:$0xff]  ;;  %v8779_v43 = vld [vmem:[#allocation33_spill] sm:$0xff]  ;;  %v8782_v24 = vld [vmem:[#allocation44_spill] sm:$0xff] }
 0x1ab   : > { %v1183_v15 = vsel %vm1175_vm9, %v1166_v32, %v1024_v29  ;;  %v1169_v38 = vsel %vm1158_vm8, %v1152_v10, %v8766_v51  ;;  %v8769_v32 = vld [vmem:[#allocation56_spill] sm:$0xff]  ;;  %v8770_v29 = vld [vmem:[#allocation13_spill] sm:$0xff]  ;;  %v1137_v41 = vsel %vm1124_vm6, %v1120_v14, %v8773_v55  ;;  %v1088_v30 = vsel %vm1073_vm3, %v1071_v16, %v8775_v23  ;;  %v8778_v22 = vld [vmem:[#allocation58_spill] sm:$0xff] }
 0x1ac   : > { %1792 = vrot.lane.b32.xlu1 %v8753_v18, %s5056_s28  ;;  %4856 = vmatmul.mubr.msk.f32.gmra.mrb[6].mxu0 %vm1204_vm10, %v1183_v15  ;;  %v1186_v36 = vsel %vm1175_vm9, %v1169_v38, %v1030_v48  ;;  %v1072_v13 = vsel %vm225_vm0, %v8771_v12, %v8770_v29  ;;  %v8774_v15 = vld [vmem:[#allocation79_spill] sm:$0xff]  ;;  %v8777_v48 = vld [vmem:[#allocation77_spill] sm:$0xff]  ;;  %v1105_v6 = vsel %vm1090_vm4, %v1088_v30, %v8779_v43  ;;  %v8781_v16 = vld [vmem:[#allocation102_spill] sm:$0xff] }
 0x1ad   : > { %4858 = vmatprep.mubr.msk.f32.mxu0 %vm1204_vm10, %v1184_v19  ;;  %1798 = vrot.lane.b32.xlu0 %v8763_v46, %s5056_s28  ;;  %v1153_v11 = vsel %vm1141_vm7, %v1136_v33, %v8774_v15  ;;  %v1104_v19 = vsel %vm1090_vm4, %v1087_v27, %v8776_v59  ;;  %v1154_v18 = vsel %vm1141_vm7, %v1137_v41, %v8777_v48  ;;  %v8780_v35 = vld [vmem:[#allocation45_spill] sm:$0xff]  ;;  %v8784_v10 = vld [vmem:[#allocation60_spill] sm:$0xff]  ;;  %v8787_v3 = vld [vmem:[#allocation83_spill] sm:$0xff] }
 0x1ae   : > { %v1028_v4 = vpop.permute.xlu1 %1027  ;;  %v1034_v9 = vpop.permute.xlu0 %1033  ;;  %v1170_v47 = vsel %vm1158_vm8, %v1153_v11, %v6128_v39  ;;  %v1121_v54 = vsel %vm1107_vm5, %v1104_v19, %v8780_v35  ;;  %v1171_v61 = vsel %vm1158_vm8, %v1154_v18, %v8781_v16  ;;  %v1122_v34 = vsel %vm1107_vm5, %v1105_v6, %v8782_v24  ;;  %v8783_v60 = vld [vmem:[#allocation61_spill] sm:$0xff]  ;;  %v8788_v20 = vld [vmem:[#allocation35_spill] sm:$0xff]  ;;  %v8790_v14 = vld [vmem:[#allocation62_spill] sm:$0xff] }
 0x1af   : > { %v1185_v7 = vsel %vm1175_vm9, %v1168_v2, %v1028_v4  ;;  %v1138_v39 = vsel %vm1124_vm6, %v1121_v54, %v8783_v60  ;;  %v1188_v31 = vsel %vm1175_vm9, %v1171_v61, %v1034_v9  ;;  %v8785_v25 = vld [vmem:[#allocation25_spill] sm:$0xff]  ;;  %v8786_v4 = vld [vmem:[#allocation59_spill] sm:$0xff]  ;;  %v8791_v33 = vld [vmem:[#allocation46_spill] sm:$0xff] }
 0x1b0   : > { %1796 = vrot.lane.b32.xlu1 %v8769_v32, %s5056_s28  ;;  %4859 = vmatmul.mubr.msk.f32.gmra.mrb[8].mxu0 %vm1204_vm10, %v1185_v7  ;;  %v1089_v2 = vsel %vm1073_vm3, %v1072_v13, %v8785_v25  ;;  %v1139_v50 = vsel %vm1124_vm6, %v1122_v34, %v8786_v4  ;;  %v1155_v52 = vsel %vm1141_vm7, %v1138_v39, %v8787_v3  ;;  %v8789_v38 = vld [vmem:[#allocation81_spill] sm:$0xff]  ;;  %v8792_v12 = vld [vmem:[#allocation64_spill] sm:$0xff]  ;;  %v8794_v55 = vld [vmem:[#allocation86_spill] sm:$0xff] }
 0x1b1   : > { %4861 = vmatprep.mubr.msk.f32.mxu0 %vm1204_vm10, %v1186_v36  ;;  %1802 = vrot.lane.b32.xlu0 %v8778_v22, %s5056_s28  ;;  %v1106_v51 = vsel %vm1090_vm4, %v1089_v2, %v8788_v20  ;;  %v1156_v7 = vsel %vm1141_vm7, %v1139_v50, %v8789_v38  ;;  %v1172_v8 = vsel %vm1158_vm8, %v1155_v52, %v6148_v1  ;;  %v8793_v1 = vld [vmem:[#allocation63_spill] sm:$0xff]  ;;  %v8795_v15 = vld [vmem:[#allocation65_spill] sm:$0xff]  ;;  %v8796_v59 = vld [vmem:[#allocation66_spill] sm:$0xff] }
 0x1b2   : > { %v1032_v42 = vpop.permute.xlu1 %1031  ;;  %v1038_v40 = vpop.permute.xlu0 %1037  ;;  %v1123_v36 = vsel %vm1107_vm5, %v1106_v51, %v8791_v33  ;;  %v1173_v9 = vsel %vm1158_vm8, %v1156_v7, %v6136_v49  ;;  %v8797_v19 = vld [vmem:[#allocation67_spill] sm:$0xff]  ;;  %v6481_v18 = vld [vmem:[#allocation2 + $0x181] sm:$0xff]  ;;  %v8799_v6 = vld [vmem:[#allocation70_spill] sm:$0xff] }
 0x1b3   : > { %v1187_v62 = vsel %vm1175_vm9, %v1170_v47, %v1032_v42  ;;  %v1140_v13 = vsel %vm1124_vm6, %v1123_v36, %v8792_v12  ;;  %v1190_v57 = vsel %vm1175_vm9, %v1173_v9, %v1038_v40  ;;  %v8798_v47 = vld [vmem:[#allocation68_spill] sm:$0xff]  ;;  %v6495_v35 = vld [vmem:[#allocation2 + $0x189] sm:$0xff]  ;;  %v8800_v54 = vld [vmem:[#allocation47_spill] sm:$0xff] }
 0x1b4   : > { %1800 = vrot.lane.b32.xlu1 %v8784_v10, %s5056_s28  ;;  %4862 = vmatmul.mubr.msk.f32.gmra.mrb[10].mxu0 %vm1204_vm10, %v1187_v62  ;;  %v1157_v41 = vsel %vm1141_vm7, %v1140_v13, %v8794_v55  ;;  %v8801_v62 = vld [vmem:[#allocation73_spill] sm:$0xff]  ;;  %v8803_v60 = vld [vmem:[#allocation48_spill] sm:$0xff]  ;;  %v8807_v25 = vld [vmem:[#allocation78_spill] sm:$0xff] }
 0x1b5   : > { %4864 = vmatprep.mubr.msk.f32.mxu0 %vm1204_vm10, %v1188_v31  ;;  %1806 = vrot.lane.b32.xlu0 %v8790_v14, %s5056_s28  ;;  %v1174_v49 = vsel %vm1158_vm8, %v1157_v41, %v6184_v53  ;;  %v8804_v39 = vld [vmem:[#allocation76_spill] sm:$0xff]  ;;  %v8811_v3 = vld [vmem:[#allocation82_spill] sm:$0xff]  ;;  %v8814_v38 = vld [vmem:[#allocation85_spill] sm:$0xff] }
 0x1b6   : > { %v1036_v63 = vpop.permute.xlu1 %1035  ;;  %v6459_v27 = vpop.permute.xlu0 %1598  ;;  %v8808_v2 = vld [vmem:[#allocation80_spill] sm:$0xff]  ;;  %v8815_v7 = vld [vmem:[#allocation87_spill] sm:$0xff]  ;;  %v8818_v36 = vld [vmem:[#allocation89_spill] sm:$0xff] }
 0x1b7   : > { %v1189_v29 = vsel %vm1175_vm9, %v1172_v8, %v1036_v63  ;;  %v8812_v52 = vld [vmem:[#allocation84_spill] sm:$0xff]  ;;  %v8819_v13 = vld [vmem:[#allocation90_spill] sm:$0xff] }
 0x1b8   : > { %1804 = vrot.lane.b32.xlu1 %v8793_v1, %s5056_s28  ;;  %4865 = vmatmul.mubr.msk.f32.gmra.mrb[12].mxu0 %vm1204_vm10, %v1189_v29  ;;  %v8817_v33 = vld [vmem:[#allocation88_spill] sm:$0xff] }
 0x1b9   : > { %4867 = vmatprep.mubr.msk.f32.mxu0 %vm1204_vm10, %v1190_v57  ;;  %1810 = vrot.lane.b32.xlu0 %v8795_v15, %s5056_s28  ;;  %v6549_v29 = vld [vmem:[#allocation2 + $0x182] sm:$0xff] }
 0x1ba   : > { %v1040_v11 = vpop.permute.xlu1 %1039  ;;  %v6472_v30 = vpop.permute.xlu0 %1602  ;;  %v8820_v41 = vld [vmem:[#allocation92_spill] sm:$0xff] }
 0x1bb   : > { %v1191_v23 = vsel %vm1175_vm9, %v1174_v49, %v1040_v11  ;;  %v6563_v49 = vld [vmem:[#allocation2 + $0x18a] sm:$0xff] }
 0x1bc   : > { %1808 = vrot.lane.b32.xlu1 %v8796_v59, %s5056_s28  ;;  %4868 = vmatmul.mubr.msk.f32.gmra.mrb[14].mxu0 %vm1204_vm10, %v1191_v23  ;;  %v8821_v11 = vld [vmem:[#allocation94_spill] sm:$0xff] }
 0x1bd   : > { %1814 = vrot.lane.b32.xlu0 %v8797_v19, %s5056_s28 }
 0x1be   : > { %v6479_v48 = vpop.permute.xlu1 %1600  ;;  %v6483_v53 = vpop.permute.xlu0 %1606 }
 0x1c0   : > { %1812 = vrot.lane.b32.xlu1 %v8798_v47, %s5056_s28 }
 0x1c1   : > { %1818 = vrot.lane.b32.xlu0 %v6481_v18, %s5056_s28 }
 0x1c2   : > { %v6489_v42 = vpop.permute.xlu1 %1604  ;;  %v6491_v43 = vpop.permute.xlu0 %1610 }
 0x1c4   : > { %1816 = vrot.lane.b32.xlu1 %v8799_v6, %s5056_s28 }
 0x1c5   : > { %1854 = vrot.lane.b32.xlu0 %v8800_v54, %s5057_s29 }
 0x1c6   : > { %v6499_v16 = vpop.permute.xlu1 %1608  ;;  %v6501_v61 = vpop.permute.xlu0 %1614 }
 0x1c8   : > { %1820 = vrot.lane.b32.xlu1 %v6495_v35, %s5056_s28 }
 0x1c9   : > { %1858 = vrot.lane.b32.xlu0 %v8801_v62, %s5057_s29 }
 0x1ca   : > { %v6507_v24 = vpop.permute.xlu1 %1612  ;;  %v6509_v34 = vpop.permute.xlu0 %1618 }
 0x1cb   : > { %8802 = vst [vmem:[#allocation14_spill] sm:$0xff] %v6509_v34 }
 0x1cc   : > { %1856 = vrot.lane.b32.xlu1 %v8803_v60, %s5057_s29  ;;  %v8823_v60 = vld [vmem:[#allocation97_spill] sm:$0xff] }
 0x1cd   : > { %1862 = vrot.lane.b32.xlu0 %v8804_v39, %s5057_s29 }
 0x1ce   : > { %v6515_v31 = vpop.permute.xlu1 %1616  ;;  %v6517_v40 = vpop.permute.xlu0 %1622 }
 0x1cf   : > { %8805 = vst [vmem:[#allocation9_spill] sm:$0xff] %v6515_v31  ;;  %8806 = vst [vmem:[#allocation4_spill] sm:$0xff] %v6517_v40  ;;  %v8825_v40 = vld [vmem:[#allocation99_spill] sm:$0xff] }
 0x1d0   : > { %1860 = vrot.lane.b32.xlu1 %v8807_v25, %s5057_s29 }
 0x1d1   : > { %1866 = vrot.lane.b32.xlu0 %v8808_v2, %s5057_s29 }
 0x1d2   : > { %v6523_v4 = vpop.permute.xlu1 %1620  ;;  %v6525_v50 = vpop.permute.xlu0 %1626 }
 0x1d3   : > { %8809 = vst [vmem:[#allocation16_spill] sm:$0xff] %v6523_v4  ;;  %8810 = vst [vmem:[#allocation15_spill] sm:$0xff] %v6525_v50  ;;  %v2226_v50 = vld [vmem:[%s8544_s1 + $0x20] sm:$0xf]  ;;  %v8826_v4 = vld [vmem:[#allocation101_spill] sm:$0xff] }
 0x1d4   : > { %1864 = vrot.lane.b32.xlu1 %v8811_v3, %s5057_s29  ;;  %4878 = vmatprep.subr.msk.mxu1 %vm1253_vm2, %v2226_v50 }
 0x1d5   : > { %1870 = vrot.lane.b32.xlu0 %v8812_v52, %s5057_s29  ;;  %4879 = vmatpush3.msk.msra.mxu1 %vm1253_vm2, %v2226_v50 }
 0x1d6   : > { %v6531_v20 = vpop.permute.xlu1 %1624  ;;  %v6533_v51 = vpop.permute.xlu0 %1662 }
 0x1d7   : > { %8813 = vst [vmem:[#allocation26_spill] sm:$0xff] %v6531_v20 }
 0x1d8   : > { %1868 = vrot.lane.b32.xlu1 %v8814_v38, %s5057_s29 }
 0x1d9   : > { %1874 = vrot.lane.b32.xlu0 %v8815_v7, %s5057_s29 }
 0x1da   : > { %v6539_v8 = vpop.permute.xlu1 %1628  ;;  %v6541_v63 = vpop.permute.xlu0 %1666 }
 0x1db   : > { %8816 = vst [vmem:[#allocation10_spill] sm:$0xff] %v6539_v8 }
 0x1dc   : > { %1872 = vrot.lane.b32.xlu1 %v8817_v33, %s5057_s29 }
 0x1dd   : > { %1878 = vrot.lane.b32.xlu0 %v8818_v36, %s5057_s29 }
 0x1de   : > { %v6547_v9 = vpop.permute.xlu1 %1664  ;;  %v6551_v12 = vpop.permute.xlu0 %1670 }
 0x1e0   : > { %1876 = vrot.lane.b32.xlu1 %v8819_v13, %s5057_s29 }
 0x1e1   : > { %1882 = vrot.lane.b32.xlu0 %v6549_v29, %s5057_s29 }
 0x1e2   : > { %v6557_v57 = vpop.permute.xlu1 %1668  ;;  %v6559_v55 = vpop.permute.xlu0 %1674 }
 0x1e4   : > { %1880 = vrot.lane.b32.xlu1 %v8820_v41, %s5057_s29 }
 0x1e5   : > { %1918 = vrot.lane.b32.xlu0 %v8821_v11, %s5058_s30 }
 0x1e6   : > { %v6567_v23 = vpop.permute.xlu1 %1672  ;;  %v6569_v54 = vpop.permute.xlu0 %1678 }
 0x1e7   : > { %8822 = vst [vmem:[#allocation5_spill] sm:$0xff] %v6569_v54 }
 0x1e8   : > { %1884 = vrot.lane.b32.xlu1 %v6563_v49, %s5057_s29 }
 0x1e9   : > { %1922 = vrot.lane.b32.xlu0 %v8823_v60, %s5058_s30 }
 0x1ea   : > { %v6575_v8 = vpop.permute.xlu1 %1676  ;;  %v6581_v20 = vpop.permute.xlu0 %1682 }
 0x1eb   : > { %8824 = vst [vmem:[#allocation18_spill] sm:$0xff] %v6581_v20 }
 0x1ec   : > { %1920 = vrot.lane.b32.xlu1 %v8825_v40, %s5058_s30 }
 0x1ed   : > { %1926 = vrot.lane.b32.xlu0 %v8826_v4, %s5058_s30 }
 0x1ee   : > { %v6588_v34 = vpop.permute.xlu1 %1680  ;;  %v6590_v31 = vpop.permute.xlu0 %1686 }
 0x1ef   : > { %8827 = vst [vmem:[#allocation17_spill] sm:$0xff] %v6590_v31 }
 0x1f0   : > { %1924 = vrot.lane.b32.xlu1 %v6122_v45, %s5058_s30 }
 0x1f1   : > { %1984 = vrot.lane.b32.xlu0 %v8769_v32, %s5059_s6 }
 0x1f2   : > { %v6596_v54 = vpop.permute.xlu1 %1684  ;;  %v6598_v20 = vpop.permute.xlu0 %1690 }
 0x1f3   : > { %8828 = vst [vmem:[#allocation28_spill] sm:$0xff] %v6596_v54  ;;  %8829 = vst [vmem:[#allocation69_spill] sm:$0xff] %v6598_v20 }
 0x1f4   : > { %1982 = vrot.lane.b32.xlu1 %v8747_v56, %s5059_s6 }
 0x1f5   : > { %2048 = vrot.lane.b32.xlu0 %v8807_v25, %s5060_s17 }
 0x1f6   : > { %v6604_v4 = vpop.permute.xlu1 %1688  ;;  %v6606_v50 = vpop.permute.xlu0 %1726 }
 0x1f7   : > { %8830 = vst [vmem:[#allocation93_spill] sm:$0xff] %v6604_v4 }
 0x1f8   : > { %2046 = vrot.lane.b32.xlu1 %v8801_v62, %s5060_s17 }
 0x1f9   : > { %1988 = vrot.lane.b32.xlu0 %v8784_v10, %s5059_s6 }
 0x1fa   : > { %v6612_v32 = vpop.permute.xlu1 %1692  ;;  %v6614_v31 = vpop.permute.xlu0 %1730 }
 0x1fb   : > { %8831 = vst [vmem:[#allocation36_spill] sm:$0xff] %v6612_v32 }
 0x1fc   : > { %1986 = vrot.lane.b32.xlu1 %v8763_v46, %s5059_s6 }
 0x1fd   : > { %2052 = vrot.lane.b32.xlu0 %v8811_v3, %s5060_s17 }
 0x1fe   : > { %v6620_v56 = vpop.permute.xlu1 %1728  ;;  %v6622_v25 = vpop.permute.xlu0 %1734 }
 0x200   : > { %2050 = vrot.lane.b32.xlu1 %v8804_v39, %s5060_s17 }
 0x201   : > { %1990 = vrot.lane.b32.xlu0 %v8778_v22, %s5059_s6 }
 0x202   : > { %v6628_v10 = vpop.permute.xlu1 %1732  ;;  %v6630_v62 = vpop.permute.xlu0 %1738 }
 0x204   : > { %1928 = vrot.lane.b32.xlu1 %v6142_v28, %s5058_s30 }
 0x205   : > { %2054 = vrot.lane.b32.xlu0 %v8808_v2, %s5060_s17 }
 0x206   : > { %v6636_v46 = vpop.permute.xlu1 %1736  ;;  %v6638_v3 = vpop.permute.xlu0 %1742 }
 0x208   : > { %1992 = vrot.lane.b32.xlu1 %v8793_v1, %s5059_s6 }
 0x209   : > { %1930 = vrot.lane.b32.xlu0 %v6132_v21, %s5058_s30 }
 0x20a   : > { %v6644_v22 = vpop.permute.xlu1 %1740  ;;  %v6646_v39 = vpop.permute.xlu0 %1746 }
 0x20b   : > { %8832 = vst [vmem:[#allocation27_spill] sm:$0xff] %v6646_v39  ;;  %v1437_v39 = vld [vmem:[#allocation2 + $0xc8] sm:$0xff] }
 0x20c   : > { %2056 = vrot.lane.b32.xlu1 %v8814_v38, %s5060_s17 }
 0x20d   : > { %1994 = vrot.lane.b32.xlu0 %v8790_v14, %s5059_s6 }
 0x20e   : > { %v6652_v28 = vpop.permute.xlu1 %1744  ;;  %v6654_v2 = vpop.permute.xlu0 %1750 }
 0x20f   : > { %8833 = vst [vmem:[#allocation39_spill] sm:$0xff] %v6652_v28  ;;  %8834 = vst [vmem:[#allocation91_spill] sm:$0xff] %v6654_v2 }
 0x210   : > { %1932 = vrot.lane.b32.xlu1 %v6172_v5, %s5058_s30 }
 0x211   : > { %2058 = vrot.lane.b32.xlu0 %v8812_v52, %s5060_s17 }
 0x212   : > { %v6660_v21 = vpop.permute.xlu1 %1748 }
 0x213   : > { %8835 = vst [vmem:[#allocation38_spill] sm:$0xff] %v6660_v21  ;;  %v6662_v1 = vpop.permute.xlu0 %1754 }
 0x214   : > { %8836 = vst [vmem:[#allocation50_spill] sm:$0xff] %v6662_v1  ;;  %1996 = vrot.lane.b32.xlu1 %v8796_v59, %s5059_s6 }
 0x215   : > { %1934 = vrot.lane.b32.xlu0 %v6152_v0, %s5058_s30 }
 0x216   : > { %v6668_v14 = vpop.permute.xlu1 %1752 }
 0x217   : > { %8837 = vst [vmem:[#allocation11_spill] sm:$0xff] %v6668_v14  ;;  %v6670_v38 = vpop.permute.xlu0 %1790 }
 0x218   : > { %2060 = vrot.lane.b32.xlu1 %v8817_v33, %s5060_s17 }
 0x219   : > { %1998 = vrot.lane.b32.xlu0 %v8795_v15, %s5059_s6 }
 0x21a   : > { %v6676_v5 = vpop.permute.xlu1 %1756 }
 0x21b   : > { %8838 = vst [vmem:[#allocation6_spill] sm:$0xff] %v6676_v5  ;;  %v6678_v52 = vpop.permute.xlu0 %1794 }
 0x21c   : > { %1936 = vrot.lane.b32.xlu1 %v6223_v17, %s5058_s30 }
 0x21d   : > { %2062 = vrot.lane.b32.xlu0 %v8815_v7, %s5060_s17 }
 0x21e   : > { %v6684_v0 = vpop.permute.xlu1 %1792 }
 0x21f   : > { %v6686_v59 = vpop.permute.xlu0 %1798 }
 0x220   : > { %2000 = vrot.lane.b32.xlu1 %v8798_v47, %s5059_s6 }
 0x221   : > { %1938 = vrot.lane.b32.xlu0 %v6196_v37, %s5058_s30 }
 0x222   : > { %v6692_v15 = vpop.permute.xlu1 %1796 }
 0x223   : > { %v6694_v33 = vpop.permute.xlu0 %1802 }
 0x224   : > { %2064 = vrot.lane.b32.xlu1 %v8819_v13, %s5060_s17 }
 0x225   : > { %2002 = vrot.lane.b32.xlu0 %v8797_v19, %s5059_s6 }
 0x226   : > { %v6700_v17 = vpop.permute.xlu1 %1800 }
 0x227   : > { %v6702_v7 = vpop.permute.xlu0 %1806 }
 0x228   : > { %1940 = vrot.lane.b32.xlu1 %v6264_v26, %s5058_s30 }
 0x229   : > { %2066 = vrot.lane.b32.xlu0 %v8818_v36, %s5060_s17 }
 0x22a   : > { %v6708_v37 = vpop.permute.xlu1 %1804 }
 0x22b   : > { %v6710_v47 = vpop.permute.xlu0 %1810 }
 0x22c   : > { %8839 = vst [vmem:[#allocation20_spill] sm:$0xff] %v6710_v47  ;;  %2004 = vrot.lane.b32.xlu1 %v8799_v6, %s5059_s6  ;;  %v1548_v6 = vld [vmem:[#allocation2 + $0x198] sm:$0xff] }
 0x22d   : > { %1942 = vrot.lane.b32.xlu0 %v6242_v44, %s5058_s30 }
 0x22e   : > { %v6716_v19 = vpop.permute.xlu1 %1808 }
 0x22f   : > { %8840 = vst [vmem:[#allocation49_spill] sm:$0xff] %v6716_v19  ;;  %v6718_v13 = vpop.permute.xlu0 %1814 }
 0x230   : > { %8841 = vst [vmem:[#allocation72_spill] sm:$0xff] %v6718_v13  ;;  %2068 = vrot.lane.b32.xlu1 %v8820_v41, %s5060_s17  ;;  %v1564_v41 = vld [vmem:[#allocation2 + $0x199] sm:$0xff] }
 0x231   : > { %2006 = vrot.lane.b32.xlu0 %v6481_v18, %s5059_s6 }
 0x232   : > { %v6724_v26 = vpop.permute.xlu1 %1812 }
 0x233   : > { %8842 = vst [vmem:[#allocation19_spill] sm:$0xff] %v6724_v26  ;;  %v6726_v36 = vpop.permute.xlu0 %1818 }
 0x234   : > { %8843 = vst [vmem:[#allocation30_spill] sm:$0xff] %v6726_v36  ;;  %1944 = vrot.lane.b32.xlu1 %v6301_v58, %s5058_s30  ;;  %v1549_v58 = vld [vmem:[#allocation2 + $0x1a0] sm:$0xff] }
 0x235   : > { %2070 = vrot.lane.b32.xlu0 %v6549_v29, %s5060_s17  ;;  %v1580_v36 = vld [vmem:[#allocation2 + $0x19a] sm:$0xff] }
 0x236   : > { %v6732_v44 = vpop.permute.xlu1 %1816 }
 0x237   : > { %8844 = vst [vmem:[#allocation71_spill] sm:$0xff] %v6732_v44  ;;  %v1855_v5 = vpop.permute.xlu0 %1854 }
 0x238   : > { %2008 = vrot.lane.b32.xlu1 %v6495_v35, %s5059_s6  ;;  %v1565_v35 = vld [vmem:[#allocation2 + $0x1a1] sm:$0xff] }
 0x239   : > { %1946 = vrot.lane.b32.xlu0 %v1548_v6, %s5058_s30 }
 0x23a   : > { %v6737_v18 = vpop.permute.xlu1 %1820 }
 0x23b   : > { %8845 = vst [vmem:[#allocation96_spill] sm:$0xff] %v6737_v18  ;;  %v6739_v32 = vpop.permute.xlu0 %1858  ;;  %v2479_v18 = vld [vmem:[#allocation3 + $0x1] sm:$0xff] }
 0x23c   : > { %2072 = vrot.lane.b32.xlu1 %v6563_v49, %s5060_s17  ;;  %v1581_v49 = vld [vmem:[#allocation2 + $0x1a2] sm:$0xff] }
 0x23d   : > { %2010 = vrot.lane.b32.xlu0 %v1564_v41, %s5059_s6 }
 0x23e   : > { %v1857_v29 = vpop.permute.xlu1 %1856 }
 0x23f   : > { %v6744_v1 = vpop.permute.xlu0 %1862 }
 0x240   : > { %1948 = vrot.lane.b32.xlu1 %v1549_v58, %s5058_s30  ;;  %v2480_v58 = vld [vmem:[#allocation3 + $0x9] sm:$0xff] }
 0x241   : > { %2074 = vrot.lane.b32.xlu0 %v1580_v36, %s5060_s17 }
 0x242   : > { %v6748_v6 = vpop.permute.xlu1 %1860 }
 0x243   : > { %v6750_v20 = vpop.permute.xlu0 %1866 }
 0x244   : > { %2012 = vrot.lane.b32.xlu1 %v1565_v35, %s5059_s6 }
 0x245   : > { %2624 = vrot.lane.b32.xlu0 %v2479_v18, %s5053_s25 }
 0x246   : > { %v6753_v44 = vpop.permute.xlu1 %1864 }
 0x247   : > { %v6756_v41 = vpop.permute.xlu0 %1870 }
 0x248   : > { %2076 = vrot.lane.b32.xlu1 %v1581_v49, %s5060_s17 }
 0x24a   : > { %v6759_v14 = vpop.permute.xlu1 %1868 }
 0x24b   : > { %v6761_v36 = vpop.permute.xlu0 %1874 }
 0x24c   : > { %8846 = vst [vmem:[#allocation51_spill] sm:$0xff] %v6761_v36  ;;  %2626 = vrot.lane.b32.xlu1 %v2480_v58, %s5053_s25  ;;  %v1436_v36 = vld [vmem:[#allocation2 + $0xc0] sm:$0xff] }
 0x24e   : > { %v6764_v4 = vpop.permute.xlu1 %1872 }
 0x24f   : > { %8847 = vst [vmem:[#allocation29_spill] sm:$0xff] %v6764_v4  ;;  %v6766_v13 = vpop.permute.xlu0 %1878  ;;  %v2094_v4 = vsel %vm225_vm0, %v1436_v36, %v6459_v27 }
 0x250   : > { %8848 = vst [vmem:[#allocation41_spill] sm:$0xff] %v6766_v13 }
 0x252   : > { %v6768_v35 = vpop.permute.xlu1 %1876 }
 0x253   : > { %8849 = vst [vmem:[#allocation95_spill] sm:$0xff] %v6768_v35  ;;  %v6770_v2 = vpop.permute.xlu0 %1882  ;;  %v2095_v35 = vsel %vm225_vm0, %v1437_v39, %v6479_v48 }
 0x254   : > { %8850 = vst [vmem:[#allocation40_spill] sm:$0xff] %v6770_v2  ;;  %v2110_v2 = vsel %vm1073_vm3, %v2094_v4, %v6533_v51 }
 0x256   : > { %v6772_v18 = vpop.permute.xlu1 %1880 }
 0x257   : > { %8851 = vst [vmem:[#allocation53_spill] sm:$0xff] %v6772_v18  ;;  %v1919_v26 = vpop.permute.xlu0 %1918  ;;  %v2126_v18 = vsel %vm1090_vm4, %v2110_v2, %v6606_v50 }
 0x258   : > { %v2142_v27 = vsel %vm1107_vm5, %v2126_v18, %v6670_v38  ;;  %v5021_v38 = vld [vmem:[#allocation2 + $0xd8] sm:$0xff] }
 0x259   : > { %v2158_v48 = vsel %vm1124_vm6, %v2142_v27, %v1855_v5 }
 0x25a   : > { %v6774_v21 = vpop.permute.xlu1 %1884 }
 0x25b   : > { %8852 = vst [vmem:[#allocation37_spill] sm:$0xff] %v6774_v21  ;;  %v1923_v49 = vpop.permute.xlu0 %1922  ;;  %v2111_v21 = vsel %vm1073_vm3, %v2095_v35, %v6547_v9  ;;  %v2174_v9 = vsel %vm1141_vm7, %v2158_v48, %v1919_v26 }
 0x25c   : > { %v2127_v28 = vsel %vm1090_vm4, %v2111_v21, %v6620_v56 }
 0x25d   : > { %v2143_v36 = vsel %vm1107_vm5, %v2127_v28, %v6684_v0  ;;  %v2096_v28 = vsel %vm225_vm0, %v5021_v38, %v6472_v30 }
 0x25e   : > { %v1921_v54 = vpop.permute.xlu1 %1920  ;;  %v2159_v51 = vsel %vm1124_vm6, %v2143_v36, %v1857_v29  ;;  %v5022_v29 = vld [vmem:[#allocation2 + $0xe0] sm:$0xff] }
 0x25f   : > { %v6776_v47 = vpop.permute.xlu0 %1926  ;;  %v2175_v4 = vsel %vm1141_vm7, %v2159_v51, %v1921_v54  ;;  %v2097_v54 = vsel %vm225_vm0, %v5022_v29, %v6489_v42 }
 0x262   : > { %v1925_v58 = vpop.permute.xlu1 %1924 }
 0x263   : > { %v1985_v13 = vpop.permute.xlu0 %1984 }
 0x264   : > { %v2191_v56 = vsel %vm1158_vm8, %v2175_v4, %v1985_v13  ;;  %v2113_v13 = vsel %vm1073_vm3, %v2097_v54, %v6557_v57 }
 0x265   : > { %v2129_v35 = vsel %vm1090_vm4, %v2113_v13, %v6628_v10  ;;  %v2098_v10 = vsel %vm225_vm0, %v8821_v11, %v6483_v53 }
 0x266   : > { %v1983_v19 = vpop.permute.xlu1 %1982  ;;  %v2145_v42 = vsel %vm1107_vm5, %v2129_v35, %v6692_v15  ;;  %v2114_v48 = vsel %vm1073_vm3, %v2098_v10, %v6551_v12 }
 0x267   : > { %v2049_v39 = vpop.permute.xlu0 %2048  ;;  %v2190_v50 = vsel %vm1158_vm8, %v2174_v9, %v1983_v19  ;;  %v2112_v19 = vsel %vm1073_vm3, %v2096_v28, %v6541_v63  ;;  %v2161_v57 = vsel %vm1124_vm6, %v2145_v42, %v6748_v6  ;;  %v2130_v51 = vsel %vm1090_vm4, %v2114_v48, %v6622_v25 }
 0x268   : > { %v2207_v5 = vsel %vm1175_vm9, %v2191_v56, %v2049_v39  ;;  %v2128_v30 = vsel %vm1090_vm4, %v2112_v19, %v6614_v31  ;;  %v6828_v31 = vld [vmem:[%s8545_s2] ss:$0 sm:$0xff]  ;;  %v2146_v4 = vsel %vm1107_vm5, %v2130_v51, %v6686_v59  ;;  %v2099_v28 = vsel %vm225_vm0, %v8825_v40, %v6499_v16 }
 0x269   : > { %v2144_v18 = vsel %vm1107_vm5, %v2128_v30, %v6678_v52  ;;  %v2177_v52 = vsel %vm1141_vm7, %v2161_v57, %v1925_v58 }
 0x26a   : > { %v2047_v2 = vpop.permute.xlu1 %2046  ;;  %v2160_v63 = vsel %vm1124_vm6, %v2144_v18, %v6739_v32 }
 0x26b   : > { %v2206_v21 = vsel %vm1175_vm9, %v2190_v50, %v2047_v2  ;;  %v1989_v0 = vpop.permute.xlu0 %1988  ;;  %v2176_v36 = vsel %vm1141_vm7, %v2160_v63, %v1923_v49  ;;  %v2162_v50 = vsel %vm1124_vm6, %v2146_v4, %v6744_v1  ;;  %v2115_v1 = vsel %vm1073_vm3, %v2099_v28, %v6567_v23 }
 0x26c   : > { %4880 = vmatprep.mubr.msk.f32.mxu1 %vm1204_vm10, %v2206_v21  ;;  %v2193_v6 = vsel %vm1158_vm8, %v2177_v52, %v1989_v0  ;;  %v2178_v56 = vsel %vm1141_vm7, %v2162_v50, %v6776_v47  ;;  %v2131_v16 = vsel %vm1090_vm4, %v2115_v1, %v6636_v46 }
 0x26d   : > { %4881 = vmatmul.mubr.msk.f32.vlgmr.msra.gmra.mrb[0].mxu1 %vm1204_vm10, %v2207_v5  ;;  %v2147_v13 = vsel %vm1107_vm5, %v2131_v16, %v6700_v17  ;;  %v2100_v17 = vsel %vm225_vm0, %v8823_v60, %v6491_v43 }
 0x26e   : > { %v1987_v26 = vpop.permute.xlu1 %1986  ;;  %v2163_v23 = vsel %vm1124_vm6, %v2147_v13, %v6753_v44 }
 0x26f   : > { %v2053_v27 = vpop.permute.xlu0 %2052  ;;  %v2192_v15 = vsel %vm1158_vm8, %v2176_v36, %v1987_v26  ;;  %v2116_v36 = vsel %vm1073_vm3, %v2100_v17, %v6559_v55 }
 0x270   : > { %v2209_v9 = vsel %vm1175_vm9, %v2193_v6, %v2053_v27  ;;  %v2132_v48 = vsel %vm1090_vm4, %v2116_v36, %v6630_v62 }
 0x272   : > { %v2051_v32 = vpop.permute.xlu1 %2050 }
 0x273   : > { %v2208_v49 = vsel %vm1175_vm9, %v2192_v15, %v2051_v32  ;;  %v4848_v39 = vpop.f32.mrb[0].mxu0  ;;  %v1991_v11 = vpop.permute.xlu0 %1990 }
 0x274   : > { %v1329_v53 = vadd.f32 %v4848_v39, %v6828_v31  ;;  %v1323_v58 = vpop.f32.mrb[1].mxu0  ;;  %4883 = vmatprep.mubr.msk.f32.mxu1 %vm1204_vm10, %v2208_v49  ;;  %v2194_v59 = vsel %vm1158_vm8, %v2178_v56, %v1991_v11  ;;  %v2148_v49 = vsel %vm1107_vm5, %v2132_v48, %v6694_v33  ;;  %v2101_v33 = vsel %vm225_vm0, %v6122_v45, %v6507_v24 }
 0x275   : > { %v1324_v12 = vadd.f32 %v6828_v31, %v1323_v58  ;;  %4884 = vmatmul.mubr.msk.f32.gmra.mrb[2].mxu1 %vm1204_vm10, %v2209_v9  ;;  %v2164_v39 = vsel %vm1124_vm6, %v2148_v49, %v6750_v20  ;;  %v2117_v56 = vsel %vm1073_vm3, %v2101_v33, %v6575_v8  ;;  %v8855_v33 = vld [vmem:[#allocation39_spill] sm:$0xff] }
 0x276   : > { %v1403_v2 = vmax.f32 %v1329_v53, 0.0  ;;  %v1929_v25 = vpop.permute.xlu1 %1928 }
 0x277   : > { %v1402_v21 = vmax.f32 %v1324_v12, 0.0  ;;  %v4851_v38 = vpop.f32.mrb[2].mxu0  ;;  %v2055_v0 = vpop.permute.xlu0 %2054  ;;  %v2179_v46 = vsel %vm1141_vm7, %v2163_v23, %v1929_v25 }
 0x278   : > { %1420 = vst.msk [vmem:[#allocation3 + $0x21] sm:$0xff] %vm225_vm0, %v1403_v2  ;;  %v1339_v5 = vadd.f32 %v4851_v38, %v6828_v31  ;;  %v1333_v29 = vpop.f32.mrb[3].mxu0  ;;  %v2210_v47 = vsel %vm1175_vm9, %v2194_v59, %v2055_v0 }
 0x279   : > { %1419 = vst.msk [vmem:[#allocation3 + $0x19] sm:$0xff] %vm225_vm0, %v1402_v21  ;;  %v1334_v54 = vadd.f32 %v6828_v31, %v1333_v29  ;;  %4886 = vmatprep.mubr.msk.f32.mxu1 %vm1204_vm10, %v2210_v47  ;;  %v2133_v21 = vsel %vm1090_vm4, %v2117_v56, %v6644_v22 }
 0x27a   : > { %v1405_v40 = vmax.f32 %v1339_v5, 0.0  ;;  %v1993_v19 = vpop.permute.xlu1 %1992  ;;  %v2149_v59 = vsel %vm1107_vm5, %v2133_v21, %v6708_v37 }
 0x27b   : > { %v1404_v30 = vmax.f32 %v1334_v54, 0.0  ;;  %v4854_v26 = vpop.f32.mrb[4].mxu0  ;;  %v1931_v18 = vpop.permute.xlu0 %1930  ;;  %v2195_v27 = vsel %vm1158_vm8, %v2179_v46, %v1993_v19  ;;  %v2165_v29 = vsel %vm1124_vm6, %v2149_v59, %v6759_v14  ;;  %v5023_v14 = vld [vmem:[#allocation2 + $0x120] sm:$0xff] }
 0x27c   : > { %1422 = vst.msk [vmem:[#allocation3 + $0x39] sm:$0xff] %vm225_vm0, %v1405_v40  ;;  %v1349_v35 = vadd.f32 %v4854_v26, %v6828_v31  ;;  %v1343_v42 = vpop.f32.mrb[5].mxu0  ;;  %v2180_v53 = vsel %vm1141_vm7, %v2164_v39, %v1931_v18  ;;  %v2102_v40 = vsel %vm225_vm0, %v5023_v14, %v6501_v61  ;;  %v8853_v26 = vld [vmem:[#allocation5_spill] sm:$0xff] }
 0x27d   : > { %1421 = vst.msk [vmem:[#allocation3 + $0x31] sm:$0xff] %vm225_vm0, %v1404_v30  ;;  %v1344_v63 = vadd.f32 %v6828_v31, %v1343_v42  ;;  %v2118_v23 = vsel %vm1073_vm3, %v2102_v40, %v8853_v26  ;;  %v8860_v40 = vld [vmem:[#allocation27_spill] sm:$0xff]  ;;  %v8861_v26 = vld [vmem:[#allocation20_spill] sm:$0xff] }
 0x27e   : > { %v1407_v57 = vmax.f32 %v1349_v35, 0.0  ;;  %v2057_v44 = vpop.permute.xlu1 %2056 }
 0x27f   : > { %v1406_v10 = vmax.f32 %v1344_v63, 0.0  ;;  %v2211_v52 = vsel %vm1175_vm9, %v2195_v27, %v2057_v44  ;;  %v4857_v15 = vpop.f32.mrb[6].mxu0  ;;  %v6882_v32 = vld [vmem:[#allocation3 + $0x21] sm:$0xff]  ;;  %v1995_v60 = vpop.permute.xlu0 %1994  ;;  %v2134_v63 = vsel %vm1090_vm4, %v2118_v23, %v6638_v3 }
 0x280   : > { %1424 = vst.msk [vmem:[#allocation3 + $0x51] sm:$0xff] %vm225_vm0, %v1407_v57  ;;  %v1359_v43 = vadd.f32 %v4857_v15, %v6828_v31  ;;  %2630 = vrot.lane.b32.xlu1 %v6882_v32, %s5053_s25  ;;  %v1353_v6 = vpop.f32.mrb[7].mxu0  ;;  %4887 = vmatmul.mubr.msk.f32.gmra.mrb[4].mxu1 %vm1204_vm10, %v2211_v52  ;;  %v6891_v55 = vld [vmem:[#allocation3 + $0x19] sm:$0xff]  ;;  %v2196_v12 = vsel %vm1158_vm8, %v2180_v53, %v1995_v60 }
 0x281   : > { %1423 = vst.msk [vmem:[#allocation3 + $0x49] sm:$0xff] %vm225_vm0, %v1406_v10  ;;  %v1354_v62 = vadd.f32 %v6828_v31, %v1353_v6  ;;  %2628 = vrot.lane.b32.xlu0 %v6891_v55, %s5053_s25  ;;  %v2150_v44 = vsel %vm1107_vm5, %v2134_v63, %v6702_v7  ;;  %v5024_v6 = vld [vmem:[#allocation2 + $0x128] sm:$0xff] }
 0x282   : > { %v1409_v51 = vmax.f32 %v1359_v43, 0.0  ;;  %v1933_v9 = vpop.permute.xlu1 %1932  ;;  %v2166_v36 = vsel %vm1124_vm6, %v2150_v44, %v6756_v41  ;;  %v8854_v7 = vld [vmem:[#allocation9_spill] sm:$0xff]  ;;  %v8863_v44 = vld [vmem:[#allocation16_spill] sm:$0xff] }
 0x283   : > { %v1408_v11 = vmax.f32 %v1354_v62, 0.0  ;;  %v4860_v58 = vpop.f32.mrb[8].mxu0  ;;  %v6902_v4 = vld [vmem:[#allocation3 + $0x39] sm:$0xff]  ;;  %v2059_v2 = vpop.permute.xlu0 %2058  ;;  %v2181_v37 = vsel %vm1141_vm7, %v2165_v29, %v1933_v9  ;;  %v2103_v49 = vsel %vm225_vm0, %v5024_v6, %v8854_v7 }
 0x284   : > { %1426 = vst.msk [vmem:[#allocation3 + $0x69] sm:$0xff] %vm225_vm0, %v1409_v51  ;;  %v1369_v50 = vadd.f32 %v4860_v58, %v6828_v31  ;;  %2634 = vrot.lane.b32.xlu1 %v6902_v4, %s5053_s25  ;;  %v1363_v20 = vpop.f32.mrb[9].mxu0  ;;  %v6912_v25 = vld [vmem:[#allocation3 + $0x31] sm:$0xff]  ;;  %v2212_v45 = vsel %vm1175_vm9, %v2196_v12, %v2059_v2  ;;  %v2119_v53 = vsel %vm1073_vm3, %v2103_v49, %v6588_v34  ;;  %v8866_v49 = vld [vmem:[#allocation19_spill] sm:$0xff] }
 0x285   : > { %1425 = vst.msk [vmem:[#allocation3 + $0x61] sm:$0xff] %vm225_vm0, %v1408_v11  ;;  %v1364_v24 = vadd.f32 %v6828_v31, %v1363_v20  ;;  %2632 = vrot.lane.b32.xlu0 %v6912_v25, %s5053_s25  ;;  %4889 = vmatprep.mubr.msk.f32.mxu1 %vm1204_vm10, %v2212_v45  ;;  %v2135_v12 = vsel %vm1090_vm4, %v2119_v53, %v8855_v33  ;;  %v8856_v20 = vld [vmem:[#allocation49_spill] sm:$0xff]  ;;  %v5027_v33 = vld [vmem:[#allocation2 + $0x150] sm:$0xff] }
 0x286   : > { %v1411_v38 = vmax.f32 %v1369_v50, 0.0  ;;  %v1997_v28 = vpop.permute.xlu1 %1996  ;;  %v2151_v56 = vsel %vm1107_vm5, %v2135_v12, %v8856_v20  ;;  %v8868_v12 = vld [vmem:[#allocation4_spill] sm:$0xff] }
 0x287   : > { %v1410_v8 = vmax.f32 %v1364_v24, 0.0  ;;  %v4863_v5 = vpop.f32.mrb[10].mxu0  ;;  %v6926_v0 = vld [vmem:[#allocation3 + $0x51] sm:$0xff]  ;;  %v1935_v47 = vpop.permute.xlu0 %1934  ;;  %v2197_v19 = vsel %vm1158_vm8, %v2181_v37, %v1997_v28 }
 0x288   : > { %1428 = vst.msk [vmem:[#allocation3 + $0x81] sm:$0xff] %vm225_vm0, %v1411_v38  ;;  %v1379_v1 = vadd.f32 %v4863_v5, %v6828_v31  ;;  %2638 = vrot.lane.b32.xlu1 %v6926_v0, %s5053_s25  ;;  %v1373_v22 = vpop.f32.mrb[11].mxu0  ;;  %v6934_v54 = vld [vmem:[#allocation3 + $0x49] sm:$0xff]  ;;  %v2182_v15 = vsel %vm1141_vm7, %v2166_v36, %v1935_v47  ;;  %v8857_v24 = vld [vmem:[#allocation29_spill] sm:$0xff]  ;;  %v8858_v5 = vld [vmem:[#allocation14_spill] sm:$0xff] }
 0x289   : > { %1427 = vst.msk [vmem:[#allocation3 + $0x79] sm:$0xff] %vm225_vm0, %v1410_v8  ;;  %v1374_v16 = vadd.f32 %v6828_v31, %v1373_v22  ;;  %2636 = vrot.lane.b32.xlu0 %v6934_v54, %s5053_s25  ;;  %v2167_v21 = vsel %vm1124_vm6, %v2151_v56, %v8857_v24  ;;  %v5025_v8 = vld [vmem:[#allocation2 + $0x138] sm:$0xff]  ;;  %v8859_v22 = vld [vmem:[#allocation18_spill] sm:$0xff]  ;;  %v8869_v56 = vld [vmem:[#allocation17_spill] sm:$0xff] }
 0x28a   : > { %v1413_v13 = vmax.f32 %v1379_v1, 0.0  ;;  %v2061_v30 = vpop.permute.xlu1 %2060  ;;  %v2104_v29 = vsel %vm225_vm0, %v5025_v8, %v8858_v5  ;;  %v7062_v5 = vld [vmem:[#allocation3 + $0x32] sm:$0xff] }
 0x28b   : > { %v1412_v35 = vmax.f32 %v1374_v16, 0.0  ;;  %v2213_v18 = vsel %vm1175_vm9, %v2197_v19, %v2061_v30  ;;  %v4866_v42 = vpop.f32.mrb[12].mxu0  ;;  %v6947_v46 = vld [vmem:[#allocation3 + $0x69] sm:$0xff]  ;;  %v1999_v17 = vpop.permute.xlu0 %1998  ;;  %v2120_v37 = vsel %vm1073_vm3, %v2104_v29, %v8859_v22 }
 0x28c   : > { %1430 = vst.msk [vmem:[#allocation3 + $0x99] sm:$0xff] %vm225_vm0, %v1413_v13  ;;  %v1389_v61 = vadd.f32 %v4866_v42, %v6828_v31  ;;  %4890 = vmatmul.mubr.msk.f32.gmra.mrb[6].mxu1 %vm1204_vm10, %v2213_v18  ;;  %2642 = vrot.lane.b32.xlu1 %v6947_v46, %s5053_s25  ;;  %v1383_v27 = vpop.f32.mrb[13].mxu0  ;;  %v6956_v57 = vld [vmem:[#allocation3 + $0x61] sm:$0xff]  ;;  %v2198_v62 = vsel %vm1158_vm8, %v2182_v15, %v1999_v17  ;;  %v8871_v29 = vld [vmem:[#allocation72_spill] sm:$0xff] }
 0x28d   : > { %1429 = vst.msk [vmem:[#allocation3 + $0x91] sm:$0xff] %vm225_vm0, %v1412_v35  ;;  %v1384_v3 = vadd.f32 %v6828_v31, %v1383_v27  ;;  %2640 = vrot.lane.b32.xlu0 %v6956_v57, %s5053_s25  ;;  %v2136_v19 = vsel %vm1090_vm4, %v2120_v37, %v8860_v40  ;;  %v2496_v35 = vld [vmem:[#allocation3 + $0xa] sm:$0xff]  ;;  %v7071_v40 = vld [vmem:[#allocation3 + $0x52] sm:$0xff] }
 0x28e   : > { %v1415_v10 = vmax.f32 %v1389_v61, 0.0  ;;  %v1937_v52 = vpop.permute.xlu1 %1936  ;;  %v2152_v23 = vsel %vm1107_vm5, %v2136_v19, %v8861_v26  ;;  %v8862_v18 = vld [vmem:[#allocation51_spill] sm:$0xff]  ;;  %v5026_v27 = vld [vmem:[#allocation2 + $0x140] sm:$0xff] }
 0x28f   : > { %v1414_v48 = vmax.f32 %v1384_v3, 0.0  ;;  %v4869_v43 = vpop.f32.mrb[14].mxu0  ;;  %v6967_v60 = vld [vmem:[#allocation3 + $0x81] sm:$0xff]  ;;  %v2063_v51 = vpop.permute.xlu0 %2062  ;;  %v2183_v59 = vsel %vm1141_vm7, %v2167_v21, %v1937_v52  ;;  %v2168_v42 = vsel %vm1124_vm6, %v2152_v23, %v8862_v18  ;;  %v2105_v3 = vsel %vm225_vm0, %v5026_v27, %v8863_v44  ;;  %v8864_v52 = vld [vmem:[#allocation28_spill] sm:$0xff] }
 0x290   : > { %1432 = vst.msk [vmem:[#allocation3 + $0xb1] sm:$0xff] %vm225_vm0, %v1415_v10  ;;  %v1399_v39 = vadd.f32 %v4869_v43, %v6828_v31  ;;  %2646 = vrot.lane.b32.xlu1 %v6967_v60, %s5053_s25  ;;  %v1393_v41 = vpop.f32.mrb[15].mxu0  ;;  %v6976_v9 = vld [vmem:[#allocation3 + $0x79] sm:$0xff]  ;;  %v2214_v11 = vsel %vm1175_vm9, %v2198_v62, %v2063_v51  ;;  %v2495_v61 = vld [vmem:[#allocation3 + $0x2] sm:$0xff]  ;;  %v2121_v15 = vsel %vm1073_vm3, %v2105_v3, %v8864_v52  ;;  %v7078_v18 = vld [vmem:[#allocation3 + $0x4a] sm:$0xff] }
 0x291   : > { %1431 = vst.msk [vmem:[#allocation3 + $0xa9] sm:$0xff] %vm225_vm0, %v1414_v48  ;;  %v1394_v58 = vadd.f32 %v6828_v31, %v1393_v41  ;;  %2644 = vrot.lane.b32.xlu0 %v6976_v9, %s5053_s25  ;;  %4892 = vmatprep.mubr.msk.f32.mxu1 %vm1204_vm10, %v2214_v11  ;;  %v8865_v43 = vld [vmem:[#allocation38_spill] sm:$0xff]  ;;  %v8867_v51 = vld [vmem:[#allocation95_spill] sm:$0xff]  ;;  %v8877_v52 = vld [vmem:[#allocation53_spill] sm:$0xff] }
 0x292   : > { %v1417_v50 = vmax.f32 %v1399_v39, 0.0  ;;  %v2001_v2 = vpop.permute.xlu1 %2000  ;;  %v2137_v6 = vsel %vm1090_vm4, %v2121_v15, %v8865_v43  ;;  %v7038_v39 = vld [vmem:[#allocation3 + $0x22] sm:$0xff]  ;;  %v7044_v11 = vld [vmem:[#allocation3 + $0x1a] sm:$0xff] }
 0x293   : > { %v1416_v34 = vmax.f32 %v1394_v58, 0.0  ;;  %v6990_v45 = vld [vmem:[#allocation3 + $0x99] sm:$0xff]  ;;  %v1939_v38 = vpop.permute.xlu0 %1938  ;;  %v2199_v1 = vsel %vm1158_vm8, %v2183_v59, %v2001_v2  ;;  %v2153_v62 = vsel %vm1107_vm5, %v2137_v6, %v8866_v49  ;;  %v5028_v19 = vld [vmem:[#allocation2 + $0x158] sm:$0xff] }
 0x294   : > { %1434 = vst.msk [vmem:[#allocation3 + $0xc9] sm:$0xff] %vm225_vm0, %v1417_v50  ;;  %2650 = vrot.lane.b32.xlu1 %v6990_v45, %s5053_s25  ;;  %v6997_v28 = vld [vmem:[#allocation3 + $0x91] sm:$0xff]  ;;  %v2184_v17 = vsel %vm1141_vm7, %v2168_v42, %v1939_v38  ;;  %v2169_v41 = vsel %vm1124_vm6, %v2153_v62, %v8867_v51  ;;  %v2106_v50 = vsel %vm225_vm0, %v5027_v33, %v8868_v12  ;;  %v7055_v21 = vld [vmem:[#allocation3 + $0x3a] sm:$0xff]  ;;  %v8870_v38 = vld [vmem:[#allocation91_spill] sm:$0xff] }
 0x295   : > { %1433 = vst.msk [vmem:[#allocation3 + $0xc1] sm:$0xff] %vm225_vm0, %v1416_v34  ;;  %2648 = vrot.lane.b32.xlu0 %v6997_v28, %s5053_s25  ;;  %v2122_v34 = vsel %vm1073_vm3, %v2106_v50, %v8869_v56  ;;  %v8874_v42 = vld [vmem:[#allocation93_spill] sm:$0xff]  ;;  %v8876_v3 = vld [vmem:[#allocation71_spill] sm:$0xff]  ;;  %v8880_v50 = vld [vmem:[#allocation50_spill] sm:$0xff] }
 0x296   : > { %v2065_v47 = vpop.permute.xlu1 %2064  ;;  %v2138_v59 = vsel %vm1090_vm4, %v2122_v34, %v8870_v38  ;;  %v7096_v43 = vld [vmem:[#allocation3 + $0x62] sm:$0xff]  ;;  %v7114_v56 = vld [vmem:[#allocation3 + $0x7a] sm:$0xff]  ;;  %v8882_v38 = vld [vmem:[#allocation40_spill] sm:$0xff] }
 0x297   : > { %v2215_v16 = vsel %vm1175_vm9, %v2199_v1, %v2065_v47  ;;  %v7009_v14 = vld [vmem:[#allocation3 + $0xb1] sm:$0xff]  ;;  %v2003_v13 = vpop.permute.xlu0 %2002  ;;  %v2154_v1 = vsel %vm1107_vm5, %v2138_v59, %v8871_v29  ;;  %v8878_v49 = vld [vmem:[#allocation15_spill] sm:$0xff]  ;;  %v8881_v34 = vld [vmem:[#allocation30_spill] sm:$0xff] }
 0x298   : > { %4893 = vmatmul.mubr.msk.f32.gmra.mrb[8].mxu1 %vm1204_vm10, %v2215_v16  ;;  %2654 = vrot.lane.b32.xlu1 %v7009_v14, %s5053_s25  ;;  %v7016_v30 = vld [vmem:[#allocation3 + $0xa9] sm:$0xff]  ;;  %v2200_v36 = vsel %vm1158_vm8, %v2184_v17, %v2003_v13  ;;  %v8872_v47 = vld [vmem:[#allocation41_spill] sm:$0xff]  ;;  %v8873_v13 = vld [vmem:[#allocation26_spill] sm:$0xff] }
 0x299   : > { %2652 = vrot.lane.b32.xlu0 %v7016_v30, %s5053_s25  ;;  %v2170_v22 = vsel %vm1124_vm6, %v2154_v1, %v8872_v47  ;;  %v2107_v26 = vsel %vm225_vm0, %v5028_v19, %v8873_v13  ;;  %v8875_v17 = vld [vmem:[#allocation11_spill] sm:$0xff]  ;;  %v7123_v1 = vld [vmem:[#allocation3 + $0x9a] sm:$0xff]  ;;  %v7130_v13 = vld [vmem:[#allocation3 + $0x92] sm:$0xff] }
 0x29a   : > { %v1941_v63 = vpop.permute.xlu1 %1940  ;;  %v7107_v12 = vld [vmem:[#allocation3 + $0x82] sm:$0xff] }
 0x29b   : > { %v2067_v10 = vpop.permute.xlu0 %2066  ;;  %v2185_v58 = vsel %vm1141_vm7, %v2169_v41, %v1941_v63  ;;  %v2123_v63 = vsel %vm1073_vm3, %v2107_v26, %v8874_v42  ;;  %v5030_v47 = vld [vmem:[#allocation2 + $0x170] sm:$0xff]  ;;  %v8884_v26 = vld [vmem:[#allocation36_spill] sm:$0xff] }
 0x29c   : > { %2690 = vrot.lane.b32.xlu1 %v2496_v35, %s5054_s26  ;;  %v2216_v48 = vsel %vm1175_vm9, %v2200_v36, %v2067_v10  ;;  %v2139_v27 = vsel %vm1090_vm4, %v2123_v63, %v8875_v17  ;;  %v7090_v10 = vld [vmem:[#allocation3 + $0x6a] sm:$0xff]  ;;  %v8885_v42 = vld [vmem:[#allocation6_spill] sm:$0xff] }
 0x29d   : > { %2688 = vrot.lane.b32.xlu0 %v2495_v61, %s5054_s26  ;;  %4895 = vmatprep.mubr.msk.f32.mxu1 %vm1204_vm10, %v2216_v48  ;;  %v2155_v36 = vsel %vm1107_vm5, %v2139_v27, %v8876_v3  ;;  %v8886_v17 = vld [vmem:[#allocation96_spill] sm:$0xff]  ;;  %v8887_v3 = vld [vmem:[#allocation37_spill] sm:$0xff] }
 0x29e   : > { %v2005_v7 = vpop.permute.xlu1 %2004  ;;  %v2171_v15 = vsel %vm1124_vm6, %v2155_v36, %v8877_v52  ;;  %v7148_v52 = vld [vmem:[#allocation3 + $0xaa] sm:$0xff] }
 0x29f   : > { %v1943_v53 = vpop.permute.xlu0 %1942  ;;  %v2201_v2 = vsel %vm1158_vm8, %v2185_v58, %v2005_v7  ;;  %v5029_v7 = vld [vmem:[#allocation2 + $0x168] sm:$0xff] }
 0x2a0   : > { %2694 = vrot.lane.b32.xlu1 %v7038_v39, %s5054_s26  ;;  %v2186_v16 = vsel %vm1141_vm7, %v2170_v22, %v1943_v53  ;;  %v2108_v62 = vsel %vm225_vm0, %v5029_v7, %v8878_v49  ;;  %v8879_v53 = vld [vmem:[#allocation69_spill] sm:$0xff]  ;;  %v8883_v22 = vld [vmem:[#allocation10_spill] sm:$0xff] }
 0x2a1   : > { %2692 = vrot.lane.b32.xlu0 %v7044_v11, %s5054_s26  ;;  %v2124_v58 = vsel %vm1073_vm3, %v2108_v62, %v8879_v53  ;;  %v7155_v49 = vld [vmem:[#allocation3 + $0x20] sm:$0xff]  ;;  %v7160_v62 = vld [vmem:[#allocation3 + $0x18] sm:$0xff]  ;;  %v7172_v53 = vld [vmem:[#allocation3 + $0x50] sm:$0xff] }
 0x2a2   : > { %v2069_v20 = vpop.permute.xlu1 %2068 }
 0x2a3   : > { %v2217_v24 = vsel %vm1175_vm9, %v2201_v2, %v2069_v20  ;;  %v2007_v8 = vpop.permute.xlu0 %2006  ;;  %v2140_v2 = vsel %vm1090_vm4, %v2124_v58, %v8880_v50  ;;  %v7176_v58 = vld [vmem:[#allocation3 + $0x48] sm:$0xff]  ;;  %v7184_v50 = vld [vmem:[#allocation3 + $0x60] sm:$0xff] }
 0x2a4   : > { %4896 = vmatmul.mubr.msk.f32.gmra.mrb[10].mxu1 %vm1204_vm10, %v2217_v24  ;;  %2698 = vrot.lane.b32.xlu1 %v7055_v21, %s5054_s26  ;;  %v2202_v23 = vsel %vm1158_vm8, %v2186_v16, %v2007_v8  ;;  %v2156_v24 = vsel %vm1107_vm5, %v2140_v2, %v8881_v34  ;;  %v7188_v2 = vld [vmem:[#allocation3 + $0x80] sm:$0xff]  ;;  %v7196_v34 = vld [vmem:[#allocation3 + $0x98] sm:$0xff] }
 0x2a5   : > { %2696 = vrot.lane.b32.xlu0 %v7062_v5, %s5054_s26  ;;  %v2172_v59 = vsel %vm1124_vm6, %v2156_v24, %v8882_v38  ;;  %v7200_v24 = vld [vmem:[#allocation3 + $0x90] sm:$0xff] }
 0x2a6   : > { %v1945_v37 = vpop.permute.xlu1 %1944  ;;  %v7204_v38 = vld [vmem:[#allocation3 + $0xb0] sm:$0xff] }
 0x2a7   : > { %v2071_v35 = vpop.permute.xlu0 %2070  ;;  %v2187_v6 = vsel %vm1141_vm7, %v2171_v15, %v1945_v37  ;;  %v2109_v37 = vsel %vm225_vm0, %v5030_v47, %v8883_v22 }
 0x2a8   : > { %2702 = vrot.lane.b32.xlu1 %v7071_v40, %s5054_s26  ;;  %v2218_v61 = vsel %vm1175_vm9, %v2202_v23, %v2071_v35  ;;  %v2125_v23 = vsel %vm1073_vm3, %v2109_v37, %v8884_v26 }
 0x2a9   : > { %2700 = vrot.lane.b32.xlu0 %v7078_v18, %s5054_s26  ;;  %4898 = vmatprep.mubr.msk.f32.mxu1 %vm1204_vm10, %v2218_v61  ;;  %v2141_v63 = vsel %vm1090_vm4, %v2125_v23, %v8885_v42  ;;  %v7328_v23 = vld [vmem:[#allocation3 + $0xca] sm:$0xff] }
 0x2aa   : > { %v2009_v44 = vpop.permute.xlu1 %2008  ;;  %v2157_v27 = vsel %vm1107_vm5, %v2141_v63, %v8886_v17 }
 0x2ab   : > { %v1947_v48 = vpop.permute.xlu0 %1946  ;;  %v2203_v51 = vsel %vm1158_vm8, %v2187_v6, %v2009_v44  ;;  %v7142_v44 = vld [vmem:[#allocation3 + $0xb2] sm:$0xff]  ;;  %v2173_v36 = vsel %vm1124_vm6, %v2157_v27, %v8887_v3 }
 0x2ac   : > { %2706 = vrot.lane.b32.xlu1 %v7090_v10, %s5054_s26  ;;  %v2188_v29 = vsel %vm1141_vm7, %v2172_v59, %v1947_v48  ;;  %v7208_v59 = vld [vmem:[#allocation3 + $0xa8] sm:$0xff] }
 0x2ad   : > { %2704 = vrot.lane.b32.xlu0 %v7096_v43, %s5054_s26 }
 0x2ae   : > { %v2073_v41 = vpop.permute.xlu1 %2072 }
 0x2af   : > { %v2219_v33 = vsel %vm1175_vm9, %v2203_v51, %v2073_v41  ;;  %v2011_v20 = vpop.permute.xlu0 %2010  ;;  %v7164_v51 = vld [vmem:[#allocation3 + $0x38] sm:$0xff]  ;;  %v7168_v41 = vld [vmem:[#allocation3 + $0x30] sm:$0xff] }
 0x2b0   : > { %4899 = vmatmul.mubr.msk.f32.gmra.mrb[12].mxu1 %vm1204_vm10, %v2219_v33  ;;  %2710 = vrot.lane.b32.xlu1 %v7107_v12, %s5054_s26  ;;  %v2204_v16 = vsel %vm1158_vm8, %v2188_v29, %v2011_v20  ;;  %v7180_v33 = vld [vmem:[#allocation3 + $0x68] sm:$0xff]  ;;  %v7192_v20 = vld [vmem:[#allocation3 + $0x78] sm:$0xff]  ;;  %v7216_v29 = vld [vmem:[#allocation3 + $0xc0] sm:$0xff] }
 0x2b1   : > { %2708 = vrot.lane.b32.xlu0 %v7114_v56, %s5054_s26 }
 0x2b2   : > { %v1949_v8 = vpop.permute.xlu1 %1948 }
 0x2b3   : > { %v2075_v19 = vpop.permute.xlu0 %2074  ;;  %v2189_v15 = vsel %vm1141_vm7, %v2173_v36, %v1949_v8  ;;  %v7212_v8 = vld [vmem:[#allocation3 + $0xc8] sm:$0xff] }
 0x2b4   : > { %2714 = vrot.lane.b32.xlu1 %v7123_v1, %s5054_s26  ;;  %v2220_v35 = vsel %vm1175_vm9, %v2204_v16, %v2075_v19 }
 0x2b5   : > { %2712 = vrot.lane.b32.xlu0 %v7130_v13, %s5054_s26  ;;  %4901 = vmatprep.mubr.msk.f32.mxu1 %vm1204_vm10, %v2220_v35 }
 0x2b6   : > { %v2013_v61 = vpop.permute.xlu1 %2012 }
 0x2b7   : > { %v2205_v48 = vsel %vm1158_vm8, %v2189_v15, %v2013_v61 }
 0x2b8   : > { %2718 = vrot.lane.b32.xlu1 %v7142_v44, %s5054_s26 }
 0x2b9   : > { %2716 = vrot.lane.b32.xlu0 %v7148_v52, %s5054_s26 }
 0x2ba   : > { %v2077_v6 = vpop.permute.xlu1 %2076 }
 0x2bb   : > { %v2221_v7 = vsel %vm1175_vm9, %v2205_v48, %v2077_v6 }
 0x2bc   : > { %4902 = vmatmul.mubr.msk.f32.gmra.mrb[14].mxu1 %vm1204_vm10, %v2221_v7  ;;  %2754 = vrot.lane.b32.xlu1 %v7155_v49, %s5055_s27 }
 0x2bd   : > { %2752 = vrot.lane.b32.xlu0 %v7160_v62, %s5055_s27 }
 0x2c0   : > { %2758 = vrot.lane.b32.xlu1 %v7164_v51, %s5055_s27 }
 0x2c1   : > { %2756 = vrot.lane.b32.xlu0 %v7168_v41, %s5055_s27 }
 0x2c4   : > { %2762 = vrot.lane.b32.xlu1 %v7172_v53, %s5055_s27 }
 0x2c5   : > { %2760 = vrot.lane.b32.xlu0 %v7176_v58, %s5055_s27 }
 0x2c8   : > { %2766 = vrot.lane.b32.xlu1 %v7180_v33, %s5055_s27 }
 0x2c9   : > { %2764 = vrot.lane.b32.xlu0 %v7184_v50, %s5055_s27 }
 0x2cc   : > { %2770 = vrot.lane.b32.xlu1 %v7188_v2, %s5055_s27 }
 0x2cd   : > { %2768 = vrot.lane.b32.xlu0 %v7192_v20, %s5055_s27 }
 0x2d0   : > { %2774 = vrot.lane.b32.xlu1 %v7196_v34, %s5055_s27 }
 0x2d1   : > { %2772 = vrot.lane.b32.xlu0 %v7200_v24, %s5055_s27 }
 0x2d4   : > { %2778 = vrot.lane.b32.xlu1 %v7204_v38, %s5055_s27 }
 0x2d5   : > { %2776 = vrot.lane.b32.xlu0 %v7208_v59, %s5055_s27 }
 0x2d8   : > { %2782 = vrot.lane.b32.xlu1 %v7212_v8, %s5055_s27 }
 0x2d9   : > { %2780 = vrot.lane.b32.xlu0 %v7216_v29, %s5055_s27 }
 0x2dc   : > { %2818 = vrot.lane.b32.xlu1 %v6882_v32, %s5056_s28  ;;  %v7238_v32 = vpop.permute.xlu1 %2626 }
 0x2dd   : > { %2816 = vrot.lane.b32.xlu0 %v6891_v55, %s5056_s28  ;;  %v7242_v55 = vpop.permute.xlu0 %2624 }
 0x2e0   : > { %2822 = vrot.lane.b32.xlu1 %v6902_v4, %s5056_s28 }
 0x2e1   : > { %2820 = vrot.lane.b32.xlu0 %v6912_v25, %s5056_s28 }
 0x2e4   : > { %2826 = vrot.lane.b32.xlu1 %v6926_v0, %s5056_s28 }
 0x2e5   : > { %2824 = vrot.lane.b32.xlu0 %v6934_v54, %s5056_s28 }
 0x2e8   : > { %2830 = vrot.lane.b32.xlu1 %v6947_v46, %s5056_s28 }
 0x2e9   : > { %2828 = vrot.lane.b32.xlu0 %v6956_v57, %s5056_s28 }
 0x2ec   : > { %2834 = vrot.lane.b32.xlu1 %v6967_v60, %s5056_s28 }
 0x2ed   : > { %2832 = vrot.lane.b32.xlu0 %v6976_v9, %s5056_s28  ;;  %v7260_v9 = vld [vmem:[#allocation3 + $0xc9] sm:$0xff] }
 0x2f0   : > { %2838 = vrot.lane.b32.xlu1 %v6990_v45, %s5056_s28  ;;  %v7264_v45 = vld [vmem:[#allocation3 + $0xc1] sm:$0xff] }
 0x2f1   : > { %2836 = vrot.lane.b32.xlu0 %v6997_v28, %s5056_s28 }
 0x2f2   : > { %v7248_v0 = vpop.permute.xlu1 %2630 }
 0x2f3   : > { %v7250_v46 = vpop.permute.xlu0 %2628 }
 0x2f4   : > { %2842 = vrot.lane.b32.xlu1 %v7009_v14, %s5056_s28 }
 0x2f5   : > { %2840 = vrot.lane.b32.xlu0 %v7016_v30, %s5056_s28 }
 0x2f6   : > { %v7256_v57 = vpop.permute.xlu1 %2634 }
 0x2f7   : > { %8888 = vst [vmem:[#allocation12_spill] sm:$0xff] %v7256_v57  ;;  %v7258_v60 = vpop.permute.xlu0 %2632 }
 0x2f8   : > { %2846 = vrot.lane.b32.xlu1 %v7260_v9, %s5056_s28 }
 0x2f9   : > { %2844 = vrot.lane.b32.xlu0 %v7264_v45, %s5056_s28 }
 0x2fa   : > { %v7268_v28 = vpop.permute.xlu1 %2638 }
 0x2fb   : > { %8889 = vst [vmem:[#allocation7_spill] sm:$0xff] %v7268_v28  ;;  %v7270_v14 = vpop.permute.xlu0 %2636 }
 0x2fc   : > { %8890 = vst [vmem:[#allocation22_spill] sm:$0xff] %v7270_v14  ;;  %2882 = vrot.lane.b32.xlu1 %v7038_v39, %s5057_s29 }
 0x2fd   : > { %2880 = vrot.lane.b32.xlu0 %v7044_v11, %s5057_s29 }
 0x2fe   : > { %v7276_v30 = vpop.permute.xlu1 %2642 }
 0x2ff   : > { %8891 = vst [vmem:[#allocation52_spill] sm:$0xff] %v7276_v30  ;;  %v7278_v47 = vpop.permute.xlu0 %2640 }
 0x300   : > { %8892 = vst [vmem:[#allocation75_spill] sm:$0xff] %v7278_v47  ;;  %2886 = vrot.lane.b32.xlu1 %v7055_v21, %s5057_s29 }
 0x301   : > { %2884 = vrot.lane.b32.xlu0 %v7062_v5, %s5057_s29 }
 0x302   : > { %v7284_v22 = vpop.permute.xlu1 %2646 }
 0x303   : > { %8893 = vst [vmem:[#allocation21_spill] sm:$0xff] %v7284_v22  ;;  %v7286_v37 = vpop.permute.xlu0 %2644 }
 0x304   : > { %8894 = vst [vmem:[#allocation32_spill] sm:$0xff] %v7286_v37  ;;  %2890 = vrot.lane.b32.xlu1 %v7071_v40, %s5057_s29 }
 0x305   : > { %2888 = vrot.lane.b32.xlu0 %v7078_v18, %s5057_s29 }
 0x306   : > { %v7292_v39 = vpop.permute.xlu1 %2650 }
 0x307   : > { %8895 = vst [vmem:[#allocation74_spill] sm:$0xff] %v7292_v39  ;;  %v7294_v11 = vpop.permute.xlu0 %2648 }
 0x308   : > { %8896 = vst [vmem:[#allocation100_spill] sm:$0xff] %v7294_v11  ;;  %2894 = vrot.lane.b32.xlu1 %v7090_v10, %s5057_s29 }
 0x309   : > { %2892 = vrot.lane.b32.xlu0 %v7096_v43, %s5057_s29 }
 0x30a   : > { %v7300_v16 = vpop.permute.xlu1 %2654 }
 0x30b   : > { %8897 = vst [vmem:[#allocation54_spill] sm:$0xff] %v7300_v16  ;;  %v7302_v19 = vpop.permute.xlu0 %2652 }
 0x30c   : > { %8898 = vst [vmem:[#allocation31_spill] sm:$0xff] %v7302_v19  ;;  %2898 = vrot.lane.b32.xlu1 %v7107_v12, %s5057_s29 }
 0x30d   : > { %2896 = vrot.lane.b32.xlu0 %v7114_v56, %s5057_s29 }
 0x30e   : > { %v7308_v40 = vpop.permute.xlu1 %2690 }
 0x30f   : > { %v7310_v26 = vpop.permute.xlu0 %2688 }
 0x310   : > { %2902 = vrot.lane.b32.xlu1 %v7123_v1, %s5057_s29  ;;  %v7332_v1 = vld [vmem:[#allocation3 + $0xc2] sm:$0xff] }
 0x311   : > { %2900 = vrot.lane.b32.xlu0 %v7130_v13, %s5057_s29 }
 0x312   : > { %v7316_v10 = vpop.permute.xlu1 %2694 }
 0x313   : > { %v7318_v43 = vpop.permute.xlu0 %2692 }
 0x314   : > { %2906 = vrot.lane.b32.xlu1 %v7142_v44, %s5057_s29 }
 0x315   : > { %2904 = vrot.lane.b32.xlu0 %v7148_v52, %s5057_s29 }
 0x316   : > { %v7324_v12 = vpop.permute.xlu1 %2698 }
 0x317   : > { %8899 = vst [vmem:[#allocation43_spill] sm:$0xff] %v7324_v12  ;;  %v7326_v56 = vpop.permute.xlu0 %2696 }
 0x318   : > { %2910 = vrot.lane.b32.xlu1 %v7328_v23, %s5057_s29 }
 0x319   : > { %2908 = vrot.lane.b32.xlu0 %v7332_v1, %s5057_s29 }
 0x31a   : > { %v7336_v13 = vpop.permute.xlu1 %2702 }
 0x31b   : > { %8900 = vst [vmem:[#allocation98_spill] sm:$0xff] %v7336_v13  ;;  %v7338_v35 = vpop.permute.xlu0 %2700 }
 0x31c   : > { %8901 = vst [vmem:[#allocation42_spill] sm:$0xff] %v7338_v35  ;;  %2946 = vrot.lane.b32.xlu1 %v7164_v51, %s5058_s30 }
 0x31d   : > { %2944 = vrot.lane.b32.xlu0 %v7168_v41, %s5058_s30 }
 0x31e   : > { %v7344_v42 = vpop.permute.xlu1 %2706 }
 0x31f   : > { %8902 = vst [vmem:[#allocation57_spill] sm:$0xff] %v7344_v42  ;;  %v7346_v63 = vpop.permute.xlu0 %2704 }
 0x320   : > { %8903 = vst [vmem:[#allocation56_spill] sm:$0xff] %v7346_v63  ;;  %2950 = vrot.lane.b32.xlu1 %v7172_v53, %s5058_s30 }
 0x321   : > { %2948 = vrot.lane.b32.xlu0 %v7176_v58, %s5058_s30 }
 0x322   : > { %v7352_v61 = vpop.permute.xlu1 %2710 }
 0x323   : > { %8904 = vst [vmem:[#allocation13_spill] sm:$0xff] %v7352_v61  ;;  %v7354_v17 = vpop.permute.xlu0 %2708 }
 0x324   : > { %8905 = vst [vmem:[#allocation8_spill] sm:$0xff] %v7354_v17  ;;  %2954 = vrot.lane.b32.xlu1 %v7180_v33, %s5058_s30 }
 0x325   : > { %2952 = vrot.lane.b32.xlu0 %v7184_v50, %s5058_s30 }
 0x326   : > { %v7360_v27 = vpop.permute.xlu1 %2714 }
 0x327   : > { %8906 = vst [vmem:[#allocation24_spill] sm:$0xff] %v7360_v27  ;;  %v7362_v44 = vpop.permute.xlu0 %2712 }
 0x328   : > { %8907 = vst [vmem:[#allocation55_spill] sm:$0xff] %v7362_v44  ;;  %2958 = vrot.lane.b32.xlu1 %v7188_v2, %s5058_s30 }
 0x329   : > { %2956 = vrot.lane.b32.xlu0 %v7192_v20, %s5058_s30 }
 0x32a   : > { %v7368_v3 = vpop.permute.xlu1 %2718 }
 0x32b   : > { %8908 = vst [vmem:[#allocation79_spill] sm:$0xff] %v7368_v3  ;;  %v7370_v36 = vpop.permute.xlu0 %2716 }
 0x32c   : > { %8909 = vst [vmem:[#allocation23_spill] sm:$0xff] %v7370_v36  ;;  %2962 = vrot.lane.b32.xlu1 %v7196_v34, %s5058_s30 }
 0x32d   : > { %2960 = vrot.lane.b32.xlu0 %v7200_v24, %s5058_s30 }
 0x32e   : > { %v7376_v52 = vpop.permute.xlu1 %2754 }
 0x32f   : > { %v7378_v15 = vpop.permute.xlu0 %2752 }
 0x330   : > { %2966 = vrot.lane.b32.xlu1 %v7204_v38, %s5058_s30 }
 0x331   : > { %2964 = vrot.lane.b32.xlu0 %v7208_v59, %s5058_s30 }
 0x332   : > { %v7384_v48 = vpop.permute.xlu1 %2758 }
 0x333   : > { %v7386_v6 = vpop.permute.xlu0 %2756 }
 0x334   : > { %2970 = vrot.lane.b32.xlu1 %v7212_v8, %s5058_s30 }
 0x335   : > { %2968 = vrot.lane.b32.xlu0 %v7216_v29, %s5058_s30 }
 0x336   : > { %v7392_v7 = vpop.permute.xlu1 %2762 }
 0x337   : > { %8910 = vst [vmem:[#allocation34_spill] sm:$0xff] %v7392_v7  ;;  %v7394_v51 = vpop.permute.xlu0 %2760 }
 0x33a   : > { %v7396_v41 = vpop.permute.xlu1 %2766 }
 0x33b   : > { %8911 = vst [vmem:[#allocation77_spill] sm:$0xff] %v7396_v41  ;;  %v7398_v53 = vpop.permute.xlu0 %2764 }
 0x33c   : > { %8912 = vst [vmem:[#allocation58_spill] sm:$0xff] %v7398_v53 }
 0x33e   : > { %v7400_v58 = vpop.permute.xlu1 %2770 }
 0x33f   : > { %8913 = vst [vmem:[#allocation33_spill] sm:$0xff] %v7400_v58  ;;  %v7402_v33 = vpop.permute.xlu0 %2768 }
 0x340   : > { %8914 = vst [vmem:[#allocation45_spill] sm:$0xff] %v7402_v33  ;;  %v4882_v50 = vpop.f32.mrb[0].mxu1 }
 0x341   : > { %v2357_v2 = vadd.f32 %v4882_v50, %v6828_v31  ;;  %v2351_v20 = vpop.f32.mrb[1].mxu1 }
 0x342   : > { %v2352_v34 = vadd.f32 %v6828_v31, %v2351_v20  ;;  %v7406_v24 = vpop.permute.xlu1 %2774 }
 0x343   : > { %8915 = vst [vmem:[#allocation102_spill] sm:$0xff] %v7406_v24  ;;  %v2431_v38 = vmax.f32 %v2357_v2, 0.0  ;;  %v7408_v59 = vpop.permute.xlu0 %2772 }
 0x344   : > { %8916 = vst [vmem:[#allocation44_spill] sm:$0xff] %v7408_v59  ;;  %v2430_v3 = vmax.f32 %v2352_v34, 0.0 }
 0x345   : > { %2448 = vst.msk [vmem:[#allocation3 + $0xe1] sm:$0xff] %vm225_vm0, %v2431_v38 }
 0x346   : > { %2447 = vst.msk [vmem:[#allocation3 + $0xd9] sm:$0xff] %vm225_vm0, %v2430_v3  ;;  %v7412_v16 = vpop.permute.xlu1 %2778 }
 0x347   : > { %8917 = vst [vmem:[#allocation61_spill] sm:$0xff] %v7412_v16  ;;  %v7414_v36 = vpop.permute.xlu0 %2776 }
 0x348   : > { %8918 = vst [vmem:[#allocation60_spill] sm:$0xff] %v7414_v36  ;;  %v4885_v19 = vpop.f32.mrb[2].mxu1 }
 0x349   : > { %v2367_v50 = vadd.f32 %v4885_v19, %v6828_v31  ;;  %v2361_v27 = vpop.f32.mrb[3].mxu1 }
 0x34a   : > { %v2362_v20 = vadd.f32 %v6828_v31, %v2361_v27  ;;  %v7418_v39 = vpop.permute.xlu1 %2782 }
 0x34b   : > { %8919 = vst [vmem:[#allocation25_spill] sm:$0xff] %v7418_v39  ;;  %v2433_v2 = vmax.f32 %v2367_v50, 0.0  ;;  %v7420_v44 = vpop.permute.xlu0 %2780 }
 0x34c   : > { %8920 = vst [vmem:[#allocation59_spill] sm:$0xff] %v7420_v44  ;;  %v2432_v34 = vmax.f32 %v2362_v20, 0.0 }
 0x34d   : > { %2450 = vst.msk [vmem:[#allocation3 + $0xf9] sm:$0xff] %vm225_vm0, %v2433_v2  ;;  %v7423_v38 = vld [vmem:[#allocation3 + $0xe0] sm:$0xff]  ;;  %v7425_v3 = vld [vmem:[#allocation3 + $0xd8] sm:$0xff] }
 0x34e   : > { %2449 = vst.msk [vmem:[#allocation3 + $0xf1] sm:$0xff] %vm225_vm0, %v2432_v34  ;;  %2974 = vrot.lane.b32.xlu1 %v7423_v38, %s5058_s30  ;;  %v7430_v19 = vpop.permute.xlu1 %2818  ;;  %2972 = vrot.lane.b32.xlu0 %v7425_v3, %s5058_s30 }
 0x34f   : > { %v7434_v27 = vpop.permute.xlu0 %2816 }
 0x352   : > { %3010 = vrot.lane.b32.xlu1 %v6902_v4, %s5059_s6  ;;  %v7438_v50 = vpop.permute.xlu1 %2822  ;;  %3008 = vrot.lane.b32.xlu0 %v6912_v25, %s5059_s6 }
 0x353   : > { %v4888_v20 = vpop.f32.mrb[4].mxu1  ;;  %v7442_v2 = vpop.permute.xlu0 %2820 }
 0x354   : > { %v2377_v34 = vadd.f32 %v4888_v20, %v6828_v31  ;;  %v2371_v39 = vpop.f32.mrb[5].mxu1 }
 0x355   : > { %v2372_v44 = vadd.f32 %v6828_v31, %v2371_v39 }
 0x356   : > { %v2435_v16 = vmax.f32 %v2377_v34, 0.0  ;;  %3682 = vrot.lane.b32.xlu1 %v7264_v45, %s5053_s25  ;;  %v7448_v36 = vpop.permute.xlu1 %2826  ;;  %3012 = vrot.lane.b32.xlu0 %v6934_v54, %s5059_s6  ;;  %v3585_v34 = vld [vmem:[#allocation3 + $0xd9] sm:$0xff] }
 0x357   : > { %8921 = vst [vmem:[#allocation83_spill] sm:$0xff] %v7448_v36  ;;  %v2434_v4 = vmax.f32 %v2372_v44, 0.0  ;;  %v7452_v11 = vpop.permute.xlu0 %2824  ;;  %v2582_v36 = vld [vmem:[#allocation3 + $0x79] sm:$0xff] }
 0x358   : > { %2452 = vst.msk [vmem:[#allocation3 + $0x111] sm:$0xff] %vm225_vm0, %v2435_v16 }
 0x359   : > { %2451 = vst.msk [vmem:[#allocation3 + $0x109] sm:$0xff] %vm225_vm0, %v2434_v4 }
 0x35a   : > { %3746 = vrot.lane.b32.xlu1 %v7332_v1, %s5054_s26  ;;  %v7458_v25 = vpop.permute.xlu1 %2830  ;;  %3684 = vrot.lane.b32.xlu0 %v7260_v9, %s5053_s25 }
 0x35b   : > { %8922 = vst [vmem:[#allocation35_spill] sm:$0xff] %v7458_v25  ;;  %v7462_v45 = vpop.permute.xlu0 %2828 }
 0x35c   : > { %8923 = vst [vmem:[#allocation81_spill] sm:$0xff] %v7462_v45 }
 0x35e   : > { %3810 = vrot.lane.b32.xlu1 %v7425_v3, %s5055_s27  ;;  %v7466_v54 = vpop.permute.xlu1 %2834  ;;  %3748 = vrot.lane.b32.xlu0 %v7328_v23, %s5054_s26  ;;  %v3586_v23 = vld [vmem:[#allocation3 + $0xe1] sm:$0xff] }
 0x35f   : > { %8924 = vst [vmem:[#allocation62_spill] sm:$0xff] %v7466_v54  ;;  %v4891_v39 = vpop.f32.mrb[6].mxu1  ;;  %v7470_v16 = vpop.permute.xlu0 %2832  ;;  %v3634_v54 = vld [vmem:[#allocation3 + $0xf1] sm:$0xff] }
 0x360   : > { %8925 = vst [vmem:[#allocation46_spill] sm:$0xff] %v7470_v16  ;;  %v2387_v1 = vadd.f32 %v4891_v39, %v6828_v31  ;;  %v2381_v44 = vpop.f32.mrb[7].mxu1 }
 0x361   : > { %v2382_v20 = vadd.f32 %v6828_v31, %v2381_v44  ;;  %v3601_v44 = vld [vmem:[#allocation3 + $0xda] sm:$0xff] }
 0x362   : > { %v2437_v9 = vmax.f32 %v2387_v1, 0.0  ;;  %3874 = vrot.lane.b32.xlu1 %v3585_v34, %s5056_s28  ;;  %v7475_v4 = vpop.permute.xlu1 %2838  ;;  %3812 = vrot.lane.b32.xlu0 %v7423_v38, %s5055_s27 }
 0x363   : > { %8926 = vst [vmem:[#allocation64_spill] sm:$0xff] %v7475_v4  ;;  %v2436_v24 = vmax.f32 %v2382_v20, 0.0  ;;  %v7479_v61 = vpop.permute.xlu0 %2836 }
 0x364   : > { %8927 = vst [vmem:[#allocation63_spill] sm:$0xff] %v7479_v61  ;;  %2454 = vst.msk [vmem:[#allocation3 + $0x129] sm:$0xff] %vm225_vm0, %v2437_v9 }
 0x365   : > { %2453 = vst.msk [vmem:[#allocation3 + $0x121] sm:$0xff] %vm225_vm0, %v2436_v24 }
 0x366   : > { %3876 = vrot.lane.b32.xlu1 %v3586_v23, %s5056_s28  ;;  %v7484_v39 = vpop.permute.xlu1 %2842  ;;  %3686 = vrot.lane.b32.xlu0 %v3585_v34, %s5053_s25 }
 0x367   : > { %8928 = vst [vmem:[#allocation86_spill] sm:$0xff] %v7484_v39  ;;  %v7487_v1 = vpop.permute.xlu0 %2840  ;;  %v3602_v39 = vld [vmem:[#allocation3 + $0xe2] sm:$0xff] }
 0x368   : > { %8929 = vst [vmem:[#allocation65_spill] sm:$0xff] %v7487_v1 }
 0x36a   : > { %3688 = vrot.lane.b32.xlu1 %v3586_v23, %s5053_s25  ;;  %v7490_v4 = vpop.permute.xlu1 %2846  ;;  %3938 = vrot.lane.b32.xlu0 %v3601_v44, %s5057_s29 }
 0x36b   : > { %8930 = vst [vmem:[#allocation66_spill] sm:$0xff] %v7490_v4  ;;  %v4894_v20 = vpop.f32.mrb[8].mxu1  ;;  %v7493_v9 = vpop.permute.xlu0 %2844  ;;  %v3639_v41 = vld [vmem:[#allocation3 + $0x129] sm:$0xff] }
 0x36c   : > { %8931 = vst [vmem:[#allocation67_spill] sm:$0xff] %v7493_v9  ;;  %v2397_v24 = vadd.f32 %v4894_v20, %v6828_v31  ;;  %v2391_v22 = vpop.f32.mrb[9].mxu1  ;;  %v3248_v9 = vld [vmem:[%s8546_s3] sm:$0xff]  ;;  %v3249_v20 = vld [vmem:[%s8546_s3 + $0x8] sm:$0xff]  ;;  %v3638_v25 = vld [vmem:[#allocation3 + $0x121] sm:$0xff] }
 0x36d   : > { %v2392_v61 = vadd.f32 %v6828_v31, %v2391_v22  ;;  %v4988_v31 = vpack.c.bf16 %v3249_v20, %v3248_v9  ;;  %v7511_v22 = vld [vmem:[#allocation3 + $0xf0] sm:$0xff]  ;;  %v3654_v28 = vld [vmem:[#allocation3 + $0x122] sm:$0xff] }
 0x36e   : > { %v2439_v59 = vmax.f32 %v2397_v24, 0.0  ;;  %3940 = vrot.lane.b32.xlu1 %v3602_v39, %s5057_s29  ;;  %v7498_v34 = vpop.permute.xlu1 %2882  ;;  %3750 = vrot.lane.b32.xlu0 %v3601_v44, %s5054_s26  ;;  %8932 = vst [vmem:[#allocation68_spill] sm:$0xff] %v7511_v22  ;;  %v3250_v44 = vld [vmem:[%s8546_s3 + $0x10] sm:$0xff]  ;;  %v3655_v45 = vld [vmem:[#allocation3 + $0x12a] sm:$0xff] }
 0x36f   : > { %v2438_v23 = vmax.f32 %v2392_v61, 0.0  ;;  %v7501_v4 = vpop.permute.xlu0 %2880  ;;  %4989 = vmatprep.subr.bf16.mxu0 %v4988_v31  ;;  %4997 = vmatprep.subr.bf16.mxu1 %v4988_v31 }
 0x370   : > { %2456 = vst.msk [vmem:[#allocation3 + $0x141] sm:$0xff] %vm225_vm0, %v2439_v59  ;;  %v3251_v59 = vld [vmem:[%s8546_s3 + $0x18] sm:$0xff]  ;;  %4991 = vmatpush3.bf16.msra.mxu0 %v4988_v31  ;;  %4999 = vmatpush3.bf16.msra.mxu1 %v4988_v31  ;;  %v5031_v31 = vld [vmem:[%s8545_s2] ss:$0 sm:$0xff] }
 0x371   : > { %2455 = vst.msk [vmem:[#allocation3 + $0x139] sm:$0xff] %vm225_vm0, %v2438_v23  ;;  %v4992_v24 = vpack.c.bf16 %v3251_v59, %v3250_v44  ;;  %v3252_v44 = vld [vmem:[%s8546_s3 + $0x20] sm:$0xf] }
 0x372   : > { %3752 = vrot.lane.b32.xlu1 %v3602_v39, %s5054_s26  ;;  %v7514_v61 = vpop.permute.xlu1 %2886  ;;  %4002 = vrot.lane.b32.xlu0 %v7511_v22, %s5058_s30  ;;  %v7526_v39 = vld [vmem:[#allocation3 + $0xf8] sm:$0xff] }
 0x373   : > { %v7524_v9 = vpop.permute.xlu0 %2884  ;;  %8933 = vst [vmem:[#allocation70_spill] sm:$0xff] %v7526_v39  ;;  %4993 = vmatprep.subr.bf16.mxu0 %v4992_v24  ;;  %5001 = vmatprep.subr.bf16.mxu1 %v4992_v24 }
 0x374   : > { %4995 = vmatpush3.bf16.msra.mxu0 %v4992_v24  ;;  %5003 = vmatpush3.bf16.msra.mxu1 %v4992_v24  ;;  %v3635_v24 = vld [vmem:[#allocation3 + $0xf9] sm:$0xff] }
 0x375   : > { %4912 = vmatprep.subr.msk.mxu0 %vm1253_vm2, %v3252_v44 }
 0x376   : > { %4004 = vrot.lane.b32.xlu1 %v7526_v39, %s5058_s30  ;;  %v7530_v23 = vpop.permute.xlu1 %2890  ;;  %3814 = vrot.lane.b32.xlu0 %v7511_v22, %s5055_s27 }
 0x377   : > { %8934 = vst [vmem:[#allocation47_spill] sm:$0xff] %v7530_v23  ;;  %v4897_v20 = vpop.f32.mrb[10].mxu1  ;;  %v7534_v1 = vpop.permute.xlu0 %2888 }
 0x378   : > { %v2407_v59 = vadd.f32 %v5031_v31, %v4897_v20  ;;  %v2401_v17 = vpop.f32.mrb[11].mxu1  ;;  %4913 = vmatpush3.msk.msra.mxu0 %vm1253_vm2, %v3252_v44 }
 0x379   : > { %v2402_v37 = vadd.f32 %v5031_v31, %v2401_v17 }
 0x37a   : > { %v2441_v58 = vmax.f32 %v2407_v59, 0.0  ;;  %3072 = vrot.lane.b32.xlu1 %v7062_v5, %s5060_s17  ;;  %v7545_v42 = vpop.permute.xlu1 %2894  ;;  %4066 = vrot.lane.b32.xlu0 %v3634_v54, %s5059_s6  ;;  %v4310_v5 = vld [vmem:[%s8546_s3 + $0x20] sm:$0xf] }
 0x37b   : > { %8935 = vst [vmem:[#allocation73_spill] sm:$0xff] %v7545_v42  ;;  %v2440_v30 = vmax.f32 %v2402_v37, 0.0  ;;  %v7548_v16 = vpop.permute.xlu0 %2892  ;;  %4946 = vmatprep.subr.msk.mxu1 %vm1253_vm2, %v4310_v5 }
 0x37c   : > { %8936 = vst [vmem:[#allocation48_spill] sm:$0xff] %v7548_v16  ;;  %2458 = vst.msk [vmem:[#allocation3 + $0x159] sm:$0xff] %vm225_vm0, %v2441_v58  ;;  %4947 = vmatpush3.msk.msra.mxu1 %vm1253_vm2, %v4310_v5  ;;  %v3650_v58 = vld [vmem:[#allocation3 + $0xf2] sm:$0xff] }
 0x37d   : > { %2457 = vst.msk [vmem:[#allocation3 + $0x151] sm:$0xff] %vm225_vm0, %v2440_v30 }
 0x37e   : > { %3878 = vrot.lane.b32.xlu1 %v3634_v54, %s5056_s28  ;;  %3816 = vrot.lane.b32.xlu0 %v7526_v39, %s5055_s27  ;;  %v7560_v37 = vpop.permute.xlu1 %2898  ;;  %v2463_v39 = vld [vmem:[#allocation3] sm:$0xff] }
 0x37f   : > { %8937 = vst [vmem:[#allocation76_spill] sm:$0xff] %v7560_v37  ;;  %v7562_v17 = vpop.permute.xlu0 %2896 }
 0x380   : > { %8938 = vst [vmem:[#allocation78_spill] sm:$0xff] %v7562_v17 }
 0x382   : > { %4130 = vrot.lane.b32.xlu1 %v3650_v58, %s5060_s17  ;;  %4068 = vrot.lane.b32.xlu0 %v3635_v24, %s5059_s6  ;;  %v7567_v33 = vpop.permute.xlu1 %2902 }
 0x383   : > { %v4900_v30 = vpop.f32.mrb[12].mxu1  ;;  %8939 = vst [vmem:[#allocation80_spill] sm:$0xff] %v7567_v33  ;;  %v7569_v47 = vpop.permute.xlu0 %2900 }
 0x384   : > { %v2417_v20 = vadd.f32 %v5031_v31, %v4900_v30  ;;  %v2411_v44 = vpop.f32.mrb[13].mxu1  ;;  %8940 = vst [vmem:[#allocation82_spill] sm:$0xff] %v7569_v47 }
 0x385   : > { %v2412_v59 = vadd.f32 %v5031_v31, %v2411_v44 }
 0x386   : > { %v2443_v63 = vmax.f32 %v2417_v20, 0.0  ;;  %3690 = vrot.lane.b32.xlu1 %v3634_v54, %s5053_s25  ;;  %3074 = vrot.lane.b32.xlu0 %v7055_v21, %s5060_s17  ;;  %v7578_v30 = vpop.permute.xlu1 %2906  ;;  %v3651_v20 = vld [vmem:[#allocation3 + $0xfa] sm:$0xff] }
 0x387   : > { %v2442_v5 = vmax.f32 %v2412_v59, 0.0  ;;  %8941 = vst [vmem:[#allocation84_spill] sm:$0xff] %v7578_v30  ;;  %v7580_v44 = vpop.permute.xlu0 %2904 }
 0x388   : > { %2460 = vst.msk [vmem:[#allocation3 + $0x171] sm:$0xff] %vm225_vm0, %v2443_v63  ;;  %8942 = vst [vmem:[#allocation85_spill] sm:$0xff] %v7580_v44  ;;  %v3652_v44 = vld [vmem:[#allocation3 + $0x10a] sm:$0xff] }
 0x389   : > { %2459 = vst.msk [vmem:[#allocation3 + $0x169] sm:$0xff] %vm225_vm0, %v2442_v5 }
 0x38a   : > { %3942 = vrot.lane.b32.xlu1 %v3650_v58, %s5057_s29  ;;  %3880 = vrot.lane.b32.xlu0 %v3635_v24, %s5056_s28  ;;  %v7584_v63 = vpop.permute.xlu1 %2910 }
 0x38b   : > { %8943 = vst [vmem:[#allocation87_spill] sm:$0xff] %v7584_v63  ;;  %v7586_v5 = vpop.permute.xlu0 %2908  ;;  %v3637_v63 = vld [vmem:[#allocation3 + $0x111] sm:$0xff] }
 0x38c   : > { %8944 = vst [vmem:[#allocation88_spill] sm:$0xff] %v7586_v5  ;;  %v2595_v5 = vld [vmem:[#allocation3 + $0x52] sm:$0xff] }
 0x38e   : > { %3692 = vrot.lane.b32.xlu1 %v3635_v24, %s5053_s25  ;;  %4132 = vrot.lane.b32.xlu0 %v3651_v20, %s5060_s17  ;;  %v7592_v24 = vld [vmem:[#allocation3 + $0x108] sm:$0xff] }
 0x38f   : > { %v4903_v54 = vpop.f32.mrb[14].mxu1  ;;  %8945 = vst [vmem:[#allocation89_spill] sm:$0xff] %v7592_v24 }
 0x390   : > { %v2427_v21 = vadd.f32 %v5031_v31, %v4903_v54  ;;  %v2421_v59 = vpop.f32.mrb[15].mxu1  ;;  %v7599_v54 = vpop.permute.xlu0 %2944 }
 0x391   : > { %v2422_v33 = vadd.f32 %v5031_v31, %v2421_v59  ;;  %v7597_v31 = vpop.permute.xlu1 %2946 }
 0x392   : > { %v2445_v47 = vmax.f32 %v2427_v21, 0.0  ;;  %3944 = vrot.lane.b32.xlu1 %v3651_v20, %s5057_s29  ;;  %3754 = vrot.lane.b32.xlu0 %v3650_v58, %s5054_s26  ;;  %v7601_v21 = vld [vmem:[#allocation3 + $0x110] sm:$0xff] }
 0x393   : > { %v2444_v30 = vmax.f32 %v2422_v33, 0.0  ;;  %8946 = vst [vmem:[#allocation90_spill] sm:$0xff] %v7601_v21  ;;  %v3636_v33 = vld [vmem:[#allocation3 + $0x109] sm:$0xff] }
 0x394   : > { %2462 = vst.msk [vmem:[#allocation3 + $0x189] sm:$0xff] %vm225_vm0, %v2445_v47  ;;  %v2579_v47 = vld [vmem:[#allocation3 + $0x51] sm:$0xff] }
 0x395   : > { %2461 = vst.msk [vmem:[#allocation3 + $0x181] sm:$0xff] %vm225_vm0, %v2444_v30  ;;  %v7607_v58 = vpop.permute.xlu1 %2950  ;;  %v7609_v30 = vpop.permute.xlu0 %2948 }
 0x396   : > { %3756 = vrot.lane.b32.xlu1 %v3651_v20, %s5054_s26  ;;  %4006 = vrot.lane.b32.xlu0 %v7592_v24, %s5058_s30 }
 0x399   : > { %v7617_v20 = vpop.permute.xlu1 %2954  ;;  %v7619_v59 = vpop.permute.xlu0 %2952 }
 0x39a   : > { %4008 = vrot.lane.b32.xlu1 %v7601_v21, %s5058_s30  ;;  %3818 = vrot.lane.b32.xlu0 %v7592_v24, %s5055_s27  ;;  %8947 = vst [vmem:[#allocation92_spill] sm:$0xff] %v7617_v20  ;;  %8948 = vst [vmem:[#allocation94_spill] sm:$0xff] %v7619_v59  ;;  %v2597_v24 = vld [vmem:[#allocation3 + $0x6a] sm:$0xff]  ;;  %v7718_v59 = vld [vmem:[#allocation3 + $0x140] sm:$0xff] }
 0x39d   : > { %v7625_v37 = vpop.permute.xlu0 %2956 }
 0x39e   : > { %3014 = vrot.lane.b32.xlu1 %v2579_v47, %s5059_s6  ;;  %4070 = vrot.lane.b32.xlu0 %v3636_v33, %s5059_s6  ;;  %v7623_v47 = vpop.permute.xlu1 %2958  ;;  %8950 = vst [vmem:[#allocation99_spill] sm:$0xff] %v7625_v37 }
 0x39f   : > { %8949 = vst [vmem:[#allocation97_spill] sm:$0xff] %v7623_v47 }
 0x3a1   : > { %v7633_v17 = vpop.permute.xlu0 %2960 }
 0x3a2   : > { %3820 = vrot.lane.b32.xlu1 %v7601_v21, %s5055_s27  ;;  %3076 = vrot.lane.b32.xlu0 %v7078_v18, %s5060_s17  ;;  %v7631_v18 = vpop.permute.xlu1 %2962  ;;  %8952 = vst [vmem:[#allocation5_spill] sm:$0xff] %v7633_v17  ;;  %v3653_v21 = vld [vmem:[#allocation3 + $0x112] sm:$0xff]  ;;  %v2580_v17 = vld [vmem:[#allocation3 + $0x61] sm:$0xff] }
 0x3a3   : > { %8951 = vst [vmem:[#allocation101_spill] sm:$0xff] %v7631_v18 }
 0x3a5   : > { %v7639_v42 = vpop.permute.xlu0 %2964 }
 0x3a6   : > { %4072 = vrot.lane.b32.xlu1 %v3637_v63, %s5059_s6  ;;  %3882 = vrot.lane.b32.xlu0 %v3636_v33, %s5056_s28  ;;  %v7637_v47 = vpop.permute.xlu1 %2966  ;;  %8954 = vst [vmem:[#allocation39_spill] sm:$0xff] %v7639_v42  ;;  %v2581_v42 = vld [vmem:[#allocation3 + $0x69] sm:$0xff] }
 0x3a7   : > { %8953 = vst [vmem:[#allocation9_spill] sm:$0xff] %v7637_v47 }
 0x3a9   : > { %v7650_v18 = vpop.permute.xlu0 %2968 }
 0x3aa   : > { %3078 = vrot.lane.b32.xlu1 %v2595_v5, %s5060_s17  ;;  %4134 = vrot.lane.b32.xlu0 %v3652_v44, %s5060_s17  ;;  %v7643_v5 = vld [vmem:[#allocation3 + $0x120] sm:$0xff]  ;;  %8957 = vst [vmem:[#allocation14_spill] sm:$0xff] %v7650_v18 }
 0x3ab   : > { %8955 = vst [vmem:[#allocation49_spill] sm:$0xff] %v7643_v5 }
 0x3ae   : > { %3884 = vrot.lane.b32.xlu1 %v3637_v63, %s5056_s28  ;;  %3694 = vrot.lane.b32.xlu0 %v3636_v33, %s5053_s25  ;;  %v7648_v33 = vpop.permute.xlu1 %2970 }
 0x3af   : > { %8956 = vst [vmem:[#allocation29_spill] sm:$0xff] %v7648_v33 }
 0x3b2   : > { %4136 = vrot.lane.b32.xlu1 %v3653_v21, %s5060_s17  ;;  %3946 = vrot.lane.b32.xlu0 %v3652_v44, %s5057_s29 }
 0x3b6   : > { %3758 = vrot.lane.b32.xlu1 %v3652_v44, %s5054_s26  ;;  %3696 = vrot.lane.b32.xlu0 %v3637_v63, %s5053_s25  ;;  %v7658_v63 = vld [vmem:[#allocation3 + $0x128] sm:$0xff] }
 0x3b7   : > { %8960 = vst [vmem:[#allocation20_spill] sm:$0xff] %v7658_v63 }
 0x3ba   : > { %4010 = vrot.lane.b32.xlu1 %v7643_v5, %s5058_s30  ;;  %3948 = vrot.lane.b32.xlu0 %v3653_v21, %s5057_s29 }
 0x3be   : > { %3760 = vrot.lane.b32.xlu1 %v3653_v21, %s5054_s26  ;;  %3016 = vrot.lane.b32.xlu0 %v2580_v17, %s5059_s6 }
 0x3c0   : > { %v7654_v47 = vpop.permute.xlu1 %2974  ;;  %v7656_v44 = vpop.permute.xlu0 %2972 }
 0x3c1   : > { %8958 = vst [vmem:[#allocation18_spill] sm:$0xff] %v7654_v47  ;;  %8959 = vst [vmem:[#allocation27_spill] sm:$0xff] %v7656_v44  ;;  %v2596_v47 = vld [vmem:[#allocation3 + $0x62] sm:$0xff] }
 0x3c2   : > { %4012 = vrot.lane.b32.xlu1 %v7658_v63, %s5058_s30  ;;  %3822 = vrot.lane.b32.xlu0 %v7643_v5, %s5055_s27 }
 0x3c4   : > { %v7664_v33 = vpop.permute.xlu1 %3010  ;;  %v3009_v18 = vpop.permute.xlu0 %3008 }
 0x3c6   : > { %3018 = vrot.lane.b32.xlu1 %v2581_v42, %s5059_s6  ;;  %4074 = vrot.lane.b32.xlu0 %v3638_v25, %s5059_s6 }
 0x3c8   : > { %v3683_v17 = vpop.permute.xlu1 %3682  ;;  %v7668_v21 = vpop.permute.xlu0 %3012 }
 0x3ca   : > { %3824 = vrot.lane.b32.xlu1 %v7658_v63, %s5055_s27  ;;  %3080 = vrot.lane.b32.xlu0 %v2596_v47, %s5060_s17 }
 0x3cc   : > { %v3747_v44 = vpop.permute.xlu1 %3746  ;;  %v7673_v5 = vpop.permute.xlu0 %3684 }
 0x3ce   : > { %4076 = vrot.lane.b32.xlu1 %v3639_v41, %s5059_s6  ;;  %3886 = vrot.lane.b32.xlu0 %v3638_v25, %s5056_s28 }
 0x3d0   : > { %v3811_v42 = vpop.permute.xlu1 %3810  ;;  %v7677_v13 = vpop.permute.xlu0 %3748 }
 0x3d2   : > { %3082 = vrot.lane.b32.xlu1 %v2597_v24, %s5060_s17  ;;  %4138 = vrot.lane.b32.xlu0 %v3654_v28, %s5060_s17 }
 0x3d4   : > { %v3875_v63 = vpop.permute.xlu1 %3874  ;;  %v7681_v37 = vpop.permute.xlu0 %3812 }
 0x3d6   : > { %3888 = vrot.lane.b32.xlu1 %v3639_v41, %s5056_s28  ;;  %3698 = vrot.lane.b32.xlu0 %v3638_v25, %s5053_s25  ;;  %v7699_v25 = vld [vmem:[#allocation3 + $0x138] sm:$0xff] }
 0x3d8   : > { %v7685_v47 = vpop.permute.xlu1 %3876  ;;  %v7687_v16 = vpop.permute.xlu0 %3686 }
 0x3da   : > { %4140 = vrot.lane.b32.xlu1 %v3655_v45, %s5060_s17  ;;  %3950 = vrot.lane.b32.xlu0 %v3654_v28, %s5057_s29 }
 0x3dc   : > { %v7691_v53 = vpop.permute.xlu1 %3688  ;;  %v3939_v24 = vpop.permute.xlu0 %3938 }
 0x3de   : > { %3762 = vrot.lane.b32.xlu1 %v3654_v28, %s5054_s26  ;;  %3700 = vrot.lane.b32.xlu0 %v3639_v41, %s5053_s25  ;;  %v3120_v28 = vsel %vm225_vm0, %v2463_v39, %v7242_v55  ;;  %v3640_v39 = vld [vmem:[#allocation3 + $0x139] sm:$0xff] }
 0x3df   : > { %v3136_v41 = vsel %vm1073_vm3, %v3120_v28, %v7310_v26 }
 0x3e0   : > { %v7695_v35 = vpop.permute.xlu1 %3940  ;;  %v7697_v14 = vpop.permute.xlu0 %3750  ;;  %v3152_v7 = vsel %vm1090_vm4, %v3136_v41, %v7378_v15 }
 0x3e1   : > { %v3168_v57 = vsel %vm1107_vm5, %v3152_v7, %v7434_v27  ;;  %v2583_v27 = vld [vmem:[#allocation3 + $0x81] sm:$0xff] }
 0x3e2   : > { %4014 = vrot.lane.b32.xlu1 %v7699_v25, %s5058_s30  ;;  %3952 = vrot.lane.b32.xlu0 %v3655_v45, %s5057_s29  ;;  %v3184_v55 = vsel %vm1124_vm6, %v3168_v57, %v7501_v4  ;;  %v4178_v57 = vsel %vm225_vm0, %v7216_v29, %v3683_v17  ;;  %v2464_v4 = vld [vmem:[#allocation3 + $0x8] sm:$0xff] }
 0x3e3   : > { %v3200_v26 = vsel %vm1141_vm7, %v3184_v55, %v7599_v54  ;;  %v4194_v28 = vsel %vm1073_vm3, %v4178_v57, %v3747_v44  ;;  %v3121_v29 = vsel %vm225_vm0, %v2464_v4, %v7238_v32  ;;  %v2599_v4 = vld [vmem:[#allocation3 + $0x82] sm:$0xff] }
 0x3e4   : > { %v7704_v20 = vpop.permute.xlu1 %3752  ;;  %v4003_v23 = vpop.permute.xlu0 %4002  ;;  %v4210_v54 = vsel %vm1090_vm4, %v4194_v28, %v3811_v42  ;;  %v3137_v44 = vsel %vm1073_vm3, %v3121_v29, %v7308_v40  ;;  %v3656_v28 = vld [vmem:[#allocation3 + $0x13a] sm:$0xff] }
 0x3e5   : > { %v4226_v55 = vsel %vm1107_vm5, %v4210_v54, %v3875_v63 }
 0x3e6   : > { %3764 = vrot.lane.b32.xlu1 %v3655_v45, %s5054_s26  ;;  %3020 = vrot.lane.b32.xlu0 %v2582_v36, %s5059_s6  ;;  %v3216_v36 = vsel %vm1158_vm8, %v3200_v26, %v3009_v18  ;;  %v2598_v26 = vld [vmem:[#allocation3 + $0x7a] sm:$0xff]  ;;  %v4242_v17 = vsel %vm1124_vm6, %v4226_v55, %v3939_v24 }
 0x3e7   : > { %v4258_v42 = vsel %vm1141_vm7, %v4242_v17, %v4003_v23 }
 0x3e8   : > { %v4005_v12 = vpop.permute.xlu1 %4004  ;;  %v7714_v22 = vpop.permute.xlu0 %3814 }
 0x3ea   : > { %4016 = vrot.lane.b32.xlu1 %v7718_v59, %s5058_s30  ;;  %3826 = vrot.lane.b32.xlu0 %v7699_v25, %s5055_s27 }
 0x3ec   : > { %v3073_v15 = vpop.permute.xlu1 %3072  ;;  %v4067_v45 = vpop.permute.xlu0 %4066 }
 0x3ed   : > { %v3232_v7 = vsel %vm1175_vm9, %v3216_v36, %v3073_v15  ;;  %v3153_v36 = vsel %vm1090_vm4, %v3137_v44, %v7376_v52  ;;  %v4274_v63 = vsel %vm1158_vm8, %v4258_v42, %v4067_v45  ;;  %v3657_v44 = vld [vmem:[#allocation3 + $0x142] sm:$0xff]  ;;  %v7803_v42 = vld [vmem:[#allocation3 + $0x150] sm:$0xff] }
 0x3ee   : > { %3022 = vrot.lane.b32.xlu1 %v2583_v27, %s5059_s6  ;;  %4078 = vrot.lane.b32.xlu0 %v3640_v39, %s5059_s6  ;;  %v3169_v32 = vsel %vm1107_vm5, %v3153_v36, %v7430_v19  ;;  %v3641_v27 = vld [vmem:[#allocation3 + $0x141] sm:$0xff] }
 0x3ef   : > { %4914 = vmatprep.mubr.msk.f32.mxu0 %vm1204_vm10, %v3232_v7  ;;  %v3185_v57 = vsel %vm1124_vm6, %v3169_v32, %v7498_v34  ;;  %v4179_v34 = vsel %vm225_vm0, %v7212_v8, %v7673_v5 }
 0x3f0   : > { %v7737_v18 = vpop.permute.xlu1 %3878  ;;  %v7739_v41 = vpop.permute.xlu0 %3816  ;;  %v3201_v40 = vsel %vm1141_vm7, %v3185_v57, %v7597_v31  ;;  %v4195_v31 = vsel %vm1073_vm3, %v4179_v34, %v7677_v13 }
 0x3f1   : > { %v3217_v52 = vsel %vm1158_vm8, %v3201_v40, %v7664_v33  ;;  %v4211_v33 = vsel %vm1090_vm4, %v4195_v31, %v7681_v37  ;;  %v2600_v31 = vld [vmem:[#allocation3 + $0x92] sm:$0xff] }
 0x3f2   : > { %3828 = vrot.lane.b32.xlu1 %v7718_v59, %s5055_s27  ;;  %3084 = vrot.lane.b32.xlu0 %v2598_v26, %s5060_s17  ;;  %v4227_v26 = vsel %vm1107_vm5, %v4211_v33, %v7685_v47 }
 0x3f3   : > { %v4243_v8 = vsel %vm1124_vm6, %v4227_v26, %v7695_v35 }
 0x3f4   : > { %v4131_v15 = vpop.permute.xlu1 %4130  ;;  %v4069_v7 = vpop.permute.xlu0 %4068  ;;  %v4259_v13 = vsel %vm1141_vm7, %v4243_v8, %v4005_v12 }
 0x3f5   : > { %v4290_v24 = vsel %vm1175_vm9, %v4274_v63, %v4131_v15  ;;  %v4275_v5 = vsel %vm1158_vm8, %v4259_v13, %v4069_v7  ;;  %v2584_v15 = vld [vmem:[#allocation3 + $0x91] sm:$0xff]  ;;  %v3122_v7 = vsel %vm225_vm0, %v7160_v62, %v7250_v46  ;;  %v3643_v13 = vld [vmem:[#allocation3 + $0x159] sm:$0xff] }
 0x3f6   : > { %4080 = vrot.lane.b32.xlu1 %v3641_v27, %s5059_s6  ;;  %3890 = vrot.lane.b32.xlu0 %v3640_v39, %s5056_s28  ;;  %v3138_v32 = vsel %vm1073_vm3, %v3122_v7, %v7318_v43 }
 0x3f7   : > { %4948 = vmatprep.mubr.msk.f32.mxu1 %vm1204_vm10, %v4290_v24  ;;  %v3154_v24 = vsel %vm1090_vm4, %v3138_v32, %v7386_v6 }
 0x3f8   : > { %v7766_v23 = vpop.permute.xlu1 %3690  ;;  %v3075_v19 = vpop.permute.xlu0 %3074  ;;  %v3170_v40 = vsel %vm1107_vm5, %v3154_v24, %v7442_v2 }
 0x3f9   : > { %v3233_v45 = vsel %vm1175_vm9, %v3217_v52, %v3075_v19  ;;  %v7823_v52 = vld [vmem:[#allocation3 + $0x158] sm:$0xff]  ;;  %v3186_v62 = vsel %vm1124_vm6, %v3170_v40, %v7524_v9  ;;  %v3123_v9 = vsel %vm225_vm0, %v7155_v49, %v7248_v0 }
 0x3fa   : > { %3086 = vrot.lane.b32.xlu1 %v2599_v4, %s5060_s17  ;;  %4142 = vrot.lane.b32.xlu0 %v3656_v28, %s5060_s17  ;;  %v3202_v46 = vsel %vm1141_vm7, %v3186_v62, %v7609_v30  ;;  %v3642_v4 = vld [vmem:[#allocation3 + $0x151] sm:$0xff]  ;;  %v3139_v30 = vsel %vm1073_vm3, %v3123_v9, %v7316_v10 }
 0x3fb   : > { %4915 = vmatmul.mubr.msk.f32.vlgmr.msra.gmra.mrb[16].mxu0 %vm1204_vm10, %v3233_v45  ;;  %v3218_v43 = vsel %vm1158_vm8, %v3202_v46, %v7668_v21  ;;  %v2585_v45 = vld [vmem:[#allocation3 + $0x99] sm:$0xff]  ;;  %v3155_v34 = vsel %vm1090_vm4, %v3139_v30, %v7384_v48  ;;  %v7914_v46 = vld [vmem:[#allocation3 + $0x168] sm:$0xff] }
 0x3fc   : > { %v3943_v54 = vpop.permute.xlu1 %3942  ;;  %v7779_v55 = vpop.permute.xlu0 %3880 }
 0x3fe   : > { %3892 = vrot.lane.b32.xlu1 %v3641_v27, %s5056_s28  ;;  %3702 = vrot.lane.b32.xlu0 %v3640_v39, %s5053_s25 }
 0x400   : > { %v7789_v29 = vpop.permute.xlu1 %3692  ;;  %v4133_v37 = vpop.permute.xlu0 %4132 }
 0x401   : > { %v4291_v17 = vsel %vm1175_vm9, %v4275_v5, %v4133_v37  ;;  %v4181_v5 = vsel %vm225_vm0, %v7423_v38, %v7691_v53  ;;  %v2601_v38 = vld [vmem:[#allocation3 + $0x9a] sm:$0xff] }
 0x402   : > { %4144 = vrot.lane.b32.xlu1 %v3657_v44, %s5060_s17  ;;  %3954 = vrot.lane.b32.xlu0 %v3656_v28, %s5057_s29 }
 0x403   : > { %4949 = vmatmul.mubr.msk.f32.vlgmr.msra.gmra.mrb[16].mxu1 %vm1204_vm10, %v4291_v17 }
 0x404   : > { %v7795_v35 = vpop.permute.xlu1 %3944  ;;  %v7797_v47 = vpop.permute.xlu0 %3754 }
 0x406   : > { %3766 = vrot.lane.b32.xlu1 %v3656_v28, %s5054_s26  ;;  %3704 = vrot.lane.b32.xlu0 %v3641_v27, %s5053_s25  ;;  %v4180_v28 = vsel %vm225_vm0, %v7425_v3, %v7687_v16  ;;  %v3171_v16 = vsel %vm1107_vm5, %v3155_v34, %v7438_v50 }
 0x407   : > { %v4196_v21 = vsel %vm1073_vm3, %v4180_v28, %v7697_v14  ;;  %v3187_v14 = vsel %vm1124_vm6, %v3171_v16, %v7514_v61 }
 0x408   : > { %v7801_v12 = vpop.permute.xlu1 %3756  ;;  %v4007_v39 = vpop.permute.xlu0 %4006  ;;  %v4212_v49 = vsel %vm1090_vm4, %v4196_v21, %v7714_v22  ;;  %v3203_v48 = vsel %vm1141_vm7, %v3187_v14, %v7607_v58  ;;  %v4197_v58 = vsel %vm1073_vm3, %v4181_v5, %v7704_v20  ;;  %v3644_v14 = vld [vmem:[#allocation3 + $0x169] sm:$0xff] }
 0x409   : > { %v4228_v10 = vsel %vm1107_vm5, %v4212_v49, %v7737_v18  ;;  %v4213_v37 = vsel %vm1090_vm4, %v4197_v58, %v7739_v41  ;;  %v7933_v49 = vld [vmem:[#allocation3 + $0x170] sm:$0xff]  ;;  %v8966_v58 = vld [vmem:[#allocation83_spill] sm:$0xff] }
 0x40a   : > { %4018 = vrot.lane.b32.xlu1 %v7803_v42, %s5058_s30  ;;  %3956 = vrot.lane.b32.xlu0 %v3657_v44, %s5057_s29  ;;  %v4244_v33 = vsel %vm1124_vm6, %v4228_v10, %v3943_v54  ;;  %v4229_v53 = vsel %vm1107_vm5, %v4213_v37, %v7779_v55 }
 0x40b   : > { %v4260_v22 = vsel %vm1141_vm7, %v4244_v33, %v4007_v39  ;;  %v3658_v39 = vld [vmem:[#allocation3 + $0x152] sm:$0xff] }
 0x40c   : > { %v7808_v36 = vpop.permute.xlu1 %4008  ;;  %v7810_v63 = vpop.permute.xlu0 %3818  ;;  %v5033_v33 = vld [vmem:[#allocation3 + $0x38] sm:$0xff] }
 0x40e   : > { %3768 = vrot.lane.b32.xlu1 %v3657_v44, %s5054_s26  ;;  %3024 = vrot.lane.b32.xlu0 %v2584_v15, %s5059_s6  ;;  %v4245_v15 = vsel %vm1124_vm6, %v4229_v53, %v7795_v35 }
 0x40f   : > { %v4261_v20 = vsel %vm1141_vm7, %v4245_v15, %v7808_v36 }
 0x410   : > { %v3015_v27 = vpop.permute.xlu1 %3014  ;;  %v4071_v57 = vpop.permute.xlu0 %4070 }
 0x411   : > { %v3219_v50 = vsel %vm1158_vm8, %v3203_v48, %v3015_v27  ;;  %v4276_v18 = vsel %vm1158_vm8, %v4260_v22, %v4071_v57  ;;  %v3659_v27 = vld [vmem:[#allocation3 + $0x15a] sm:$0xff]  ;;  %v8963_v22 = vld [vmem:[#allocation68_spill] sm:$0xff] }
 0x412   : > { %4020 = vrot.lane.b32.xlu1 %v7823_v52, %s5058_s30  ;;  %3830 = vrot.lane.b32.xlu0 %v7803_v42, %s5055_s27 }
 0x414   : > { %v7835_v6 = vpop.permute.xlu1 %3820  ;;  %v3077_v2 = vpop.permute.xlu0 %3076 }
 0x415   : > { %v3234_v19 = vsel %vm1175_vm9, %v3218_v43, %v3077_v2 }
 0x416   : > { %3026 = vrot.lane.b32.xlu1 %v2585_v45, %s5059_s6  ;;  %4082 = vrot.lane.b32.xlu0 %v3642_v4, %s5059_s6  ;;  %v5032_v45 = vld [vmem:[#allocation3 + $0x30] sm:$0xff] }
 0x417   : > { %4917 = vmatprep.mubr.msk.f32.mxu0 %vm1204_vm10, %v3234_v19  ;;  %v2586_v19 = vld [vmem:[#allocation3 + $0xa9] sm:$0xff] }
 0x418   : > { %v4073_v0 = vpop.permute.xlu1 %4072  ;;  %v7855_v3 = vpop.permute.xlu0 %3882 }
 0x419   : > { %v4277_v41 = vsel %vm1158_vm8, %v4261_v20, %v4073_v0 }
 0x41a   : > { %3832 = vrot.lane.b32.xlu1 %v7823_v52, %s5055_s27  ;;  %3088 = vrot.lane.b32.xlu0 %v2600_v31, %s5060_s17  ;;  %v2587_v31 = vld [vmem:[#allocation3 + $0xb1] sm:$0xff] }
 0x41c   : > { %v3079_v26 = vpop.permute.xlu1 %3078  ;;  %v4135_v8 = vpop.permute.xlu0 %4134 }
 0x41d   : > { %v3235_v61 = vsel %vm1175_vm9, %v3219_v50, %v3079_v26  ;;  %v4292_v54 = vsel %vm1175_vm9, %v4276_v18, %v4135_v8  ;;  %v4182_v50 = vsel %vm225_vm0, %v8963_v22, %v7766_v23  ;;  %v8964_v18 = vld [vmem:[#allocation43_spill] sm:$0xff] }
 0x41e   : > { %4084 = vrot.lane.b32.xlu1 %v3643_v13, %s5059_s6  ;;  %3894 = vrot.lane.b32.xlu0 %v3642_v4, %s5056_s28  ;;  %v4198_v8 = vsel %vm1073_vm3, %v4182_v50, %v7797_v47  ;;  %v2588_v22 = vld [vmem:[#allocation3 + $0xc1] sm:$0xff] }
 0x41f   : > { %4918 = vmatmul.mubr.msk.f32.gmra.mrb[18].mxu0 %vm1204_vm10, %v3235_v61  ;;  %4951 = vmatprep.mubr.msk.f32.mxu1 %vm1204_vm10, %v4292_v54  ;;  %v8965_v61 = vld [vmem:[#allocation34_spill] sm:$0xff]  ;;  %v5034_v50 = vld [vmem:[#allocation3 + $0x48] sm:$0xff] }
 0x420   : > { %v7885_v17 = vpop.permute.xlu1 %3884  ;;  %v7887_v44 = vpop.permute.xlu0 %3694 }
 0x422   : > { %3090 = vrot.lane.b32.xlu1 %v2601_v38, %s5060_s17  ;;  %4146 = vrot.lane.b32.xlu0 %v3658_v39, %s5060_s17  ;;  %v2602_v38 = vld [vmem:[#allocation3 + $0xaa] sm:$0xff] }
 0x424   : > { %v4137_v7 = vpop.permute.xlu1 %4136  ;;  %v3947_v32 = vpop.permute.xlu0 %3946 }
 0x425   : > { %v4293_v24 = vsel %vm1175_vm9, %v4277_v41, %v4137_v7 }
 0x426   : > { %3896 = vrot.lane.b32.xlu1 %v3643_v13, %s5056_s28  ;;  %3706 = vrot.lane.b32.xlu0 %v3642_v4, %s5053_s25  ;;  %v3124_v4 = vsel %vm225_vm0, %v5032_v45, %v7258_v60  ;;  %v8969_v45 = vld [vmem:[#allocation70_spill] sm:$0xff] }
 0x427   : > { %4952 = vmatmul.mubr.msk.f32.gmra.mrb[18].mxu1 %vm1204_vm10, %v4293_v24  ;;  %v3140_v9 = vsel %vm1073_vm3, %v3124_v4, %v7326_v56  ;;  %v8961_v56 = vld [vmem:[#allocation94_spill] sm:$0xff]  ;;  %v4183_v4 = vsel %vm225_vm0, %v8969_v45, %v7789_v29  ;;  %v8977_v45 = vld [vmem:[#allocation89_spill] sm:$0xff] }
 0x428   : > { %v7902_v55 = vpop.permute.xlu1 %3758  ;;  %v7904_v35 = vpop.permute.xlu0 %3696  ;;  %v3156_v28 = vsel %vm1090_vm4, %v3140_v9, %v7394_v51 }
 0x429   : > { %v3172_v34 = vsel %vm1107_vm5, %v3156_v28, %v7452_v11 }
 0x42a   : > { %4148 = vrot.lane.b32.xlu1 %v3659_v27, %s5060_s17  ;;  %3958 = vrot.lane.b32.xlu0 %v3658_v39, %s5057_s29  ;;  %v3188_v60 = vsel %vm1124_vm6, %v3172_v34, %v7534_v1  ;;  %v8962_v1 = vld [vmem:[#allocation12_spill] sm:$0xff] }
 0x42b   : > { %v3204_v0 = vsel %vm1141_vm7, %v3188_v60, %v8961_v56  ;;  %v3125_v48 = vsel %vm225_vm0, %v5033_v33, %v8962_v1  ;;  %v3660_v34 = vld [vmem:[#allocation3 + $0x16a] sm:$0xff]  ;;  %v3630_v33 = vld [vmem:[#allocation3 + $0x180] sm:$0xff] }
 0x42c   : > { %v4011_v36 = vpop.permute.xlu1 %4010  ;;  %v7908_v57 = vpop.permute.xlu0 %3948  ;;  %v3141_v26 = vsel %vm1073_vm3, %v3125_v48, %v8964_v18  ;;  %v8970_v18 = vld [vmem:[#allocation22_spill] sm:$0xff] }
 0x42d   : > { %v3157_v54 = vsel %vm1090_vm4, %v3141_v26, %v8965_v61  ;;  %v3126_v26 = vsel %vm225_vm0, %v5034_v50, %v8970_v18 }
 0x42e   : > { %3770 = vrot.lane.b32.xlu1 %v3658_v39, %s5054_s26  ;;  %3708 = vrot.lane.b32.xlu0 %v3643_v13, %s5053_s25  ;;  %v4214_v13 = vsel %vm1090_vm4, %v4198_v8, %v7810_v63  ;;  %v3173_v37 = vsel %vm1107_vm5, %v3157_v54, %v8966_v58  ;;  %v8967_v39 = vld [vmem:[#allocation47_spill] sm:$0xff]  ;;  %v8968_v63 = vld [vmem:[#allocation92_spill] sm:$0xff]  ;;  %v8971_v8 = vld [vmem:[#allocation42_spill] sm:$0xff] }
 0x42f   : > { %v4230_v53 = vsel %vm1107_vm5, %v4214_v13, %v7855_v3  ;;  %v3189_v47 = vsel %vm1124_vm6, %v3173_v37, %v8967_v39  ;;  %v3142_v61 = vsel %vm1073_vm3, %v3126_v26, %v8971_v8  ;;  %v8972_v54 = vld [vmem:[#allocation58_spill] sm:$0xff]  ;;  %v8973_v37 = vld [vmem:[#allocation81_spill] sm:$0xff]  ;;  %v8974_v39 = vld [vmem:[#allocation48_spill] sm:$0xff] }
 0x430   : > { %v7912_v40 = vpop.permute.xlu1 %3760  ;;  %v3017_v62 = vpop.permute.xlu0 %3016  ;;  %v4246_v15 = vsel %vm1124_vm6, %v4230_v53, %v3947_v32  ;;  %v3205_v20 = vsel %vm1141_vm7, %v3189_v47, %v8968_v63  ;;  %v3158_v13 = vsel %vm1090_vm4, %v3142_v61, %v8972_v54 }
 0x431   : > { %v3220_v51 = vsel %vm1158_vm8, %v3204_v0, %v3017_v62  ;;  %v4262_v41 = vsel %vm1141_vm7, %v4246_v15, %v4011_v36  ;;  %v4199_v36 = vsel %vm1073_vm3, %v4183_v4, %v7801_v12  ;;  %v3174_v53 = vsel %vm1107_vm5, %v3158_v13, %v8973_v37  ;;  %v8975_v15 = vld [vmem:[#allocation99_spill] sm:$0xff]  ;;  %v8983_v13 = vld [vmem:[#allocation90_spill] sm:$0xff] }
 0x432   : > { %4022 = vrot.lane.b32.xlu1 %v7914_v46, %s5058_s30  ;;  %3960 = vrot.lane.b32.xlu0 %v3659_v27, %s5057_s29  ;;  %v4215_v9 = vsel %vm1090_vm4, %v4199_v36, %v7835_v6  ;;  %v3190_v47 = vsel %vm1124_vm6, %v3174_v53, %v8974_v39  ;;  %v4184_v4 = vsel %vm225_vm0, %v8977_v45, %v7887_v44  ;;  %v8978_v36 = vld [vmem:[#allocation98_spill] sm:$0xff] }
 0x433   : > { %v4231_v29 = vsel %vm1107_vm5, %v4215_v9, %v7885_v17  ;;  %v3206_v63 = vsel %vm1141_vm7, %v3190_v47, %v8975_v15  ;;  %v4185_v37 = vsel %vm225_vm0, %v8983_v13, %v7904_v35  ;;  %v3662_v39 = vld [vmem:[#allocation3 + $0x182] sm:$0xff] }
 0x434   : > { %v7919_v43 = vpop.permute.xlu1 %4012  ;;  %v7921_v2 = vpop.permute.xlu0 %3822  ;;  %v4247_v60 = vsel %vm1124_vm6, %v4231_v29, %v7908_v57  ;;  %v4200_v29 = vsel %vm1073_vm3, %v4184_v4, %v7902_v55 }
 0x435   : > { %v4263_v12 = vsel %vm1141_vm7, %v4247_v60, %v7919_v43  ;;  %v4216_v60 = vsel %vm1090_vm4, %v4200_v29, %v7921_v2  ;;  %v8982_v2 = vld [vmem:[#allocation97_spill] sm:$0xff]  ;;  %v2591_v29 = vld [vmem:[#allocation3 + $0xe1] sm:$0xff] }
 0x436   : > { %3772 = vrot.lane.b32.xlu1 %v3659_v27, %s5054_s26  ;;  %3028 = vrot.lane.b32.xlu0 %v2586_v19, %s5059_s6  ;;  %v3645_v19 = vld [vmem:[#allocation3 + $0x171] sm:$0xff] }
 0x438   : > { %v3019_v30 = vpop.permute.xlu1 %3018  ;;  %v4075_v21 = vpop.permute.xlu0 %4074 }
 0x439   : > { %v3221_v7 = vsel %vm1158_vm8, %v3205_v20, %v3019_v30  ;;  %v4278_v3 = vsel %vm1158_vm8, %v4262_v41, %v4075_v21  ;;  %v2603_v21 = vld [vmem:[#allocation3 + $0xb2] sm:$0xff] }
 0x43a   : > { %4024 = vrot.lane.b32.xlu1 %v7933_v49, %s5058_s30  ;;  %3834 = vrot.lane.b32.xlu0 %v7914_v46, %s5055_s27 }
 0x43c   : > { %v7944_v16 = vpop.permute.xlu1 %3824  ;;  %v3081_v10 = vpop.permute.xlu0 %3080 }
 0x43d   : > { %v3236_v11 = vsel %vm1175_vm9, %v3220_v51, %v3081_v10  ;;  %v3661_v10 = vld [vmem:[#allocation3 + $0x172] sm:$0xff] }
 0x43e   : > { %3030 = vrot.lane.b32.xlu1 %v2587_v31, %s5059_s6  ;;  %4086 = vrot.lane.b32.xlu0 %v3644_v14, %s5059_s6 }
 0x43f   : > { %4920 = vmatprep.mubr.msk.f32.mxu0 %vm1204_vm10, %v3236_v11 }
 0x440   : > { %v4077_v5 = vpop.permute.xlu1 %4076  ;;  %v7963_v23 = vpop.permute.xlu0 %3886 }
 0x441   : > { %v4279_v6 = vsel %vm1158_vm8, %v4263_v12, %v4077_v5 }
 0x442   : > { %3836 = vrot.lane.b32.xlu1 %v7933_v49, %s5055_s27  ;;  %3092 = vrot.lane.b32.xlu0 %v2602_v38, %s5060_s17  ;;  %v3631_v38 = vld [vmem:[#allocation3 + $0x188] sm:$0xff] }
 0x444   : > { %v3083_v24 = vpop.permute.xlu1 %3082  ;;  %v4139_v27 = vpop.permute.xlu0 %4138 }
 0x445   : > { %v3237_v62 = vsel %vm1175_vm9, %v3221_v7, %v3083_v24  ;;  %v4294_v32 = vsel %vm1175_vm9, %v4278_v3, %v4139_v27  ;;  %v2589_v24 = vld [vmem:[#allocation3 + $0xc9] sm:$0xff]  ;;  %v3646_v27 = vld [vmem:[#allocation3 + $0x181] sm:$0xff] }
 0x446   : > { %4088 = vrot.lane.b32.xlu1 %v3645_v19, %s5059_s6  ;;  %3898 = vrot.lane.b32.xlu0 %v3644_v14, %s5056_s28 }
 0x447   : > { %4921 = vmatmul.mubr.msk.f32.gmra.mrb[20].mxu0 %vm1204_vm10, %v3237_v62  ;;  %4954 = vmatprep.mubr.msk.f32.mxu1 %vm1204_vm10, %v4294_v32  ;;  %v5035_v62 = vld [vmem:[#allocation3 + $0x50] sm:$0xff]  ;;  %v8976_v32 = vld [vmem:[#allocation7_spill] sm:$0xff] }
 0x448   : > { %v7993_v28 = vpop.permute.xlu1 %3888  ;;  %v7995_v30 = vpop.permute.xlu0 %3698 }
 0x44a   : > { %3094 = vrot.lane.b32.xlu1 %v2603_v21, %s5060_s17  ;;  %4150 = vrot.lane.b32.xlu0 %v3660_v34, %s5060_s17  ;;  %v8979_v21 = vld [vmem:[#allocation77_spill] sm:$0xff] }
 0x44c   : > { %v4141_v56 = vpop.permute.xlu1 %4140  ;;  %v3951_v0 = vpop.permute.xlu0 %3950 }
 0x44d   : > { %v4295_v51 = vsel %vm1175_vm9, %v4279_v6, %v4141_v56  ;;  %v8980_v6 = vld [vmem:[#allocation35_spill] sm:$0xff] }
 0x44e   : > { %3900 = vrot.lane.b32.xlu1 %v3645_v19, %s5056_s28  ;;  %3710 = vrot.lane.b32.xlu0 %v3644_v14, %s5053_s25 }
 0x44f   : > { %4955 = vmatmul.mubr.msk.f32.gmra.mrb[20].mxu1 %vm1204_vm10, %v4295_v51  ;;  %v4232_v51 = vsel %vm1107_vm5, %v4216_v60, %v7963_v23 }
 0x450   : > { %v8010_v17 = vpop.permute.xlu1 %3762  ;;  %v8012_v57 = vpop.permute.xlu0 %3700 }
 0x452   : > { %4152 = vrot.lane.b32.xlu1 %v3661_v10, %s5060_s17  ;;  %3962 = vrot.lane.b32.xlu0 %v3660_v34, %s5057_s29 }
 0x454   : > { %v4015_v43 = vpop.permute.xlu1 %4014  ;;  %v8016_v11 = vpop.permute.xlu0 %3952 }
 0x456   : > { %3774 = vrot.lane.b32.xlu1 %v3660_v34, %s5054_s26  ;;  %3712 = vrot.lane.b32.xlu0 %v3645_v19, %s5053_s25  ;;  %v3127_v19 = vsel %vm225_vm0, %v5035_v62, %v8976_v32  ;;  %v3648_v62 = vld [vmem:[#allocation3 + $0x199] sm:$0xff] }
 0x457   : > { %v3143_v9 = vsel %vm1073_vm3, %v3127_v19, %v8978_v36  ;;  %v3633_v32 = vld [vmem:[#allocation3 + $0x1a0] sm:$0xff] }
 0x458   : > { %v8020_v31 = vpop.permute.xlu1 %3764  ;;  %v3021_v14 = vpop.permute.xlu0 %3020  ;;  %v3159_v34 = vsel %vm1090_vm4, %v3143_v9, %v8979_v21  ;;  %v2606_v9 = vld [vmem:[#allocation3 + $0xda] sm:$0xff] }
 0x459   : > { %v3222_v20 = vsel %vm1158_vm8, %v3206_v63, %v3021_v14  ;;  %v3175_v56 = vsel %vm1107_vm5, %v3159_v34, %v8980_v6  ;;  %v8981_v14 = vld [vmem:[#allocation73_spill] sm:$0xff]  ;;  %v5036_v21 = vld [vmem:[#allocation3 + $0x60] sm:$0xff]  ;;  %v8984_v34 = vld [vmem:[#allocation75_spill] sm:$0xff] }
 0x45a   : > { %4026 = vrot.lane.b32.xlu1 %v3630_v33, %s5058_s30  ;;  %3964 = vrot.lane.b32.xlu0 %v3661_v10, %s5057_s29  ;;  %v3191_v55 = vsel %vm1124_vm6, %v3175_v56, %v8981_v14  ;;  %v3128_v60 = vsel %vm225_vm0, %v5036_v21, %v8984_v34  ;;  %v3664_v56 = vld [vmem:[#allocation3 + $0x19a] sm:$0xff] }
 0x45c   : > { %v8024_v1 = vpop.permute.xlu1 %4016  ;;  %v8026_v48 = vpop.permute.xlu0 %3826 }
 0x45e   : > { %3776 = vrot.lane.b32.xlu1 %v3661_v10, %s5054_s26  ;;  %3032 = vrot.lane.b32.xlu0 %v2588_v22, %s5059_s6  ;;  %v2604_v10 = vld [vmem:[#allocation3 + $0xc2] sm:$0xff]  ;;  %v3207_v22 = vsel %vm1141_vm7, %v3191_v55, %v8982_v2 }
 0x45f   : > { %v8987_v2 = vld [vmem:[#allocation46_spill] sm:$0xff] }
 0x460   : > { %v3023_v5 = vpop.permute.xlu1 %3022  ;;  %v4079_v58 = vpop.permute.xlu0 %4078 }
 0x461   : > { %v3223_v18 = vsel %vm1158_vm8, %v3207_v22, %v3023_v5 }
 0x462   : > { %4028 = vrot.lane.b32.xlu1 %v3631_v38, %s5058_s30  ;;  %3838 = vrot.lane.b32.xlu0 %v3630_v33, %s5055_s27  ;;  %v4248_v33 = vsel %vm1124_vm6, %v4232_v51, %v3951_v0  ;;  %v3647_v0 = vld [vmem:[#allocation3 + $0x189] sm:$0xff]  ;;  %v3649_v51 = vld [vmem:[#allocation3 + $0x1a1] sm:$0xff] }
 0x463   : > { %v4264_v50 = vsel %vm1141_vm7, %v4248_v33, %v4015_v43  ;;  %v4201_v43 = vsel %vm1073_vm3, %v4185_v37, %v7912_v40  ;;  %v2607_v37 = vld [vmem:[#allocation3 + $0xe2] sm:$0xff] }
 0x464   : > { %v8045_v41 = vpop.permute.xlu1 %3828  ;;  %v3085_v7 = vpop.permute.xlu0 %3084  ;;  %v4280_v26 = vsel %vm1158_vm8, %v4264_v50, %v4079_v58  ;;  %v4217_v5 = vsel %vm1090_vm4, %v4201_v43, %v7944_v16  ;;  %v8988_v50 = vld [vmem:[#allocation78_spill] sm:$0xff]  ;;  %v5037_v43 = vld [vmem:[#allocation3 + $0x68] sm:$0xff] }
 0x465   : > { %v3238_v3 = vsel %vm1175_vm9, %v3222_v20, %v3085_v7  ;;  %v4233_v35 = vsel %vm1107_vm5, %v4217_v5, %v7993_v28  ;;  %v3616_v7 = vld [vmem:[#allocation3 + $0x18a] sm:$0xff] }
 0x466   : > { %3034 = vrot.lane.b32.xlu1 %v2589_v24, %s5059_s6  ;;  %4090 = vrot.lane.b32.xlu0 %v3646_v27, %s5059_s6  ;;  %v4249_v47 = vsel %vm1124_vm6, %v4233_v35, %v8016_v11  ;;  %v8990_v5 = vld [vmem:[#allocation52_spill] sm:$0xff] }
 0x467   : > { %4923 = vmatprep.mubr.msk.f32.mxu0 %vm1204_vm10, %v3238_v3  ;;  %v4265_v40 = vsel %vm1141_vm7, %v4249_v47, %v8024_v1  ;;  %v3632_v1 = vld [vmem:[#allocation3 + $0x198] sm:$0xff]  ;;  %v3129_v35 = vsel %vm225_vm0, %v5037_v43, %v8990_v5  ;;  %v8999_v43 = vld [vmem:[#allocation8_spill] sm:$0xff] }
 0x468   : > { %v4081_v12 = vpop.permute.xlu1 %4080  ;;  %v8064_v44 = vpop.permute.xlu0 %3890  ;;  %v8992_v47 = vld [vmem:[#allocation57_spill] sm:$0xff] }
 0x469   : > { %v4281_v16 = vsel %vm1158_vm8, %v4265_v40, %v4081_v12  ;;  %v8985_v12 = vld [vmem:[#allocation56_spill] sm:$0xff]  ;;  %v3145_v40 = vsel %vm1073_vm3, %v3129_v35, %v8992_v47 }
 0x46a   : > { %3840 = vrot.lane.b32.xlu1 %v3631_v38, %s5055_s27  ;;  %3096 = vrot.lane.b32.xlu0 %v2604_v10, %s5060_s17  ;;  %v2605_v38 = vld [vmem:[#allocation3 + $0xca] sm:$0xff]  ;;  %v3144_v6 = vsel %vm1073_vm3, %v3128_v60, %v8985_v12  ;;  %v8986_v10 = vld [vmem:[#allocation45_spill] sm:$0xff] }
 0x46b   : > { %v3160_v14 = vsel %vm1090_vm4, %v3144_v6, %v8986_v10  ;;  %v9000_v35 = vld [vmem:[#allocation44_spill] sm:$0xff] }
 0x46c   : > { %v3087_v23 = vpop.permute.xlu1 %3086  ;;  %v4143_v8 = vpop.permute.xlu0 %4142  ;;  %v3176_v22 = vsel %vm1107_vm5, %v3160_v14, %v8987_v2 }
 0x46d   : > { %v3239_v61 = vsel %vm1175_vm9, %v3223_v18, %v3087_v23  ;;  %v4296_v54 = vsel %vm1175_vm9, %v4280_v26, %v4143_v8  ;;  %v3192_v18 = vsel %vm1124_vm6, %v3176_v22, %v8988_v50  ;;  %v8989_v26 = vld [vmem:[#allocation5_spill] sm:$0xff]  ;;  %v3665_v8 = vld [vmem:[#allocation3 + $0x1a2] sm:$0xff] }
 0x46e   : > { %4092 = vrot.lane.b32.xlu1 %v3647_v0, %s5059_s6  ;;  %3902 = vrot.lane.b32.xlu0 %v3646_v27, %s5056_s28  ;;  %v2590_v27 = vld [vmem:[#allocation3 + $0xd9] sm:$0xff]  ;;  %v3208_v23 = vsel %vm1141_vm7, %v3192_v18, %v8989_v26 }
 0x46f   : > { %4924 = vmatmul.mubr.msk.f32.gmra.mrb[22].mxu0 %vm1204_vm10, %v3239_v61  ;;  %4957 = vmatprep.mubr.msk.f32.mxu1 %vm1204_vm10, %v4296_v54 }
 0x470   : > { %v8093_v58 = vpop.permute.xlu1 %3892  ;;  %v8095_v53 = vpop.permute.xlu0 %3702 }
 0x472   : > { %3098 = vrot.lane.b32.xlu1 %v2605_v38, %s5060_s17  ;;  %4154 = vrot.lane.b32.xlu0 %v3662_v39, %s5060_s17  ;;  %v8991_v38 = vld [vmem:[#allocation49_spill] sm:$0xff] }
 0x474   : > { %v4145_v15 = vpop.permute.xlu1 %4144  ;;  %v8106_v63 = vpop.permute.xlu0 %3954 }
 0x475   : > { %v4297_v20 = vsel %vm1175_vm9, %v4281_v16, %v4145_v15  ;;  %v8993_v15 = vld [vmem:[#allocation33_spill] sm:$0xff] }
 0x476   : > { %3966 = vrot.lane.b32.xlu1 %v3662_v39, %s5057_s29  ;;  %3904 = vrot.lane.b32.xlu0 %v3647_v0, %s5056_s28  ;;  %v4186_v39 = vsel %vm225_vm0, %v8991_v38, %v7995_v30 }
 0x477   : > { %4958 = vmatmul.mubr.msk.f32.gmra.mrb[22].mxu1 %vm1204_vm10, %v4297_v20  ;;  %v4202_v16 = vsel %vm1073_vm3, %v4186_v39, %v8010_v17  ;;  %v3161_v20 = vsel %vm1090_vm4, %v3145_v40, %v8993_v15  ;;  %v9001_v40 = vld [vmem:[#allocation63_spill] sm:$0xff]  ;;  %v9002_v15 = vld [vmem:[#allocation82_spill] sm:$0xff] }
 0x478   : > { %v8112_v28 = vpop.permute.xlu1 %3766  ;;  %v8114_v11 = vpop.permute.xlu0 %3704 }
 0x47a   : > { %3968 = vrot.lane.b32.xlu1 %v3616_v7, %s5057_s29  ;;  %4156 = vrot.lane.b32.xlu0 %v3616_v7, %s5060_s17  ;;  %v4218_v7 = vsel %vm1090_vm4, %v4202_v16, %v8026_v48  ;;  %s8294_s29 = scalar_lea.vmem %s8548_s5, %s4750_s21 }
 0x47c   : > { %v4019_v3 = vpop.permute.xlu1 %4018  ;;  %v8118_v24 = vpop.permute.xlu0 %3956 }
 0x47e   : > { %3036 = vrot.lane.b32.xlu1 %v2590_v27, %s5059_s6  ;;  %4030 = vrot.lane.b32.xlu0 %v3632_v1, %s5058_s30  ;;  %v8994_v27 = vld [vmem:[#allocation62_spill] sm:$0xff] }
 0x480   : > { %v8122_v19 = vpop.permute.xlu1 %3768  ;;  %v3025_v45 = vpop.permute.xlu0 %3024 }
 0x481   : > { %v3224_v61 = vsel %vm1158_vm8, %v3208_v23, %v3025_v45  ;;  %v8995_v45 = vld [vmem:[#allocation76_spill] sm:$0xff] }
 0x482   : > { %4094 = vrot.lane.b32.xlu1 %v3648_v62, %s5059_s6  ;;  %4032 = vrot.lane.b32.xlu0 %v3633_v32, %s5058_s30  ;;  %v3177_v62 = vsel %vm1107_vm5, %v3161_v20, %v8994_v27  ;;  %v4234_v32 = vsel %vm1107_vm5, %v4218_v7, %v8064_v44  ;;  %v9003_v7 = vld [vmem:[#allocation39_spill] sm:$0xff] }
 0x483   : > { %v4250_v17 = vsel %vm1124_vm6, %v4234_v32, %v8106_v63 }
 0x484   : > { %v4021_v4 = vpop.permute.xlu1 %4020  ;;  %v8126_v36 = vpop.permute.xlu0 %3830  ;;  %v4266_v34 = vsel %vm1141_vm7, %v4250_v17, %v4019_v3  ;;  %v9004_v17 = vld [vmem:[#allocation21_spill] sm:$0xff] }
 0x486   : > { %3100 = vrot.lane.b32.xlu1 %v2606_v9, %s5060_s17  ;;  %3038 = vrot.lane.b32.xlu0 %v2591_v29, %s5059_s6  ;;  %v3193_v9 = vsel %vm1124_vm6, %v3177_v62, %v8995_v45  ;;  %v8996_v29 = vld [vmem:[#allocation101_spill] sm:$0xff] }
 0x487   : > { %v3209_v21 = vsel %vm1141_vm7, %v3193_v9, %v8996_v29  ;;  %v5039_v9 = vld [vmem:[#allocation3 + $0x80] sm:$0xff] }
 0x488   : > { %v3027_v55 = vpop.permute.xlu1 %3026  ;;  %v4083_v33 = vpop.permute.xlu0 %4082  ;;  %v3131_v29 = vsel %vm225_vm0, %v5039_v9, %v9004_v17 }
 0x489   : > { %v3225_v48 = vsel %vm1158_vm8, %v3209_v21, %v3027_v55  ;;  %v4282_v60 = vsel %vm1158_vm8, %v4266_v34, %v4083_v33  ;;  %v4188_v21 = vsel %vm225_vm0, %v7699_v25, %v8095_v53  ;;  %v9005_v34 = vld [vmem:[#allocation13_spill] sm:$0xff] }
 0x48a   : > { %4158 = vrot.lane.b32.xlu1 %v3664_v56, %s5060_s17  ;;  %4096 = vrot.lane.b32.xlu0 %v3649_v51, %s5059_s6  ;;  %v8997_v51 = vld [vmem:[#allocation20_spill] sm:$0xff] }
 0x48b   : > { %v4187_v10 = vsel %vm225_vm0, %v8997_v51, %v8012_v57 }
 0x48c   : > { %v8145_v54 = vpop.permute.xlu1 %3832  ;;  %v3089_v0 = vpop.permute.xlu0 %3088  ;;  %v4203_v63 = vsel %vm1073_vm3, %v4187_v10, %v8020_v31  ;;  %v9007_v10 = vld [vmem:[#allocation64_spill] sm:$0xff] }
 0x48d   : > { %v3240_v13 = vsel %vm1175_vm9, %v3224_v61, %v3089_v0  ;;  %v4219_v3 = vsel %vm1090_vm4, %v4203_v63, %v8045_v41  ;;  %v9008_v63 = vld [vmem:[#allocation80_spill] sm:$0xff] }
 0x48e   : > { %4160 = vrot.lane.b32.xlu1 %v3665_v8, %s5060_s17  ;;  %3102 = vrot.lane.b32.xlu0 %v2607_v37, %s5060_s17  ;;  %v4235_v33 = vsel %vm1107_vm5, %v4219_v3, %v8093_v58 }
 0x48f   : > { %4926 = vmatprep.mubr.msk.f32.mxu0 %vm1204_vm10, %v3240_v13  ;;  %v4251_v2 = vsel %vm1124_vm6, %v4235_v33, %v8118_v24  ;;  %v8998_v13 = vld [vmem:[#allocation32_spill] sm:$0xff] }
 0x490   : > { %v4085_v1 = vpop.permute.xlu1 %4084  ;;  %v3895_v30 = vpop.permute.xlu0 %3894  ;;  %v4267_v57 = vsel %vm1141_vm7, %v4251_v2, %v4021_v4  ;;  %v5038_v4 = vld [vmem:[#allocation3 + $0x78] sm:$0xff] }
 0x491   : > { %v4283_v22 = vsel %vm1158_vm8, %v4267_v57, %v4085_v1  ;;  %v3130_v37 = vsel %vm225_vm0, %v5038_v4, %v8998_v13  ;;  %v4189_v4 = vsel %vm225_vm0, %v7718_v59, %v8114_v11 }
 0x492   : > { %v3146_v5 = vsel %vm1073_vm3, %v3130_v37, %v8999_v43 }
 0x493   : > { %v3162_v38 = vsel %vm1090_vm4, %v3146_v5, %v9000_v35 }
 0x494   : > { %v3091_v12 = vpop.permute.xlu1 %3090  ;;  %v4147_v6 = vpop.permute.xlu0 %4146  ;;  %v3178_v16 = vsel %vm1107_vm5, %v3162_v38, %v9001_v40  ;;  %v3457_v40 = vld [vmem:[%s5333_s24 + $0x8] sm:$0xff] }
 0x495   : > { %v3241_v56 = vsel %vm1175_vm9, %v3225_v48, %v3091_v12  ;;  %v4298_v44 = vsel %vm1175_vm9, %v4282_v60, %v4147_v6  ;;  %v3194_v20 = vsel %vm1124_vm6, %v3178_v16, %v9002_v15  ;;  %v3147_v48 = vsel %vm1073_vm3, %v3131_v29, %v9005_v34  ;;  %v9006_v12 = vld [vmem:[#allocation102_spill] sm:$0xff]  ;;  %v5040_v34 = vld [vmem:[#allocation3 + $0x90] sm:$0xff] }
 0x496   : > { %4927 = vmatmul.mubr.msk.f32.gmra.mrb[24].mxu0 %vm1204_vm10, %v3241_v56  ;;  %4960 = vmatprep.mubr.msk.f32.mxu1 %vm1204_vm10, %v4298_v44  ;;  %v3210_v1 = vsel %vm1141_vm7, %v3194_v20, %v9003_v7  ;;  %v4204_v60 = vsel %vm1073_vm3, %v4188_v21, %v8112_v28  ;;  %v3163_v6 = vsel %vm1090_vm4, %v3147_v48, %v9006_v12  ;;  %v9009_v28 = vld [vmem:[#allocation9_spill] sm:$0xff]  ;;  %v3456_v20 = vld [vmem:[%s5333_s24] sm:$0xff] }
 0x497   : > { %v4220_v56 = vsel %vm1090_vm4, %v4204_v60, %v8126_v36  ;;  %v3179_v25 = vsel %vm1107_vm5, %v3163_v6, %v9007_v10  ;;  %v9010_v48 = vld [vmem:[#allocation100_spill] sm:$0xff]  ;;  %v4717_v6 = vld [vmem:[%s5333_s24 + $0x88] sm:$0xff] }
 0x498   : > { %v3897_v14 = vpop.permute.xlu1 %3896  ;;  %v8188_v55 = vpop.permute.xlu0 %3706  ;;  %v4236_v53 = vsel %vm1107_vm5, %v4220_v56, %v3895_v30  ;;  %v3195_v3 = vsel %vm1124_vm6, %v3179_v25, %v9008_v63  ;;  %v3132_v60 = vsel %vm225_vm0, %v5040_v34, %v9010_v48  ;;  %v9011_v56 = vld [vmem:[#allocation55_spill] sm:$0xff]  ;;  %v9012_v63 = vld [vmem:[#allocation60_spill] sm:$0xff] }
 0x499   : > { %v3211_v2 = vsel %vm1141_vm7, %v3195_v3, %v9009_v28  ;;  %v9020_v34 = vld [vmem:[#allocation84_spill] sm:$0xff] }
 0x49c   : > { %v4149_v50 = vpop.permute.xlu1 %4148  ;;  %v3959_v18 = vpop.permute.xlu0 %3958 }
 0x49d   : > { %v4299_v31 = vsel %vm1175_vm9, %v4283_v22, %v4149_v50  ;;  %v4252_v33 = vsel %vm1124_vm6, %v4236_v53, %v3959_v18  ;;  %v4205_v18 = vsel %vm1073_vm3, %v4189_v4, %v8122_v19  ;;  %v4716_v53 = vld [vmem:[%s5333_s24 + $0x80] sm:$0xff] }
 0x49e   : > { %4961 = vmatmul.mubr.msk.f32.gmra.mrb[24].mxu1 %vm1204_vm10, %v4299_v31 }
 0x4a0   : > { %v8198_v41 = vpop.permute.xlu1 %3770  ;;  %v8200_v26 = vpop.permute.xlu0 %3708 }
 0x4a4   : > { %v4023_v23 = vpop.permute.xlu1 %4022  ;;  %v3961_v8 = vpop.permute.xlu0 %3960 }
 0x4a5   : > { %v4268_v57 = vsel %vm1141_vm7, %v4252_v33, %v4023_v23  ;;  %v4221_v23 = vsel %vm1090_vm4, %v4205_v18, %v8145_v54 }
 0x4a6   : > { %v4237_v43 = vsel %vm1107_vm5, %v4221_v23, %v3897_v14 }
 0x4a7   : > { %v4253_v5 = vsel %vm1124_vm6, %v4237_v43, %v3961_v8  ;;  %v8281_v8 = vld [vmem:[%s8547_s4] ss:$0 sm:$0xff] }
 0x4a8   : > { %v8202_v58 = vpop.permute.xlu1 %3772  ;;  %v3029_v61 = vpop.permute.xlu0 %3028 }
 0x4a9   : > { %v3226_v27 = vsel %vm1158_vm8, %v3210_v1, %v3029_v61 }
 0x4ac   : > { %v4025_v24 = vpop.permute.xlu1 %4024  ;;  %v8204_v0 = vpop.permute.xlu0 %3834 }
 0x4ad   : > { %v4269_v59 = vsel %vm1141_vm7, %v4253_v5, %v4025_v24 }
 0x4b0   : > { %v3031_v39 = vpop.permute.xlu1 %3030  ;;  %v4087_v47 = vpop.permute.xlu0 %4086 }
 0x4b1   : > { %v3227_v36 = vsel %vm1158_vm8, %v3211_v2, %v3031_v39  ;;  %v4284_v22 = vsel %vm1158_vm8, %v4268_v57, %v4087_v47  ;;  %v9013_v57 = vld [vmem:[#allocation65_spill] sm:$0xff] }
 0x4b4   : > { %v8219_v62 = vpop.permute.xlu1 %3836  ;;  %v3093_v32 = vpop.permute.xlu0 %3092 }
 0x4b5   : > { %v3242_v45 = vsel %vm1175_vm9, %v3226_v27, %v3093_v32 }
 0x4b6   : > { %4929 = vmatprep.mubr.msk.f32.mxu0 %vm1204_vm10, %v3242_v45 }
 0x4b8   : > { %v4089_v44 = vpop.permute.xlu1 %4088  ;;  %v8236_v51 = vpop.permute.xlu0 %3898 }
 0x4b9   : > { %v4285_v11 = vsel %vm1158_vm8, %v4269_v59, %v4089_v44  ;;  %v3148_v44 = vsel %vm1073_vm3, %v3132_v60, %v9011_v56  ;;  %v9021_v60 = vld [vmem:[#allocation29_spill] sm:$0xff] }
 0x4ba   : > { %v3164_v3 = vsel %vm1090_vm4, %v3148_v44, %v9012_v63 }
 0x4bc   : > { %v3095_v50 = vpop.permute.xlu1 %3094  ;;  %v4151_v31 = vpop.permute.xlu0 %4150 }
 0x4bd   : > { %v3243_v61 = vsel %vm1175_vm9, %v3227_v36, %v3095_v50  ;;  %v4300_v30 = vsel %vm1175_vm9, %v4284_v22, %v4151_v31  ;;  %v3180_v36 = vsel %vm1107_vm5, %v3164_v3, %v9013_v57  ;;  %v9014_v50 = vld [vmem:[#allocation85_spill] sm:$0xff] }
 0x4be   : > { %4930 = vmatmul.mubr.msk.f32.gmra.mrb[26].mxu0 %vm1204_vm10, %v3243_v61  ;;  %4963 = vmatprep.mubr.msk.f32.mxu1 %vm1204_vm10, %v4300_v30  ;;  %v3196_v31 = vsel %vm1124_vm6, %v3180_v36, %v9014_v50  ;;  %v9015_v30 = vld [vmem:[#allocation14_spill] sm:$0xff]  ;;  %v9022_v50 = vld [vmem:[#allocation31_spill] sm:$0xff] }
 0x4bf   : > { %v3212_v4 = vsel %vm1141_vm7, %v3196_v31, %v9015_v30 }
 0x4c0   : > { %v8260_v13 = vpop.permute.xlu1 %3900  ;;  %v8262_v37 = vpop.permute.xlu0 %3710 }
 0x4c4   : > { %v4153_v35 = vpop.permute.xlu1 %4152  ;;  %v8268_v38 = vpop.permute.xlu0 %3962 }
 0x4c5   : > { %v4301_v19 = vsel %vm1175_vm9, %v4285_v11, %v4153_v35  ;;  %v5041_v35 = vld [vmem:[#allocation3 + $0x98] sm:$0xff] }
 0x4c6   : > { %4964 = vmatmul.mubr.msk.f32.gmra.mrb[26].mxu1 %vm1204_vm10, %v4301_v19  ;;  %v9016_v19 = vld [vmem:[#allocation74_spill] sm:$0xff] }
 0x4c8   : > { %v8272_v54 = vpop.permute.xlu1 %3774  ;;  %v8274_v39 = vpop.permute.xlu0 %3712 }
 0x4cc   : > { %v4027_v14 = vpop.permute.xlu1 %4026  ;;  %v8276_v47 = vpop.permute.xlu0 %3964 }
 0x4ce   : > { %v4916_v24 = vpop.f32.mrb[16].mxu0 }
 0x4cf   : > { %v3383_v16 = vadd.f32 %v4916_v24, %v8281_v8  ;;  %v3377_v15 = vpop.f32.mrb[17].mxu0  ;;  %v3133_v24 = vsel %vm225_vm0, %v5041_v35, %v9016_v19  ;;  %v9025_v19 = vld [vmem:[#allocation67_spill] sm:$0xff] }
 0x4d0   : > { %v3378_v7 = vadd.f32 %v8281_v8, %v3377_v15  ;;  %v8287_v1 = vpop.permute.xlu1 %3776  ;;  %v3033_v27 = vpop.permute.xlu0 %3032 }
 0x4d1   : > { %v3473_v32 = vadd.f32 %v3457_v40, %v3383_v16  ;;  %v3228_v23 = vsel %vm1158_vm8, %v3212_v4, %v3033_v27  ;;  %v4190_v40 = vsel %vm225_vm0, %v7803_v42, %v8188_v55  ;;  %v9017_v16 = vld [vmem:[#allocation24_spill] sm:$0xff] }
 0x4d2   : > { %v3472_v45 = vadd.f32 %v3456_v20, %v3378_v7  ;;  %v3149_v15 = vsel %vm1073_vm3, %v3133_v24, %v9017_v16  ;;  %v4206_v20 = vsel %vm1073_vm3, %v4190_v40, %v8198_v41  ;;  %v9018_v7 = vld [vmem:[#allocation61_spill] sm:$0xff]  ;;  %v9026_v16 = vld [vmem:[#allocation88_spill] sm:$0xff] }
 0x4d3   : > { %v3489_v9 = vmax.f32 %v3473_v32, 0.0  ;;  %v3165_v27 = vsel %vm1090_vm4, %v3149_v15, %v9018_v7  ;;  %v4222_v32 = vsel %vm1090_vm4, %v4206_v20, %v8204_v0  ;;  %v4192_v20 = vsel %vm225_vm0, %v7914_v46, %v8262_v37 }
 0x4d4   : > { %v3488_v17 = vmax.f32 %v3472_v45, 0.0  ;;  %v4029_v29 = vpop.permute.xlu1 %4028  ;;  %v8296_v21 = vpop.permute.xlu0 %3838  ;;  %v4238_v55 = vsel %vm1107_vm5, %v4222_v32, %v8236_v51 }
 0x4d5   : > { %3505 = vst.msk [vmem:[%s8294_s29 + $0x8] sm:$0xff] %vm225_vm0, %v3489_v9  ;;  %v4254_v41 = vsel %vm1124_vm6, %v4238_v55, %v8268_v38 }
 0x4d6   : > { %3504 = vst.msk [vmem:[%s8294_s29] sm:$0xff] %vm225_vm0, %v3488_v17  ;;  %v4950_v12 = vpop.f32.mrb[16].mxu1  ;;  %v9019_v17 = vld [vmem:[#allocation86_spill] sm:$0xff] }
 0x4d7   : > { %v4441_v10 = vadd.f32 %v4950_v12, %v8281_v8  ;;  %v4435_v25 = vpop.f32.mrb[17].mxu1  ;;  %v3181_v42 = vsel %vm1107_vm5, %v3165_v27, %v9019_v17  ;;  %v9027_v27 = vld [vmem:[#allocation27_spill] sm:$0xff] }
 0x4d8   : > { %v4436_v33 = vadd.f32 %v8281_v8, %v4435_v25  ;;  %v3035_v28 = vpop.permute.xlu1 %3034  ;;  %v4091_v2 = vpop.permute.xlu0 %4090  ;;  %v3197_v48 = vsel %vm1124_vm6, %v3181_v42, %v9020_v34 }
 0x4d9   : > { %v4532_v22 = vadd.f32 %v4717_v6, %v4441_v10  ;;  %v3213_v12 = vsel %vm1141_vm7, %v3197_v48, %v9021_v60  ;;  %v4270_v6 = vsel %vm1141_vm7, %v4254_v41, %v4027_v14  ;;  %v5043_v60 = vld [vmem:[#allocation3 + $0xb0] sm:$0xff] }
 0x4da   : > { %v4531_v61 = vadd.f32 %v4716_v53, %v4436_v33  ;;  %v3229_v0 = vsel %vm1158_vm8, %v3213_v12, %v3035_v28  ;;  %v4286_v56 = vsel %vm1158_vm8, %v4270_v6, %v4091_v2  ;;  %v4191_v53 = vsel %vm225_vm0, %v7823_v52, %v8200_v26  ;;  %v9028_v12 = vld [vmem:[#allocation54_spill] sm:$0xff] }
 0x4db   : > { %v4548_v18 = vmax.f32 %v4532_v22, 0.0  ;;  %v4207_v38 = vsel %vm1073_vm3, %v4191_v53, %v8202_v58  ;;  %v5042_v22 = vld [vmem:[#allocation3 + $0xa8] sm:$0xff] }
 0x4dc   : > { %v4547_v43 = vmax.f32 %v4531_v61, 0.0  ;;  %v8319_v5 = vpop.permute.xlu1 %3840  ;;  %v3097_v59 = vpop.permute.xlu0 %3096  ;;  %v4223_v14 = vsel %vm1090_vm4, %v4207_v38, %v8219_v62  ;;  %v3459_v61 = vld [vmem:[%s5333_s24 + $0x18] sm:$0xff] }
 0x4dd   : > { %4733 = vst.msk [vmem:[%s8294_s29 + $0x88] sm:$0xff] %vm225_vm0, %v4548_v18  ;;  %v3244_v11 = vsel %vm1175_vm9, %v3228_v23, %v3097_v59  ;;  %v4239_v33 = vsel %vm1107_vm5, %v4223_v14, %v8260_v13  ;;  %v3134_v13 = vsel %vm225_vm0, %v5042_v22, %v9022_v50  ;;  %v3458_v18 = vld [vmem:[%s5333_s24 + $0x10] sm:$0xff]  ;;  %v9024_v23 = vld [vmem:[#allocation59_spill] sm:$0xff] }
 0x4de   : > { %4732 = vst.msk [vmem:[%s8294_s29 + $0x80] sm:$0xff] %vm225_vm0, %v4547_v43  ;;  %4932 = vmatprep.mubr.msk.f32.mxu0 %vm1204_vm10, %v3244_v11  ;;  %v4255_v28 = vsel %vm1124_vm6, %v4239_v33, %v8276_v47  ;;  %v9023_v47 = vld [vmem:[#allocation23_spill] sm:$0xff] }
 0x4df   : > { %v4271_v52 = vsel %vm1141_vm7, %v4255_v28, %v4029_v29  ;;  %v3150_v30 = vsel %vm1073_vm3, %v3134_v13, %v9023_v47  ;;  %v9033_v13 = vld [vmem:[#allocation18_spill] sm:$0xff] }
 0x4e0   : > { %v4093_v45 = vpop.permute.xlu1 %4092  ;;  %v3903_v9 = vpop.permute.xlu0 %3902  ;;  %v3166_v43 = vsel %vm1090_vm4, %v3150_v30, %v9024_v23 }
 0x4e1   : > { %v4287_v26 = vsel %vm1158_vm8, %v4271_v52, %v4093_v45  ;;  %v3182_v24 = vsel %vm1107_vm5, %v3166_v43, %v9025_v19  ;;  %v4208_v45 = vsel %vm1073_vm3, %v4192_v20, %v8272_v54  ;;  %v3135_v54 = vsel %vm225_vm0, %v5043_v60, %v9028_v12  ;;  %v3460_v19 = vld [vmem:[%s5333_s24 + $0x20] sm:$0xff] }
 0x4e2   : > { %v3198_v15 = vsel %vm1124_vm6, %v3182_v24, %v9026_v16  ;;  %v4224_v42 = vsel %vm1090_vm4, %v4208_v45, %v8296_v21  ;;  %v4193_v21 = vsel %vm225_vm0, %v7933_v49, %v8274_v39  ;;  %v4718_v49 = vld [vmem:[%s5333_s24 + $0x90] sm:$0xff]  ;;  %v9030_v39 = vld [vmem:[#allocation25_spill] sm:$0xff] }
 0x4e3   : > { %v3214_v32 = vsel %vm1141_vm7, %v3198_v15, %v9027_v27  ;;  %v4240_v46 = vsel %vm1107_vm5, %v4224_v42, %v3903_v9  ;;  %v9029_v9 = vld [vmem:[#allocation79_spill] sm:$0xff]  ;;  %v4721_v27 = vld [vmem:[%s5333_s24 + $0xa8] sm:$0xff] }
 0x4e4   : > { %v3099_v44 = vpop.permute.xlu1 %3098  ;;  %v4155_v10 = vpop.permute.xlu0 %4154 }
 0x4e5   : > { %v3245_v25 = vsel %vm1175_vm9, %v3229_v0, %v3099_v44  ;;  %v4302_v51 = vsel %vm1175_vm9, %v4286_v56, %v4155_v10  ;;  %v4719_v56 = vld [vmem:[%s5333_s24 + $0x98] sm:$0xff]  ;;  %v3151_v44 = vsel %vm1073_vm3, %v3135_v54, %v9029_v9  ;;  %v4209_v10 = vsel %vm1073_vm3, %v4193_v21, %v8287_v1  ;;  %v3462_v54 = vld [vmem:[%s5333_s24 + $0x30] sm:$0xff] }
 0x4e6   : > { %4933 = vmatmul.mubr.msk.f32.gmra.mrb[28].mxu0 %vm1204_vm10, %v3245_v25  ;;  %4966 = vmatprep.mubr.msk.f32.mxu1 %vm1204_vm10, %v4302_v51  ;;  %v3167_v38 = vsel %vm1090_vm4, %v3151_v44, %v9030_v39  ;;  %v4225_v14 = vsel %vm1090_vm4, %v4209_v10, %v8319_v5  ;;  %v4723_v10 = vld [vmem:[%s5333_s24 + $0xb8] sm:$0xff] }
 0x4e8   : > { %v3967_v63 = vpop.permute.xlu1 %3966  ;;  %v3905_v3 = vpop.permute.xlu0 %3904 }
 0x4e9   : > { %v4256_v6 = vsel %vm1124_vm6, %v4240_v46, %v3967_v63 }
 0x4ec   : > { %v3969_v2 = vpop.permute.xlu1 %3968  ;;  %v4157_v57 = vpop.permute.xlu0 %4156 }
 0x4ed   : > { %v4303_v58 = vsel %vm1175_vm9, %v4287_v26, %v4157_v57  ;;  %v9031_v26 = vld [vmem:[#allocation66_spill] sm:$0xff]  ;;  %v4241_v57 = vsel %vm1107_vm5, %v4225_v14, %v3905_v3 }
 0x4ee   : > { %4967 = vmatmul.mubr.msk.f32.gmra.mrb[28].mxu1 %vm1204_vm10, %v4303_v58  ;;  %v3183_v1 = vsel %vm1107_vm5, %v3167_v38, %v9031_v26  ;;  %v4257_v5 = vsel %vm1124_vm6, %v4241_v57, %v3969_v2 }
 0x4f0   : > { %v3037_v62 = vpop.permute.xlu1 %3036  ;;  %v4031_v36 = vpop.permute.xlu0 %4030 }
 0x4f1   : > { %v3230_v55 = vsel %vm1158_vm8, %v3214_v32, %v3037_v62  ;;  %v4272_v25 = vsel %vm1141_vm7, %v4256_v6, %v4031_v36  ;;  %v9032_v36 = vld [vmem:[#allocation87_spill] sm:$0xff] }
 0x4f2   : > { %v4919_v31 = vpop.f32.mrb[18].mxu0  ;;  %v3199_v22 = vsel %vm1124_vm6, %v3183_v1, %v9032_v36  ;;  %v3464_v1 = vld [vmem:[%s5333_s24 + $0x40] sm:$0xff] }
 0x4f3   : > { %v3393_v29 = vadd.f32 %v4919_v31, %v8281_v8  ;;  %v3387_v4 = vpop.f32.mrb[19].mxu0  ;;  %v3215_v31 = vsel %vm1141_vm7, %v3199_v22, %v9033_v13 }
 0x4f4   : > { %v3388_v59 = vadd.f32 %v8281_v8, %v3387_v4  ;;  %v4095_v11 = vpop.permute.xlu1 %4094  ;;  %v4033_v35 = vpop.permute.xlu0 %4032 }
 0x4f5   : > { %v3475_v40 = vadd.f32 %v3459_v61, %v3393_v29  ;;  %v4288_v63 = vsel %vm1158_vm8, %v4272_v25, %v4095_v11  ;;  %v4273_v61 = vsel %vm1141_vm7, %v4257_v5, %v4033_v35 }
 0x4f6   : > { %v3474_v7 = vadd.f32 %v3458_v18, %v3388_v59  ;;  %v3461_v59 = vld [vmem:[%s5333_s24 + $0x28] sm:$0xff] }
 0x4f7   : > { %v3491_v17 = vmax.f32 %v3475_v40, 0.0 }
 0x4f8   : > { %v3490_v34 = vmax.f32 %v3474_v7, 0.0  ;;  %v3101_v48 = vpop.permute.xlu1 %3100  ;;  %v3039_v41 = vpop.permute.xlu0 %3038 }
 0x4f9   : > { %3507 = vst.msk [vmem:[%s8294_s29 + $0x18] sm:$0xff] %vm225_vm0, %v3491_v17  ;;  %v3246_v37 = vsel %vm1175_vm9, %v3230_v55, %v3101_v48  ;;  %v3231_v3 = vsel %vm1158_vm8, %v3215_v31, %v3039_v41  ;;  %v4720_v17 = vld [vmem:[%s5333_s24 + $0xa0] sm:$0xff] }
 0x4fa   : > { %3506 = vst.msk [vmem:[%s8294_s29 + $0x10] sm:$0xff] %vm225_vm0, %v3490_v34  ;;  %v4953_v0 = vpop.f32.mrb[18].mxu1  ;;  %4935 = vmatprep.mubr.msk.f32.mxu0 %vm1204_vm10, %v3246_v37  ;;  %v3463_v37 = vld [vmem:[%s5333_s24 + $0x38] sm:$0xff] }
 0x4fb   : > { %v4451_v51 = vadd.f32 %v4953_v0, %v8281_v8  ;;  %v4445_v53 = vpop.f32.mrb[19].mxu1 }
 0x4fc   : > { %v4446_v33 = vadd.f32 %v8281_v8, %v4445_v53  ;;  %v4159_v28 = vpop.permute.xlu1 %4158  ;;  %v4097_v52 = vpop.permute.xlu0 %4096  ;;  %v4722_v53 = vld [vmem:[%s5333_s24 + $0xb0] sm:$0xff] }
 0x4fd   : > { %v4534_v58 = vadd.f32 %v4719_v56, %v4451_v51  ;;  %v4304_v62 = vsel %vm1175_vm9, %v4288_v63, %v4159_v28  ;;  %v4289_v29 = vsel %vm1158_vm8, %v4273_v61, %v4097_v52  ;;  %v3465_v28 = vld [vmem:[%s5333_s24 + $0x48] sm:$0xff]  ;;  %v4724_v61 = vld [vmem:[%s5333_s24 + $0xc0] sm:$0xff] }
 0x4fe   : > { %v4533_v50 = vadd.f32 %v4718_v49, %v4446_v33  ;;  %4969 = vmatprep.mubr.msk.f32.mxu1 %vm1204_vm10, %v4304_v62 }
 0x4ff   : > { %v4550_v47 = vmax.f32 %v4534_v58, 0.0 }
 0x500   : > { %v4549_v30 = vmax.f32 %v4533_v50, 0.0  ;;  %v4161_v4 = vpop.permute.xlu1 %4160  ;;  %v3103_v18 = vpop.permute.xlu0 %3102  ;;  %v4725_v50 = vld [vmem:[%s5333_s24 + $0xc8] sm:$0xff] }
 0x501   : > { %4735 = vst.msk [vmem:[%s8294_s29 + $0x98] sm:$0xff] %vm225_vm0, %v4550_v47  ;;  %v4305_v2 = vsel %vm1175_vm9, %v4289_v29, %v4161_v4  ;;  %v3247_v23 = vsel %vm1175_vm9, %v3231_v3, %v3103_v18 }
 0x502   : > { %4734 = vst.msk [vmem:[%s8294_s29 + $0x90] sm:$0xff] %vm225_vm0, %v4549_v30  ;;  %4936 = vmatmul.mubr.msk.f32.gmra.mrb[30].mxu0 %vm1204_vm10, %v3247_v23  ;;  %4970 = vmatmul.mubr.msk.f32.gmra.mrb[30].mxu1 %vm1204_vm10, %v4305_v2  ;;  %v3467_v2 = vld [vmem:[%s5333_s24 + $0x58] sm:$0xff] }
 0x51a   : > { %v4922_v43 = vpop.f32.mrb[20].mxu0 }
 0x51b   : > { %v3403_v11 = vadd.f32 %v4922_v43, %v8281_v8  ;;  %v3397_v35 = vpop.f32.mrb[21].mxu0 }
 0x51c   : > { %v3398_v24 = vadd.f32 %v8281_v8, %v3397_v35 }
 0x51d   : > { %v3477_v40 = vadd.f32 %v3461_v59, %v3403_v11  ;;  %v3466_v59 = vld [vmem:[%s5333_s24 + $0x50] sm:$0xff] }
 0x51e   : > { %v3476_v16 = vadd.f32 %v3460_v19, %v3398_v24 }
 0x51f   : > { %v3493_v15 = vmax.f32 %v3477_v40, 0.0 }
 0x520   : > { %v3492_v20 = vmax.f32 %v3476_v16, 0.0 }
 0x521   : > { %3509 = vst.msk [vmem:[%s8294_s29 + $0x28] sm:$0xff] %vm225_vm0, %v3493_v15  ;;  %v4727_v15 = vld [vmem:[%s5333_s24 + $0xd8] sm:$0xff] }
 0x522   : > { %3508 = vst.msk [vmem:[%s8294_s29 + $0x20] sm:$0xff] %vm225_vm0, %v3492_v20  ;;  %v4956_v7 = vpop.f32.mrb[20].mxu1 }
 0x523   : > { %v4461_v32 = vadd.f32 %v4956_v7, %v8281_v8  ;;  %v4455_v45 = vpop.f32.mrb[21].mxu1 }
 0x524   : > { %v4456_v42 = vadd.f32 %v8281_v8, %v4455_v45 }
 0x525   : > { %v4536_v55 = vadd.f32 %v4721_v27, %v4461_v32  ;;  %v4726_v27 = vld [vmem:[%s5333_s24 + $0xd0] sm:$0xff] }
 0x526   : > { %v4535_v34 = vadd.f32 %v4720_v17, %v4456_v42 }
 0x527   : > { %v4552_v48 = vmax.f32 %v4536_v55, 0.0 }
 0x528   : > { %v4551_v41 = vmax.f32 %v4535_v34, 0.0 }
 0x529   : > { %4737 = vst.msk [vmem:[%s8294_s29 + $0xa8] sm:$0xff] %vm225_vm0, %v4552_v48  ;;  %v3469_v48 = vld [vmem:[%s5333_s24 + $0x68] sm:$0xff] }
 0x52a   : > { %4736 = vst.msk [vmem:[%s8294_s29 + $0xa0] sm:$0xff] %vm225_vm0, %v4551_v41 }
 0x542   : > { %v4925_v46 = vpop.f32.mrb[22].mxu0 }
 0x543   : > { %v3413_v60 = vadd.f32 %v4925_v46, %v8281_v8  ;;  %v3407_v12 = vpop.f32.mrb[23].mxu0 }
 0x544   : > { %v3408_v21 = vadd.f32 %v8281_v8, %v3407_v12 }
 0x545   : > { %v3479_v6 = vadd.f32 %v3463_v37, %v3413_v60  ;;  %v3468_v37 = vld [vmem:[%s5333_s24 + $0x60] sm:$0xff] }
 0x546   : > { %v3478_v0 = vadd.f32 %v3462_v54, %v3408_v21 }
 0x547   : > { %v3495_v56 = vmax.f32 %v3479_v6, 0.0 }
 0x548   : > { %v3494_v9 = vmax.f32 %v3478_v0, 0.0 }
 0x549   : > { %3511 = vst.msk [vmem:[%s8294_s29 + $0x38] sm:$0xff] %vm225_vm0, %v3495_v56  ;;  %v4729_v56 = vld [vmem:[%s5333_s24 + $0xe8] sm:$0xff] }
 0x54a   : > { %3510 = vst.msk [vmem:[%s8294_s29 + $0x30] sm:$0xff] %vm225_vm0, %v3494_v9  ;;  %v4959_v44 = vpop.f32.mrb[22].mxu1 }
 0x54b   : > { %v4471_v25 = vadd.f32 %v4959_v44, %v8281_v8  ;;  %v4465_v51 = vpop.f32.mrb[23].mxu1 }
 0x54c   : > { %v4466_v49 = vadd.f32 %v8281_v8, %v4465_v51 }
 0x54d   : > { %v4538_v39 = vadd.f32 %v4723_v10, %v4471_v25  ;;  %v4728_v10 = vld [vmem:[%s5333_s24 + $0xe0] sm:$0xff] }
 0x54e   : > { %v4537_v38 = vadd.f32 %v4722_v53, %v4466_v49 }
 0x54f   : > { %v4554_v14 = vmax.f32 %v4538_v39, 0.0 }
 0x550   : > { %v4553_v63 = vmax.f32 %v4537_v38, 0.0 }
 0x551   : > { %4739 = vst.msk [vmem:[%s8294_s29 + $0xb8] sm:$0xff] %vm225_vm0, %v4554_v14  ;;  %v3471_v14 = vld [vmem:[%s5333_s24 + $0x78] sm:$0xff] }
 0x552   : > { %4738 = vst.msk [vmem:[%s8294_s29 + $0xb0] sm:$0xff] %vm225_vm0, %v4553_v63 }
 0x569   : > { %v4928_v33 = vpop.f32.mrb[24].mxu0 }
 0x56a   : > { %v3423_v52 = vadd.f32 %v4928_v33, %v8281_v8  ;;  %v3417_v26 = vpop.f32.mrb[25].mxu0  ;;  %v4731_v33 = vld [vmem:[%s5333_s24 + $0xf8] sm:$0xff] }
 0x56b   : > { %v3418_v57 = vadd.f32 %v8281_v8, %v3417_v26 }
 0x56c   : > { %v3481_v58 = vadd.f32 %v3465_v28, %v3423_v52 }
 0x56d   : > { %v3480_v62 = vadd.f32 %v3464_v1, %v3418_v57  ;;  %v3470_v1 = vld [vmem:[%s5333_s24 + $0x70] sm:$0xff] }
 0x56e   : > { %v3497_v36 = vmax.f32 %v3481_v58, 0.0  ;;  %v4730_v58 = vld [vmem:[%s5333_s24 + $0xf0] sm:$0xff] }
 0x56f   : > { %v3496_v22 = vmax.f32 %v3480_v62, 0.0 }
 0x570   : > { %3513 = vst.msk [vmem:[%s8294_s29 + $0x48] sm:$0xff] %vm225_vm0, %v3497_v36 }
 0x571   : > { %3512 = vst.msk [vmem:[%s8294_s29 + $0x40] sm:$0xff] %vm225_vm0, %v3496_v22  ;;  %v4962_v5 = vpop.f32.mrb[24].mxu1 }
 0x572   : > { %v4481_v13 = vadd.f32 %v4962_v5, %v8281_v8  ;;  %v4475_v31 = vpop.f32.mrb[25].mxu1 }
 0x573   : > { %v4476_v47 = vadd.f32 %v8281_v8, %v4475_v31 }
 0x574   : > { %v4540_v3 = vadd.f32 %v4725_v50, %v4481_v13 }
 0x575   : > { %v4539_v30 = vadd.f32 %v4724_v61, %v4476_v47 }
 0x576   : > { %v4556_v29 = vmax.f32 %v4540_v3, 0.0 }
 0x577   : > { %v4555_v4 = vmax.f32 %v4539_v30, 0.0 }
 0x578   : > { %4741 = vst.msk [vmem:[%s8294_s29 + $0xc8] sm:$0xff] %vm225_vm0, %v4556_v29 }
 0x579   : > { %4740 = vst.msk [vmem:[%s8294_s29 + $0xc0] sm:$0xff] %vm225_vm0, %v4555_v4 }
 0x591   : > { %v4931_v18 = vpop.f32.mrb[26].mxu0 }
 0x592   : > { %v3433_v23 = vadd.f32 %v4931_v18, %v8281_v8  ;;  %v3427_v43 = vpop.f32.mrb[27].mxu0 }
 0x593   : > { %v3428_v11 = vadd.f32 %v8281_v8, %v3427_v43 }
 0x594   : > { %v3483_v35 = vadd.f32 %v3467_v2, %v3433_v23 }
 0x595   : > { %v3482_v19 = vadd.f32 %v3466_v59, %v3428_v11 }
 0x596   : > { %v3499_v24 = vmax.f32 %v3483_v35, 0.0 }
 0x597   : > { %v3498_v40 = vmax.f32 %v3482_v19, 0.0 }
 0x598   : > { %3515 = vst.msk [vmem:[%s8294_s29 + $0x58] sm:$0xff] %vm225_vm0, %v3499_v24 }
 0x599   : > { %3514 = vst.msk [vmem:[%s8294_s29 + $0x50] sm:$0xff] %vm225_vm0, %v3498_v40  ;;  %v4965_v16 = vpop.f32.mrb[26].mxu1 }
 0x59a   : > { %v4491_v20 = vadd.f32 %v4965_v16, %v8281_v8  ;;  %v4485_v7 = vpop.f32.mrb[27].mxu1 }
 0x59b   : > { %v4486_v32 = vadd.f32 %v8281_v8, %v4485_v7 }
 0x59c   : > { %v4542_v45 = vadd.f32 %v4727_v15, %v4491_v20 }
 0x59d   : > { %v4541_v17 = vadd.f32 %v4726_v27, %v4486_v32 }
 0x59e   : > { %v4558_v42 = vmax.f32 %v4542_v45, 0.0 }
 0x59f   : > { %v4557_v55 = vmax.f32 %v4541_v17, 0.0 }
 0x5a0   : > { %4743 = vst.msk [vmem:[%s8294_s29 + $0xd8] sm:$0xff] %vm225_vm0, %v4558_v42 }
 0x5a1   : > { %4742 = vst.msk [vmem:[%s8294_s29 + $0xd0] sm:$0xff] %vm225_vm0, %v4557_v55 }
 0x5b9   : > { %v4934_v34 = vpop.f32.mrb[28].mxu0 }
 0x5ba   : > { %v3443_v41 = vadd.f32 %v4934_v34, %v8281_v8  ;;  %v3437_v46 = vpop.f32.mrb[29].mxu0 }
 0x5bb   : > { %v3438_v60 = vadd.f32 %v8281_v8, %v3437_v46 }
 0x5bc   : > { %v3485_v12 = vadd.f32 %v3469_v48, %v3443_v41 }
 0x5bd   : > { %v3484_v54 = vadd.f32 %v3468_v37, %v3438_v60 }
 0x5be   : > { %v3501_v21 = vmax.f32 %v3485_v12, 0.0 }
 0x5bf   : > { %v3500_v6 = vmax.f32 %v3484_v54, 0.0 }
 0x5c0   : > { %3517 = vst.msk [vmem:[%s8294_s29 + $0x68] sm:$0xff] %vm225_vm0, %v3501_v21 }
 0x5c1   : > { %3516 = vst.msk [vmem:[%s8294_s29 + $0x60] sm:$0xff] %vm225_vm0, %v3500_v6  ;;  %v4968_v0 = vpop.f32.mrb[28].mxu1 }
 0x5c2   : > { %v4501_v9 = vadd.f32 %v4968_v0, %v8281_v8  ;;  %v4495_v44 = vpop.f32.mrb[29].mxu1 }
 0x5c3   : > { %v4496_v25 = vadd.f32 %v8281_v8, %v4495_v44 }
 0x5c4   : > { %v4544_v51 = vadd.f32 %v4729_v56, %v4501_v9 }
 0x5c5   : > { %v4543_v53 = vadd.f32 %v4728_v10, %v4496_v25 }
 0x5c6   : > { %v4560_v49 = vmax.f32 %v4544_v51, 0.0 }
 0x5c7   : > { %v4559_v39 = vmax.f32 %v4543_v53, 0.0 }
 0x5c8   : > { %4745 = vst.msk [vmem:[%s8294_s29 + $0xe8] sm:$0xff] %vm225_vm0, %v4560_v49 }
 0x5c9   : > { %4744 = vst.msk [vmem:[%s8294_s29 + $0xe0] sm:$0xff] %vm225_vm0, %v4559_v39 }
 0x5d5   : > { %v4937_v38 = vpop.f32.mrb[30].mxu0  ;;  %v4971_v63 = vpop.f32.mrb[30].mxu1 }
 0x5d6   : > { %v3453_v28 = vadd.f32 %v4937_v38, %v8281_v8  ;;  %v4511_v52 = vadd.f32 %v4971_v63, %v8281_v8  ;;  %v3447_v26 = vpop.f32.mrb[31].mxu0  ;;  %v4505_v57 = vpop.f32.mrb[31].mxu1 }
 0x5d7   : > { %v3448_v62 = vadd.f32 %v8281_v8, %v3447_v26  ;;  %v4506_v36 = vadd.f32 %v8281_v8, %v4505_v57 }
 0x5d8   : > { %v3487_v22 = vadd.f32 %v3471_v14, %v3453_v28  ;;  %v4546_v5 = vadd.f32 %v4731_v33, %v4511_v52 }
 0x5d9   : > { %v3486_v50 = vadd.f32 %v3470_v1, %v3448_v62  ;;  %v4545_v13 = vadd.f32 %v4730_v58, %v4506_v36 }
 0x5da   : > { %v3503_v31 = vmax.f32 %v3487_v22, 0.0  ;;  %v4562_v61 = vmax.f32 %v4546_v5, 0.0 }
 0x5db   : > { %v3502_v47 = vmax.f32 %v3486_v50, 0.0  ;;  %v4561_v3 = vmax.f32 %v4545_v13, 0.0 }
 0x5dc   : > { %3519 = vst.msk [vmem:[%s8294_s29 + $0x78] sm:$0xff] %vm225_vm0, %v3503_v31  ;;  %4747 = vst.msk [vmem:[%s8294_s29 + $0xf8] sm:$0xff] %vm225_vm0, %v4562_v61 }
 0x5dd   : > { %3518 = vst.msk [vmem:[%s8294_s29 + $0x70] sm:$0xff] %vm225_vm0, %v3502_v47  ;;  %4746 = vst.msk [vmem:[%s8294_s29 + $0xf0] sm:$0xff] %vm225_vm0, %v4561_v3 }
 0x5de PF: > { %s15_s18 = sadd.s32 1, %s5050_s18  }
 0x5df   : > { %p12_p4 = scmp.ge.s32.totalorder %s15_s18, 4  }
 0x5e1   :  { %14 = sbr.rel (!%p12_p4) target bundleno = 1 (0x1), region = 82 }

</bundles_post_ra>
